<compile_context>
chip_gen: v5e
topology: v5e:2x2
jax: 0.10.0
libtpu: 0.0.40
codegen_flags: <defaults>
</compile_context>

<pallas_src>
import functools

import numpy as np

import jax
import jax.numpy as jnp
from jax.experimental import pallas as pl
from jax.experimental.pallas import tpu as pltpu

_ACT_DTYPE = jnp.bfloat16            # activation / MXU-operand dtype (f32 accumulate)
_LANE = 128
_VMEM_LIMIT = 32 * 1024 * 1024       # safe on v5e/v6e/v7x
_BN_EPS = 1e-5

INVERTED_RESIDUAL_SETTING = [
    # t (expand), c (out channels), n (repeats), s (first stride)
    (1, 16, 1, 1),
    (6, 24, 2, 2),
    (6, 32, 3, 2),
    (6, 64, 4, 2),
    (6, 96, 3, 1),
    (6, 160, 3, 2),
    (6, 320, 1, 1),
]


def _round_up(x, m=_LANE):
    return ((x + m - 1) // m) * m


def _sel_matrix(h_out, w_out, stride, row_w, num_cols):
    """0/1 matrix picking flat index stride*i*row_w + stride*j for output (i, j)."""
    sel = np.zeros((h_out * w_out, num_cols), np.float32)
    for i in range(h_out):
        for j in range(w_out):
            sel[i * w_out + j, stride * i * row_w + stride * j] = 1.0
    return jnp.asarray(sel)


# ----------------------------------------------------------------------------
# Pallas kernels
# ----------------------------------------------------------------------------
def _stem_kernel(x_ref, w_ref, s_ref, b_ref, sel_ref, o_ref, *, h, wp, cin):
    """Fused 3x3 stride-2 stem conv + folded BN + ReLU6 for one image.

    x_ref holds the zero-padded image flattened row-major: ((h+3)*wp, cin).
    The 9 taps are contiguous flat slices; the stride-2 output pixels are picked
    with one selection matmul (exact 0/1 weights).
    """
    xp = x_ref[...].reshape(x_ref.shape[1], cin)             # bf16
    wk = w_ref[...]                                          # (9*cin, cout) bf16
    cout = wk.shape[1]
    tap_len = h * wp
    acc = jnp.zeros((tap_len, cout), jnp.float32)
    for k in range(9):
        dy, dx = divmod(k, 3)
        off = dy * wp + dx
        acc = acc + jnp.dot(xp[off:off + tap_len, :], wk[k * cin:(k + 1) * cin, :],
                            preferred_element_type=jnp.float32)
    conv = jnp.dot(sel_ref[...], acc, preferred_element_type=jnp.float32)
    conv = jnp.clip(conv * s_ref[...] + b_ref[...], 0.0, 6.0)
    o_ref[...] = conv.reshape(1, conv.shape[0], conv.shape[1]).astype(o_ref.dtype)


def _invres_block_kernel(*refs, h, w, has_expand, use_res):
    """One fused inverted-residual block (per image): expand 1x1 + BN + ReLU6,
    3x3 depthwise + BN + ReLU6, project 1x1 + BN, fused residual add.

    The expanded intermediate stays in VMEM (value + flat padded scratch)."""
    spatial = (h > 1) or (w > 1)
    idx = 0
    x_ref = refs[idx]; idx += 1
    if has_expand:
        we_ref, se_ref, be_ref = refs[idx:idx + 3]; idx += 3
    wd_ref, sd_ref, bd_ref, wp_ref, sp_ref, bp_ref = refs[idx:idx + 6]; idx += 6
    if spatial:
        sel_ref = refs[idx]; idx += 1
    o_ref = refs[idx]; idx += 1
    if spatial:
        pad_ref = refs[idx]

    hw = h * w
    x2d = x_ref[...].reshape(hw, x_ref.shape[-1])            # (hw, cin_pad) bf16

    # --- 1) expand 1x1 conv + BN + ReLU6 (MXU, f32 accumulate) ---
    if has_expand:
        hidf = jnp.dot(x2d, we_ref[...], preferred_element_type=jnp.float32)
        hidf = jnp.clip(hidf * se_ref[...] + be_ref[...], 0.0, 6.0)
        hidb = hidf.astype(_ACT_DTYPE)
    else:
        hidb = x2d
    hid_c = hidb.shape[-1]

    # --- 2) 3x3 depthwise conv (pad=1) ---
    if not spatial:
        # 1x1 spatial map: only the centre tap sees data.
        dw = hidb.astype(jnp.float32) * wd_ref[...][4:5, :]
    else:
        wp2 = w + 2
        tap_len = h * wp2
        # In-kernel halo padding: zero the flat scratch, write the interior rows.
        pad_ref[...] = jnp.zeros(pad_ref.shape, pad_ref.dtype)
        for i in range(h):
            s0 = (i + 1) * wp2 + 1
            pad_ref[s0:s0 + w, :] = hidb[i * w:(i + 1) * w, :]
        padv = pad_ref[...].astype(jnp.float32)              # ((h+3)*wp2, hid)
        wd = wd_ref[...]                                     # (9, hid) f32
        acc = jnp.zeros((tap_len, hid_c), jnp.float32)
        for k in range(9):
            dy, dx = divmod(k, 3)
            off = dy * wp2 + dx
            acc = acc + padv[off:off + tap_len, :] * wd[k:k + 1, :]
        # Pick the (strided) output pixels with one exact selection matmul.
        dw = jnp.dot(sel_ref[...], acc, preferred_element_type=jnp.float32)

    dw = jnp.clip(dw * sd_ref[...] + bd_ref[...], 0.0, 6.0).astype(_ACT_DTYPE)

    # --- 3) project 1x1 conv + BN (+ fused residual) ---
    out = jnp.dot(dw, wp_ref[...], preferred_element_type=jnp.float32)
    out = out * sp_ref[...] + bp_ref[...]
    if use_res:
        out = out + x2d.astype(jnp.float32)
    o_ref[...] = out.reshape(1, out.shape[0], out.shape[1]).astype(o_ref.dtype)


def _head_kernel(x_ref, wh_ref, sh_ref, bh_ref, wc_ref, bc_ref, o_ref, *, n, hw):
    """Fused: 1x1 head conv + BN + ReLU6 -> global avg pool -> classifier Linear."""
    cin = x_ref.shape[-1]
    x2d = x_ref[...].reshape(n * hw, cin)
    hid = jnp.dot(x2d, wh_ref[...], preferred_element_type=jnp.float32)
    hid = jnp.clip(hid * sh_ref[...] + bh_ref[...], 0.0, 6.0)
    if hw == 1:
        pooled = hid
    else:
        pooled = jnp.mean(hid.reshape(n, hw, hid.shape[-1]), axis=1)
    logits = jnp.dot(pooled.astype(_ACT_DTYPE), wc_ref[...],
                     preferred_element_type=jnp.float32) + bc_ref[...]
    o_ref[...] = logits


# ----------------------------------------------------------------------------
# Pallas wrappers
# ----------------------------------------------------------------------------
def stem_conv(x_nhwc, w, scale, bias):
    n, h, w_sp, cin = x_nhwc.shape
    # One tiny XLA pad (1 top, 1 left/right, 2 bottom: the extra bottom row is
    # slack for the flat tap slices) -> flatten row-major.
    xp = jnp.pad(x_nhwc, ((0, 0), (1, 2), (1, 1), (0, 0))).astype(_ACT_DTYPE)
    hp, wp = h + 3, w_sp + 2
    xflat = xp.reshape(n, hp * wp, cin)
    h_out = (h - 1) // 2 + 1
    w_out = (w_sp - 1) // 2 + 1
    cout = w.shape[1]
    sel = _sel_matrix(h_out, w_out, 2, wp, h * wp)
    kernel = functools.partial(_stem_kernel, h=h, wp=wp, cin=cin)
    flops = 2 * h * wp * 9 * cin * cout + 2 * h_out * w_out * h * wp * cout
    out = pl.pallas_call(
        kernel,
        out_shape=jax.ShapeDtypeStruct((n, h_out * w_out, cout), _ACT_DTYPE),
        grid=(n,),
        in_specs=[
            pl.BlockSpec((1, hp * wp, cin), lambda b: (b, 0, 0)),
            pl.BlockSpec((9 * cin, cout), lambda b: (0, 0)),
            pl.BlockSpec((1, cout), lambda b: (0, 0)),
            pl.BlockSpec((1, cout), lambda b: (0, 0)),
            pl.BlockSpec((h_out * w_out, h * wp), lambda b: (0, 0)),
        ],
        out_specs=pl.BlockSpec((1, h_out * w_out, cout), lambda b: (b, 0, 0)),
        compiler_params=pltpu.CompilerParams(
            dimension_semantics=("parallel",), vmem_limit_bytes=_VMEM_LIMIT),
        cost_estimate=pl.CostEstimate(
            flops=n * flops, transcendentals=0,
            bytes_accessed=int(xflat.size * 2 + w.size * 2 + sel.size * 4
                               + n * h_out * w_out * cout * 2)),
    )(xflat, w, scale, bias, sel)
    return out, h_out, w_out


def invres_block(x, blk, h, w):
    """One fused inverted-residual block. x: (N, h*w, cin_pad) bf16."""
    n = x.shape[0]
    cin_p = x.shape[-1]
    stride = blk["stride"]
    use_res = blk["use_res"]
    has_expand = blk["expand"] is not None
    wdw, sdw, bdw = blk["dw"]
    hid_c = wdw.shape[1]
    wpj, spj, bpj = blk["project"]
    cout_p = wpj.shape[1]
    h_out = (h - 1) // stride + 1
    w_out = (w - 1) // stride + 1
    howo = h_out * w_out
    spatial = (h > 1) or (w > 1)

    args = [x]
    in_specs = [pl.BlockSpec((1, h * w, cin_p), lambda b: (b, 0, 0))]
    if has_expand:
        we, se, be = blk["expand"]
        args += [we, se, be]
        in_specs += [pl.BlockSpec(a.shape, lambda b: (0, 0)) for a in (we, se, be)]
    args += [wdw, sdw, bdw, wpj, spj, bpj]
    in_specs += [pl.BlockSpec(a.shape, lambda b: (0, 0))
                 for a in (wdw, sdw, bdw, wpj, spj, bpj)]
    scratch_shapes = []
    if spatial:
        sel = _sel_matrix(h_out, w_out, stride, w + 2, h * (w + 2))
        args.append(sel)
        in_specs.append(pl.BlockSpec(sel.shape, lambda b: (0, 0)))
        scratch_shapes.append(pltpu.VMEM(((h + 3) * (w + 2), hid_c), _ACT_DTYPE))

    kernel = functools.partial(_invres_block_kernel, h=h, w=w,
                               has_expand=has_expand, use_res=use_res)
    flops = (2 * h * w * cin_p * hid_c if has_expand else 0)
    flops += 18 * h * (w + 2) * hid_c + 2 * howo * h * (w + 2) * hid_c
    flops += 2 * howo * hid_c * cout_p
    bytes_accessed = int(x.size * 2
                         + sum(int(a.size) * a.dtype.itemsize for a in args[1:])
                         + n * howo * cout_p * 2)

    out = pl.pallas_call(
        kernel,
        out_shape=jax.ShapeDtypeStruct((n, howo, cout_p), _ACT_DTYPE),
        grid=(n,),
        in_specs=in_specs,
        out_specs=pl.BlockSpec((1, howo, cout_p), lambda b: (b, 0, 0)),
        scratch_shapes=scratch_shapes,
        compiler_params=pltpu.CompilerParams(
            dimension_semantics=("parallel",), vmem_limit_bytes=_VMEM_LIMIT),
        cost_estimate=pl.CostEstimate(flops=n * flops, transcendentals=0,
                                      bytes_accessed=bytes_accessed),
    )(*args)
    return out, h_out, w_out


def head_classifier(x, wh, sh, bh, wc, bc):
    n, hw, cin_p = x.shape
    ncls = wc.shape[1]
    kernel = functools.partial(_head_kernel, n=n, hw=hw)
    return pl.pallas_call(
        kernel,
        out_shape=jax.ShapeDtypeStruct((n, ncls), jnp.float32),
        grid=(1,),
        in_specs=[
            pl.BlockSpec((n, hw, cin_p), lambda i: (0, 0, 0)),
            pl.BlockSpec(wh.shape, lambda i: (0, 0)),
            pl.BlockSpec(sh.shape, lambda i: (0, 0)),
            pl.BlockSpec(bh.shape, lambda i: (0, 0)),
            pl.BlockSpec(wc.shape, lambda i: (0, 0)),
            pl.BlockSpec(bc.shape, lambda i: (0, 0)),
        ],
        out_specs=pl.BlockSpec((n, ncls), lambda i: (0, 0)),
        compiler_params=pltpu.CompilerParams(
            dimension_semantics=("arbitrary",), vmem_limit_bytes=_VMEM_LIMIT),
    )(x, wh, sh, bh, wc, bc)


# ----------------------------------------------------------------------------
# Deterministic parameter construction (MobileNetV2 topology, channel-padded)
# ----------------------------------------------------------------------------
def _bn_fold(key, c_true, c_pad):
    k1, k2 = jax.random.split(key)
    gamma = 1.0 + 0.1 * jax.random.normal(k1, (c_true,), jnp.float32)
    beta = 0.1 * jax.random.normal(k2, (c_true,), jnp.float32)
    mean = jnp.zeros((c_true,), jnp.float32)
    var = jnp.ones((c_true,), jnp.float32)
    scale = gamma / jnp.sqrt(var + _BN_EPS)
    bias = beta - mean * scale
    scale = jnp.pad(scale, (0, c_pad - c_true))
    bias = jnp.pad(bias, (0, c_pad - c_true))
    return scale.reshape(1, c_pad), bias.reshape(1, c_pad)


def build_params(key, num_classes=100):
    keys = iter(jax.random.split(key, 128))
    params = {}

    # stem: ConvBNReLU6(3 -> 32, 3x3, stride 2); output channels padded to 128
    cin, cout_t = 3, 32
    cout_p = _round_up(cout_t)
    w = jax.random.normal(next(keys), (9 * cin, cout_t), jnp.float32) * (2.0 / (9 * cin)) ** 0.5
    w = jnp.pad(w, ((0, 0), (0, cout_p - cout_t))).astype(_ACT_DTYPE)
    s, b = _bn_fold(next(keys), cout_t, cout_p)
    params["stem"] = (w, s, b)

    blocks = []
    cin_t, cin_p = cout_t, cout_p
    for t, c, reps, s_first in INVERTED_RESIDUAL_SETTING:
        for i in range(reps):
            stride = s_first if i == 0 else 1
            cout_t = c
            cout_p = _round_up(cout_t)
            blk = {"stride": stride, "use_res": stride == 1 and cin_t == cout_t}
            if t != 1:
                hid = cin_t * t
                we = jax.random.normal(next(keys), (cin_t, hid), jnp.float32) * (2.0 / cin_t) ** 0.5
                we = jnp.pad(we, ((0, cin_p - cin_t), (0, 0))).astype(_ACT_DTYPE)
                se, be = _bn_fold(next(keys), hid, hid)
                blk["expand"] = (we, se, be)
                dw_true, dw_pad = hid, hid
            else:
                blk["expand"] = None
                dw_true, dw_pad = cin_t, cin_p
            wd = jax.random.normal(next(keys), (9, dw_true), jnp.float32) * (2.0 / 9.0) ** 0.5
            wd = jnp.pad(wd, ((0, 0), (0, dw_pad - dw_true)))       # f32 (VPU path)
            sd, bd = _bn_fold(next(keys), dw_true, dw_pad)
            blk["dw"] = (wd, sd, bd)
            wpj = jax.random.normal(next(keys), (dw_pad, cout_t), jnp.float32) * (2.0 / dw_pad) ** 0.5
            wpj = jnp.pad(wpj, ((0, 0), (0, cout_p - cout_t))).astype(_ACT_DTYPE)
            sp, bp = _bn_fold(next(keys), cout_t, cout_p)
            blk["project"] = (wpj, sp, bp)
            blocks.append(blk)
            cin_t, cin_p = cout_t, cout_p
    params["blocks"] = blocks

    # head ConvBNReLU6(-> 1280, 1x1) + Linear(1280 -> num_classes)
    head_c = 1280
    wh = jax.random.normal(next(keys), (cin_t, head_c), jnp.float32) * (2.0 / cin_t) ** 0.5
    wh = jnp.pad(wh, ((0, cin_p - cin_t), (0, 0))).astype(_ACT_DTYPE)
    sh, bh = _bn_fold(next(keys), head_c, head_c)
    params["head"] = (wh, sh, bh)
    kw, kb = jax.random.split(next(keys))
    wc = (jax.random.normal(kw, (head_c, num_classes), jnp.float32)
          * (1.0 / head_c) ** 0.5).astype(_ACT_DTYPE)
    bc = 0.01 * jax.random.normal(kb, (1, num_classes), jnp.float32)
    params["classifier"] = (wc, bc)
    return params


# ----------------------------------------------------------------------------
# Forward pass (matches torchvision MobileNetV2.forward semantics, eval mode)
# ----------------------------------------------------------------------------
def mobilenet_v2_forward(x_nchw, params):
    x_nhwc = jnp.transpose(x_nchw, (0, 2, 3, 1))              # NCHW -> NHWC

    # stem
    w, s, b = params["stem"]
    x, h, w_sp = stem_conv(x_nhwc, w, s, b)                   # (N, 256, 128)

    # inverted residual blocks (each fused into one pallas_call)
    for blk in params["blocks"]:
        x, h, w_sp = invres_block(x, blk, h, w_sp)

    # fused head conv + BN + ReLU6 + global avg pool + classifier
    wh, sh, bh = params["head"]
    wc, bc = params["classifier"]
    return head_classifier(x, wh, sh, bh, wc, bc)


if __name__ == "__main__":
    key = jax.random.PRNGKey(0)
    k_param, k_input = jax.random.split(key)
    params = build_params(k_param, num_classes=100)
    # Small NCHW input (PyTorch convention): batch=2, channels=3, spatial=32
    x = jax.random.normal(k_input, (2, 3, 32, 32), jnp.float32)
    logits = mobilenet_v2_forward(x, params)
    logits = jax.block_until_ready(logits)
    assert logits.shape == (2, 100), logits.shape
    assert bool(jnp.all(jnp.isfinite(logits)))
    print("KERNEL_OK")
</pallas_src>

<mosaic_0001>
module attributes {stable_mosaic.version = 11 : i64} {
  func.func @_stem_kernel(%arg0: i32, %arg1: memref<1x1190x3xbf16, #tpu.memory_space<vmem>>, %arg2: memref<27x128xbf16, #tpu.memory_space<vmem>>, %arg3: memref<1x128xf32, #tpu.memory_space<vmem>>, %arg4: memref<1x128xf32, #tpu.memory_space<vmem>>, %arg5: memref<256x1088xf32, #tpu.memory_space<vmem>>, %arg6: memref<1x256x128xbf16, #tpu.memory_space<vmem>>) attributes {dimension_semantics = [#tpu.dimension_semantics<parallel>], iteration_bounds = array<i64: 2>, scalar_prefetch = 0 : i64, scratch_operands = 0 : i64, tpu.core_type = #tpu.core_type<tc>, window_params = [{transform_indices = @transform_0, window_bounds = array<i64: 1, 1190, 3>}, {pipeline_mode = #tpu.pipeline_mode<synchronous>, transform_indices = @transform_1, window_bounds = array<i64: 27, 128>}, {pipeline_mode = #tpu.pipeline_mode<synchronous>, transform_indices = @transform_2, window_bounds = array<i64: 1, 128>}, {pipeline_mode = #tpu.pipeline_mode<synchronous>, transform_indices = @transform_3, window_bounds = array<i64: 1, 128>}, {pipeline_mode = #tpu.pipeline_mode<synchronous>, transform_indices = @transform_4, window_bounds = array<i64: 256, 1088>}, {transform_indices = @transform_5, window_bounds = array<i64: 1, 256, 128>}]} {
    %c0 = arith.constant 0 : index
    %c0_0 = arith.constant 0 : index
    %c0_1 = arith.constant 0 : index
    %0 = vector.load %arg1[%c0, %c0_0, %c0_1] : memref<1x1190x3xbf16, #tpu.memory_space<vmem>>, vector<1x1190x3xbf16>
    %1 = vector.shape_cast %0 : vector<1x1190x3xbf16> to vector<1190x3xbf16>
    %c0_2 = arith.constant 0 : index
    %c0_3 = arith.constant 0 : index
    %2 = vector.load %arg2[%c0_2, %c0_3] : memref<27x128xbf16, #tpu.memory_space<vmem>>, vector<27x128xbf16>
    %cst = arith.constant 0.000000e+00 : f32
    %3 = vector.broadcast %cst : f32 to vector<1088x128xf32>
    %4 = vector.extract_strided_slice %1 {offsets = [0, 0], sizes = [1088, 3], strides = [1, 1]} : vector<1190x3xbf16> to vector<1088x3xbf16>
    %5 = vector.extract_strided_slice %2 {offsets = [0, 0], sizes = [3, 128], strides = [1, 1]} : vector<27x128xbf16> to vector<3x128xbf16>
    %cst_4 = arith.constant dense<0.000000e+00> : vector<1088x128xf32>
    %6 = tpu.matmul %4, %5, %cst_4 {dimension_numbers = #tpu.dot_dimension_numbers<[1], [0], [0], [1], [0, 0, 1, 1], [], []>} : vector<1088x3xbf16>, vector<3x128xbf16>, vector<1088x128xf32> -> vector<1088x128xf32>
    %7 = arith.addf %3, %6 : vector<1088x128xf32>
    %8 = vector.extract_strided_slice %1 {offsets = [1, 0], sizes = [1088, 3], strides = [1, 1]} : vector<1190x3xbf16> to vector<1088x3xbf16>
    %9 = vector.extract_strided_slice %2 {offsets = [3, 0], sizes = [3, 128], strides = [1, 1]} : vector<27x128xbf16> to vector<3x128xbf16>
    %cst_5 = arith.constant dense<0.000000e+00> : vector<1088x128xf32>
    %10 = tpu.matmul %8, %9, %cst_5 {dimension_numbers = #tpu.dot_dimension_numbers<[1], [0], [0], [1], [0, 0, 1, 1], [], []>} : vector<1088x3xbf16>, vector<3x128xbf16>, vector<1088x128xf32> -> vector<1088x128xf32>
    %11 = arith.addf %7, %10 : vector<1088x128xf32>
    %12 = vector.extract_strided_slice %1 {offsets = [2, 0], sizes = [1088, 3], strides = [1, 1]} : vector<1190x3xbf16> to vector<1088x3xbf16>
    %13 = vector.extract_strided_slice %2 {offsets = [6, 0], sizes = [3, 128], strides = [1, 1]} : vector<27x128xbf16> to vector<3x128xbf16>
    %cst_6 = arith.constant dense<0.000000e+00> : vector<1088x128xf32>
    %14 = tpu.matmul %12, %13, %cst_6 {dimension_numbers = #tpu.dot_dimension_numbers<[1], [0], [0], [1], [0, 0, 1, 1], [], []>} : vector<1088x3xbf16>, vector<3x128xbf16>, vector<1088x128xf32> -> vector<1088x128xf32>
    %15 = arith.addf %11, %14 : vector<1088x128xf32>
    %16 = vector.extract_strided_slice %1 {offsets = [34, 0], sizes = [1088, 3], strides = [1, 1]} : vector<1190x3xbf16> to vector<1088x3xbf16>
    %17 = vector.extract_strided_slice %2 {offsets = [9, 0], sizes = [3, 128], strides = [1, 1]} : vector<27x128xbf16> to vector<3x128xbf16>
    %cst_7 = arith.constant dense<0.000000e+00> : vector<1088x128xf32>
    %18 = tpu.matmul %16, %17, %cst_7 {dimension_numbers = #tpu.dot_dimension_numbers<[1], [0], [0], [1], [0, 0, 1, 1], [], []>} : vector<1088x3xbf16>, vector<3x128xbf16>, vector<1088x128xf32> -> vector<1088x128xf32>
    %19 = arith.addf %15, %18 : vector<1088x128xf32>
    %20 = vector.extract_strided_slice %1 {offsets = [35, 0], sizes = [1088, 3], strides = [1, 1]} : vector<1190x3xbf16> to vector<1088x3xbf16>
    %21 = vector.extract_strided_slice %2 {offsets = [12, 0], sizes = [3, 128], strides = [1, 1]} : vector<27x128xbf16> to vector<3x128xbf16>
    %cst_8 = arith.constant dense<0.000000e+00> : vector<1088x128xf32>
    %22 = tpu.matmul %20, %21, %cst_8 {dimension_numbers = #tpu.dot_dimension_numbers<[1], [0], [0], [1], [0, 0, 1, 1], [], []>} : vector<1088x3xbf16>, vector<3x128xbf16>, vector<1088x128xf32> -> vector<1088x128xf32>
    %23 = arith.addf %19, %22 : vector<1088x128xf32>
    %24 = vector.extract_strided_slice %1 {offsets = [36, 0], sizes = [1088, 3], strides = [1, 1]} : vector<1190x3xbf16> to vector<1088x3xbf16>
    %25 = vector.extract_strided_slice %2 {offsets = [15, 0], sizes = [3, 128], strides = [1, 1]} : vector<27x128xbf16> to vector<3x128xbf16>
    %cst_9 = arith.constant dense<0.000000e+00> : vector<1088x128xf32>
    %26 = tpu.matmul %24, %25, %cst_9 {dimension_numbers = #tpu.dot_dimension_numbers<[1], [0], [0], [1], [0, 0, 1, 1], [], []>} : vector<1088x3xbf16>, vector<3x128xbf16>, vector<1088x128xf32> -> vector<1088x128xf32>
    %27 = arith.addf %23, %26 : vector<1088x128xf32>
    %28 = vector.extract_strided_slice %1 {offsets = [68, 0], sizes = [1088, 3], strides = [1, 1]} : vector<1190x3xbf16> to vector<1088x3xbf16>
    %29 = vector.extract_strided_slice %2 {offsets = [18, 0], sizes = [3, 128], strides = [1, 1]} : vector<27x128xbf16> to vector<3x128xbf16>
    %cst_10 = arith.constant dense<0.000000e+00> : vector<1088x128xf32>
    %30 = tpu.matmul %28, %29, %cst_10 {dimension_numbers = #tpu.dot_dimension_numbers<[1], [0], [0], [1], [0, 0, 1, 1], [], []>} : vector<1088x3xbf16>, vector<3x128xbf16>, vector<1088x128xf32> -> vector<1088x128xf32>
    %31 = arith.addf %27, %30 : vector<1088x128xf32>
    %32 = vector.extract_strided_slice %1 {offsets = [69, 0], sizes = [1088, 3], strides = [1, 1]} : vector<1190x3xbf16> to vector<1088x3xbf16>
    %33 = vector.extract_strided_slice %2 {offsets = [21, 0], sizes = [3, 128], strides = [1, 1]} : vector<27x128xbf16> to vector<3x128xbf16>
    %cst_11 = arith.constant dense<0.000000e+00> : vector<1088x128xf32>
    %34 = tpu.matmul %32, %33, %cst_11 {dimension_numbers = #tpu.dot_dimension_numbers<[1], [0], [0], [1], [0, 0, 1, 1], [], []>} : vector<1088x3xbf16>, vector<3x128xbf16>, vector<1088x128xf32> -> vector<1088x128xf32>
    %35 = arith.addf %31, %34 : vector<1088x128xf32>
    %36 = vector.extract_strided_slice %1 {offsets = [70, 0], sizes = [1088, 3], strides = [1, 1]} : vector<1190x3xbf16> to vector<1088x3xbf16>
    %37 = vector.extract_strided_slice %2 {offsets = [24, 0], sizes = [3, 128], strides = [1, 1]} : vector<27x128xbf16> to vector<3x128xbf16>
    %cst_12 = arith.constant dense<0.000000e+00> : vector<1088x128xf32>
    %38 = tpu.matmul %36, %37, %cst_12 {dimension_numbers = #tpu.dot_dimension_numbers<[1], [0], [0], [1], [0, 0, 1, 1], [], []>} : vector<1088x3xbf16>, vector<3x128xbf16>, vector<1088x128xf32> -> vector<1088x128xf32>
    %39 = arith.addf %35, %38 : vector<1088x128xf32>
    %c0_13 = arith.constant 0 : index
    %c0_14 = arith.constant 0 : index
    %40 = vector.load %arg5[%c0_13, %c0_14] : memref<256x1088xf32, #tpu.memory_space<vmem>>, vector<256x1088xf32>
    %cst_15 = arith.constant dense<0.000000e+00> : vector<256x128xf32>
    %41 = tpu.matmul %40, %39, %cst_15 {dimension_numbers = #tpu.dot_dimension_numbers<[1], [0], [0], [1], [0, 0, 1, 1], [], []>} : vector<256x1088xf32>, vector<1088x128xf32>, vector<256x128xf32> -> vector<256x128xf32>
    %c0_16 = arith.constant 0 : index
    %c0_17 = arith.constant 0 : index
    %42 = vector.load %arg3[%c0_16, %c0_17] : memref<1x128xf32, #tpu.memory_space<vmem>>, vector<1x128xf32>
    %43 = vector.broadcast %42 : vector<1x128xf32> to vector<256x128xf32>
    %44 = arith.mulf %41, %43 : vector<256x128xf32>
    %c0_18 = arith.constant 0 : index
    %c0_19 = arith.constant 0 : index
    %45 = vector.load %arg4[%c0_18, %c0_19] : memref<1x128xf32, #tpu.memory_space<vmem>>, vector<1x128xf32>
    %46 = vector.broadcast %45 : vector<1x128xf32> to vector<256x128xf32>
    %47 = arith.addf %44, %46 : vector<256x128xf32>
    %cst_20 = arith.constant 0.000000e+00 : f32
    %cst_21 = arith.constant 6.000000e+00 : f32
    %48 = vector.broadcast %cst_20 : f32 to vector<256x128xf32>
    %49 = arith.maximumf %48, %47 : vector<256x128xf32>
    %50 = vector.broadcast %cst_21 : f32 to vector<256x128xf32>
    %51 = arith.minimumf %50, %49 : vector<256x128xf32>
    %52 = vector.shape_cast %51 : vector<256x128xf32> to vector<1x256x128xf32>
    %53 = arith.truncf %52 : vector<1x256x128xf32> to vector<1x256x128xbf16>
    %c0_22 = arith.constant 0 : index
    %c0_23 = arith.constant 0 : index
    %c0_24 = arith.constant 0 : index
    %54 = vector.load %arg6[%c0_22, %c0_23, %c0_24] : memref<1x256x128xbf16, #tpu.memory_space<vmem>>, vector<1x256x128xbf16>
    tpu.vector_store %arg6[%c0_22, %c0_23, %c0_24], %53 {strides = array<i32>} : memref<1x256x128xbf16, #tpu.memory_space<vmem>>, vector<1x256x128xbf16>,
    return
  }
  func.func @transform_0(%arg0: i32) -> (i32, i32, i32) {
    %c0_i32 = arith.constant 0 : i32
    %c0_i32_0 = arith.constant 0 : i32
    %c0_i32_1 = arith.constant 0 : i32
    return %arg0, %c0_i32, %c0_i32_0 : i32, i32, i32
  }
  func.func @transform_1(%arg0: i32) -> (i32, i32) {
    %c0_i32 = arith.constant 0 : i32
    %c0_i32_0 = arith.constant 0 : i32
    %c0_i32_1 = arith.constant 0 : i32
    return %c0_i32, %c0_i32_0 : i32, i32
  }
  func.func @transform_2(%arg0: i32) -> (i32, i32) {
    %c0_i32 = arith.constant 0 : i32
    %c0_i32_0 = arith.constant 0 : i32
    %c0_i32_1 = arith.constant 0 : i32
    return %c0_i32, %c0_i32_0 : i32, i32
  }
  func.func @transform_3(%arg0: i32) -> (i32, i32) {
    %c0_i32 = arith.constant 0 : i32
    %c0_i32_0 = arith.constant 0 : i32
    %c0_i32_1 = arith.constant 0 : i32
    return %c0_i32, %c0_i32_0 : i32, i32
  }
  func.func @transform_4(%arg0: i32) -> (i32, i32) {
    %c0_i32 = arith.constant 0 : i32
    %c0_i32_0 = arith.constant 0 : i32
    %c0_i32_1 = arith.constant 0 : i32
    return %c0_i32, %c0_i32_0 : i32, i32
  }
  func.func @transform_5(%arg0: i32) -> (i32, i32, i32) {
    %c0_i32 = arith.constant 0 : i32
    %c0_i32_0 = arith.constant 0 : i32
    %c0_i32_1 = arith.constant 0 : i32
    return %arg0, %c0_i32, %c0_i32_0 : i32, i32, i32
  }
}

</mosaic_0001>

<bundles_post_ra>
// kernel: tpu_custom_call.1
= control target key start
LH: loop header
LB: loop body
LE: loop exit
PB: predicated region body
PF: predicated region fallthrough
CT: control target
= control target key end

     0   :  { %10 = vsyncpa [#allocation3], 0  ;;  %s17387_s0 = inlined_call_operand.vmem [shape: bf16[2,1190,3], index: 0, kind: input, shape index: {}]   ;;  %s17388_s1 = inlined_call_operand.vmem [shape: bf16[27,128], index: 1, kind: input, shape index: {}]   ;;  %s17389_s2 = inlined_call_operand.vmem [shape: f32[1,128], index: 2, kind: input, shape index: {}]   ;;  %s17390_s3 = inlined_call_operand.vmem [shape: f32[1,128], index: 3, kind: input, shape index: {}]   ;;  %s17391_s4 = inlined_call_operand.vmem [shape: f32[256,1088], index: 4, kind: input, shape index: {}]   ;;  %s17392_s5 = inlined_call_operand.hbm [shape: bf16[2,256,128], index: 5, kind: output, shape index: {}]  }
   0x1   :  { %12 = vsyncpa [#allocation3 + $0x1], 0  ;;  %s10934_s18 = smov 0   ;;  %s10936_s19 = smov 0  }
   0x2   :  { %s10938_s20 = smov 0   ;;  %s10940_s21 = smov 0  }
   0x3 LB: > { %s10955_s22 = sadd.s32 4294967295, %s10899_s21   ;;  %s9523_s23 = sadd.s32 4294967294, %s10899_s21   ;;  %s10899_s21 = sphi %s10940_s21, %s18993_s21   ;;  %s10895_s20 = sphi %s10938_s20, %s18992_s20   ;;  %s10891_s19 = sphi %s10936_s19, %s18991_s19   ;;  %s10887_s18 = sphi %s10934_s18, %s18990_s18  }
   0x4   : > { %s10959_s24 = sadd.s32 1, %s10899_s21   ;;  %s135_s25 = sadd.s32 1, %s10895_s20 }
   0x5   : > { %s132_s26 = ssub.s32 %s10899_s21, %s10959_s24  ;;  %p145_p0 = scmp.ne.s32.totalorder %s10895_s20, %s10891_s19 }
   0x6   : > { %p133_p1 = scmp.eq.s32.totalorder %s132_s26, 0  ;;  %p146_p2 = scmp.eq.s32.totalorder %s10955_s22, 1 }
   0x7   : > { %p151_p3 = scmp.ne.s32.totalorder %s10891_s19, %s10887_s18  ;;  %p152_p4 = scmp.eq.s32.totalorder %s9523_s23, 1 }
   0x8   : > { %s10970_s27 = scalar_select %p133_p1, %s10895_s20, %s135_s25  }
   0x9   : > { %p10972_p5 = por %p146_p2, %p145_p0  ;;  %p10976_p6 = por %p152_p4, %p151_p3 }
   0xa   : > { %p9526_p7 = scmp.ge.s32.totalorder %s10899_s21, 1  ;;  %p190_p8 = scmp.lt.s32.totalorder %s10899_s21, 3 }
   0xc   : > { %p191_p9 = pnand %p9526_p7, %p190_p8 }
   0xe   : > { %194 = sbr.rel (%p191_p9) target bundleno = 3590 (0xe06), region = 40 }
  0x13   : > { %v10985_v0 = vld [vmem:[%s17388_s1] sm:$0xf]  ;;  %p218_p10 = scmp.lt.s32.totalorder %s10955_s22, 1  ;;  %vm1481_vm0 = vcmask 1040384   ;;  %vm1482_vm1 = vcmask 1041408   ;;  %v10901_v5 = vmov 65535  }
  0x14   : > { %v10989_v1 = vunpack.c.l.b16 %v10985_v0  ;;  %v1483_v6 = vsel %vm1481_vm0, 4294967295, %v10901_v5  ;;  %vm716_vm2 = vsmask.f32 7424  ;;  %vm1276_vm3 = vcmask 23552   ;;  %s215_s25 = sand.u32 1, %s10891_s19   ;;  %s10528_s23 = sshll.u32 %s10955_s22, 7 }
  0x15   : > { %s219_s7 = scalar_select %p218_p10, %s10955_s22, 1  ;;  %v11006_v12 = vsel %vm1482_vm1, %v1483_v6, 0  ;;  %vm2325_vm4 = vcmask 1046528   ;;  %vm3681_vm5 = vsmask.f32 6400  ;;  %vm4665_vm6 = vcmask 1045504  }
  0x16   : > { %v1267_v2 = vpack.c.b16 %v10989_v1, %v10989_v1  ;;  %17631 = vst [vmem:[#allocation5_spill] sm:$0xff] %v11006_v12  ;;  %vm6022_vm7 = vsmask.f32 5376  ;;  %vm7013_vm8 = vcmask 1044480   ;;  %vm8131_vm9 = vcmask 523264   ;;  %s9527_s26 = sshll.u32 %s215_s25, 7  ;;  %s9457_s6 = scalar_lea.hbm %s17392_s5, %s10528_s23 }
  0x17   : > { %s10637_s8 = smul.u32 596, %s219_s7  ;;  %s16993_s9 = scalar_lea.vmem [#allocation2], %s9527_s26 }
  0x18   : > { %v1269_v3 = vshrl.u32 %v1267_v2, 16  ;;  %v1272_v4 = vshll.u32 %v1267_v2, 16  ;;  %s9458_s7 = sshll.u32 %s16993_s9, 4  ;;  %s9446_s22 = scalar_lea.sflag [#allocation3], %s215_s25  ;;  %s9459_s7 = int_to_ptr.vmem [resolvable:$true] %s9458_s7 }
  0x19   : > { %s10997_s11 = scalar_lea.vmem %s17387_s0, %s10637_s8  ;;  %s9460_s8 = sshll.u32 %s9457_s6, 4  ;;  %s9461_s8 = int_to_ptr.hbm [resolvable:$true] %s9460_s8 }
  0x1a   : > { %v1271_v7 = vrot.slane %v1269_v3, 1  ;;  %v1274_v8 = vrot.slane %v1272_v4, 2  ;;  %v11000_v9 = vld [vmem:[%s10997_s11] sm:$0xff]  ;;  %v11003_v10 = vld [vmem:[%s10997_s11 + $0x8] sm:$0xff]  ;;  %v10512_v13 = vld [vmem:[%s10997_s11 + $0x1b0] sm:$0xff]  ;;  %s10851_s10 = sshra.s32 %s9461_s8, 4  ;;  %s10852_s10 = int_to_ptr.hbm [resolvable:$true] %s10851_s10 }
  0x1b   : > { %v10511_v11 = vld [vmem:[%s10997_s11 + $0x1a8] sm:$0xff]  ;;  %v10516_v14 = vld [vmem:[%s10997_s11 + $0x1d0] sm:$0xff]  ;;  %v10517_v15 = vld [vmem:[%s10997_s11 + $0x1d8] sm:$0xff]  ;;  %v718_v17 = vshrl.u32 %v11000_v9, 16  ;;  %v720_v18 = vshll.u32 %v11000_v9, 16  ;;  %v725_v19 = vshll.u32 %v11003_v10, 16  ;;  %p10858_p0 = scmp.lt.s32.totalorder %s10852_s10, %s17392_s5 }
  0x1c   : > { %v1275_v16 = vor.u32 %v1274_v8, %v1271_v7  ;;  %v10521_v20 = vld [vmem:[%s10997_s11 + $0x1f8] sm:$0xff]  ;;  %v10522_v21 = vld [vmem:[%s10997_s11 + $0x200] sm:$0xff]  ;;  %v11016_v22 = vshll.u32 %v10511_v11, 16  ;;  %v11018_v23 = vshrl.u32 %v10511_v11, 16  ;;  %v11020_v24 = vshll.u32 %v10512_v13, 16  ;;  %v11057_v47 = vld [vmem:[%s10997_s11 + $0x10] sm:$0xff] }
  0x1d   : > { %v11022_v25 = vshll.u32 %v10516_v14, 16  ;;  %v722_v27 = vrot.slane %v720_v18, 1  ;;  %v727_v28 = vrot.slane %v725_v19, 1  ;;  %v11025_v29 = vshrl.u32 %v10516_v14, 16  ;;  %v10513_v48 = vld [vmem:[%s10997_s11 + $0x1b8] sm:$0xff]  ;;  %v10518_v49 = vld [vmem:[%s10997_s11 + $0x1e0] sm:$0xff] }
  0x1e   : > { %17632 = vst [vmem:[#allocation6_spill] sm:$0xff] %v11016_v22  ;;  %v1486_v26 = vand.u32 %v11006_v12, %v1275_v16  ;;  %v17393_v30 = vrot.slane %v11016_v22, 1  ;;  %v1151_v31 = vrot.slane %v11020_v24, 1  ;;  %v11030_v33 = vshll.u32 %v10517_v15, 16  ;;  %v10523_v53 = vld [vmem:[%s10997_s11 + $0x208] sm:$0xff]  ;;  %v10514_v14 = vld [vmem:[%s10997_s11 + $0x1c0] sm:$0xff] }
  0x1f   : > { %17633 = vst [vmem:[#allocation7_spill] sm:$0xff] %v11018_v23  ;;  %v1183_v32 = vrot.slane %v11022_v25, 1  ;;  %v723_v34 = vor.u32 %v722_v27, %v718_v17  ;;  %v11032_v35 = vshll.u32 %v10521_v20, 16  ;;  %v11034_v36 = vshrl.u32 %v10521_v20, 16  ;;  %v10524_v18 = vld [vmem:[%s10997_s11 + $0x210] sm:$0xff]  ;;  %s10853_s12 = scalar_lea.hbm %s10852_s10, 128 }
  0x20   : > { %17634 = vst [vmem:[#allocation8_spill] sm:$0xff] %v11020_v24  ;;  %1495 = vmatpush.bf16.msra.mxu0 %v1486_v26  ;;  %10634 = vmatpush.bf16.msra.mxu1 %v1486_v26  ;;  %v11036_v37 = vshll.u32 %v10522_v21, 16  ;;  %v1147_v38 = vor.u32 %v11018_v23, %v17393_v30  ;;  %v1191_v40 = vrot.slane %v11030_v33, 1  ;;  %v729_v51 = vshrl.u32 %v11003_v10, 16  ;;  %p10854_p11 = scmp.ne.s32.totalorder %s10852_s10, %s10853_s12  ;;  %s10857_s15 = scalar_lea.hbm %s17392_s5, 256 }
  0x21   : > { %17635 = vst [vmem:[#allocation9_spill] sm:$0xff] %v11022_v25  ;;  %10635 = vmatpush.bf16.msra.mxu2 %v1486_v26  ;;  %10636 = vmatpush.bf16.msra.mxu3 %v1486_v26  ;;  %v1187_v39 = vor.u32 %v11025_v29, %v1183_v32  ;;  %v728_v41 = vsel %vm716_vm2, %v723_v34, %v727_v28  ;;  %v1223_v42 = vrot.slane %v11032_v35, 1  ;;  %v17397_v52 = vshll.u32 %v11057_v47, 16  ;;  %p10859_p1 = scmp.lt.s32.totalorder %s10857_s15, %s10853_s12 }
  0x22   : > { %17636 = vst [vmem:[#allocation10_spill] sm:$0xff] %v11025_v29  ;;  %v1231_v43 = vrot.slane %v11036_v37, 1  ;;  %v1152_v44 = vsel %vm716_vm2, %v1147_v38, %v1151_v31  ;;  %v11066_v54 = vshrl.u32 %v10512_v13, 16  ;;  %v11068_v55 = vshll.u32 %v10513_v48, 16  ;;  %v11094_v13 = vld [vmem:[%s10997_s11 + $0x18] sm:$0xff]  ;;  %p10855_p12 = pnand %p10854_p11, %p10972_p5 }
  0x23   : > { %17637 = vst [vmem:[#allocation11_spill] sm:$0xff] %v11030_v33  ;;  %9801 = vmatmul.msk.bf16.vlgmr.msra.gmra.mxu0 %vm1276_vm3, %v728_v41  ;;  %v1192_v45 = vsel %vm716_vm2, %v1187_v39, %v1191_v40  ;;  %9854 = vmatmul.msk.bf16.vlgmr.msra.gmra.mxu1 %vm1276_vm3, %v1152_v44  ;;  %v1227_v46 = vor.u32 %v11034_v36, %v1223_v42  ;;  %v11070_v56 = vshrl.u32 %v10517_v15, 16  ;;  %v11072_v57 = vshll.u32 %v10518_v49, 16  ;;  %v10519_v15 = vld [vmem:[%s10997_s11 + $0x1e8] sm:$0xff]  ;;  %p10860_p2 = por %p10859_p1, %p10858_p0 }
  0x24   : > { %17638 = vst [vmem:[#allocation12_spill] sm:$0xff] %v11032_v35  ;;  %9859 = vmatmul.msk.bf16.vlgmr.msra.gmra.mxu2 %vm1276_vm3, %v1192_v45  ;;  %v731_v58 = vor.u32 %v729_v51, %v727_v28  ;;  %v735_v59 = vrot.slane %v17397_v52, 1  ;;  %v11076_v60 = vshrl.u32 %v10522_v21, 16  ;;  %v11078_v61 = vshll.u32 %v10523_v53, 16  ;;  %v10515_v51 = vld [vmem:[%s10997_s11 + $0x1c8] sm:$0xff]  ;;  %p10856_p13 = pneg %p10855_p12 }
  0x25   : > { %17639 = vst [vmem:[#allocation13_spill] sm:$0xff] %v11034_v36  ;;  %v1232_v50 = vsel %vm716_vm2, %v1227_v46, %v1231_v43  ;;  %v1155_v62 = vor.u32 %v11066_v54, %v1151_v31  ;;  %v1159_v63 = vrot.slane %v11068_v55, 1  ;;  %v1195_v2 = vor.u32 %v11070_v56, %v1191_v40 }
  0x26   : > { %17640 = vst [vmem:[#allocation14_spill] sm:$0xff] %v11036_v37  ;;  %9864 = vmatmul.msk.bf16.vlgmr.msra.gmra.mxu3 %vm1276_vm3, %v1232_v50  ;;  %v1199_v3 = vrot.slane %v11072_v57, 1  ;;  %v736_v4 = vsel %vm716_vm2, %v731_v58, %v735_v59  ;;  %v1235_v5 = vor.u32 %v11076_v60, %v1231_v43  ;;  %v1239_v6 = vrot.slane %v11078_v61, 1  ;;  %p10861_p3 = pnand %p10860_p2, %p10856_p13 }
  0x27   : > { %17641 = vst [vmem:[#allocation15_spill] sm:$0xff] %v11066_v54  ;;  %v1160_v7 = vsel %vm716_vm2, %v1155_v62, %v1159_v63  ;;  %v17396_v16 = vshrl.u32 %v11057_v47, 16  ;;  %v17395_v17 = vshll.u32 %v11094_v13, 16  ;;  %v11102_v19 = vshrl.u32 %v10513_v48, 16 }
  0x28   : > { %17642 = vst [vmem:[#allocation16_spill] sm:$0xff] %v11068_v55  ;;  %v1200_v8 = vsel %vm716_vm2, %v1195_v2, %v1199_v3  ;;  %v1240_v11 = vsel %vm716_vm2, %v1235_v5, %v1239_v6  ;;  %v11104_v20 = vshll.u32 %v10514_v14, 16  ;;  %v11106_v21 = vshrl.u32 %v10518_v49, 16  ;;  %v11129_v49 = vld [vmem:[%s10997_s11 + $0x20] sm:$0xff]  ;;  %v10525_v2 = vld [vmem:[%s10997_s11 + $0x218] sm:$0xff] }
  0x29   : > { %17643 = vst [vmem:[#allocation17_spill] sm:$0xff] %v11070_v56  ;;  %v11108_v26 = vshll.u32 %v10519_v15, 16  ;;  %v739_v27 = vor.u32 %v17396_v16, %v735_v59  ;;  %v743_v28 = vrot.slane %v17395_v17, 1  ;;  %v11114_v31 = vshrl.u32 %v10523_v53, 16  ;;  %v10520_v53 = vld [vmem:[%s10997_s11 + $0x1f0] sm:$0xff] }
  0x2a   : > { %17644 = vst [vmem:[#allocation18_spill] sm:$0xff] %v11072_v57  ;;  %v11116_v34 = vshll.u32 %v10524_v18, 16  ;;  %v1163_v38 = vor.u32 %v11102_v19, %v1159_v63  ;;  %v1167_v39 = vrot.slane %v11104_v20, 1  ;;  %v1203_v40 = vor.u32 %v11106_v21, %v1199_v3  ;;  %v11146_v63 = vld [vmem:[%s17388_s1 + $0x4] sm:$0xff]  }
  0x2b   : > { %17645 = vst [vmem:[#allocation19_spill] sm:$0xff] %v11076_v60  ;;  %v1207_v41 = vrot.slane %v11108_v26, 1  ;;  %v744_v43 = vsel %vm716_vm2, %v739_v27, %v743_v28  ;;  %v1243_v44 = vor.u32 %v11114_v31, %v1239_v6  ;;  %v17394_v58 = vshrl.u32 %v11094_v13, 16 }
  0x2c   : > { %17646 = vst [vmem:[#allocation20_spill] sm:$0xff] %v11078_v61  ;;  %v1247_v45 = vrot.slane %v11116_v34, 1  ;;  %v1168_v46 = vsel %vm716_vm2, %v1163_v38, %v1167_v39  ;;  %v11139_v59 = vshll.u32 %v11129_v49, 16  ;;  %v1974_v62 = vand.u32 %v11006_v12, %v10985_v0 }
  0x2d   : > { %17647 = vst [vmem:[#allocation21_spill] sm:$0xff] %v11102_v19  ;;  %v1208_v48 = vsel %vm716_vm2, %v1203_v40, %v1207_v41  ;;  %v2464_v3 = vunpack.c.l.b16 %v11146_v63  ;;  %v11151_v5 = vshrl.u32 %v10514_v14, 16  ;;  %v11153_v6 = vshll.u32 %v10515_v51, 16 }
  0x2e   : > { %17648 = vst [vmem:[#allocation22_spill] sm:$0xff] %v11104_v20  ;;  %v1248_v50 = vsel %vm716_vm2, %v1243_v44, %v1247_v45  ;;  %1983 = vmatpush.bf16.msrb.mxu1 %v1974_v62  ;;  %v747_v27 = vor.u32 %v17394_v58, %v743_v28  ;;  %v751_v38 = vrot.slane %v11139_v59, 1  ;;  %v11165_v40 = vshrl.u32 %v10524_v18, 16  ;;  %v10617_v58 = vld [vmem:[%s10997_s11 + $0x220] sm:$0xff]  }
  0x2f   : > { %17649 = vst [vmem:[#allocation23_spill] sm:$0xff] %v11106_v21  ;;  %v2465_v0 = vpack.c.b16 %v2464_v3, %v10989_v1  ;;  %v11167_v14 = vshll.u32 %v10525_v2, 16  ;;  %v1175_v1 = vrot.slane %v11153_v6, 1 }
  0x30   : > { %17650 = vst [vmem:[#allocation24_spill] sm:$0xff] %v11108_v26  ;;  %v752_v62 = vsel %vm716_vm2, %v747_v27, %v751_v38 }
  0x31   : > { %17651 = vst [vmem:[#allocation25_spill] sm:$0xff] %v11114_v31 }
  0x32   : > { %17652 = vst [vmem:[#allocation26_spill] sm:$0xff] %v11116_v34 }
  0x33   : > { %9802 = vmatmul.msk.bf16.gmra.mxu0 %vm1276_vm3, %v736_v4  ;;  %9855 = vmatmul.msk.bf16.gmra.mxu1 %vm1276_vm3, %v1160_v7  ;;  %17653 = vst [vmem:[#allocation27_spill] sm:$0xff] %v11146_v63  ;;  %v11155_v7 = vshrl.u32 %v10519_v15, 16 }
  0x34   : > { %9860 = vmatmul.msk.bf16.gmra.mxu2 %vm1276_vm3, %v1200_v8  ;;  %17654 = vst [vmem:[#allocation28_spill] sm:$0xff] %v11151_v5  ;;  %v11157_v8 = vshll.u32 %v10520_v53, 16 }
  0x35   : > { %17655 = vst [vmem:[#allocation29_spill] sm:$0xff] %v11153_v6  ;;  %v11378_v6 = vld [vmem:[%s10997_s11 + $0x60] sm:$0xff] }
  0x36   : > { %9865 = vmatmul.msk.bf16.gmra.mxu3 %vm1276_vm3, %v1240_v11  ;;  %17656 = vst [vmem:[#allocation30_spill] sm:$0xff] %v11155_v7  ;;  %v11160_v11 = vpack.c.b16 %v2464_v3, %v2464_v3  ;;  %v1215_v28 = vrot.slane %v11157_v8, 1  ;;  %v1251_v3 = vor.u32 %v11165_v40, %v1247_v45  ;;  %v11188_v45 = vld [vmem:[%s10997_s11 + $0x28] sm:$0xff] }
  0x37   : > { %17657 = vst [vmem:[#allocation31_spill] sm:$0xff] %v11157_v8  ;;  %v11343_v8 = vld [vmem:[%s10997_s11 + $0x58] sm:$0xff] }
  0x38   : > { %17658 = vst [vmem:[#allocation32_spill] sm:$0xff] %v11165_v40  ;;  %v3178_v15 = vshrl.u32 %v11160_v11, 16  ;;  %v3180_v44 = vshll.u32 %v11160_v11, 16  ;;  %v11386_v20 = vshrl.u32 %v11343_v8, 16  ;;  %v2347_v63 = vrot.slane %v11343_v8, 1 }
  0x39   : > { %17659 = vst [vmem:[#allocation33_spill] sm:$0xff] %v11167_v14 }
  0x43   : > { %9803 = vmatmul.msk.bf16.gmra.mxu0 %vm1276_vm3, %v744_v43  ;;  %9856 = vmatmul.msk.bf16.gmra.mxu1 %vm1276_vm3, %v1168_v46  ;;  %v2466_v43 = vrot.slane %v2465_v0, 3  ;;  %v1171_v46 = vor.u32 %v11151_v5, %v1167_v39  ;;  %v1255_v0 = vrot.slane %v11167_v14, 1 }
  0x44   : > { %9861 = vmatmul.msk.bf16.gmra.mxu2 %vm1276_vm3, %v1208_v48  ;;  %v1211_v48 = vor.u32 %v11155_v7, %v1207_v41 }
  0x45   : > { %v2672_v18 = vand.u32 %v2466_v43, %v11006_v12  ;;  %v1176_v39 = vsel %vm716_vm2, %v1171_v46, %v1175_v1  ;;  %v1256_v27 = vsel %vm716_vm2, %v1251_v3, %v1255_v0  ;;  %v10531_v43 = vunpack.c.l.b16 %v10617_v58 }
  0x46   : > { %9866 = vmatmul.msk.bf16.gmra.mxu3 %vm1276_vm3, %v1248_v50  ;;  %v3182_v50 = vrot.slane %v3180_v44, 1  ;;  %v1216_v30 = vsel %vm716_vm2, %v1211_v48, %v1215_v28  ;;  %v11195_v44 = vshll.u32 %v11188_v45, 16  ;;  %v11199_v46 = vshrl.u32 %v10515_v51, 16 }
  0x47   : > { %2681 = vmatpush.bf16.msrb.mxu2 %v2672_v18  ;;  %v11201_v48 = vshrl.u32 %v10520_v53, 16  ;;  %v11205_v18 = vshrl.u32 %v10525_v2, 16 }
  0x48   : > { %v3183_v4 = vor.u32 %v3182_v50, %v3178_v15  ;;  %v11192_v15 = vshrl.u32 %v11129_v49, 16  ;;  %17661 = vst [vmem:[#allocation35_spill] sm:$0xff] %v11199_v46  ;;  %v759_v58 = vrot.slane %v11195_v44, 1 }
  0x49   : > { %17662 = vst [vmem:[#allocation36_spill] sm:$0xff] %v11201_v48  ;;  %v1219_v3 = vor.u32 %v11201_v48, %v1215_v28  ;;  %v1259_v51 = vor.u32 %v11205_v18, %v1255_v0  ;;  %v11227_v28 = vshrl.u32 %v11188_v45, 16 }
  0x4a   : > { %v3194_v41 = vand.u32 %v3183_v4, %v11006_v12  ;;  %v11197_v4 = vpack.c.b16 %v10531_v43, %v10531_v43  ;;  %17663 = vst [vmem:[#allocation37_spill] sm:$0xff] %v11205_v18  ;;  %v2327_v43 = vrot.slane %v11003_v10, 1 }
  0x4b   : > { %v1224_v2 = vsel %vm716_vm2, %v1219_v3, %v1223_v42  ;;  %v763_v42 = vor.u32 %v11227_v28, %v759_v58 }
  0x4c   : > { %3203 = vmatpush.bf16.msrb.mxu3 %v3194_v41  ;;  %17660 = vst [vmem:[#allocation34_spill] sm:$0xff] %v11197_v4  ;;  %v1261_v50 = vshll.u32 %v11197_v4, 16 }
  0x4e   : > { %v1263_v41 = vrot.slane %v1261_v50, 1  ;;  %v2329_v50 = vrot.slane %v11057_v47, 1 }
  0x53   : > { %9804 = vmatmul.msk.bf16.gmra.mxu0 %vm1276_vm3, %v752_v62  ;;  %9857 = vmatmul.msk.bf16.gmra.mxu1 %vm1276_vm3, %v1176_v39  ;;  %v1179_v62 = vor.u32 %v11199_v46, %v1175_v1  ;;  %v11223_v1 = vld [vmem:[%s10997_s11 + $0x30] sm:$0xff] }
  0x54   : > { %9862 = vmatmul.msk.bf16.gmra.mxu2 %vm1276_vm3, %v1216_v30  ;;  %v755_v30 = vor.u32 %v11192_v15, %v751_v38  ;;  %v1264_v38 = vsel %vm716_vm2, %v1259_v51, %v1263_v41  ;;  %v11250_v51 = vshrl.u32 %v11223_v1, 16 }
  0x55   : > { %v1184_v53 = vsel %vm716_vm2, %v1179_v62, %v1183_v32  ;;  %v11230_v32 = vshll.u32 %v11223_v1, 16  ;;  %v2331_v62 = vrot.slane %v11094_v13, 1 }
  0x56   : > { %9867 = vmatmul.msk.bf16.gmra.mxu3 %vm1276_vm3, %v1256_v27  ;;  %v760_v39 = vsel %vm716_vm2, %v755_v30, %v759_v58  ;;  %v2326_v27 = vrot.slane %v11000_v9, 1 }
  0x57   : > { %v767_v0 = vrot.slane %v11230_v32, 1  ;;  %v2332_v58 = vsel %vm2325_vm4, %v2329_v50, %v2331_v62 }
  0x58   : > { %v2328_v3 = vsel %vm2325_vm4, %v2326_v27, %v2327_v43 }
  0x59   : > { %v768_v30 = vsel %vm716_vm2, %v763_v42, %v767_v0  ;;  %v2330_v42 = vsel %vm2325_vm4, %v2327_v43, %v2329_v50 }
  0x63   : > { %9805 = vmatmul.msk.bf16.gmra.mxu0 %vm1276_vm3, %v760_v39  ;;  %9858 = vmatmul.msk.bf16.gmra.mxu1 %vm1276_vm3, %v1184_v53  ;;  %v11246_v39 = vld [vmem:[%s10997_s11 + $0x38] sm:$0xff]  ;;  %v771_v53 = vor.u32 %v11250_v51, %v767_v0 }
  0x64   : > { %9863 = vmatmul.msk.bf16.gmra.mxu2 %vm1276_vm3, %v1224_v2  ;;  %v11253_v41 = vshll.u32 %v11246_v39, 16  ;;  %v11270_v0 = vshrl.u32 %v11246_v39, 16  ;;  %v2339_v60 = vrot.slane %v11246_v39, 1 }
  0x66   : > { %9868 = vmatmul.msk.bf16.gmra.mxu3 %vm1276_vm3, %v1264_v38  ;;  %v775_v2 = vrot.slane %v11253_v41, 1  ;;  %v2333_v38 = vrot.slane %v11129_v49, 1 }
  0x68   : > { %v2334_v27 = vsel %vm2325_vm4, %v2331_v62, %v2333_v38  ;;  %v779_v43 = vor.u32 %v11270_v0, %v775_v2 }
  0x73   : > { %9806 = vmatmul.msk.bf16.gmra.mxu0 %vm1276_vm3, %v768_v30  ;;  %9869 = vmatmul.msk.bf16.vlgmr.msrb.gmra.mxu1 %vm1276_vm3, %v11000_v9  ;;  %v776_v9 = vsel %vm716_vm2, %v771_v53, %v775_v2  ;;  %v11266_v30 = vld [vmem:[%s10997_s11 + $0x40] sm:$0xff]  ;;  %v2335_v53 = vrot.slane %v11188_v45, 1 }
  0x74   : > { %9937 = vmatmul.msk.bf16.vlgmr.msrb.gmra.mxu2 %vm1276_vm3, %v2328_v3  ;;  %v11273_v3 = vshll.u32 %v11266_v30, 16  ;;  %v11289_v2 = vshrl.u32 %v11266_v30, 16  ;;  %v2341_v56 = vrot.slane %v11266_v30, 1 }
  0x75   : > { %v2336_v62 = vsel %vm2325_vm4, %v2333_v38, %v2335_v53  ;;  %v2337_v38 = vrot.slane %v11223_v1, 1 }
  0x76   : > { %10009 = vmatmul.msk.bf16.vlgmr.msrb.gmra.mxu3 %vm1276_vm3, %v2332_v58  ;;  %v783_v50 = vrot.slane %v11273_v3, 1 }
  0x77   : > { %v2338_v52 = vsel %vm2325_vm4, %v2335_v53, %v2337_v38 }
  0x83   : > { %9807 = vmatmul.msk.bf16.gmra.mxu0 %vm1276_vm3, %v776_v9  ;;  %9870 = vmatmul.msk.bf16.gmra.mxu1 %vm1276_vm3, %v11003_v10  ;;  %v784_v10 = vsel %vm716_vm2, %v779_v43, %v783_v50  ;;  %v11285_v9 = vld [vmem:[%s10997_s11 + $0x48] sm:$0xff]  ;;  %v787_v43 = vor.u32 %v11289_v2, %v783_v50  ;;  %v11308_v50 = vld [vmem:[%s10997_s11 + $0x50] sm:$0xff] }
  0x84   : > { %9938 = vmatmul.msk.bf16.gmra.mxu2 %vm1276_vm3, %v2330_v42  ;;  %v11292_v42 = vshll.u32 %v11285_v9, 16  ;;  %v11316_v18 = vshrl.u32 %v11285_v9, 16  ;;  %v11351_v26 = vshrl.u32 %v11308_v50, 16  ;;  %v2343_v54 = vrot.slane %v11285_v9, 1 }
  0x86   : > { %10010 = vmatmul.msk.bf16.gmra.mxu3 %vm1276_vm3, %v2334_v27 }
  0x93   : > { %9808 = vmatmul.msk.bf16.gmra.mxu0 %vm1276_vm3, %v784_v10  ;;  %9871 = vmatmul.msk.bf16.gmra.mxu1 %vm1276_vm3, %v11057_v47  ;;  %v791_v10 = vrot.slane %v11292_v42, 1 }
  0x94   : > { %9939 = vmatmul.msk.bf16.gmra.mxu2 %vm1276_vm3, %v2332_v58 }
  0x95   : > { %v792_v58 = vsel %vm716_vm2, %v787_v43, %v791_v10  ;;  %v795_v53 = vor.u32 %v11316_v18, %v791_v10  ;;  %v2340_v10 = vsel %vm2325_vm4, %v2337_v38, %v2339_v60 }
  0x96   : > { %10011 = vmatmul.msk.bf16.gmra.mxu3 %vm1276_vm3, %v2336_v62 }
  0xa0   : > { %v11296_v17 = vpop.f32.mrf.mxu0  ;;  %v11300_v16 = vpop.f32.mrf.mxu1 }
  0xa1   : > { %17664 = vst [vmem:[#allocation38_spill] sm:$0xff] %v11300_v16 }
  0xa3   : > { %9809 = vmatmul.msk.bf16.gmra.mxu0 %vm1276_vm3, %v792_v58  ;;  %9872 = vmatmul.msk.bf16.gmra.mxu1 %vm1276_vm3, %v11094_v13  ;;  %v11319_v58 = vshll.u32 %v11308_v50, 16 }
  0xa4   : > { %9940 = vmatmul.msk.bf16.gmra.mxu2 %vm1276_vm3, %v2334_v27 }
  0xa5   : > { %v799_v40 = vrot.slane %v11319_v58, 1 }
  0xa6   : > { %10012 = vmatmul.msk.bf16.gmra.mxu3 %vm1276_vm3, %v2338_v52 }
  0xa7   : > { %v11311_v14 = vpop.f32.mrf.mxu2  ;;  %v800_v37 = vsel %vm716_vm2, %v795_v53, %v799_v40  ;;  %v803_v38 = vor.u32 %v11351_v26, %v799_v40  ;;  %v2342_v40 = vsel %vm2325_vm4, %v2339_v60, %v2341_v56 }
  0xa8   : > { %17665 = vst [vmem:[#allocation39_spill] sm:$0xff] %v11311_v14  ;;  %v11313_v43 = vpop.f32.mrf.mxu0  ;;  %v11321_v34 = vpop.f32.mrf.mxu1 }
  0xa9   : > { %17666 = vst [vmem:[#allocation40_spill] sm:$0xff] %v11321_v34  ;;  %v11323_v27 = vpop.f32.mrf.mxu3 }
  0xaa   : > { %17667 = vst [vmem:[#allocation41_spill] sm:$0xff] %v11323_v27 }
  0xaf   : > { %v11327_v61 = vpop.f32.mrf.mxu2 }
  0xb0   : > { %17668 = vst [vmem:[#allocation42_spill] sm:$0xff] %v11327_v61  ;;  %v11329_v31 = vpop.f32.mrf.mxu0  ;;  %v11333_v35 = vpop.f32.mrf.mxu1 }
  0xb1   : > { %17669 = vst [vmem:[#allocation43_spill] sm:$0xff] %v11333_v35  ;;  %v11335_v36 = vpop.f32.mrf.mxu3  ;;  %v2349_v35 = vrot.slane %v11378_v6, 1 }
  0xb2   : > { %17670 = vst [vmem:[#allocation44_spill] sm:$0xff] %v11335_v36  ;;  %v11421_v36 = vshrl.u32 %v11378_v6, 16 }
  0xb3   : > { %9810 = vmatmul.msk.bf16.gmra.mxu0 %vm1276_vm3, %v800_v37  ;;  %9873 = vmatmul.msk.bf16.gmra.mxu1 %vm1276_vm3, %v11129_v49  ;;  %v11354_v37 = vshll.u32 %v11343_v8, 16 }
  0xb4   : > { %9941 = vmatmul.msk.bf16.gmra.mxu2 %vm1276_vm3, %v2336_v62 }
  0xb5   : > { %v807_v7 = vrot.slane %v11354_v37, 1 }
  0xb6   : > { %10013 = vmatmul.msk.bf16.gmra.mxu3 %vm1276_vm3, %v2340_v10 }
  0xb7   : > { %v11346_v53 = vpop.f32.mrf.mxu2  ;;  %v808_v33 = vsel %vm716_vm2, %v803_v38, %v807_v7  ;;  %v811_v60 = vor.u32 %v11386_v20, %v807_v7  ;;  %v2344_v7 = vsel %vm2325_vm4, %v2341_v56, %v2343_v54 }
  0xb8   : > { %17671 = vst [vmem:[#allocation45_spill] sm:$0xff] %v11346_v53  ;;  %v11348_v48 = vpop.f32.mrf.mxu0  ;;  %v11356_v49 = vpop.f32.mrf.mxu1 }
  0xb9   : > { %17672 = vst [vmem:[#allocation46_spill] sm:$0xff] %v11356_v49  ;;  %v11358_v62 = vpop.f32.mrf.mxu3 }
  0xba   : > { %17673 = vst [vmem:[#allocation47_spill] sm:$0xff] %v11358_v62 }
  0xbf   : > { %v11362_v57 = vpop.f32.mrf.mxu2 }
  0xc0   : > { %17674 = vst [vmem:[#allocation48_spill] sm:$0xff] %v11362_v57  ;;  %v11364_v21 = vpop.f32.mrf.mxu0  ;;  %v11368_v25 = vpop.f32.mrf.mxu1 }
  0xc1   : > { %17675 = vst [vmem:[#allocation49_spill] sm:$0xff] %v11368_v25  ;;  %v11370_v29 = vpop.f32.mrf.mxu3 }
  0xc2   : > { %17676 = vst [vmem:[#allocation50_spill] sm:$0xff] %v11370_v29 }
  0xc3   : > { %9811 = vmatmul.msk.bf16.gmra.mxu0 %vm1276_vm3, %v808_v33  ;;  %9874 = vmatmul.msk.bf16.gmra.mxu1 %vm1276_vm3, %v11188_v45  ;;  %v11389_v33 = vshll.u32 %v11378_v6, 16 }
  0xc4   : > { %9942 = vmatmul.msk.bf16.gmra.mxu2 %vm1276_vm3, %v2338_v52 }
  0xc5   : > { %v815_v5 = vrot.slane %v11389_v33, 1 }
  0xc6   : > { %10014 = vmatmul.msk.bf16.gmra.mxu3 %vm1276_vm3, %v2342_v40 }
  0xc7   : > { %v11381_v38 = vpop.f32.mrf.mxu2  ;;  %v816_v24 = vsel %vm716_vm2, %v811_v60, %v815_v5  ;;  %v819_v56 = vor.u32 %v11421_v36, %v815_v5 }
  0xc8   : > { %17677 = vst [vmem:[#allocation51_spill] sm:$0xff] %v11381_v38  ;;  %v11383_v46 = vpop.f32.mrf.mxu0  ;;  %v11391_v45 = vpop.f32.mrf.mxu1  ;;  %v2345_v38 = vrot.slane %v11308_v50, 1 }
  0xc9   : > { %17678 = vst [vmem:[#allocation52_spill] sm:$0xff] %v11391_v45  ;;  %v11393_v52 = vpop.f32.mrf.mxu3 }
  0xca   : > { %17679 = vst [vmem:[#allocation53_spill] sm:$0xff] %v11393_v52  ;;  %v11413_v52 = vld [vmem:[%s10997_s11 + $0x68] sm:$0xff]  ;;  %v2346_v5 = vsel %vm2325_vm4, %v2343_v54, %v2345_v38 }
  0xcb   : > { %v11456_v61 = vshrl.u32 %v11413_v52, 16 }
  0xcd   : > { %17691 = vst [vmem:[#allocation65_spill] sm:$0xff] %v11456_v61 }
  0xcf   : > { %v11397_v55 = vpop.f32.mrf.mxu2 }
  0xd0   : > { %17680 = vst [vmem:[#allocation54_spill] sm:$0xff] %v11397_v55  ;;  %v11399_v19 = vpop.f32.mrf.mxu0  ;;  %v11403_v23 = vpop.f32.mrf.mxu1 }
  0xd1   : > { %17681 = vst [vmem:[#allocation55_spill] sm:$0xff] %v11403_v23  ;;  %v11405_v29 = vpop.f32.mrf.mxu3 }
  0xd2   : > { %17682 = vst [vmem:[#allocation56_spill] sm:$0xff] %v11405_v29 }
  0xd3   : > { %9812 = vmatmul.msk.bf16.gmra.mxu0 %vm1276_vm3, %v816_v24  ;;  %9875 = vmatmul.msk.bf16.gmra.mxu1 %vm1276_vm3, %v11223_v1  ;;  %v11424_v24 = vshll.u32 %v11413_v52, 16 }
  0xd4   : > { %9943 = vmatmul.msk.bf16.gmra.mxu2 %vm1276_vm3, %v2340_v10 }
  0xd5   : > { %17684 = vst [vmem:[#allocation58_spill] sm:$0xff] %v11424_v24  ;;  %v823_v29 = vrot.slane %v11424_v24, 1 }
  0xd6   : > { %10015 = vmatmul.msk.bf16.gmra.mxu3 %vm1276_vm3, %v2344_v7 }
  0xd7   : > { %v11416_v60 = vpop.f32.mrf.mxu2  ;;  %v824_v55 = vsel %vm716_vm2, %v819_v56, %v823_v29  ;;  %v827_v54 = vor.u32 %v11456_v61, %v823_v29  ;;  %v2348_v29 = vsel %vm2325_vm4, %v2345_v38, %v2347_v63 }
  0xd8   : > { %17683 = vst [vmem:[#allocation57_spill] sm:$0xff] %v11416_v60  ;;  %v11418_v62 = vpop.f32.mrf.mxu0  ;;  %v11426_v1 = vpop.f32.mrf.mxu1 }
  0xd9   : > { %17685 = vst [vmem:[#allocation59_spill] sm:$0xff] %v11426_v1  ;;  %v11428_v10 = vpop.f32.mrf.mxu3 }
  0xda   : > { %17686 = vst [vmem:[#allocation60_spill] sm:$0xff] %v11428_v10  ;;  %v11448_v10 = vld [vmem:[%s10997_s11 + $0x70] sm:$0xff] }
  0xdf   : > { %v11432_v27 = vpop.f32.mrf.mxu2 }
  0xe0   : > { %17687 = vst [vmem:[#allocation61_spill] sm:$0xff] %v11432_v27  ;;  %v11434_v60 = vpop.f32.mrf.mxu0  ;;  %v11438_v57 = vpop.f32.mrf.mxu1 }
  0xe1   : > { %17688 = vst [vmem:[#allocation62_spill] sm:$0xff] %v11438_v57  ;;  %v11440_v53 = vpop.f32.mrf.mxu3 }
  0xe2   : > { %17689 = vst [vmem:[#allocation63_spill] sm:$0xff] %v11440_v53 }
  0xe3   : > { %9813 = vmatmul.msk.bf16.gmra.mxu0 %vm1276_vm3, %v824_v55  ;;  %9876 = vmatmul.msk.bf16.gmra.mxu1 %vm1276_vm3, %v11246_v39  ;;  %v11459_v55 = vshll.u32 %v11448_v10, 16 }
  0xe4   : > { %9944 = vmatmul.msk.bf16.gmra.mxu2 %vm1276_vm3, %v2342_v40 }
  0xe5   : > { %17692 = vst [vmem:[#allocation66_spill] sm:$0xff] %v11459_v55  ;;  %v831_v53 = vrot.slane %v11459_v55, 1 }
  0xe6   : > { %10016 = vmatmul.msk.bf16.gmra.mxu3 %vm1276_vm3, %v2346_v5 }
  0xe7   : > { %v11451_v56 = vpop.f32.mrf.mxu2  ;;  %v832_v14 = vsel %vm716_vm2, %v827_v54, %v831_v53 }
  0xe8   : > { %17690 = vst [vmem:[#allocation64_spill] sm:$0xff] %v11451_v56  ;;  %v11453_v27 = vpop.f32.mrf.mxu0  ;;  %v11461_v39 = vpop.f32.mrf.mxu1 }
  0xe9   : > { %17693 = vst [vmem:[#allocation67_spill] sm:$0xff] %v11461_v39  ;;  %v11463_v40 = vpop.f32.mrf.mxu3 }
  0xea   : > { %17694 = vst [vmem:[#allocation68_spill] sm:$0xff] %v11463_v40  ;;  %v11481_v40 = vld [vmem:[%s10997_s11 + $0x78] sm:$0xff] }
  0xef   : > { %v11467_v4 = vpop.f32.mrf.mxu2 }
  0xf0   : > { %17695 = vst [vmem:[#allocation69_spill] sm:$0xff] %v11467_v4  ;;  %v11469_v56 = vpop.f32.mrf.mxu0  ;;  %v1985_v57 = vpop.f32.mrf.mxu1 }
  0xf1   : > { %v11473_v1 = vpop.f32.mrf.mxu3  ;;  %v1986_v4 = vadd.f32 %v1985_v57, %v11296_v17 }
  0xf2   : > { %17696 = vst [vmem:[#allocation70_spill] sm:$0xff] %v11473_v1  ;;  %v11488_v1 = vshrl.u32 %v11448_v10, 16 }
  0xf3   : > { %9814 = vmatmul.msk.bf16.gmra.mxu0 %vm1276_vm3, %v832_v14  ;;  %9877 = vmatmul.msk.bf16.gmra.mxu1 %vm1276_vm3, %v11266_v30  ;;  %v11491_v14 = vshll.u32 %v11481_v40, 16 }
  0xf4   : > { %9945 = vmatmul.msk.bf16.gmra.mxu2 %vm1276_vm3, %v2344_v7  ;;  %17697 = vst [vmem:[#allocation71_spill] sm:$0xff] %v11488_v1  ;;  %v835_v38 = vor.u32 %v11488_v1, %v831_v53  ;;  %v11510_v53 = vld [vmem:[%s10997_s11 + $0x80] sm:$0xff] }
  0xf5   : > { %17698 = vst [vmem:[#allocation72_spill] sm:$0xff] %v11491_v14  ;;  %v839_v57 = vrot.slane %v11491_v14, 1  ;;  %v2351_v14 = vrot.slane %v11413_v52, 1 }
  0xf6   : > { %10017 = vmatmul.msk.bf16.gmra.mxu3 %vm1276_vm3, %v2348_v29 }
  0xf7   : > { %v2683_v54 = vpop.f32.mrf.mxu2  ;;  %v840_v49 = vsel %vm716_vm2, %v835_v38, %v839_v57 }
  0xf8   : > { %v3023_v39 = vadd.f32 %v2683_v54, %v1986_v4  ;;  %v11485_v23 = vpop.f32.mrf.mxu0  ;;  %v1987_v30 = vpop.f32.mrf.mxu1 }
  0xf9   : > { %v3205_v7 = vpop.f32.mrf.mxu3  ;;  %v1988_v17 = vadd.f32 %v1987_v30, %v11313_v43  ;;  %v2350_v43 = vsel %vm2325_vm4, %v2347_v63, %v2349_v35 }
  0xfa   : > { %v11493_v45 = vadd.f32 %v3205_v7, %v3023_v39 }
  0xff   : > { %v2685_v4 = vpop.f32.mrf.mxu2 }
 0x100   : > { %v3024_v54 = vadd.f32 %v2685_v4, %v1988_v17  ;;  %v11498_v25 = vpop.f32.mrf.mxu0  ;;  %v1990_v34 = vpop.f32.mrf.mxu1 }
 0x101   : > { %v3207_v16 = vpop.f32.mrf.mxu3  ;;  %v1991_v39 = vadd.f32 %v1990_v34, %v11329_v31 }
 0x102   : > { %v11502_v55 = vadd.f32 %v3207_v16, %v3024_v54  ;;  %v11517_v16 = vshrl.u32 %v11481_v40, 16 }
 0x103   : > { %9815 = vmatmul.msk.bf16.gmra.mxu0 %vm1276_vm3, %v840_v49  ;;  %9878 = vmatmul.msk.bf16.gmra.mxu1 %vm1276_vm3, %v11285_v9  ;;  %v11520_v49 = vshll.u32 %v11510_v53, 16 }
 0x104   : > { %9946 = vmatmul.msk.bf16.gmra.mxu2 %vm1276_vm3, %v2346_v5  ;;  %17699 = vst [vmem:[#allocation73_spill] sm:$0xff] %v11517_v16  ;;  %v843_v63 = vor.u32 %v11517_v16, %v839_v57  ;;  %v11539_v57 = vld [vmem:[%s10997_s11 + $0x88] sm:$0xff] }
 0x105   : > { %17700 = vst [vmem:[#allocation74_spill] sm:$0xff] %v11520_v49  ;;  %v847_v31 = vrot.slane %v11520_v49, 1  ;;  %v2353_v49 = vrot.slane %v11448_v10, 1 }
 0x106   : > { %10018 = vmatmul.msk.bf16.gmra.mxu3 %vm1276_vm3, %v2350_v43 }
 0x107   : > { %v2688_v30 = vpop.f32.mrf.mxu2 }
 0x108   : > { %v3025_v7 = vadd.f32 %v2688_v30, %v1991_v39  ;;  %v11514_v38 = vpop.f32.mrf.mxu0  ;;  %v1992_v9 = vpop.f32.mrf.mxu1  ;;  %v848_v30 = vsel %vm716_vm2, %v843_v63, %v847_v31 }
 0x109   : > { %v3210_v5 = vpop.f32.mrf.mxu3  ;;  %v1993_v34 = vadd.f32 %v1992_v9, %v11348_v48  ;;  %v2352_v48 = vsel %vm2325_vm4, %v2349_v35, %v2351_v14 }
 0x10a   : > { %v11522_v17 = vadd.f32 %v3210_v5, %v3025_v7 }
 0x10c   : > { %17701 = vst [vmem:[#allocation75_spill] sm:$0xff] %v11522_v17 }
 0x10f   : > { %v2690_v4 = vpop.f32.mrf.mxu2 }
 0x110   : > { %v3026_v54 = vadd.f32 %v2690_v4, %v1993_v34  ;;  %v11527_v39 = vpop.f32.mrf.mxu0  ;;  %v1995_v1 = vpop.f32.mrf.mxu1  ;;  %v11549_v34 = vshll.u32 %v11539_v57, 16 }
 0x111   : > { %v3212_v24 = vpop.f32.mrf.mxu3  ;;  %v1996_v7 = vadd.f32 %v1995_v1, %v11364_v21 }
 0x112   : > { %v11531_v61 = vadd.f32 %v3212_v24, %v3026_v54  ;;  %v11546_v24 = vshrl.u32 %v11510_v53, 16  ;;  %17704 = vst [vmem:[#allocation78_spill] sm:$0xff] %v11549_v34  ;;  %v855_v21 = vrot.slane %v11549_v34, 1  ;;  %v2355_v34 = vrot.slane %v11481_v40, 1 }
 0x113   : > { %9816 = vmatmul.msk.bf16.gmra.mxu0 %vm1276_vm3, %v848_v30  ;;  %9879 = vmatmul.msk.bf16.gmra.mxu1 %vm1276_vm3, %v11308_v50 }
 0x114   : > { %17702 = vst [vmem:[#allocation76_spill] sm:$0xff] %v11531_v61  ;;  %9947 = vmatmul.msk.bf16.gmra.mxu2 %vm1276_vm3, %v2348_v29  ;;  %v851_v35 = vor.u32 %v11546_v24, %v847_v31  ;;  %v11568_v31 = vld [vmem:[%s10997_s11 + $0x90] sm:$0xff] }
 0x115   : > { %17703 = vst [vmem:[#allocation77_spill] sm:$0xff] %v11546_v24 }
 0x116   : > { %10019 = vmatmul.msk.bf16.gmra.mxu3 %vm1276_vm3, %v2352_v48 }
 0x117   : > { %v2693_v9 = vpop.f32.mrf.mxu2 }
 0x118   : > { %v3027_v5 = vadd.f32 %v2693_v9, %v1996_v7  ;;  %v11543_v63 = vpop.f32.mrf.mxu0  ;;  %v1997_v50 = vpop.f32.mrf.mxu1  ;;  %v856_v9 = vsel %vm716_vm2, %v851_v35, %v855_v21 }
 0x119   : > { %v3215_v29 = vpop.f32.mrf.mxu3  ;;  %v1998_v1 = vadd.f32 %v1997_v50, %v11383_v46  ;;  %v2354_v46 = vsel %vm2325_vm4, %v2351_v14, %v2353_v49 }
 0x11a   : > { %v11551_v4 = vadd.f32 %v3215_v29, %v3027_v5 }
 0x11c   : > { %17705 = vst [vmem:[#allocation79_spill] sm:$0xff] %v11551_v4 }
 0x11f   : > { %v2695_v54 = vpop.f32.mrf.mxu2 }
 0x120   : > { %v3028_v30 = vadd.f32 %v2695_v54, %v1998_v1  ;;  %v11556_v7 = vpop.f32.mrf.mxu0  ;;  %v2000_v16 = vpop.f32.mrf.mxu1  ;;  %v11578_v1 = vshll.u32 %v11568_v31, 16 }
 0x121   : > { %v3217_v61 = vpop.f32.mrf.mxu3  ;;  %v2001_v5 = vadd.f32 %v2000_v16, %v11399_v19 }
 0x122   : > { %v11560_v17 = vadd.f32 %v3217_v61, %v3028_v30  ;;  %v11575_v61 = vshrl.u32 %v11539_v57, 16  ;;  %17708 = vst [vmem:[#allocation82_spill] sm:$0xff] %v11578_v1  ;;  %v863_v19 = vrot.slane %v11578_v1, 1  ;;  %v2357_v1 = vrot.slane %v11510_v53, 1 }
 0x123   : > { %9817 = vmatmul.msk.bf16.gmra.mxu0 %vm1276_vm3, %v856_v9  ;;  %9880 = vmatmul.msk.bf16.gmra.mxu1 %vm1276_vm3, %v11343_v8 }
 0x124   : > { %17706 = vst [vmem:[#allocation80_spill] sm:$0xff] %v11560_v17  ;;  %9948 = vmatmul.msk.bf16.gmra.mxu2 %vm1276_vm3, %v2350_v43  ;;  %v859_v14 = vor.u32 %v11575_v61, %v855_v21  ;;  %v11597_v21 = vld [vmem:[%s10997_s11 + $0x98] sm:$0xff] }
 0x125   : > { %17707 = vst [vmem:[#allocation81_spill] sm:$0xff] %v11575_v61 }
 0x126   : > { %10020 = vmatmul.msk.bf16.gmra.mxu3 %vm1276_vm3, %v2354_v46 }
 0x127   : > { %v2698_v50 = vpop.f32.mrf.mxu2 }
 0x128   : > { %v3029_v29 = vadd.f32 %v2698_v50, %v2001_v5  ;;  %v11572_v35 = vpop.f32.mrf.mxu0  ;;  %v2002_v8 = vpop.f32.mrf.mxu1  ;;  %v864_v50 = vsel %vm716_vm2, %v859_v14, %v863_v19 }
 0x129   : > { %v3220_v43 = vpop.f32.mrf.mxu3  ;;  %v2003_v16 = vadd.f32 %v2002_v8, %v11418_v62  ;;  %v2356_v62 = vsel %vm2325_vm4, %v2353_v49, %v2355_v34 }
 0x12a   : > { %v11580_v54 = vadd.f32 %v3220_v43, %v3029_v29 }
 0x12c   : > { %17709 = vst [vmem:[#allocation83_spill] sm:$0xff] %v11580_v54 }
 0x12f   : > { %v2700_v30 = vpop.f32.mrf.mxu2 }
 0x130   : > { %v3030_v9 = vadd.f32 %v2700_v30, %v2003_v16  ;;  %v11585_v5 = vpop.f32.mrf.mxu0  ;;  %v2005_v24 = vpop.f32.mrf.mxu1  ;;  %v11607_v16 = vshll.u32 %v11597_v21, 16 }
 0x131   : > { %v3222_v17 = vpop.f32.mrf.mxu3  ;;  %v2006_v29 = vadd.f32 %v2005_v24, %v11434_v60 }
 0x132   : > { %v11589_v4 = vadd.f32 %v3222_v17, %v3030_v9  ;;  %v11604_v17 = vshrl.u32 %v11568_v31, 16  ;;  %17712 = vst [vmem:[#allocation86_spill] sm:$0xff] %v11607_v16  ;;  %v871_v60 = vrot.slane %v11607_v16, 1  ;;  %v2359_v16 = vrot.slane %v11539_v57, 1 }
 0x133   : > { %9818 = vmatmul.msk.bf16.gmra.mxu0 %vm1276_vm3, %v864_v50  ;;  %9881 = vmatmul.msk.bf16.gmra.mxu1 %vm1276_vm3, %v11378_v6 }
 0x134   : > { %17710 = vst [vmem:[#allocation84_spill] sm:$0xff] %v11589_v4  ;;  %9949 = vmatmul.msk.bf16.gmra.mxu2 %vm1276_vm3, %v2352_v48  ;;  %v867_v49 = vor.u32 %v11604_v17, %v863_v19  ;;  %v11626_v19 = vld [vmem:[%s10997_s11 + $0xa0] sm:$0xff] }
 0x135   : > { %17711 = vst [vmem:[#allocation85_spill] sm:$0xff] %v11604_v17 }
 0x136   : > { %10021 = vmatmul.msk.bf16.gmra.mxu3 %vm1276_vm3, %v2356_v62 }
 0x137   : > { %v2703_v8 = vpop.f32.mrf.mxu2 }
 0x138   : > { %v3031_v43 = vadd.f32 %v2703_v8, %v2006_v29  ;;  %v11601_v14 = vpop.f32.mrf.mxu0  ;;  %v2007_v6 = vpop.f32.mrf.mxu1  ;;  %v872_v8 = vsel %vm716_vm2, %v867_v49, %v871_v60 }
 0x139   : > { %v3225_v48 = vpop.f32.mrf.mxu3  ;;  %v2008_v24 = vadd.f32 %v2007_v6, %v11453_v27  ;;  %v2358_v27 = vsel %vm2325_vm4, %v2355_v34, %v2357_v1 }
 0x13a   : > { %v11609_v30 = vadd.f32 %v3225_v48, %v3031_v43 }
 0x13c   : > { %17713 = vst [vmem:[#allocation87_spill] sm:$0xff] %v11609_v30 }
 0x13f   : > { %v2705_v9 = vpop.f32.mrf.mxu2 }
 0x140   : > { %v3032_v50 = vadd.f32 %v2705_v9, %v2008_v24  ;;  %v11614_v29 = vpop.f32.mrf.mxu0  ;;  %v2010_v61 = vpop.f32.mrf.mxu1  ;;  %v11636_v24 = vshll.u32 %v11626_v19, 16 }
 0x141   : > { %v3227_v4 = vpop.f32.mrf.mxu3  ;;  %v2011_v43 = vadd.f32 %v2010_v61, %v11469_v56 }
 0x142   : > { %v11618_v54 = vadd.f32 %v3227_v4, %v3032_v50  ;;  %v11633_v4 = vshrl.u32 %v11597_v21, 16  ;;  %17716 = vst [vmem:[#allocation90_spill] sm:$0xff] %v11636_v24  ;;  %v879_v56 = vrot.slane %v11636_v24, 1  ;;  %v2361_v24 = vrot.slane %v11568_v31, 1 }
 0x143   : > { %9819 = vmatmul.msk.bf16.gmra.mxu0 %vm1276_vm3, %v872_v8  ;;  %9882 = vmatmul.msk.bf16.gmra.mxu1 %vm1276_vm3, %v11413_v52 }
 0x144   : > { %17714 = vst [vmem:[#allocation88_spill] sm:$0xff] %v11618_v54  ;;  %9950 = vmatmul.msk.bf16.gmra.mxu2 %vm1276_vm3, %v2354_v46  ;;  %v875_v34 = vor.u32 %v11633_v4, %v871_v60  ;;  %v11655_v60 = vld [vmem:[%s10997_s11 + $0xa8] sm:$0xff] }
 0x145   : > { %17715 = vst [vmem:[#allocation89_spill] sm:$0xff] %v11633_v4 }
 0x146   : > { %10022 = vmatmul.msk.bf16.gmra.mxu3 %vm1276_vm3, %v2358_v27 }
 0x147   : > { %v2708_v6 = vpop.f32.mrf.mxu2 }
 0x148   : > { %v3033_v48 = vadd.f32 %v2708_v6, %v2011_v43  ;;  %v11630_v49 = vpop.f32.mrf.mxu0  ;;  %v2012_v52 = vpop.f32.mrf.mxu1  ;;  %v880_v6 = vsel %vm716_vm2, %v875_v34, %v879_v56 }
 0x149   : > { %v3230_v46 = vpop.f32.mrf.mxu3  ;;  %v2013_v61 = vadd.f32 %v2012_v52, %v11485_v23  ;;  %v2360_v23 = vsel %vm2325_vm4, %v2357_v1, %v2359_v16 }
 0x14a   : > { %v11638_v9 = vadd.f32 %v3230_v46, %v3033_v48 }
 0x14c   : > { %17717 = vst [vmem:[#allocation91_spill] sm:$0xff] %v11638_v9 }
 0x14f   : > { %v2710_v50 = vpop.f32.mrf.mxu2 }
 0x150   : > { %v3034_v8 = vadd.f32 %v2710_v50, %v2013_v61  ;;  %v11643_v43 = vpop.f32.mrf.mxu0  ;;  %v2015_v17 = vpop.f32.mrf.mxu1  ;;  %v11665_v61 = vshll.u32 %v11655_v60, 16 }
 0x151   : > { %v3232_v54 = vpop.f32.mrf.mxu3  ;;  %v2016_v48 = vadd.f32 %v2015_v17, %v11498_v25 }
 0x152   : > { %v11647_v30 = vadd.f32 %v3232_v54, %v3034_v8  ;;  %v11662_v54 = vshrl.u32 %v11626_v19, 16  ;;  %17720 = vst [vmem:[#allocation94_spill] sm:$0xff] %v11665_v61  ;;  %v887_v25 = vrot.slane %v11665_v61, 1  ;;  %v2363_v61 = vrot.slane %v11597_v21, 1 }
 0x153   : > { %9820 = vmatmul.msk.bf16.gmra.mxu0 %vm1276_vm3, %v880_v6  ;;  %9883 = vmatmul.msk.bf16.gmra.mxu1 %vm1276_vm3, %v11448_v10 }
 0x154   : > { %17718 = vst [vmem:[#allocation92_spill] sm:$0xff] %v11647_v30  ;;  %9951 = vmatmul.msk.bf16.gmra.mxu2 %vm1276_vm3, %v2356_v62  ;;  %v883_v1 = vor.u32 %v11662_v54, %v879_v56  ;;  %v11684_v56 = vld [vmem:[%s10997_s11 + $0xb0] sm:$0xff] }
 0x155   : > { %17719 = vst [vmem:[#allocation93_spill] sm:$0xff] %v11662_v54 }
 0x156   : > { %10023 = vmatmul.msk.bf16.gmra.mxu3 %vm1276_vm3, %v2360_v23 }
 0x157   : > { %v2713_v52 = vpop.f32.mrf.mxu2 }
 0x158   : > { %v3035_v46 = vadd.f32 %v2713_v52, %v2016_v48  ;;  %v11659_v34 = vpop.f32.mrf.mxu0  ;;  %v2017_v10 = vpop.f32.mrf.mxu1  ;;  %v888_v52 = vsel %vm716_vm2, %v883_v1, %v887_v25 }
 0x159   : > { %v3235_v62 = vpop.f32.mrf.mxu3  ;;  %v2018_v17 = vadd.f32 %v2017_v10, %v11514_v38  ;;  %v2362_v38 = vsel %vm2325_vm4, %v2359_v16, %v2361_v24 }
 0x15a   : > { %v11667_v50 = vadd.f32 %v3235_v62, %v3035_v46 }
 0x15c   : > { %17721 = vst [vmem:[#allocation95_spill] sm:$0xff] %v11667_v50 }
 0x15f   : > { %v2715_v8 = vpop.f32.mrf.mxu2 }
 0x160   : > { %v3036_v6 = vadd.f32 %v2715_v8, %v2018_v17  ;;  %v11672_v48 = vpop.f32.mrf.mxu0  ;;  %v2020_v4 = vpop.f32.mrf.mxu1  ;;  %v11694_v17 = vshll.u32 %v11684_v56, 16 }
 0x161   : > { %v3237_v30 = vpop.f32.mrf.mxu3  ;;  %v2021_v46 = vadd.f32 %v2020_v4, %v11527_v39 }
 0x162   : > { %v11676_v9 = vadd.f32 %v3237_v30, %v3036_v6  ;;  %v11691_v30 = vshrl.u32 %v11655_v60, 16  ;;  %17724 = vst [vmem:[#allocation98_spill] sm:$0xff] %v11694_v17  ;;  %v895_v39 = vrot.slane %v11694_v17, 1  ;;  %v2365_v17 = vrot.slane %v11626_v19, 1 }
 0x163   : > { %9821 = vmatmul.msk.bf16.gmra.mxu0 %vm1276_vm3, %v888_v52  ;;  %9884 = vmatmul.msk.bf16.gmra.mxu1 %vm1276_vm3, %v11481_v40 }
 0x164   : > { %17722 = vst [vmem:[#allocation96_spill] sm:$0xff] %v11676_v9  ;;  %9952 = vmatmul.msk.bf16.gmra.mxu2 %vm1276_vm3, %v2358_v27  ;;  %v891_v16 = vor.u32 %v11691_v30, %v887_v25  ;;  %v11713_v25 = vld [vmem:[%s10997_s11 + $0xb8] sm:$0xff] }
 0x165   : > { %17723 = vst [vmem:[#allocation97_spill] sm:$0xff] %v11691_v30 }
 0x166   : > { %10024 = vmatmul.msk.bf16.gmra.mxu3 %vm1276_vm3, %v2362_v38 }
 0x167   : > { %v2718_v10 = vpop.f32.mrf.mxu2 }
 0x168   : > { %v3037_v62 = vadd.f32 %v2718_v10, %v2021_v46  ;;  %v11688_v1 = vpop.f32.mrf.mxu0  ;;  %v2022_v40 = vpop.f32.mrf.mxu1  ;;  %v896_v10 = vsel %vm716_vm2, %v891_v16, %v895_v39 }
 0x169   : > { %v3240_v27 = vpop.f32.mrf.mxu3  ;;  %v2023_v4 = vadd.f32 %v2022_v40, %v11543_v63  ;;  %v2364_v63 = vsel %vm2325_vm4, %v2361_v24, %v2363_v61 }
 0x16a   : > { %v11696_v8 = vadd.f32 %v3240_v27, %v3037_v62 }
 0x16c   : > { %17725 = vst [vmem:[#allocation99_spill] sm:$0xff] %v11696_v8 }
 0x16f   : > { %v2720_v6 = vpop.f32.mrf.mxu2 }
 0x170   : > { %v3038_v52 = vadd.f32 %v2720_v6, %v2023_v4  ;;  %v11701_v46 = vpop.f32.mrf.mxu0  ;;  %v2025_v54 = vpop.f32.mrf.mxu1  ;;  %v11723_v4 = vshll.u32 %v11713_v25, 16 }
 0x171   : > { %v3242_v9 = vpop.f32.mrf.mxu3  ;;  %v2026_v62 = vadd.f32 %v2025_v54, %v11556_v7 }
 0x172   : > { %v11705_v50 = vadd.f32 %v3242_v9, %v3038_v52  ;;  %v11720_v9 = vshrl.u32 %v11684_v56, 16  ;;  %17728 = vst [vmem:[#allocation102_spill] sm:$0xff] %v11723_v4  ;;  %v903_v7 = vrot.slane %v11723_v4, 1  ;;  %v2367_v4 = vrot.slane %v11655_v60, 1 }
 0x173   : > { %9822 = vmatmul.msk.bf16.gmra.mxu0 %vm1276_vm3, %v896_v10  ;;  %9885 = vmatmul.msk.bf16.gmra.mxu1 %vm1276_vm3, %v11510_v53 }
 0x174   : > { %17726 = vst [vmem:[#allocation100_spill] sm:$0xff] %v11705_v50  ;;  %9953 = vmatmul.msk.bf16.gmra.mxu2 %vm1276_vm3, %v2360_v23  ;;  %v899_v24 = vor.u32 %v11720_v9, %v895_v39  ;;  %v11742_v39 = vld [vmem:[%s10997_s11 + $0xc0] sm:$0xff] }
 0x175   : > { %17727 = vst [vmem:[#allocation101_spill] sm:$0xff] %v11720_v9 }
 0x176   : > { %10025 = vmatmul.msk.bf16.gmra.mxu3 %vm1276_vm3, %v2364_v63 }
 0x177   : > { %v2723_v40 = vpop.f32.mrf.mxu2 }
 0x178   : > { %v3039_v27 = vadd.f32 %v2723_v40, %v2026_v62  ;;  %v11717_v16 = vpop.f32.mrf.mxu0  ;;  %v2027_v53 = vpop.f32.mrf.mxu1  ;;  %v904_v40 = vsel %vm716_vm2, %v899_v24, %v903_v7 }
 0x179   : > { %v3245_v23 = vpop.f32.mrf.mxu3  ;;  %v2028_v54 = vadd.f32 %v2027_v53, %v11572_v35  ;;  %v2366_v35 = vsel %vm2325_vm4, %v2363_v61, %v2365_v17 }
 0x17a   : > { %v11725_v6 = vadd.f32 %v3245_v23, %v3039_v27 }
 0x17c   : > { %17729 = vst [vmem:[#allocation103_spill] sm:$0xff] %v11725_v6 }
 0x17f   : > { %v2725_v52 = vpop.f32.mrf.mxu2 }
 0x180   : > { %v3040_v10 = vadd.f32 %v2725_v52, %v2028_v54  ;;  %v11730_v62 = vpop.f32.mrf.mxu0  ;;  %v2030_v30 = vpop.f32.mrf.mxu1  ;;  %v11752_v54 = vshll.u32 %v11742_v39, 16 }
 0x181   : > { %v3247_v50 = vpop.f32.mrf.mxu3  ;;  %v2031_v27 = vadd.f32 %v2030_v30, %v11585_v5 }
 0x182   : > { %v11734_v8 = vadd.f32 %v3247_v50, %v3040_v10  ;;  %v11749_v50 = vshrl.u32 %v11713_v25, 16  ;;  %17732 = vst [vmem:[#allocation106_spill] sm:$0xff] %v11752_v54  ;;  %v911_v5 = vrot.slane %v11752_v54, 1  ;;  %v2369_v54 = vrot.slane %v11684_v56, 1 }
 0x183   : > { %9823 = vmatmul.msk.bf16.gmra.mxu0 %vm1276_vm3, %v904_v40  ;;  %9886 = vmatmul.msk.bf16.gmra.mxu1 %vm1276_vm3, %v11539_v57 }
 0x184   : > { %17730 = vst [vmem:[#allocation104_spill] sm:$0xff] %v11734_v8  ;;  %9954 = vmatmul.msk.bf16.gmra.mxu2 %vm1276_vm3, %v2362_v38  ;;  %v907_v61 = vor.u32 %v11749_v50, %v903_v7  ;;  %v11771_v7 = vld [vmem:[%s10997_s11 + $0xc8] sm:$0xff] }
 0x185   : > { %17731 = vst [vmem:[#allocation105_spill] sm:$0xff] %v11749_v50 }
 0x186   : > { %10026 = vmatmul.msk.bf16.gmra.mxu3 %vm1276_vm3, %v2366_v35 }
 0x187   : > { %v2728_v53 = vpop.f32.mrf.mxu2 }
 0x188   : > { %v3041_v23 = vadd.f32 %v2728_v53, %v2031_v27  ;;  %v11746_v24 = vpop.f32.mrf.mxu0  ;;  %v2032_v57 = vpop.f32.mrf.mxu1  ;;  %v912_v53 = vsel %vm716_vm2, %v907_v61, %v911_v5 }
 0x189   : > { %v3250_v38 = vpop.f32.mrf.mxu3  ;;  %v2033_v30 = vadd.f32 %v2032_v57, %v11601_v14  ;;  %v2368_v14 = vsel %vm2325_vm4, %v2365_v17, %v2367_v4 }
 0x18a   : > { %v11754_v52 = vadd.f32 %v3250_v38, %v3041_v23 }
 0x18c   : > { %17733 = vst [vmem:[#allocation107_spill] sm:$0xff] %v11754_v52 }
 0x18f   : > { %v2730_v10 = vpop.f32.mrf.mxu2 }
 0x190   : > { %v3042_v40 = vadd.f32 %v2730_v10, %v2033_v30  ;;  %v11759_v27 = vpop.f32.mrf.mxu0  ;;  %v2035_v9 = vpop.f32.mrf.mxu1  ;;  %v11781_v30 = vshll.u32 %v11771_v7, 16 }
 0x191   : > { %v3252_v8 = vpop.f32.mrf.mxu3  ;;  %v2036_v23 = vadd.f32 %v2035_v9, %v11614_v29 }
 0x192   : > { %v11763_v6 = vadd.f32 %v3252_v8, %v3042_v40  ;;  %v11778_v8 = vshrl.u32 %v11742_v39, 16  ;;  %17736 = vst [vmem:[#allocation110_spill] sm:$0xff] %v11781_v30  ;;  %v919_v29 = vrot.slane %v11781_v30, 1  ;;  %v2371_v30 = vrot.slane %v11713_v25, 1 }
 0x193   : > { %9824 = vmatmul.msk.bf16.gmra.mxu0 %vm1276_vm3, %v912_v53  ;;  %9887 = vmatmul.msk.bf16.gmra.mxu1 %vm1276_vm3, %v11568_v31 }
 0x194   : > { %17734 = vst [vmem:[#allocation108_spill] sm:$0xff] %v11763_v6  ;;  %9955 = vmatmul.msk.bf16.gmra.mxu2 %vm1276_vm3, %v2364_v63  ;;  %v915_v17 = vor.u32 %v11778_v8, %v911_v5  ;;  %v11800_v5 = vld [vmem:[%s10997_s11 + $0xd0] sm:$0xff] }
 0x195   : > { %17735 = vst [vmem:[#allocation109_spill] sm:$0xff] %v11778_v8 }
 0x196   : > { %10027 = vmatmul.msk.bf16.gmra.mxu3 %vm1276_vm3, %v2368_v14 }
 0x197   : > { %v2733_v57 = vpop.f32.mrf.mxu2 }
 0x198   : > { %v3043_v38 = vadd.f32 %v2733_v57, %v2036_v23  ;;  %v11775_v61 = vpop.f32.mrf.mxu0  ;;  %v2037_v31 = vpop.f32.mrf.mxu1  ;;  %v920_v57 = vsel %vm716_vm2, %v915_v17, %v919_v29 }
 0x199   : > { %v3255_v63 = vpop.f32.mrf.mxu3  ;;  %v2038_v9 = vadd.f32 %v2037_v31, %v11630_v49  ;;  %v2370_v49 = vsel %vm2325_vm4, %v2367_v4, %v2369_v54 }
 0x19a   : > { %v11783_v10 = vadd.f32 %v3255_v63, %v3043_v38 }
 0x19c   : > { %17737 = vst [vmem:[#allocation111_spill] sm:$0xff] %v11783_v10 }
 0x19f   : > { %v2735_v40 = vpop.f32.mrf.mxu2 }
 0x1a0   : > { %v3044_v53 = vadd.f32 %v2735_v40, %v2038_v9  ;;  %v11788_v23 = vpop.f32.mrf.mxu0  ;;  %v2040_v50 = vpop.f32.mrf.mxu1  ;;  %v11810_v9 = vshll.u32 %v11800_v5, 16 }
 0x1a1   : > { %v3257_v6 = vpop.f32.mrf.mxu3  ;;  %v2041_v38 = vadd.f32 %v2040_v50, %v11643_v43 }
 0x1a2   : > { %v11792_v52 = vadd.f32 %v3257_v6, %v3044_v53  ;;  %v11807_v6 = vshrl.u32 %v11771_v7, 16  ;;  %17740 = vst [vmem:[#allocation114_spill] sm:$0xff] %v11810_v9  ;;  %v927_v43 = vrot.slane %v11810_v9, 1  ;;  %v2373_v9 = vrot.slane %v11742_v39, 1 }
 0x1a3   : > { %9825 = vmatmul.msk.bf16.gmra.mxu0 %vm1276_vm3, %v920_v57  ;;  %9888 = vmatmul.msk.bf16.gmra.mxu1 %vm1276_vm3, %v11597_v21 }
 0x1a4   : > { %17738 = vst [vmem:[#allocation112_spill] sm:$0xff] %v11792_v52  ;;  %9956 = vmatmul.msk.bf16.gmra.mxu2 %vm1276_vm3, %v2366_v35  ;;  %v923_v4 = vor.u32 %v11807_v6, %v919_v29  ;;  %v11829_v29 = vld [vmem:[%s10997_s11 + $0xd8] sm:$0xff] }
 0x1a5   : > { %17739 = vst [vmem:[#allocation113_spill] sm:$0xff] %v11807_v6 }
 0x1a6   : > { %10028 = vmatmul.msk.bf16.gmra.mxu3 %vm1276_vm3, %v2370_v49 }
 0x1a7   : > { %v2738_v31 = vpop.f32.mrf.mxu2 }
 0x1a8   : > { %v3045_v63 = vadd.f32 %v2738_v31, %v2041_v38  ;;  %v11804_v17 = vpop.f32.mrf.mxu0  ;;  %v2042_v21 = vpop.f32.mrf.mxu1  ;;  %v928_v31 = vsel %vm716_vm2, %v923_v4, %v927_v43 }
 0x1a9   : > { %v3260_v35 = vpop.f32.mrf.mxu3  ;;  %v2043_v50 = vadd.f32 %v2042_v21, %v11659_v34  ;;  %v2372_v34 = vsel %vm2325_vm4, %v2369_v54, %v2371_v30 }
 0x1aa   : > { %v11812_v40 = vadd.f32 %v3260_v35, %v3045_v63 }
 0x1ac   : > { %17741 = vst [vmem:[#allocation115_spill] sm:$0xff] %v11812_v40 }
 0x1af   : > { %v2740_v53 = vpop.f32.mrf.mxu2 }
 0x1b0   : > { %v3046_v57 = vadd.f32 %v2740_v53, %v2043_v50  ;;  %v11817_v38 = vpop.f32.mrf.mxu0  ;;  %v2045_v8 = vpop.f32.mrf.mxu1  ;;  %v11839_v50 = vshll.u32 %v11829_v29, 16 }
 0x1b1   : > { %v3262_v52 = vpop.f32.mrf.mxu3  ;;  %v2046_v63 = vadd.f32 %v2045_v8, %v11672_v48 }
 0x1b2   : > { %v11821_v10 = vadd.f32 %v3262_v52, %v3046_v57  ;;  %v11836_v52 = vshrl.u32 %v11800_v5, 16  ;;  %17744 = vst [vmem:[#allocation118_spill] sm:$0xff] %v11839_v50  ;;  %v935_v48 = vrot.slane %v11839_v50, 1  ;;  %v2375_v50 = vrot.slane %v11771_v7, 1 }
 0x1b3   : > { %9826 = vmatmul.msk.bf16.gmra.mxu0 %vm1276_vm3, %v928_v31  ;;  %9889 = vmatmul.msk.bf16.gmra.mxu1 %vm1276_vm3, %v11626_v19 }
 0x1b4   : > { %17742 = vst [vmem:[#allocation116_spill] sm:$0xff] %v11821_v10  ;;  %9957 = vmatmul.msk.bf16.gmra.mxu2 %vm1276_vm3, %v2368_v14  ;;  %v931_v54 = vor.u32 %v11836_v52, %v927_v43  ;;  %v11858_v43 = vld [vmem:[%s10997_s11 + $0xe0] sm:$0xff] }
 0x1b5   : > { %17743 = vst [vmem:[#allocation117_spill] sm:$0xff] %v11836_v52 }
 0x1b6   : > { %10029 = vmatmul.msk.bf16.gmra.mxu3 %vm1276_vm3, %v2372_v34 }
 0x1b7   : > { %v2743_v21 = vpop.f32.mrf.mxu2 }
 0x1b8   : > { %v3047_v35 = vadd.f32 %v2743_v21, %v2046_v63  ;;  %v11833_v4 = vpop.f32.mrf.mxu0  ;;  %v2047_v19 = vpop.f32.mrf.mxu1  ;;  %v936_v21 = vsel %vm716_vm2, %v931_v54, %v935_v48 }
 0x1b9   : > { %v3265_v14 = vpop.f32.mrf.mxu3  ;;  %v2048_v8 = vadd.f32 %v2047_v19, %v11688_v1  ;;  %v2374_v1 = vsel %vm2325_vm4, %v2371_v30, %v2373_v9 }
 0x1ba   : > { %v11841_v53 = vadd.f32 %v3265_v14, %v3047_v35 }
 0x1bc   : > { %17745 = vst [vmem:[#allocation119_spill] sm:$0xff] %v11841_v53 }
 0x1bf   : > { %v2745_v57 = vpop.f32.mrf.mxu2 }
 0x1c0   : > { %v3048_v31 = vadd.f32 %v2745_v57, %v2048_v8  ;;  %v11846_v63 = vpop.f32.mrf.mxu0  ;;  %v2050_v6 = vpop.f32.mrf.mxu1  ;;  %v11868_v8 = vshll.u32 %v11858_v43, 16 }
 0x1c1   : > { %v3267_v10 = vpop.f32.mrf.mxu3  ;;  %v2051_v35 = vadd.f32 %v2050_v6, %v11701_v46 }
 0x1c2   : > { %v11850_v40 = vadd.f32 %v3267_v10, %v3048_v31  ;;  %v11865_v10 = vshrl.u32 %v11829_v29, 16  ;;  %17748 = vst [vmem:[#allocation122_spill] sm:$0xff] %v11868_v8  ;;  %v943_v46 = vrot.slane %v11868_v8, 1  ;;  %v2377_v8 = vrot.slane %v11800_v5, 1 }
 0x1c3   : > { %9827 = vmatmul.msk.bf16.gmra.mxu0 %vm1276_vm3, %v936_v21  ;;  %9890 = vmatmul.msk.bf16.gmra.mxu1 %vm1276_vm3, %v11655_v60 }
 0x1c4   : > { %17746 = vst [vmem:[#allocation120_spill] sm:$0xff] %v11850_v40  ;;  %9958 = vmatmul.msk.bf16.gmra.mxu2 %vm1276_vm3, %v2370_v49  ;;  %v939_v30 = vor.u32 %v11865_v10, %v935_v48  ;;  %v11887_v48 = vld [vmem:[%s10997_s11 + $0xe8] sm:$0xff] }
 0x1c5   : > { %17747 = vst [vmem:[#allocation121_spill] sm:$0xff] %v11865_v10 }
 0x1c6   : > { %10030 = vmatmul.msk.bf16.gmra.mxu3 %vm1276_vm3, %v2374_v1 }
 0x1c7   : > { %v2748_v19 = vpop.f32.mrf.mxu2 }
 0x1c8   : > { %v3049_v14 = vadd.f32 %v2748_v19, %v2051_v35  ;;  %v11862_v54 = vpop.f32.mrf.mxu0  ;;  %v2052_v60 = vpop.f32.mrf.mxu1  ;;  %v944_v19 = vsel %vm716_vm2, %v939_v30, %v943_v46 }
 0x1c9   : > { %v3270_v49 = vpop.f32.mrf.mxu3  ;;  %v2053_v6 = vadd.f32 %v2052_v60, %v11717_v16  ;;  %v2376_v16 = vsel %vm2325_vm4, %v2373_v9, %v2375_v50 }
 0x1ca   : > { %v11870_v57 = vadd.f32 %v3270_v49, %v3049_v14 }
 0x1cc   : > { %17749 = vst [vmem:[#allocation123_spill] sm:$0xff] %v11870_v57 }
 0x1cf   : > { %v2750_v31 = vpop.f32.mrf.mxu2 }
 0x1d0   : > { %v3050_v21 = vadd.f32 %v2750_v31, %v2053_v6  ;;  %v11875_v35 = vpop.f32.mrf.mxu0  ;;  %v2055_v52 = vpop.f32.mrf.mxu1  ;;  %v11897_v6 = vshll.u32 %v11887_v48, 16 }
 0x1d1   : > { %v3272_v40 = vpop.f32.mrf.mxu3  ;;  %v2056_v14 = vadd.f32 %v2055_v52, %v11730_v62 }
 0x1d2   : > { %v11879_v53 = vadd.f32 %v3272_v40, %v3050_v21  ;;  %v11894_v40 = vshrl.u32 %v11858_v43, 16  ;;  %17752 = vst [vmem:[#allocation126_spill] sm:$0xff] %v11897_v6  ;;  %v951_v62 = vrot.slane %v11897_v6, 1  ;;  %v2379_v6 = vrot.slane %v11829_v29, 1 }
 0x1d3   : > { %9828 = vmatmul.msk.bf16.gmra.mxu0 %vm1276_vm3, %v944_v19  ;;  %9891 = vmatmul.msk.bf16.gmra.mxu1 %vm1276_vm3, %v11684_v56 }
 0x1d4   : > { %17750 = vst [vmem:[#allocation124_spill] sm:$0xff] %v11879_v53  ;;  %9959 = vmatmul.msk.bf16.gmra.mxu2 %vm1276_vm3, %v2372_v34  ;;  %v947_v9 = vor.u32 %v11894_v40, %v943_v46  ;;  %v11916_v46 = vld [vmem:[%s10997_s11 + $0xf0] sm:$0xff] }
 0x1d5   : > { %17751 = vst [vmem:[#allocation125_spill] sm:$0xff] %v11894_v40 }
 0x1d6   : > { %10031 = vmatmul.msk.bf16.gmra.mxu3 %vm1276_vm3, %v2376_v16 }
 0x1d7   : > { %v2753_v60 = vpop.f32.mrf.mxu2 }
 0x1d8   : > { %v3051_v49 = vadd.f32 %v2753_v60, %v2056_v14  ;;  %v11891_v30 = vpop.f32.mrf.mxu0  ;;  %v2057_v56 = vpop.f32.mrf.mxu1  ;;  %v952_v60 = vsel %vm716_vm2, %v947_v9, %v951_v62 }
 0x1d9   : > { %v3275_v34 = vpop.f32.mrf.mxu3  ;;  %v2058_v52 = vadd.f32 %v2057_v56, %v11746_v24  ;;  %v2378_v24 = vsel %vm2325_vm4, %v2375_v50, %v2377_v8 }
 0x1da   : > { %v11899_v31 = vadd.f32 %v3275_v34, %v3051_v49 }
 0x1dc   : > { %17753 = vst [vmem:[#allocation127_spill] sm:$0xff] %v11899_v31 }
 0x1df   : > { %v2755_v21 = vpop.f32.mrf.mxu2 }
 0x1e0   : > { %v3052_v19 = vadd.f32 %v2755_v21, %v2058_v52  ;;  %v11904_v14 = vpop.f32.mrf.mxu0  ;;  %v2060_v10 = vpop.f32.mrf.mxu1  ;;  %v11926_v52 = vshll.u32 %v11916_v46, 16 }
 0x1e1   : > { %v3277_v53 = vpop.f32.mrf.mxu3  ;;  %v2061_v49 = vadd.f32 %v2060_v10, %v11759_v27 }
 0x1e2   : > { %v11908_v57 = vadd.f32 %v3277_v53, %v3052_v19  ;;  %v11923_v53 = vshrl.u32 %v11887_v48, 16  ;;  %17756 = vst [vmem:[#allocation130_spill] sm:$0xff] %v11926_v52  ;;  %v959_v27 = vrot.slane %v11926_v52, 1  ;;  %v2381_v52 = vrot.slane %v11858_v43, 1 }
 0x1e3   : > { %9829 = vmatmul.msk.bf16.gmra.mxu0 %vm1276_vm3, %v952_v60  ;;  %9892 = vmatmul.msk.bf16.gmra.mxu1 %vm1276_vm3, %v11713_v25 }
 0x1e4   : > { %17754 = vst [vmem:[#allocation128_spill] sm:$0xff] %v11908_v57  ;;  %9960 = vmatmul.msk.bf16.gmra.mxu2 %vm1276_vm3, %v2374_v1  ;;  %v955_v50 = vor.u32 %v11923_v53, %v951_v62  ;;  %v11945_v62 = vld [vmem:[%s10997_s11 + $0xf8] sm:$0xff] }
 0x1e5   : > { %17755 = vst [vmem:[#allocation129_spill] sm:$0xff] %v11923_v53 }
 0x1e6   : > { %10032 = vmatmul.msk.bf16.gmra.mxu3 %vm1276_vm3, %v2378_v24 }
 0x1e7   : > { %v2758_v56 = vpop.f32.mrf.mxu2 }
 0x1e8   : > { %v3053_v34 = vadd.f32 %v2758_v56, %v2061_v49  ;;  %v11920_v9 = vpop.f32.mrf.mxu0  ;;  %v2062_v25 = vpop.f32.mrf.mxu1  ;;  %v960_v56 = vsel %vm716_vm2, %v955_v50, %v959_v27 }
 0x1e9   : > { %v3280_v1 = vpop.f32.mrf.mxu3  ;;  %v2063_v10 = vadd.f32 %v2062_v25, %v11775_v61  ;;  %v2380_v61 = vsel %vm2325_vm4, %v2377_v8, %v2379_v6 }
 0x1ea   : > { %v11928_v21 = vadd.f32 %v3280_v1, %v3053_v34 }
 0x1ec   : > { %17757 = vst [vmem:[#allocation131_spill] sm:$0xff] %v11928_v21 }
 0x1ef   : > { %v2760_v19 = vpop.f32.mrf.mxu2 }
 0x1f0   : > { %v3054_v60 = vadd.f32 %v2760_v19, %v2063_v10  ;;  %v11933_v49 = vpop.f32.mrf.mxu0  ;;  %v2065_v40 = vpop.f32.mrf.mxu1  ;;  %v11955_v10 = vshll.u32 %v11945_v62, 16 }
 0x1f1   : > { %v3282_v57 = vpop.f32.mrf.mxu3  ;;  %v2066_v34 = vadd.f32 %v2065_v40, %v11788_v23 }
 0x1f2   : > { %v11937_v31 = vadd.f32 %v3282_v57, %v3054_v60  ;;  %v11952_v57 = vshrl.u32 %v11916_v46, 16  ;;  %17760 = vst [vmem:[#allocation134_spill] sm:$0xff] %v11955_v10  ;;  %v967_v23 = vrot.slane %v11955_v10, 1  ;;  %v2383_v10 = vrot.slane %v11887_v48, 1 }
 0x1f3   : > { %9830 = vmatmul.msk.bf16.gmra.mxu0 %vm1276_vm3, %v960_v56  ;;  %9893 = vmatmul.msk.bf16.gmra.mxu1 %vm1276_vm3, %v11742_v39 }
 0x1f4   : > { %17758 = vst [vmem:[#allocation132_spill] sm:$0xff] %v11937_v31  ;;  %9961 = vmatmul.msk.bf16.gmra.mxu2 %vm1276_vm3, %v2376_v16  ;;  %v963_v8 = vor.u32 %v11952_v57, %v959_v27  ;;  %v11974_v27 = vld [vmem:[%s10997_s11 + $0x100] sm:$0xff] }
 0x1f5   : > { %17759 = vst [vmem:[#allocation133_spill] sm:$0xff] %v11952_v57 }
 0x1f6   : > { %10033 = vmatmul.msk.bf16.gmra.mxu3 %vm1276_vm3, %v2380_v61 }
 0x1f7   : > { %v2763_v25 = vpop.f32.mrf.mxu2 }
 0x1f8   : > { %v3055_v1 = vadd.f32 %v2763_v25, %v2066_v34  ;;  %v11949_v50 = vpop.f32.mrf.mxu0  ;;  %v2067_v39 = vpop.f32.mrf.mxu1  ;;  %v968_v25 = vsel %vm716_vm2, %v963_v8, %v967_v23 }
 0x1f9   : > { %v3285_v16 = vpop.f32.mrf.mxu3  ;;  %v2068_v40 = vadd.f32 %v2067_v39, %v11804_v17  ;;  %v2382_v17 = vsel %vm2325_vm4, %v2379_v6, %v2381_v52 }
 0x1fa   : > { %v11957_v19 = vadd.f32 %v3285_v16, %v3055_v1 }
 0x1fc   : > { %17761 = vst [vmem:[#allocation135_spill] sm:$0xff] %v11957_v19 }
 0x1ff   : > { %v2765_v60 = vpop.f32.mrf.mxu2 }
 0x200   : > { %v3056_v56 = vadd.f32 %v2765_v60, %v2068_v40  ;;  %v11962_v34 = vpop.f32.mrf.mxu0  ;;  %v2070_v53 = vpop.f32.mrf.mxu1  ;;  %v11984_v40 = vshll.u32 %v11974_v27, 16 }
 0x201   : > { %v3287_v31 = vpop.f32.mrf.mxu3  ;;  %v2071_v1 = vadd.f32 %v2070_v53, %v11817_v38 }
 0x202   : > { %v11966_v21 = vadd.f32 %v3287_v31, %v3056_v56  ;;  %v11981_v31 = vshrl.u32 %v11945_v62, 16  ;;  %17764 = vst [vmem:[#allocation138_spill] sm:$0xff] %v11984_v40  ;;  %v975_v38 = vrot.slane %v11984_v40, 1  ;;  %v2385_v40 = vrot.slane %v11916_v46, 1 }
 0x203   : > { %9831 = vmatmul.msk.bf16.gmra.mxu0 %vm1276_vm3, %v968_v25  ;;  %9894 = vmatmul.msk.bf16.gmra.mxu1 %vm1276_vm3, %v11771_v7 }
 0x204   : > { %17762 = vst [vmem:[#allocation136_spill] sm:$0xff] %v11966_v21  ;;  %9962 = vmatmul.msk.bf16.gmra.mxu2 %vm1276_vm3, %v2378_v24  ;;  %v971_v6 = vor.u32 %v11981_v31, %v967_v23  ;;  %v12003_v23 = vld [vmem:[%s10997_s11 + $0x108] sm:$0xff] }
 0x205   : > { %17763 = vst [vmem:[#allocation137_spill] sm:$0xff] %v11981_v31 }
 0x206   : > { %10034 = vmatmul.msk.bf16.gmra.mxu3 %vm1276_vm3, %v2382_v17 }
 0x207   : > { %v2768_v39 = vpop.f32.mrf.mxu2 }
 0x208   : > { %v3057_v16 = vadd.f32 %v2768_v39, %v2071_v1  ;;  %v11978_v8 = vpop.f32.mrf.mxu0  ;;  %v2072_v7 = vpop.f32.mrf.mxu1  ;;  %v976_v39 = vsel %vm716_vm2, %v971_v6, %v975_v38 }
 0x209   : > { %v3290_v24 = vpop.f32.mrf.mxu3  ;;  %v2073_v53 = vadd.f32 %v2072_v7, %v11833_v4  ;;  %v2384_v4 = vsel %vm2325_vm4, %v2381_v52, %v2383_v10 }
 0x20a   : > { %v11986_v60 = vadd.f32 %v3290_v24, %v3057_v16 }
 0x20c   : > { %17765 = vst [vmem:[#allocation139_spill] sm:$0xff] %v11986_v60 }
 0x20f   : > { %v2770_v56 = vpop.f32.mrf.mxu2 }
 0x210   : > { %v3058_v25 = vadd.f32 %v2770_v56, %v2073_v53  ;;  %v11991_v1 = vpop.f32.mrf.mxu0  ;;  %v2075_v57 = vpop.f32.mrf.mxu1  ;;  %v12013_v53 = vshll.u32 %v12003_v23, 16 }
 0x211   : > { %v3292_v21 = vpop.f32.mrf.mxu3  ;;  %v2076_v16 = vadd.f32 %v2075_v57, %v11846_v63 }
 0x212   : > { %v11995_v19 = vadd.f32 %v3292_v21, %v3058_v25  ;;  %v12010_v21 = vshrl.u32 %v11974_v27, 16  ;;  %17768 = vst [vmem:[#allocation142_spill] sm:$0xff] %v12013_v53  ;;  %v983_v63 = vrot.slane %v12013_v53, 1  ;;  %v2387_v53 = vrot.slane %v11945_v62, 1 }
 0x213   : > { %9832 = vmatmul.msk.bf16.gmra.mxu0 %vm1276_vm3, %v976_v39  ;;  %9895 = vmatmul.msk.bf16.gmra.mxu1 %vm1276_vm3, %v11800_v5 }
 0x214   : > { %17766 = vst [vmem:[#allocation140_spill] sm:$0xff] %v11995_v19  ;;  %9963 = vmatmul.msk.bf16.gmra.mxu2 %vm1276_vm3, %v2380_v61  ;;  %v979_v52 = vor.u32 %v12010_v21, %v975_v38  ;;  %v12032_v38 = vld [vmem:[%s10997_s11 + $0x110] sm:$0xff] }
 0x215   : > { %17767 = vst [vmem:[#allocation141_spill] sm:$0xff] %v12010_v21 }
 0x216   : > { %10035 = vmatmul.msk.bf16.gmra.mxu3 %vm1276_vm3, %v2384_v4 }
 0x217   : > { %v2773_v7 = vpop.f32.mrf.mxu2 }
 0x218   : > { %v3059_v24 = vadd.f32 %v2773_v7, %v2076_v16  ;;  %v12007_v6 = vpop.f32.mrf.mxu0  ;;  %v2077_v5 = vpop.f32.mrf.mxu1  ;;  %v984_v7 = vsel %vm716_vm2, %v979_v52, %v983_v63 }
 0x219   : > { %v3295_v61 = vpop.f32.mrf.mxu3  ;;  %v2078_v57 = vadd.f32 %v2077_v5, %v11862_v54  ;;  %v2386_v54 = vsel %vm2325_vm4, %v2383_v10, %v2385_v40 }
 0x21a   : > { %v12015_v56 = vadd.f32 %v3295_v61, %v3059_v24 }
 0x21c   : > { %17769 = vst [vmem:[#allocation143_spill] sm:$0xff] %v12015_v56 }
 0x21f   : > { %v2775_v25 = vpop.f32.mrf.mxu2 }
 0x220   : > { %v3060_v39 = vadd.f32 %v2775_v25, %v2078_v57  ;;  %v12020_v16 = vpop.f32.mrf.mxu0  ;;  %v2080_v31 = vpop.f32.mrf.mxu1  ;;  %v12042_v57 = vshll.u32 %v12032_v38, 16 }
 0x221   : > { %v3297_v19 = vpop.f32.mrf.mxu3  ;;  %v2081_v24 = vadd.f32 %v2080_v31, %v11875_v35 }
 0x222   : > { %v12024_v60 = vadd.f32 %v3297_v19, %v3060_v39  ;;  %v12039_v19 = vshrl.u32 %v12003_v23, 16  ;;  %17772 = vst [vmem:[#allocation146_spill] sm:$0xff] %v12042_v57  ;;  %v991_v35 = vrot.slane %v12042_v57, 1  ;;  %v2389_v57 = vrot.slane %v11974_v27, 1 }
 0x223   : > { %9833 = vmatmul.msk.bf16.gmra.mxu0 %vm1276_vm3, %v984_v7  ;;  %9896 = vmatmul.msk.bf16.gmra.mxu1 %vm1276_vm3, %v11829_v29 }
 0x224   : > { %17770 = vst [vmem:[#allocation144_spill] sm:$0xff] %v12024_v60  ;;  %9964 = vmatmul.msk.bf16.gmra.mxu2 %vm1276_vm3, %v2382_v17  ;;  %v987_v10 = vor.u32 %v12039_v19, %v983_v63  ;;  %v12061_v63 = vld [vmem:[%s10997_s11 + $0x118] sm:$0xff] }
 0x225   : > { %17771 = vst [vmem:[#allocation145_spill] sm:$0xff] %v12039_v19 }
 0x226   : > { %10036 = vmatmul.msk.bf16.gmra.mxu3 %vm1276_vm3, %v2386_v54 }
 0x227   : > { %v2778_v5 = vpop.f32.mrf.mxu2 }
 0x228   : > { %v3061_v61 = vadd.f32 %v2778_v5, %v2081_v24  ;;  %v12036_v52 = vpop.f32.mrf.mxu0  ;;  %v2082_v29 = vpop.f32.mrf.mxu1  ;;  %v992_v5 = vsel %vm716_vm2, %v987_v10, %v991_v35 }
 0x229   : > { %v3300_v17 = vpop.f32.mrf.mxu3  ;;  %v2083_v31 = vadd.f32 %v2082_v29, %v11891_v30  ;;  %v2388_v30 = vsel %vm2325_vm4, %v2385_v40, %v2387_v53 }
 0x22a   : > { %v12044_v25 = vadd.f32 %v3300_v17, %v3061_v61 }
 0x22c   : > { %17773 = vst [vmem:[#allocation147_spill] sm:$0xff] %v12044_v25 }
 0x22f   : > { %v2780_v39 = vpop.f32.mrf.mxu2 }
 0x230   : > { %v3062_v7 = vadd.f32 %v2780_v39, %v2083_v31  ;;  %v12049_v24 = vpop.f32.mrf.mxu0  ;;  %v2085_v21 = vpop.f32.mrf.mxu1  ;;  %v12071_v31 = vshll.u32 %v12061_v63, 16 }
 0x231   : > { %v3302_v60 = vpop.f32.mrf.mxu3  ;;  %v2086_v61 = vadd.f32 %v2085_v21, %v11904_v14 }
 0x232   : > { %v12053_v56 = vadd.f32 %v3302_v60, %v3062_v7  ;;  %v12068_v60 = vshrl.u32 %v12032_v38, 16  ;;  %17776 = vst [vmem:[#allocation150_spill] sm:$0xff] %v12071_v31  ;;  %v999_v14 = vrot.slane %v12071_v31, 1  ;;  %v2391_v31 = vrot.slane %v12003_v23, 1 }
 0x233   : > { %9834 = vmatmul.msk.bf16.gmra.mxu0 %vm1276_vm3, %v992_v5  ;;  %9897 = vmatmul.msk.bf16.gmra.mxu1 %vm1276_vm3, %v11858_v43 }
 0x234   : > { %17774 = vst [vmem:[#allocation148_spill] sm:$0xff] %v12053_v56  ;;  %9965 = vmatmul.msk.bf16.gmra.mxu2 %vm1276_vm3, %v2384_v4  ;;  %v995_v40 = vor.u32 %v12068_v60, %v991_v35  ;;  %v12090_v35 = vld [vmem:[%s10997_s11 + $0x120] sm:$0xff] }
 0x235   : > { %17775 = vst [vmem:[#allocation149_spill] sm:$0xff] %v12068_v60 }
 0x236   : > { %10037 = vmatmul.msk.bf16.gmra.mxu3 %vm1276_vm3, %v2388_v30 }
 0x237   : > { %v2783_v29 = vpop.f32.mrf.mxu2 }
 0x238   : > { %v3063_v17 = vadd.f32 %v2783_v29, %v2086_v61  ;;  %v12065_v10 = vpop.f32.mrf.mxu0  ;;  %v2087_v43 = vpop.f32.mrf.mxu1  ;;  %v1000_v29 = vsel %vm716_vm2, %v995_v40, %v999_v14 }
 0x239   : > { %v3305_v4 = vpop.f32.mrf.mxu3  ;;  %v2088_v21 = vadd.f32 %v2087_v43, %v11920_v9  ;;  %v2390_v9 = vsel %vm2325_vm4, %v2387_v53, %v2389_v57 }
 0x23a   : > { %v12073_v39 = vadd.f32 %v3305_v4, %v3063_v17 }
 0x23c   : > { %17777 = vst [vmem:[#allocation151_spill] sm:$0xff] %v12073_v39 }
 0x23f   : > { %v2785_v7 = vpop.f32.mrf.mxu2 }
 0x240   : > { %v3064_v5 = vadd.f32 %v2785_v7, %v2088_v21  ;;  %v12078_v61 = vpop.f32.mrf.mxu0  ;;  %v2090_v19 = vpop.f32.mrf.mxu1  ;;  %v12100_v21 = vshll.u32 %v12090_v35, 16 }
 0x241   : > { %v3307_v56 = vpop.f32.mrf.mxu3  ;;  %v2091_v17 = vadd.f32 %v2090_v19, %v11933_v49 }
 0x242   : > { %v12082_v25 = vadd.f32 %v3307_v56, %v3064_v5  ;;  %v12097_v56 = vshrl.u32 %v12061_v63, 16  ;;  %17780 = vst [vmem:[#allocation154_spill] sm:$0xff] %v12100_v21  ;;  %v1007_v49 = vrot.slane %v12100_v21, 1  ;;  %v2393_v21 = vrot.slane %v12032_v38, 1 }
 0x243   : > { %9835 = vmatmul.msk.bf16.gmra.mxu0 %vm1276_vm3, %v1000_v29  ;;  %9898 = vmatmul.msk.bf16.gmra.mxu1 %vm1276_vm3, %v11887_v48 }
 0x244   : > { %17778 = vst [vmem:[#allocation152_spill] sm:$0xff] %v12082_v25  ;;  %9966 = vmatmul.msk.bf16.gmra.mxu2 %vm1276_vm3, %v2386_v54  ;;  %v1003_v53 = vor.u32 %v12097_v56, %v999_v14  ;;  %v12119_v14 = vld [vmem:[%s10997_s11 + $0x128] sm:$0xff] }
 0x245   : > { %17779 = vst [vmem:[#allocation153_spill] sm:$0xff] %v12097_v56 }
 0x246   : > { %10038 = vmatmul.msk.bf16.gmra.mxu3 %vm1276_vm3, %v2390_v9 }
 0x247   : > { %v2788_v43 = vpop.f32.mrf.mxu2 }
 0x248   : > { %v3065_v4 = vadd.f32 %v2788_v43, %v2091_v17  ;;  %v12094_v40 = vpop.f32.mrf.mxu0  ;;  %v2092_v48 = vpop.f32.mrf.mxu1  ;;  %v1008_v43 = vsel %vm716_vm2, %v1003_v53, %v1007_v49 }
 0x249   : > { %v3310_v54 = vpop.f32.mrf.mxu3  ;;  %v2093_v19 = vadd.f32 %v2092_v48, %v11949_v50  ;;  %v2392_v50 = vsel %vm2325_vm4, %v2389_v57, %v2391_v31 }
 0x24a   : > { %v12102_v7 = vadd.f32 %v3310_v54, %v3065_v4 }
 0x24c   : > { %17781 = vst [vmem:[#allocation155_spill] sm:$0xff] %v12102_v7 }
 0x24f   : > { %v2790_v5 = vpop.f32.mrf.mxu2 }
 0x250   : > { %v3066_v29 = vadd.f32 %v2790_v5, %v2093_v19  ;;  %v12107_v17 = vpop.f32.mrf.mxu0  ;;  %v2095_v60 = vpop.f32.mrf.mxu1  ;;  %v12129_v19 = vshll.u32 %v12119_v14, 16 }
 0x251   : > { %v3312_v25 = vpop.f32.mrf.mxu3  ;;  %v2096_v4 = vadd.f32 %v2095_v60, %v11962_v34 }
 0x252   : > { %v12111_v39 = vadd.f32 %v3312_v25, %v3066_v29  ;;  %v12126_v25 = vshrl.u32 %v12090_v35, 16  ;;  %17784 = vst [vmem:[#allocation158_spill] sm:$0xff] %v12129_v19  ;;  %v1015_v34 = vrot.slane %v12129_v19, 1  ;;  %v2395_v19 = vrot.slane %v12061_v63, 1 }
 0x253   : > { %9836 = vmatmul.msk.bf16.gmra.mxu0 %vm1276_vm3, %v1008_v43  ;;  %9899 = vmatmul.msk.bf16.gmra.mxu1 %vm1276_vm3, %v11916_v46 }
 0x254   : > { %17782 = vst [vmem:[#allocation156_spill] sm:$0xff] %v12111_v39  ;;  %9967 = vmatmul.msk.bf16.gmra.mxu2 %vm1276_vm3, %v2388_v30  ;;  %v1011_v57 = vor.u32 %v12126_v25, %v1007_v49  ;;  %v12148_v49 = vld [vmem:[%s10997_s11 + $0x130] sm:$0xff] }
 0x255   : > { %17783 = vst [vmem:[#allocation157_spill] sm:$0xff] %v12126_v25 }
 0x256   : > { %10039 = vmatmul.msk.bf16.gmra.mxu3 %vm1276_vm3, %v2392_v50 }
 0x257   : > { %v2793_v48 = vpop.f32.mrf.mxu2 }
 0x258   : > { %v3067_v54 = vadd.f32 %v2793_v48, %v2096_v4  ;;  %v12123_v53 = vpop.f32.mrf.mxu0  ;;  %v2097_v46 = vpop.f32.mrf.mxu1  ;;  %v1016_v48 = vsel %vm716_vm2, %v1011_v57, %v1015_v34 }
 0x259   : > { %v3315_v30 = vpop.f32.mrf.mxu3  ;;  %v2098_v60 = vadd.f32 %v2097_v46, %v11978_v8  ;;  %v2394_v8 = vsel %vm2325_vm4, %v2391_v31, %v2393_v21 }
 0x25a   : > { %v12131_v5 = vadd.f32 %v3315_v30, %v3067_v54 }
 0x25c   : > { %17785 = vst [vmem:[#allocation159_spill] sm:$0xff] %v12131_v5 }
 0x25f   : > { %v2795_v29 = vpop.f32.mrf.mxu2 }
 0x260   : > { %v3068_v43 = vadd.f32 %v2795_v29, %v2098_v60  ;;  %v12136_v4 = vpop.f32.mrf.mxu0  ;;  %v2100_v56 = vpop.f32.mrf.mxu1  ;;  %v12158_v60 = vshll.u32 %v12148_v49, 16 }
 0x261   : > { %v3317_v39 = vpop.f32.mrf.mxu3  ;;  %v2101_v54 = vadd.f32 %v2100_v56, %v11991_v1 }
 0x262   : > { %v12140_v7 = vadd.f32 %v3317_v39, %v3068_v43  ;;  %v12155_v39 = vshrl.u32 %v12119_v14, 16  ;;  %17788 = vst [vmem:[#allocation162_spill] sm:$0xff] %v12158_v60  ;;  %v1023_v1 = vrot.slane %v12158_v60, 1  ;;  %v2397_v60 = vrot.slane %v12090_v35, 1 }
 0x263   : > { %9837 = vmatmul.msk.bf16.gmra.mxu0 %vm1276_vm3, %v1016_v48  ;;  %9900 = vmatmul.msk.bf16.gmra.mxu1 %vm1276_vm3, %v11945_v62 }
 0x264   : > { %17786 = vst [vmem:[#allocation160_spill] sm:$0xff] %v12140_v7  ;;  %9968 = vmatmul.msk.bf16.gmra.mxu2 %vm1276_vm3, %v2390_v9  ;;  %v1019_v31 = vor.u32 %v12155_v39, %v1015_v34  ;;  %v12177_v34 = vld [vmem:[%s10997_s11 + $0x138] sm:$0xff] }
 0x265   : > { %17787 = vst [vmem:[#allocation161_spill] sm:$0xff] %v12155_v39 }
 0x266   : > { %10040 = vmatmul.msk.bf16.gmra.mxu3 %vm1276_vm3, %v2394_v8 }
 0x267   : > { %v2798_v46 = vpop.f32.mrf.mxu2 }
 0x268   : > { %v3069_v30 = vadd.f32 %v2798_v46, %v2101_v54  ;;  %v12152_v57 = vpop.f32.mrf.mxu0  ;;  %v2102_v62 = vpop.f32.mrf.mxu1  ;;  %v1024_v46 = vsel %vm716_vm2, %v1019_v31, %v1023_v1 }
 0x269   : > { %v3320_v9 = vpop.f32.mrf.mxu3  ;;  %v2103_v56 = vadd.f32 %v2102_v62, %v12007_v6  ;;  %v2396_v6 = vsel %vm2325_vm4, %v2393_v21, %v2395_v19 }
 0x26a   : > { %v12160_v29 = vadd.f32 %v3320_v9, %v3069_v30 }
 0x26c   : > { %17789 = vst [vmem:[#allocation163_spill] sm:$0xff] %v12160_v29 }
 0x26f   : > { %v2800_v43 = vpop.f32.mrf.mxu2 }
 0x270   : > { %v3070_v48 = vadd.f32 %v2800_v43, %v2103_v56  ;;  %v12165_v54 = vpop.f32.mrf.mxu0  ;;  %v2105_v25 = vpop.f32.mrf.mxu1  ;;  %v12187_v56 = vshll.u32 %v12177_v34, 16 }
 0x271   : > { %v3322_v7 = vpop.f32.mrf.mxu3  ;;  %v2106_v30 = vadd.f32 %v2105_v25, %v12020_v16 }
 0x272   : > { %v12169_v5 = vadd.f32 %v3322_v7, %v3070_v48  ;;  %v12184_v7 = vshrl.u32 %v12148_v49, 16  ;;  %17792 = vst [vmem:[#allocation166_spill] sm:$0xff] %v12187_v56  ;;  %v1031_v16 = vrot.slane %v12187_v56, 1  ;;  %v2399_v56 = vrot.slane %v12119_v14, 1 }
 0x273   : > { %9838 = vmatmul.msk.bf16.gmra.mxu0 %vm1276_vm3, %v1024_v46  ;;  %9901 = vmatmul.msk.bf16.gmra.mxu1 %vm1276_vm3, %v11974_v27 }
 0x274   : > { %17790 = vst [vmem:[#allocation164_spill] sm:$0xff] %v12169_v5  ;;  %9969 = vmatmul.msk.bf16.gmra.mxu2 %vm1276_vm3, %v2392_v50  ;;  %v1027_v21 = vor.u32 %v12184_v7, %v1023_v1  ;;  %v12206_v1 = vld [vmem:[%s10997_s11 + $0x140] sm:$0xff] }
 0x275   : > { %17791 = vst [vmem:[#allocation165_spill] sm:$0xff] %v12184_v7 }
 0x276   : > { %10041 = vmatmul.msk.bf16.gmra.mxu3 %vm1276_vm3, %v2396_v6 }
 0x277   : > { %v2803_v62 = vpop.f32.mrf.mxu2 }
 0x278   : > { %v3071_v9 = vadd.f32 %v2803_v62, %v2106_v30  ;;  %v12181_v31 = vpop.f32.mrf.mxu0  ;;  %v2107_v27 = vpop.f32.mrf.mxu1  ;;  %v1032_v62 = vsel %vm716_vm2, %v1027_v21, %v1031_v16 }
 0x279   : > { %v3325_v50 = vpop.f32.mrf.mxu3  ;;  %v2108_v25 = vadd.f32 %v2107_v27, %v12036_v52  ;;  %v2398_v52 = vsel %vm2325_vm4, %v2395_v19, %v2397_v60 }
 0x27a   : > { %v12189_v43 = vadd.f32 %v3325_v50, %v3071_v9 }
 0x27c   : > { %17793 = vst [vmem:[#allocation167_spill] sm:$0xff] %v12189_v43 }
 0x27f   : > { %v2805_v48 = vpop.f32.mrf.mxu2 }
 0x280   : > { %v3072_v46 = vadd.f32 %v2805_v48, %v2108_v25  ;;  %v12194_v30 = vpop.f32.mrf.mxu0  ;;  %v2110_v39 = vpop.f32.mrf.mxu1  ;;  %v12216_v25 = vshll.u32 %v12206_v1, 16 }
 0x281   : > { %v3327_v5 = vpop.f32.mrf.mxu3  ;;  %v2111_v9 = vadd.f32 %v2110_v39, %v12049_v24 }
 0x282   : > { %v12198_v29 = vadd.f32 %v3327_v5, %v3072_v46  ;;  %v12213_v5 = vshrl.u32 %v12177_v34, 16  ;;  %17796 = vst [vmem:[#allocation170_spill] sm:$0xff] %v12216_v25  ;;  %v1039_v24 = vrot.slane %v12216_v25, 1  ;;  %v2401_v25 = vrot.slane %v12148_v49, 1 }
 0x283   : > { %9839 = vmatmul.msk.bf16.gmra.mxu0 %vm1276_vm3, %v1032_v62  ;;  %9902 = vmatmul.msk.bf16.gmra.mxu1 %vm1276_vm3, %v12003_v23 }
 0x284   : > { %17794 = vst [vmem:[#allocation168_spill] sm:$0xff] %v12198_v29  ;;  %9970 = vmatmul.msk.bf16.gmra.mxu2 %vm1276_vm3, %v2394_v8  ;;  %v1035_v19 = vor.u32 %v12213_v5, %v1031_v16  ;;  %v12235_v16 = vld [vmem:[%s10997_s11 + $0x148] sm:$0xff] }
 0x285   : > { %17795 = vst [vmem:[#allocation169_spill] sm:$0xff] %v12213_v5 }
 0x286   : > { %10042 = vmatmul.msk.bf16.gmra.mxu3 %vm1276_vm3, %v2398_v52 }
 0x287   : > { %v2808_v27 = vpop.f32.mrf.mxu2 }
 0x288   : > { %v3073_v50 = vadd.f32 %v2808_v27, %v2111_v9  ;;  %v12210_v21 = vpop.f32.mrf.mxu0  ;;  %v2112_v23 = vpop.f32.mrf.mxu1  ;;  %v1040_v27 = vsel %vm716_vm2, %v1035_v19, %v1039_v24 }
 0x289   : > { %v3330_v8 = vpop.f32.mrf.mxu3  ;;  %v2113_v39 = vadd.f32 %v2112_v23, %v12065_v10  ;;  %v2400_v10 = vsel %vm2325_vm4, %v2397_v60, %v2399_v56 }
 0x28a   : > { %v12218_v48 = vadd.f32 %v3330_v8, %v3073_v50 }
 0x28c   : > { %17797 = vst [vmem:[#allocation171_spill] sm:$0xff] %v12218_v48 }
 0x28f   : > { %v2810_v46 = vpop.f32.mrf.mxu2 }
 0x290   : > { %v3074_v62 = vadd.f32 %v2810_v46, %v2113_v39  ;;  %v12223_v9 = vpop.f32.mrf.mxu0  ;;  %v2115_v7 = vpop.f32.mrf.mxu1  ;;  %v12245_v39 = vshll.u32 %v12235_v16, 16 }
 0x291   : > { %v3332_v29 = vpop.f32.mrf.mxu3  ;;  %v2116_v50 = vadd.f32 %v2115_v7, %v12078_v61 }
 0x292   : > { %v12227_v43 = vadd.f32 %v3332_v29, %v3074_v62  ;;  %v12242_v29 = vshrl.u32 %v12206_v1, 16  ;;  %17800 = vst [vmem:[#allocation174_spill] sm:$0xff] %v12245_v39  ;;  %v1047_v61 = vrot.slane %v12245_v39, 1  ;;  %v2403_v39 = vrot.slane %v12177_v34, 1 }
 0x293   : > { %9840 = vmatmul.msk.bf16.gmra.mxu0 %vm1276_vm3, %v1040_v27  ;;  %9903 = vmatmul.msk.bf16.gmra.mxu1 %vm1276_vm3, %v12032_v38 }
 0x294   : > { %17798 = vst [vmem:[#allocation172_spill] sm:$0xff] %v12227_v43  ;;  %9971 = vmatmul.msk.bf16.gmra.mxu2 %vm1276_vm3, %v2396_v6  ;;  %v1043_v60 = vor.u32 %v12242_v29, %v1039_v24  ;;  %v12264_v24 = vld [vmem:[%s10997_s11 + $0x150] sm:$0xff] }
 0x295   : > { %17799 = vst [vmem:[#allocation173_spill] sm:$0xff] %v12242_v29 }
 0x296   : > { %10043 = vmatmul.msk.bf16.gmra.mxu3 %vm1276_vm3, %v2400_v10 }
 0x297   : > { %v2813_v23 = vpop.f32.mrf.mxu2 }
 0x298   : > { %v3075_v8 = vadd.f32 %v2813_v23, %v2116_v50  ;;  %v12239_v19 = vpop.f32.mrf.mxu0  ;;  %v2117_v38 = vpop.f32.mrf.mxu1  ;;  %v1048_v23 = vsel %vm716_vm2, %v1043_v60, %v1047_v61 }
 0x299   : > { %v3335_v6 = vpop.f32.mrf.mxu3  ;;  %v2118_v7 = vadd.f32 %v2117_v38, %v12094_v40  ;;  %v2402_v40 = vsel %vm2325_vm4, %v2399_v56, %v2401_v25 }
 0x29a   : > { %v12247_v46 = vadd.f32 %v3335_v6, %v3075_v8 }
 0x29c   : > { %17801 = vst [vmem:[#allocation175_spill] sm:$0xff] %v12247_v46 }
 0x29f   : > { %v2815_v62 = vpop.f32.mrf.mxu2 }
 0x2a0   : > { %v3076_v27 = vadd.f32 %v2815_v62, %v2118_v7  ;;  %v12252_v50 = vpop.f32.mrf.mxu0  ;;  %v2120_v5 = vpop.f32.mrf.mxu1  ;;  %v12274_v7 = vshll.u32 %v12264_v24, 16 }
 0x2a1   : > { %v3337_v43 = vpop.f32.mrf.mxu3  ;;  %v2121_v8 = vadd.f32 %v2120_v5, %v12107_v17 }
 0x2a2   : > { %v12256_v48 = vadd.f32 %v3337_v43, %v3076_v27  ;;  %v12271_v43 = vshrl.u32 %v12235_v16, 16  ;;  %17804 = vst [vmem:[#allocation178_spill] sm:$0xff] %v12274_v7  ;;  %v1055_v17 = vrot.slane %v12274_v7, 1  ;;  %v2405_v7 = vrot.slane %v12206_v1, 1 }
 0x2a3   : > { %9841 = vmatmul.msk.bf16.gmra.mxu0 %vm1276_vm3, %v1048_v23  ;;  %9904 = vmatmul.msk.bf16.gmra.mxu1 %vm1276_vm3, %v12061_v63 }
 0x2a4   : > { %17802 = vst [vmem:[#allocation176_spill] sm:$0xff] %v12256_v48  ;;  %9972 = vmatmul.msk.bf16.gmra.mxu2 %vm1276_vm3, %v2398_v52  ;;  %v1051_v56 = vor.u32 %v12271_v43, %v1047_v61  ;;  %v12293_v61 = vld [vmem:[%s10997_s11 + $0x158] sm:$0xff] }
 0x2a5   : > { %17803 = vst [vmem:[#allocation177_spill] sm:$0xff] %v12271_v43 }
 0x2a6   : > { %10044 = vmatmul.msk.bf16.gmra.mxu3 %vm1276_vm3, %v2402_v40 }
 0x2a7   : > { %v2818_v38 = vpop.f32.mrf.mxu2 }
 0x2a8   : > { %v3077_v6 = vadd.f32 %v2818_v38, %v2121_v8  ;;  %v12268_v60 = vpop.f32.mrf.mxu0  ;;  %v2122_v63 = vpop.f32.mrf.mxu1  ;;  %v1056_v38 = vsel %vm716_vm2, %v1051_v56, %v1055_v17 }
 0x2a9   : > { %v3340_v52 = vpop.f32.mrf.mxu3  ;;  %v2123_v5 = vadd.f32 %v2122_v63, %v12123_v53  ;;  %v2404_v53 = vsel %vm2325_vm4, %v2401_v25, %v2403_v39 }
 0x2aa   : > { %v12276_v62 = vadd.f32 %v3340_v52, %v3077_v6 }
 0x2ac   : > { %17805 = vst [vmem:[#allocation179_spill] sm:$0xff] %v12276_v62 }
 0x2af   : > { %v2820_v27 = vpop.f32.mrf.mxu2 }
 0x2b0   : > { %v3078_v23 = vadd.f32 %v2820_v27, %v2123_v5  ;;  %v12281_v8 = vpop.f32.mrf.mxu0  ;;  %v2125_v29 = vpop.f32.mrf.mxu1  ;;  %v12303_v5 = vshll.u32 %v12293_v61, 16 }
 0x2b1   : > { %v3342_v48 = vpop.f32.mrf.mxu3  ;;  %v2126_v6 = vadd.f32 %v2125_v29, %v12136_v4 }
 0x2b2   : > { %v12285_v46 = vadd.f32 %v3342_v48, %v3078_v23  ;;  %v12300_v48 = vshrl.u32 %v12264_v24, 16  ;;  %17808 = vst [vmem:[#allocation182_spill] sm:$0xff] %v12303_v5  ;;  %v1063_v4 = vrot.slane %v12303_v5, 1  ;;  %v2407_v5 = vrot.slane %v12235_v16, 1 }
 0x2b3   : > { %9842 = vmatmul.msk.bf16.gmra.mxu0 %vm1276_vm3, %v1056_v38  ;;  %9905 = vmatmul.msk.bf16.gmra.mxu1 %vm1276_vm3, %v12090_v35 }
 0x2b4   : > { %17806 = vst [vmem:[#allocation180_spill] sm:$0xff] %v12285_v46  ;;  %9973 = vmatmul.msk.bf16.gmra.mxu2 %vm1276_vm3, %v2400_v10  ;;  %v1059_v25 = vor.u32 %v12300_v48, %v1055_v17  ;;  %v12322_v17 = vld [vmem:[%s10997_s11 + $0x160] sm:$0xff] }
 0x2b5   : > { %17807 = vst [vmem:[#allocation181_spill] sm:$0xff] %v12300_v48 }
 0x2b6   : > { %10045 = vmatmul.msk.bf16.gmra.mxu3 %vm1276_vm3, %v2404_v53 }
 0x2b7   : > { %v2823_v63 = vpop.f32.mrf.mxu2 }
 0x2b8   : > { %v3079_v52 = vadd.f32 %v2823_v63, %v2126_v6  ;;  %v12297_v56 = vpop.f32.mrf.mxu0  ;;  %v2127_v35 = vpop.f32.mrf.mxu1  ;;  %v1064_v63 = vsel %vm716_vm2, %v1059_v25, %v1063_v4 }
 0x2b9   : > { %v3345_v10 = vpop.f32.mrf.mxu3  ;;  %v2128_v29 = vadd.f32 %v2127_v35, %v12152_v57  ;;  %v2406_v57 = vsel %vm2325_vm4, %v2403_v39, %v2405_v7 }
 0x2ba   : > { %v12305_v27 = vadd.f32 %v3345_v10, %v3079_v52 }
 0x2bc   : > { %17809 = vst [vmem:[#allocation183_spill] sm:$0xff] %v12305_v27 }
 0x2bf   : > { %v2825_v23 = vpop.f32.mrf.mxu2 }
 0x2c0   : > { %v3080_v38 = vadd.f32 %v2825_v23, %v2128_v29  ;;  %v12310_v6 = vpop.f32.mrf.mxu0  ;;  %v2130_v43 = vpop.f32.mrf.mxu1  ;;  %v12332_v29 = vshll.u32 %v12322_v17, 16 }
 0x2c1   : > { %v3347_v46 = vpop.f32.mrf.mxu3  ;;  %v2131_v52 = vadd.f32 %v2130_v43, %v12165_v54 }
 0x2c2   : > { %v12314_v62 = vadd.f32 %v3347_v46, %v3080_v38  ;;  %v12329_v46 = vshrl.u32 %v12293_v61, 16  ;;  %17812 = vst [vmem:[#allocation186_spill] sm:$0xff] %v12332_v29  ;;  %v1071_v54 = vrot.slane %v12332_v29, 1  ;;  %v2409_v29 = vrot.slane %v12264_v24, 1 }
 0x2c3   : > { %9843 = vmatmul.msk.bf16.gmra.mxu0 %vm1276_vm3, %v1064_v63  ;;  %9906 = vmatmul.msk.bf16.gmra.mxu1 %vm1276_vm3, %v12119_v14 }
 0x2c4   : > { %17810 = vst [vmem:[#allocation184_spill] sm:$0xff] %v12314_v62  ;;  %9974 = vmatmul.msk.bf16.gmra.mxu2 %vm1276_vm3, %v2402_v40  ;;  %v1067_v39 = vor.u32 %v12329_v46, %v1063_v4  ;;  %v12351_v4 = vld [vmem:[%s10997_s11 + $0x168] sm:$0xff] }
 0x2c5   : > { %17811 = vst [vmem:[#allocation185_spill] sm:$0xff] %v12329_v46 }
 0x2c6   : > { %10046 = vmatmul.msk.bf16.gmra.mxu3 %vm1276_vm3, %v2406_v57 }
 0x2c7   : > { %v2828_v35 = vpop.f32.mrf.mxu2 }
 0x2c8   : > { %v3081_v10 = vadd.f32 %v2828_v35, %v2131_v52  ;;  %v12326_v25 = vpop.f32.mrf.mxu0  ;;  %v2132_v14 = vpop.f32.mrf.mxu1  ;;  %v1072_v35 = vsel %vm716_vm2, %v1067_v39, %v1071_v54 }
 0x2c9   : > { %v3350_v40 = vpop.f32.mrf.mxu3  ;;  %v2133_v43 = vadd.f32 %v2132_v14, %v12181_v31  ;;  %v2408_v31 = vsel %vm2325_vm4, %v2405_v7, %v2407_v5 }
 0x2ca   : > { %v12334_v23 = vadd.f32 %v3350_v40, %v3081_v10 }
 0x2cc   : > { %17813 = vst [vmem:[#allocation187_spill] sm:$0xff] %v12334_v23 }
 0x2cf   : > { %v2830_v38 = vpop.f32.mrf.mxu2 }
 0x2d0   : > { %v3082_v63 = vadd.f32 %v2830_v38, %v2133_v43  ;;  %v12339_v52 = vpop.f32.mrf.mxu0  ;;  %v2135_v48 = vpop.f32.mrf.mxu1  ;;  %v12361_v43 = vshll.u32 %v12351_v4, 16 }
 0x2d1   : > { %v3352_v62 = vpop.f32.mrf.mxu3  ;;  %v2136_v10 = vadd.f32 %v2135_v48, %v12194_v30 }
 0x2d2   : > { %v12343_v27 = vadd.f32 %v3352_v62, %v3082_v63  ;;  %v12358_v62 = vshrl.u32 %v12322_v17, 16  ;;  %17816 = vst [vmem:[#allocation190_spill] sm:$0xff] %v12361_v43  ;;  %v1079_v30 = vrot.slane %v12361_v43, 1  ;;  %v2411_v43 = vrot.slane %v12293_v61, 1 }
 0x2d3   : > { %9844 = vmatmul.msk.bf16.gmra.mxu0 %vm1276_vm3, %v1072_v35  ;;  %9907 = vmatmul.msk.bf16.gmra.mxu1 %vm1276_vm3, %v12148_v49 }
 0x2d4   : > { %17814 = vst [vmem:[#allocation188_spill] sm:$0xff] %v12343_v27  ;;  %9975 = vmatmul.msk.bf16.gmra.mxu2 %vm1276_vm3, %v2404_v53  ;;  %v1075_v7 = vor.u32 %v12358_v62, %v1071_v54  ;;  %v12380_v54 = vld [vmem:[%s10997_s11 + $0x170] sm:$0xff] }
 0x2d5   : > { %17815 = vst [vmem:[#allocation189_spill] sm:$0xff] %v12358_v62 }
 0x2d6   : > { %10047 = vmatmul.msk.bf16.gmra.mxu3 %vm1276_vm3, %v2408_v31 }
 0x2d7   : > { %v2833_v14 = vpop.f32.mrf.mxu2 }
 0x2d8   : > { %v3083_v40 = vadd.f32 %v2833_v14, %v2136_v10  ;;  %v12355_v39 = vpop.f32.mrf.mxu0  ;;  %v2137_v49 = vpop.f32.mrf.mxu1  ;;  %v1080_v14 = vsel %vm716_vm2, %v1075_v7, %v1079_v30 }
 0x2d9   : > { %v3355_v53 = vpop.f32.mrf.mxu3  ;;  %v2138_v48 = vadd.f32 %v2137_v49, %v12210_v21  ;;  %v2410_v21 = vsel %vm2325_vm4, %v2407_v5, %v2409_v29 }
 0x2da   : > { %v12363_v38 = vadd.f32 %v3355_v53, %v3083_v40 }
 0x2dc   : > { %17817 = vst [vmem:[#allocation191_spill] sm:$0xff] %v12363_v38 }
 0x2df   : > { %v2835_v63 = vpop.f32.mrf.mxu2 }
 0x2e0   : > { %v3084_v35 = vadd.f32 %v2835_v63, %v2138_v48  ;;  %v12368_v10 = vpop.f32.mrf.mxu0  ;;  %v2140_v46 = vpop.f32.mrf.mxu1  ;;  %v12390_v48 = vshll.u32 %v12380_v54, 16 }
 0x2e1   : > { %v3357_v27 = vpop.f32.mrf.mxu3  ;;  %v2141_v40 = vadd.f32 %v2140_v46, %v12223_v9 }
 0x2e2   : > { %v12372_v23 = vadd.f32 %v3357_v27, %v3084_v35  ;;  %v12387_v27 = vshrl.u32 %v12351_v4, 16  ;;  %17820 = vst [vmem:[#allocation194_spill] sm:$0xff] %v12390_v48  ;;  %v1087_v9 = vrot.slane %v12390_v48, 1  ;;  %v2413_v48 = vrot.slane %v12322_v17, 1 }
 0x2e3   : > { %9845 = vmatmul.msk.bf16.gmra.mxu0 %vm1276_vm3, %v1080_v14  ;;  %9908 = vmatmul.msk.bf16.gmra.mxu1 %vm1276_vm3, %v12177_v34 }
 0x2e4   : > { %17818 = vst [vmem:[#allocation192_spill] sm:$0xff] %v12372_v23  ;;  %9976 = vmatmul.msk.bf16.gmra.mxu2 %vm1276_vm3, %v2406_v57  ;;  %v1083_v5 = vor.u32 %v12387_v27, %v1079_v30  ;;  %v12409_v30 = vld [vmem:[%s10997_s11 + $0x178] sm:$0xff] }
 0x2e5   : > { %17819 = vst [vmem:[#allocation193_spill] sm:$0xff] %v12387_v27 }
 0x2e6   : > { %10048 = vmatmul.msk.bf16.gmra.mxu3 %vm1276_vm3, %v2410_v21 }
 0x2e7   : > { %v2838_v49 = vpop.f32.mrf.mxu2 }
 0x2e8   : > { %v3085_v53 = vadd.f32 %v2838_v49, %v2141_v40  ;;  %v12384_v7 = vpop.f32.mrf.mxu0  ;;  %v2142_v34 = vpop.f32.mrf.mxu1  ;;  %v1088_v49 = vsel %vm716_vm2, %v1083_v5, %v1087_v9 }
 0x2e9   : > { %v3360_v57 = vpop.f32.mrf.mxu3  ;;  %v2143_v46 = vadd.f32 %v2142_v34, %v12239_v19  ;;  %v2412_v19 = vsel %vm2325_vm4, %v2409_v29, %v2411_v43 }
 0x2ea   : > { %v12392_v63 = vadd.f32 %v3360_v57, %v3085_v53 }
 0x2ec   : > { %17821 = vst [vmem:[#allocation195_spill] sm:$0xff] %v12392_v63 }
 0x2ef   : > { %v2840_v35 = vpop.f32.mrf.mxu2 }
 0x2f0   : > { %v3086_v14 = vadd.f32 %v2840_v35, %v2143_v46  ;;  %v12397_v40 = vpop.f32.mrf.mxu0  ;;  %v2145_v62 = vpop.f32.mrf.mxu1  ;;  %v12419_v46 = vshll.u32 %v12409_v30, 16 }
 0x2f1   : > { %v3362_v23 = vpop.f32.mrf.mxu3  ;;  %v2146_v53 = vadd.f32 %v2145_v62, %v12252_v50 }
 0x2f2   : > { %v12401_v38 = vadd.f32 %v3362_v23, %v3086_v14  ;;  %v12416_v23 = vshrl.u32 %v12380_v54, 16  ;;  %17824 = vst [vmem:[#allocation198_spill] sm:$0xff] %v12419_v46  ;;  %v1095_v50 = vrot.slane %v12419_v46, 1  ;;  %v2415_v46 = vrot.slane %v12351_v4, 1 }
 0x2f3   : > { %9846 = vmatmul.msk.bf16.gmra.mxu0 %vm1276_vm3, %v1088_v49  ;;  %9909 = vmatmul.msk.bf16.gmra.mxu1 %vm1276_vm3, %v12206_v1 }
 0x2f4   : > { %17822 = vst [vmem:[#allocation196_spill] sm:$0xff] %v12401_v38  ;;  %9977 = vmatmul.msk.bf16.gmra.mxu2 %vm1276_vm3, %v2408_v31  ;;  %v1091_v29 = vor.u32 %v12416_v23, %v1087_v9  ;;  %v12438_v9 = vld [vmem:[%s10997_s11 + $0x180] sm:$0xff] }
 0x2f5   : > { %17823 = vst [vmem:[#allocation197_spill] sm:$0xff] %v12416_v23 }
 0x2f6   : > { %10049 = vmatmul.msk.bf16.gmra.mxu3 %vm1276_vm3, %v2412_v19 }
 0x2f7   : > { %v2843_v34 = vpop.f32.mrf.mxu2 }
 0x2f8   : > { %v3087_v57 = vadd.f32 %v2843_v34, %v2146_v53  ;;  %v12413_v5 = vpop.f32.mrf.mxu0  ;;  %v2147_v1 = vpop.f32.mrf.mxu1  ;;  %v1096_v34 = vsel %vm716_vm2, %v1091_v29, %v1095_v50 }
 0x2f9   : > { %v3365_v31 = vpop.f32.mrf.mxu3  ;;  %v2148_v62 = vadd.f32 %v2147_v1, %v12268_v60  ;;  %v2414_v60 = vsel %vm2325_vm4, %v2411_v43, %v2413_v48 }
 0x2fa   : > { %v12421_v35 = vadd.f32 %v3365_v31, %v3087_v57 }
 0x2fc   : > { %17825 = vst [vmem:[#allocation199_spill] sm:$0xff] %v12421_v35 }
 0x2ff   : > { %v2845_v14 = vpop.f32.mrf.mxu2 }
 0x300   : > { %v3088_v49 = vadd.f32 %v2845_v14, %v2148_v62  ;;  %v12426_v53 = vpop.f32.mrf.mxu0  ;;  %v2150_v27 = vpop.f32.mrf.mxu1  ;;  %v12448_v62 = vshll.u32 %v12438_v9, 16 }
 0x301   : > { %v3367_v38 = vpop.f32.mrf.mxu3  ;;  %v2151_v57 = vadd.f32 %v2150_v27, %v12281_v8 }
 0x302   : > { %v12430_v63 = vadd.f32 %v3367_v38, %v3088_v49  ;;  %v12445_v38 = vshrl.u32 %v12409_v30, 16  ;;  %17828 = vst [vmem:[#allocation202_spill] sm:$0xff] %v12448_v62  ;;  %v1103_v8 = vrot.slane %v12448_v62, 1  ;;  %v2417_v62 = vrot.slane %v12380_v54, 1 }
 0x303   : > { %9847 = vmatmul.msk.bf16.gmra.mxu0 %vm1276_vm3, %v1096_v34  ;;  %9910 = vmatmul.msk.bf16.gmra.mxu1 %vm1276_vm3, %v12235_v16 }
 0x304   : > { %17826 = vst [vmem:[#allocation200_spill] sm:$0xff] %v12430_v63  ;;  %9978 = vmatmul.msk.bf16.gmra.mxu2 %vm1276_vm3, %v2410_v21  ;;  %v1099_v43 = vor.u32 %v12445_v38, %v1095_v50  ;;  %v12467_v50 = vld [vmem:[%s10997_s11 + $0x188] sm:$0xff] }
 0x305   : > { %17827 = vst [vmem:[#allocation201_spill] sm:$0xff] %v12445_v38 }
 0x306   : > { %10050 = vmatmul.msk.bf16.gmra.mxu3 %vm1276_vm3, %v2414_v60 }
 0x307   : > { %v2848_v1 = vpop.f32.mrf.mxu2 }
 0x308   : > { %v3089_v31 = vadd.f32 %v2848_v1, %v2151_v57  ;;  %v12442_v29 = vpop.f32.mrf.mxu0  ;;  %v2152_v16 = vpop.f32.mrf.mxu1  ;;  %v1104_v1 = vsel %vm716_vm2, %v1099_v43, %v1103_v8 }
 0x309   : > { %v3370_v21 = vpop.f32.mrf.mxu3  ;;  %v2153_v27 = vadd.f32 %v2152_v16, %v12297_v56  ;;  %v2416_v56 = vsel %vm2325_vm4, %v2413_v48, %v2415_v46 }
 0x30a   : > { %v12450_v14 = vadd.f32 %v3370_v21, %v3089_v31 }
 0x30c   : > { %17829 = vst [vmem:[#allocation203_spill] sm:$0xff] %v12450_v14 }
 0x30f   : > { %v2850_v49 = vpop.f32.mrf.mxu2 }
 0x310   : > { %v3090_v34 = vadd.f32 %v2850_v49, %v2153_v27  ;;  %v12455_v57 = vpop.f32.mrf.mxu0  ;;  %v2155_v23 = vpop.f32.mrf.mxu1  ;;  %v12477_v27 = vshll.u32 %v12467_v50, 16 }
 0x311   : > { %v3372_v63 = vpop.f32.mrf.mxu3  ;;  %v2156_v31 = vadd.f32 %v2155_v23, %v12310_v6 }
 0x312   : > { %v12459_v35 = vadd.f32 %v3372_v63, %v3090_v34  ;;  %v12474_v63 = vshrl.u32 %v12438_v9, 16  ;;  %17832 = vst [vmem:[#allocation206_spill] sm:$0xff] %v12477_v27  ;;  %v1111_v6 = vrot.slane %v12477_v27, 1  ;;  %v2419_v27 = vrot.slane %v12409_v30, 1 }
 0x313   : > { %9848 = vmatmul.msk.bf16.gmra.mxu0 %vm1276_vm3, %v1104_v1  ;;  %9911 = vmatmul.msk.bf16.gmra.mxu1 %vm1276_vm3, %v12264_v24 }
 0x314   : > { %17830 = vst [vmem:[#allocation204_spill] sm:$0xff] %v12459_v35  ;;  %9979 = vmatmul.msk.bf16.gmra.mxu2 %vm1276_vm3, %v2412_v19  ;;  %v1107_v48 = vor.u32 %v12474_v63, %v1103_v8  ;;  %v12496_v8 = vld [vmem:[%s10997_s11 + $0x190] sm:$0xff] }
 0x315   : > { %17831 = vst [vmem:[#allocation205_spill] sm:$0xff] %v12474_v63 }
 0x316   : > { %10051 = vmatmul.msk.bf16.gmra.mxu3 %vm1276_vm3, %v2416_v56 }
 0x317   : > { %v2853_v16 = vpop.f32.mrf.mxu2 }
 0x318   : > { %v3091_v21 = vadd.f32 %v2853_v16, %v2156_v31  ;;  %v12471_v43 = vpop.f32.mrf.mxu0  ;;  %v2157_v24 = vpop.f32.mrf.mxu1  ;;  %v1112_v16 = vsel %vm716_vm2, %v1107_v48, %v1111_v6 }
 0x319   : > { %v3375_v19 = vpop.f32.mrf.mxu3  ;;  %v2158_v23 = vadd.f32 %v2157_v24, %v12326_v25  ;;  %v2418_v25 = vsel %vm2325_vm4, %v2415_v46, %v2417_v62 }
 0x31a   : > { %v12479_v49 = vadd.f32 %v3375_v19, %v3091_v21 }
 0x31c   : > { %17833 = vst [vmem:[#allocation207_spill] sm:$0xff] %v12479_v49 }
 0x31f   : > { %v2855_v34 = vpop.f32.mrf.mxu2 }
 0x320   : > { %v3092_v1 = vadd.f32 %v2855_v34, %v2158_v23  ;;  %v12484_v31 = vpop.f32.mrf.mxu0  ;;  %v2160_v38 = vpop.f32.mrf.mxu1  ;;  %v12506_v23 = vshll.u32 %v12496_v8, 16 }
 0x321   : > { %v3377_v35 = vpop.f32.mrf.mxu3  ;;  %v2161_v21 = vadd.f32 %v2160_v38, %v12339_v52 }
 0x322   : > { %v12488_v14 = vadd.f32 %v3377_v35, %v3092_v1  ;;  %v12503_v35 = vshrl.u32 %v12467_v50, 16  ;;  %17836 = vst [vmem:[#allocation210_spill] sm:$0xff] %v12506_v23  ;;  %v1119_v52 = vrot.slane %v12506_v23, 1  ;;  %v2421_v23 = vrot.slane %v12438_v9, 1 }
 0x323   : > { %9849 = vmatmul.msk.bf16.gmra.mxu0 %vm1276_vm3, %v1112_v16  ;;  %9912 = vmatmul.msk.bf16.gmra.mxu1 %vm1276_vm3, %v12293_v61 }
 0x324   : > { %17834 = vst [vmem:[#allocation208_spill] sm:$0xff] %v12488_v14  ;;  %9980 = vmatmul.msk.bf16.gmra.mxu2 %vm1276_vm3, %v2414_v60  ;;  %v1115_v46 = vor.u32 %v12503_v35, %v1111_v6  ;;  %v12525_v6 = vld [vmem:[%s10997_s11 + $0x198] sm:$0xff] }
 0x325   : > { %17835 = vst [vmem:[#allocation209_spill] sm:$0xff] %v12503_v35 }
 0x326   : > { %10052 = vmatmul.msk.bf16.gmra.mxu3 %vm1276_vm3, %v2418_v25 }
 0x327   : > { %v2858_v24 = vpop.f32.mrf.mxu2 }
 0x328   : > { %v3093_v19 = vadd.f32 %v2858_v24, %v2161_v21  ;;  %v12500_v48 = vpop.f32.mrf.mxu0  ;;  %v2162_v61 = vpop.f32.mrf.mxu1  ;;  %v1120_v24 = vsel %vm716_vm2, %v1115_v46, %v1119_v52 }
 0x329   : > { %v3380_v60 = vpop.f32.mrf.mxu3  ;;  %v2163_v38 = vadd.f32 %v2162_v61, %v12355_v39  ;;  %v2420_v39 = vsel %vm2325_vm4, %v2417_v62, %v2419_v27 }
 0x32a   : > { %v12508_v34 = vadd.f32 %v3380_v60, %v3093_v19 }
 0x32c   : > { %17837 = vst [vmem:[#allocation211_spill] sm:$0xff] %v12508_v34 }
 0x32f   : > { %v2860_v1 = vpop.f32.mrf.mxu2 }
 0x330   : > { %v3094_v16 = vadd.f32 %v2860_v1, %v2163_v38  ;;  %v12513_v21 = vpop.f32.mrf.mxu0  ;;  %v2165_v63 = vpop.f32.mrf.mxu1  ;;  %v12535_v38 = vshll.u32 %v12525_v6, 16 }
 0x331   : > { %v3382_v14 = vpop.f32.mrf.mxu3  ;;  %v2166_v19 = vadd.f32 %v2165_v63, %v12368_v10 }
 0x332   : > { %v12517_v49 = vadd.f32 %v3382_v14, %v3094_v16  ;;  %v12532_v14 = vshrl.u32 %v12496_v8, 16  ;;  %17840 = vst [vmem:[#allocation214_spill] sm:$0xff] %v12535_v38  ;;  %v1127_v10 = vrot.slane %v12535_v38, 1 }
 0x333   : > { %9850 = vmatmul.msk.bf16.gmra.mxu0 %vm1276_vm3, %v1120_v24  ;;  %9913 = vmatmul.msk.bf16.gmra.mxu1 %vm1276_vm3, %v12322_v17 }
 0x334   : > { %17838 = vst [vmem:[#allocation212_spill] sm:$0xff] %v12517_v49  ;;  %9981 = vmatmul.msk.bf16.gmra.mxu2 %vm1276_vm3, %v2416_v56  ;;  %v1123_v62 = vor.u32 %v12532_v14, %v1119_v52  ;;  %v12554_v52 = vld [vmem:[%s10997_s11 + $0x1a0] sm:$0xff] }
 0x335   : > { %17839 = vst [vmem:[#allocation213_spill] sm:$0xff] %v12532_v14  ;;  %v17849_v14 = vshrl.u32 %v11094_v13, 16 }
 0x336   : > { %10053 = vmatmul.msk.bf16.gmra.mxu3 %vm1276_vm3, %v2420_v39 }
 0x337   : > { %v2863_v61 = vpop.f32.mrf.mxu2 }
 0x338   : > { %v3095_v60 = vadd.f32 %v2863_v61, %v2166_v19  ;;  %v12529_v46 = vpop.f32.mrf.mxu0  ;;  %v2167_v17 = vpop.f32.mrf.mxu1  ;;  %v1128_v61 = vsel %vm716_vm2, %v1123_v62, %v1127_v10 }
 0x339   : > { %v3385_v56 = vpop.f32.mrf.mxu3  ;;  %v2168_v63 = vadd.f32 %v2167_v17, %v12384_v7  ;;  %v2422_v7 = vsel %vm2325_vm4, %v2419_v27, %v2421_v23 }
 0x33a   : > { %v12537_v1 = vadd.f32 %v3385_v56, %v3095_v60 }
 0x33c   : > { %17841 = vst [vmem:[#allocation215_spill] sm:$0xff] %v12537_v1 }
 0x33f   : > { %v2865_v16 = vpop.f32.mrf.mxu2 }
 0x340   : > { %v3096_v24 = vadd.f32 %v2865_v16, %v2168_v63  ;;  %v12542_v19 = vpop.f32.mrf.mxu0  ;;  %v2170_v35 = vpop.f32.mrf.mxu1  ;;  %v12564_v63 = vshll.u32 %v12554_v52, 16 }
 0x341   : > { %v3387_v49 = vpop.f32.mrf.mxu3  ;;  %v2171_v60 = vadd.f32 %v2170_v35, %v12397_v40  ;;  %v17846_v35 = vshll.u32 %v11057_v47, 16 }
 0x342   : > { %v12546_v34 = vadd.f32 %v3387_v49, %v3096_v24  ;;  %v12561_v49 = vshrl.u32 %v12525_v6, 16  ;;  %17844 = vst [vmem:[#allocation218_spill] sm:$0xff] %v12564_v63  ;;  %v1135_v40 = vrot.slane %v12564_v63, 1 }
 0x343   : > { %9851 = vmatmul.msk.bf16.gmra.mxu0 %vm1276_vm3, %v1128_v61  ;;  %9914 = vmatmul.msk.bf16.gmra.mxu1 %vm1276_vm3, %v12351_v4  ;;  %v3683_v24 = vrot.slane %v17846_v35, 2  ;;  %v17847_v61 = vshrl.u32 %v11057_v47, 16  ;;  %v2423_v35 = vrot.slane %v12467_v50, 1 }
 0x344   : > { %17842 = vst [vmem:[#allocation216_spill] sm:$0xff] %v12546_v34  ;;  %9982 = vmatmul.msk.bf16.gmra.mxu2 %vm1276_vm3, %v2418_v25  ;;  %v1131_v27 = vor.u32 %v12561_v49, %v1127_v10  ;;  %v3685_v34 = vrot.slane %v17849_v14, 1 }
 0x345   : > { %17843 = vst [vmem:[#allocation217_spill] sm:$0xff] %v12561_v49 }
 0x346   : > { %10054 = vmatmul.msk.bf16.gmra.mxu3 %vm1276_vm3, %v2422_v7  ;;  %v1136_v63 = vsel %vm716_vm2, %v1131_v27, %v1135_v40 }
 0x347   : > { %v2868_v17 = vpop.f32.mrf.mxu2 }
 0x348   : > { %v3097_v56 = vadd.f32 %v2868_v17, %v2171_v60  ;;  %v12558_v62 = vpop.f32.mrf.mxu0  ;;  %v2172_v4 = vpop.f32.mrf.mxu1  ;;  %v3682_v60 = vrot.slane %v17847_v61, 1  ;;  %v17848_v17 = vshll.u32 %v11094_v13, 16 }
 0x349   : > { %v3390_v25 = vpop.f32.mrf.mxu3  ;;  %v2173_v1 = vadd.f32 %v2172_v4, %v12413_v5 }
 0x34a   : > { %v12566_v16 = vadd.f32 %v3390_v25, %v3097_v56  ;;  %v3686_v38 = vrot.slane %v17848_v17, 2  ;;  %v3972_v56 = vrot.slane %v11160_v11, 2  ;;  %v3684_v17 = vor.u32 %v3683_v24, %v3682_v60 }
 0x34b   : > { %v2424_v11 = vsel %vm2325_vm4, %v2421_v23, %v2423_v35 }
 0x34c   : > { %17845 = vst [vmem:[#allocation219_spill] sm:$0xff] %v12566_v16  ;;  %v4178_v47 = vand.u32 %v3972_v56, %v11006_v12  ;;  %v12585_v13 = vor.u32 %v3686_v38, %v3685_v34  ;;  %v17853_v56 = vrot.slane %v11016_v22, 1 }
 0x34e   : > { %4187 = vmatpush.bf16.msrb.mxu0 %v4178_v47  ;;  %v3688_v5 = vsel %vm3681_vm5, %v3684_v17, %v12585_v13 }
 0x34f   : > { %v2870_v25 = vpop.f32.mrf.mxu2 }
 0x350   : > { %v3098_v10 = vadd.f32 %v2870_v25, %v2173_v1  ;;  %v12580_v49 = vpop.f32.mrf.mxu0  ;;  %v2175_v61 = vpop.f32.mrf.mxu1 }
 0x351   : > { %v3392_v16 = vpop.f32.mrf.mxu3  ;;  %v2176_v1 = vadd.f32 %v2175_v61, %v12426_v53 }
 0x352   : > { %v12587_v14 = vadd.f32 %v3392_v16, %v3098_v10  ;;  %v2425_v10 = vrot.slane %v12496_v8, 1 }
 0x353   : > { %9852 = vmatmul.msk.bf16.gmra.mxu0 %vm1276_vm3, %v1136_v63  ;;  %9915 = vmatmul.msk.bf16.gmra.mxu1 %vm1276_vm3, %v12380_v54  ;;  %v12601_v63 = vshrl.u32 %v12554_v52, 16 }
 0x354   : > { %17850 = vst [vmem:[#allocation220_spill] sm:$0xff] %v12587_v14  ;;  %9983 = vmatmul.msk.bf16.gmra.mxu2 %vm1276_vm3, %v2420_v39 }
 0x355   : > { %17851 = vst [vmem:[#allocation221_spill] sm:$0xff] %v12601_v63  ;;  %v1139_v23 = vor.u32 %v12601_v63, %v1135_v40 }
 0x356   : > { %10055 = vmatmul.msk.bf16.gmra.mxu3 %vm1276_vm3, %v2424_v11 }
 0x357   : > { %v2873_v34 = vpop.f32.mrf.mxu2  ;;  %v1144_v25 = vsel %vm716_vm2, %v1139_v23, %v17853_v56 }
 0x358   : > { %v3099_v38 = vadd.f32 %v2873_v34, %v2176_v1  ;;  %v12598_v4 = vpop.f32.mrf.mxu0  ;;  %v2177_v16 = vpop.f32.mrf.mxu1 }
 0x359   : > { %v3395_v54 = vpop.f32.mrf.mxu3  ;;  %v2178_v39 = vadd.f32 %v2177_v16, %v12442_v29  ;;  %v2426_v29 = vsel %vm2325_vm4, %v2423_v35, %v2425_v10 }
 0x35a   : > { %v12603_v27 = vadd.f32 %v3395_v54, %v3099_v38 }
 0x35c   : > { %17852 = vst [vmem:[#allocation222_spill] sm:$0xff] %v12603_v27  ;;  %v17902_v27 = vld [vmem:[#allocation91_spill] sm:$0xff] }
 0x35f   : > { %v2875_v24 = vpop.f32.mrf.mxu2 }
 0x360   : > { %v3100_v60 = vadd.f32 %v2875_v24, %v2178_v39  ;;  %v12607_v53 = vpop.f32.mrf.mxu0  ;;  %v2180_v47 = vpop.f32.mrf.mxu1 }
 0x361   : > { %v3397_v61 = vpop.f32.mrf.mxu3  ;;  %v2181_v40 = vadd.f32 %v2180_v47, %v12455_v57 }
 0x362   : > { %v12613_v17 = vadd.f32 %v3397_v61, %v3100_v60 }
 0x363   : > { %9853 = vmatmul.msk.bf16.gmra.mxu0 %vm1276_vm3, %v1144_v25  ;;  %9916 = vmatmul.msk.bf16.gmra.mxu1 %vm1276_vm3, %v12409_v30 }
 0x364   : > { %17854 = vst [vmem:[#allocation223_spill] sm:$0xff] %v12613_v17  ;;  %9984 = vmatmul.msk.bf16.gmra.mxu2 %vm1276_vm3, %v2422_v7  ;;  %v2427_v7 = vrot.slane %v12525_v6, 1 }
 0x366   : > { %10056 = vmatmul.msk.bf16.gmra.mxu3 %vm1276_vm3, %v2426_v29  ;;  %v2428_v25 = vsel %vm2325_vm4, %v2425_v10, %v2427_v7 }
 0x367   : > { %v2878_v1 = vpop.f32.mrf.mxu2 }
 0x368   : > { %v3101_v34 = vadd.f32 %v2878_v1, %v2181_v40  ;;  %v12622_v38 = vpop.f32.mrf.mxu0  ;;  %v2182_v16 = vpop.f32.mrf.mxu1  ;;  %v3689_v1 = vrot.slane %v11192_v15, 1 }
 0x369   : > { %v3400_v54 = vpop.f32.mrf.mxu3  ;;  %v2183_v39 = vadd.f32 %v2182_v16, %v12471_v43 }
 0x36a   : > { %v12624_v23 = vadd.f32 %v3400_v54, %v3101_v34  ;;  %v3690_v34 = vrot.slane %v11139_v59, 2 }
 0x36c   : > { %17855 = vst [vmem:[#allocation224_spill] sm:$0xff] %v12624_v23  ;;  %v17894_v23 = vld [vmem:[#allocation87_spill] sm:$0xff] }
 0x36f   : > { %v2880_v24 = vpop.f32.mrf.mxu2 }
 0x370   : > { %v3102_v30 = vadd.f32 %v2880_v24, %v2183_v39  ;;  %v12627_v60 = vpop.f32.mrf.mxu0  ;;  %v2185_v35 = vpop.f32.mrf.mxu1 }
 0x371   : > { %v3402_v57 = vpop.f32.mrf.mxu3  ;;  %v2186_v43 = vadd.f32 %v2185_v35, %v12484_v31 }
 0x372   : > { %v12630_v56 = vadd.f32 %v3402_v57, %v3102_v30  ;;  %v2429_v30 = vrot.slane %v12554_v52, 1 }
 0x373   : > { %10077 = vmatmul.msk.bf16.vlgmr.msrb.gmra.mxu0 %vm1276_vm3, %v3688_v5  ;;  %9917 = vmatmul.msk.bf16.gmra.mxu1 %vm1276_vm3, %v12438_v9  ;;  %v3691_v9 = vor.u32 %v3690_v34, %v3689_v1  ;;  %v3693_v34 = vrot.slane %v11227_v28, 1 }
 0x374   : > { %17856 = vst [vmem:[#allocation225_spill] sm:$0xff] %v12630_v56  ;;  %9985 = vmatmul.msk.bf16.gmra.mxu2 %vm1276_vm3, %v2424_v11 }
 0x375   : > { %v3692_v24 = vsel %vm3681_vm5, %v12585_v13, %v3691_v9 }
 0x376   : > { %10057 = vmatmul.msk.bf16.gmra.mxu3 %vm1276_vm3, %v2428_v25 }
 0x377   : > { %v2883_v47 = vpop.f32.mrf.mxu2 }
 0x378   : > { %v3103_v61 = vadd.f32 %v2883_v47, %v2186_v43  ;;  %v12639_v40 = vpop.f32.mrf.mxu0  ;;  %v2187_v5 = vpop.f32.mrf.mxu1 }
 0x379   : > { %v3405_v16 = vpop.f32.mrf.mxu3  ;;  %v2188_v11 = vadd.f32 %v2187_v5, %v12500_v48  ;;  %v2430_v48 = vsel %vm2325_vm4, %v2427_v7, %v2429_v30  ;;  %v3694_v5 = vrot.slane %v11195_v44, 2 }
 0x37a   : > { %v12643_v54 = vadd.f32 %v3405_v16, %v3103_v61 }
 0x37c   : > { %17857 = vst [vmem:[#allocation226_spill] sm:$0xff] %v12643_v54  ;;  %v17886_v54 = vld [vmem:[#allocation83_spill] sm:$0xff] }
 0x37f   : > { %v2885_v10 = vpop.f32.mrf.mxu2 }
 0x380   : > { %v3104_v39 = vadd.f32 %v2885_v10, %v2188_v11  ;;  %v12646_v31 = vpop.f32.mrf.mxu0  ;;  %v2190_v35 = vpop.f32.mrf.mxu1 }
 0x381   : > { %v3407_v57 = vpop.f32.mrf.mxu3  ;;  %v2191_v47 = vadd.f32 %v2190_v35, %v12513_v21  ;;  %v12671_v35 = vld [vmem:[%s10997_s11 + $0x1a8] sm:$0xff] }
 0x382   : > { %v12651_v43 = vadd.f32 %v3407_v57, %v3104_v39  ;;  %v2431_v57 = vrot.slane %v12671_v35, 1 }
 0x383   : > { %10078 = vmatmul.msk.bf16.gmra.mxu0 %vm1276_vm3, %v3692_v24  ;;  %9918 = vmatmul.msk.bf16.gmra.mxu1 %vm1276_vm3, %v12467_v50 }
 0x384   : > { %17858 = vst [vmem:[#allocation227_spill] sm:$0xff] %v12651_v43  ;;  %9986 = vmatmul.msk.bf16.gmra.mxu2 %vm1276_vm3, %v2426_v29  ;;  %v3695_v29 = vor.u32 %v3694_v5, %v3693_v34 }
 0x386   : > { %10058 = vmatmul.msk.bf16.gmra.mxu3 %vm1276_vm3, %v2430_v48  ;;  %v3696_v24 = vsel %vm3681_vm5, %v3691_v9, %v3695_v29 }
 0x387   : > { %v2888_v13 = vpop.f32.mrf.mxu2 }
 0x388   : > { %v3105_v61 = vadd.f32 %v2888_v13, %v2191_v47  ;;  %v12660_v1 = vpop.f32.mrf.mxu0  ;;  %v2192_v16 = vpop.f32.mrf.mxu1 }
 0x389   : > { %v3410_v11 = vpop.f32.mrf.mxu3  ;;  %v2193_v7 = vadd.f32 %v2192_v16, %v12529_v46  ;;  %v2432_v46 = vsel %vm2325_vm4, %v2429_v30, %v2431_v57  ;;  %v3697_v16 = vrot.slane %v11250_v51, 1 }
 0x38a   : > { %v12664_v50 = vadd.f32 %v3410_v11, %v3105_v61  ;;  %v3698_v11 = vrot.slane %v11230_v32, 2 }
 0x38c   : > { %17859 = vst [vmem:[#allocation228_spill] sm:$0xff] %v12664_v50 }
 0x38f   : > { %v2890_v10 = vpop.f32.mrf.mxu2 }
 0x390   : > { %v3106_v21 = vadd.f32 %v2890_v10, %v2193_v7  ;;  %v12667_v39 = vpop.f32.mrf.mxu0  ;;  %v2195_v47 = vpop.f32.mrf.mxu1 }
 0x391   : > { %v3412_v13 = vpop.f32.mrf.mxu3  ;;  %v2196_v61 = vadd.f32 %v2195_v47, %v12542_v19 }
 0x392   : > { %v12674_v22 = vadd.f32 %v3412_v13, %v3106_v21  ;;  %v12694_v13 = vld [vmem:[%s10997_s11 + $0x1b0] sm:$0xff] }
 0x393   : > { %10079 = vmatmul.msk.bf16.gmra.mxu0 %vm1276_vm3, %v3696_v24  ;;  %9919 = vmatmul.msk.bf16.gmra.mxu1 %vm1276_vm3, %v12496_v8 }
 0x394   : > { %17860 = vst [vmem:[#allocation229_spill] sm:$0xff] %v12674_v22  ;;  %9987 = vmatmul.msk.bf16.gmra.mxu2 %vm1276_vm3, %v2428_v25  ;;  %v3699_v25 = vor.u32 %v3698_v11, %v3697_v16 }
 0x396   : > { %10059 = vmatmul.msk.bf16.gmra.mxu3 %vm1276_vm3, %v2432_v46  ;;  %v3700_v47 = vsel %vm3681_vm5, %v3695_v29, %v3699_v25 }
 0x397   : > { %v2893_v9 = vpop.f32.mrf.mxu2 }
 0x398   : > { %v3107_v34 = vadd.f32 %v2893_v9, %v2196_v61  ;;  %v12683_v5 = vpop.f32.mrf.mxu0  ;;  %v2197_v7 = vpop.f32.mrf.mxu1  ;;  %v2433_v61 = vrot.slane %v12694_v13, 1 }
 0x399   : > { %v3415_v10 = vpop.f32.mrf.mxu3  ;;  %v2198_v30 = vadd.f32 %v2197_v7, %v12558_v62  ;;  %v3702_v7 = vrot.slane %v11253_v41, 2 }
 0x39a   : > { %v12687_v8 = vadd.f32 %v3415_v10, %v3107_v34  ;;  %v2434_v62 = vsel %vm2325_vm4, %v2431_v57, %v2433_v61 }
 0x39c   : > { %17861 = vst [vmem:[#allocation230_spill] sm:$0xff] %v12687_v8 }
 0x39f   : > { %v2895_v21 = vpop.f32.mrf.mxu2 }
 0x3a0   : > { %v3108_v19 = vadd.f32 %v2895_v21, %v2198_v30  ;;  %v12690_v24 = vpop.f32.mrf.mxu0  ;;  %v2200_v9 = vpop.f32.mrf.mxu1 }
 0x3a1   : > { %v3417_v22 = vpop.f32.mrf.mxu3  ;;  %v2201_v34 = vadd.f32 %v2200_v9, %v12580_v49  ;;  %v12717_v9 = vld [vmem:[%s10997_s11 + $0x1b8] sm:$0xff] }
 0x3a2   : > { %v12697_v50 = vadd.f32 %v3417_v22, %v3108_v19  ;;  %v3701_v22 = vrot.slane %v11270_v0, 1 }
 0x3a3   : > { %10080 = vmatmul.msk.bf16.gmra.mxu0 %vm1276_vm3, %v3700_v47  ;;  %9920 = vmatmul.msk.bf16.gmra.mxu1 %vm1276_vm3, %v12525_v6 }
 0x3a4   : > { %17862 = vst [vmem:[#allocation231_spill] sm:$0xff] %v12697_v50  ;;  %9988 = vmatmul.msk.bf16.gmra.mxu2 %vm1276_vm3, %v2430_v48  ;;  %v3703_v48 = vor.u32 %v3702_v7, %v3701_v22 }
 0x3a6   : > { %10060 = vmatmul.msk.bf16.gmra.mxu3 %vm1276_vm3, %v2434_v62  ;;  %v3704_v47 = vsel %vm3681_vm5, %v3699_v25, %v3703_v48 }
 0x3a7   : > { %v2898_v29 = vpop.f32.mrf.mxu2 }
 0x3a8   : > { %v3109_v16 = vadd.f32 %v2898_v29, %v2201_v34  ;;  %v12706_v11 = vpop.f32.mrf.mxu0  ;;  %v2202_v10 = vpop.f32.mrf.mxu1  ;;  %v2435_v34 = vrot.slane %v12717_v9, 1 }
 0x3a9   : > { %v3420_v30 = vpop.f32.mrf.mxu3  ;;  %v2203_v57 = vadd.f32 %v2202_v10, %v12598_v4  ;;  %v3706_v10 = vrot.slane %v11273_v3, 2 }
 0x3aa   : > { %v12710_v6 = vadd.f32 %v3420_v30, %v3109_v16  ;;  %v2436_v4 = vsel %vm2325_vm4, %v2433_v61, %v2435_v34 }
 0x3ac   : > { %17863 = vst [vmem:[#allocation232_spill] sm:$0xff] %v12710_v6 }
 0x3af   : > { %v2900_v21 = vpop.f32.mrf.mxu2 }
 0x3b0   : > { %v3110_v49 = vadd.f32 %v2900_v21, %v2203_v57  ;;  %v12713_v19 = vpop.f32.mrf.mxu0  ;;  %v2205_v29 = vpop.f32.mrf.mxu1 }
 0x3b1   : > { %v3422_v50 = vpop.f32.mrf.mxu3  ;;  %v2206_v16 = vadd.f32 %v2205_v29, %v12607_v53  ;;  %v12740_v29 = vld [vmem:[%s10997_s11 + $0x1c0] sm:$0xff] }
 0x3b2   : > { %v12720_v8 = vadd.f32 %v3422_v50, %v3110_v49  ;;  %v3705_v50 = vrot.slane %v11289_v2, 1 }
 0x3b3   : > { %10081 = vmatmul.msk.bf16.gmra.mxu0 %vm1276_vm3, %v3704_v47  ;;  %9921 = vmatmul.msk.bf16.gmra.mxu1 %vm1276_vm3, %v12554_v52 }
 0x3b4   : > { %17864 = vst [vmem:[#allocation233_spill] sm:$0xff] %v12720_v8  ;;  %9989 = vmatmul.msk.bf16.gmra.mxu2 %vm1276_vm3, %v2432_v46  ;;  %v3707_v46 = vor.u32 %v3706_v10, %v3705_v50 }
 0x3b6   : > { %10061 = vmatmul.msk.bf16.gmra.mxu3 %vm1276_vm3, %v2436_v4  ;;  %v3708_v47 = vsel %vm3681_vm5, %v3703_v48, %v3707_v46 }
 0x3b7   : > { %v2903_v25 = vpop.f32.mrf.mxu2 }
 0x3b8   : > { %v3111_v22 = vadd.f32 %v2903_v25, %v2206_v16  ;;  %v12729_v7 = vpop.f32.mrf.mxu0  ;;  %v2207_v30 = vpop.f32.mrf.mxu1  ;;  %v2437_v16 = vrot.slane %v12740_v29, 1 }
 0x3b9   : > { %v3425_v57 = vpop.f32.mrf.mxu3  ;;  %v2208_v61 = vadd.f32 %v2207_v30, %v12622_v38  ;;  %v3710_v30 = vrot.slane %v11292_v42, 2 }
 0x3ba   : > { %v12733_v52 = vadd.f32 %v3425_v57, %v3111_v22  ;;  %v2438_v38 = vsel %vm2325_vm4, %v2435_v34, %v2437_v16 }
 0x3bc   : > { %17865 = vst [vmem:[#allocation234_spill] sm:$0xff] %v12733_v52 }
 0x3bf   : > { %v2905_v21 = vpop.f32.mrf.mxu2 }
 0x3c0   : > { %v3112_v53 = vadd.f32 %v2905_v21, %v2208_v61  ;;  %v12736_v49 = vpop.f32.mrf.mxu0  ;;  %v2210_v25 = vpop.f32.mrf.mxu1 }
 0x3c1   : > { %v3427_v8 = vpop.f32.mrf.mxu3  ;;  %v2211_v22 = vadd.f32 %v2210_v25, %v12627_v60  ;;  %v12763_v25 = vld [vmem:[%s10997_s11 + $0x1c8] sm:$0xff] }
 0x3c2   : > { %v12743_v6 = vadd.f32 %v3427_v8, %v3112_v53  ;;  %v3709_v8 = vrot.slane %v11316_v18, 1 }
 0x3c3   : > { %10082 = vmatmul.msk.bf16.gmra.mxu0 %vm1276_vm3, %v3708_v47  ;;  %9922 = vmatmul.msk.bf16.gmra.mxu1 %vm1276_vm3, %v12671_v35 }
 0x3c4   : > { %17866 = vst [vmem:[#allocation235_spill] sm:$0xff] %v12743_v6  ;;  %9990 = vmatmul.msk.bf16.gmra.mxu2 %vm1276_vm3, %v2434_v62  ;;  %v3711_v62 = vor.u32 %v3710_v30, %v3709_v8 }
 0x3c6   : > { %10062 = vmatmul.msk.bf16.gmra.mxu3 %vm1276_vm3, %v2438_v38  ;;  %v3712_v47 = vsel %vm3681_vm5, %v3707_v46, %v3711_v62 }
 0x3c7   : > { %v2908_v48 = vpop.f32.mrf.mxu2 }
 0x3c8   : > { %v3113_v50 = vadd.f32 %v2908_v48, %v2211_v22  ;;  %v12752_v10 = vpop.f32.mrf.mxu0  ;;  %v2212_v57 = vpop.f32.mrf.mxu1  ;;  %v2439_v22 = vrot.slane %v12763_v25, 1 }
 0x3c9   : > { %v3430_v61 = vpop.f32.mrf.mxu3  ;;  %v2213_v34 = vadd.f32 %v2212_v57, %v12639_v40  ;;  %v3714_v57 = vrot.slane %v11319_v58, 2 }
 0x3ca   : > { %v12756_v35 = vadd.f32 %v3430_v61, %v3113_v50  ;;  %v2440_v40 = vsel %vm2325_vm4, %v2437_v16, %v2439_v22 }
 0x3cc   : > { %17867 = vst [vmem:[#allocation236_spill] sm:$0xff] %v12756_v35 }
 0x3cf   : > { %v2910_v21 = vpop.f32.mrf.mxu2 }
 0x3d0   : > { %v3114_v60 = vadd.f32 %v2910_v21, %v2213_v34  ;;  %v12759_v53 = vpop.f32.mrf.mxu0  ;;  %v2215_v48 = vpop.f32.mrf.mxu1 }
 0x3d1   : > { %v3432_v6 = vpop.f32.mrf.mxu3  ;;  %v2216_v50 = vadd.f32 %v2215_v48, %v12646_v31  ;;  %v12786_v48 = vld [vmem:[%s10997_s11 + $0x1d0] sm:$0xff] }
 0x3d2   : > { %v12766_v52 = vadd.f32 %v3432_v6, %v3114_v60  ;;  %v3713_v6 = vrot.slane %v11351_v26, 1 }
 0x3d3   : > { %10083 = vmatmul.msk.bf16.gmra.mxu0 %vm1276_vm3, %v3712_v47  ;;  %9923 = vmatmul.msk.bf16.gmra.mxu1 %vm1276_vm3, %v12694_v13 }
 0x3d4   : > { %17868 = vst [vmem:[#allocation237_spill] sm:$0xff] %v12766_v52  ;;  %9991 = vmatmul.msk.bf16.gmra.mxu2 %vm1276_vm3, %v2436_v4  ;;  %v3715_v4 = vor.u32 %v3714_v57, %v3713_v6 }
 0x3d6   : > { %10063 = vmatmul.msk.bf16.gmra.mxu3 %vm1276_vm3, %v2440_v40  ;;  %v3716_v47 = vsel %vm3681_vm5, %v3711_v62, %v3715_v4 }
 0x3d7   : > { %v2913_v46 = vpop.f32.mrf.mxu2 }
 0x3d8   : > { %v3115_v8 = vadd.f32 %v2913_v46, %v2216_v50  ;;  %v12775_v30 = vpop.f32.mrf.mxu0  ;;  %v2217_v61 = vpop.f32.mrf.mxu1  ;;  %v2441_v50 = vrot.slane %v12786_v48, 1 }
 0x3d9   : > { %v3435_v34 = vpop.f32.mrf.mxu3  ;;  %v2218_v16 = vadd.f32 %v2217_v61, %v12660_v1  ;;  %v3718_v61 = vrot.slane %v11354_v37, 2 }
 0x3da   : > { %v12779_v13 = vadd.f32 %v3435_v34, %v3115_v8  ;;  %v2442_v1 = vsel %vm2325_vm4, %v2439_v22, %v2441_v50 }
 0x3dc   : > { %17869 = vst [vmem:[#allocation238_spill] sm:$0xff] %v12779_v13 }
 0x3df   : > { %v2915_v21 = vpop.f32.mrf.mxu2 }
 0x3e0   : > { %v3116_v31 = vadd.f32 %v2915_v21, %v2218_v16  ;;  %v12782_v60 = vpop.f32.mrf.mxu0  ;;  %v2220_v46 = vpop.f32.mrf.mxu1 }
 0x3e1   : > { %v3437_v52 = vpop.f32.mrf.mxu3  ;;  %v2221_v8 = vadd.f32 %v2220_v46, %v12667_v39  ;;  %v12807_v46 = vld [vmem:[%s10997_s11 + $0x1d8] sm:$0xff] }
 0x3e2   : > { %v12789_v35 = vadd.f32 %v3437_v52, %v3116_v31  ;;  %v3717_v52 = vrot.slane %v11386_v20, 1 }
 0x3e3   : > { %10084 = vmatmul.msk.bf16.gmra.mxu0 %vm1276_vm3, %v3716_v47  ;;  %9924 = vmatmul.msk.bf16.gmra.mxu1 %vm1276_vm3, %v12717_v9 }
 0x3e4   : > { %17870 = vst [vmem:[#allocation239_spill] sm:$0xff] %v12789_v35  ;;  %9992 = vmatmul.msk.bf16.gmra.mxu2 %vm1276_vm3, %v2438_v38  ;;  %v3719_v38 = vor.u32 %v3718_v61, %v3717_v52  ;;  %v3722_v61 = vrot.slane %v11389_v33, 2 }
 0x3e6   : > { %10064 = vmatmul.msk.bf16.gmra.mxu3 %vm1276_vm3, %v2442_v1  ;;  %v3720_v47 = vsel %vm3681_vm5, %v3715_v4, %v3719_v38 }
 0x3e7   : > { %v2918_v62 = vpop.f32.mrf.mxu2 }
 0x3e8   : > { %v3117_v6 = vadd.f32 %v2918_v62, %v2221_v8  ;;  %v12798_v57 = vpop.f32.mrf.mxu0  ;;  %v2222_v34 = vpop.f32.mrf.mxu1  ;;  %v2443_v8 = vrot.slane %v12807_v46, 1 }
 0x3e9   : > { %v3440_v16 = vpop.f32.mrf.mxu3  ;;  %v2223_v22 = vadd.f32 %v2222_v34, %v12683_v5 }
 0x3ea   : > { %v12802_v9 = vadd.f32 %v3440_v16, %v3117_v6  ;;  %v2444_v5 = vsel %vm2325_vm4, %v2441_v50, %v2443_v8 }
 0x3ec   : > { %17871 = vst [vmem:[#allocation240_spill] sm:$0xff] %v12802_v9  ;;  %v17880_v9 = vld [vmem:[#allocation79_spill] sm:$0xff] }
 0x3ef   : > { %v2920_v21 = vpop.f32.mrf.mxu2 }
 0x3f0   : > { %v3118_v39 = vadd.f32 %v2920_v21, %v2223_v22  ;;  %v4189_v31 = vpop.f32.mrf.mxu0  ;;  %v2225_v62 = vpop.f32.mrf.mxu1 }
 0x3f1   : > { %v12811_v35 = vadd.f32 %v4189_v31, %v11493_v45  ;;  %v3442_v13 = vpop.f32.mrf.mxu3  ;;  %v2226_v4 = vadd.f32 %v2225_v62, %v12690_v24 }
 0x3f2   : > { %v12813_v43 = vadd.f32 %v3442_v13, %v3118_v39  ;;  %v3721_v13 = vrot.slane %v11421_v36, 1 }
 0x3f3   : > { %10085 = vmatmul.msk.bf16.gmra.mxu0 %vm1276_vm3, %v3720_v47  ;;  %9925 = vmatmul.msk.bf16.gmra.mxu1 %vm1276_vm3, %v12740_v29  ;;  %v12832_v47 = vld [vmem:[%s10997_s11 + $0x1e0] sm:$0xff] }
 0x3f4   : > { %17872 = vst [vmem:[#allocation241_spill] sm:$0xff] %v12813_v43  ;;  %9993 = vmatmul.msk.bf16.gmra.mxu2 %vm1276_vm3, %v2440_v40  ;;  %v3723_v50 = vor.u32 %v3722_v61, %v3721_v13  ;;  %v2445_v62 = vrot.slane %v12832_v47, 1 }
 0x3f6   : > { %10065 = vmatmul.msk.bf16.gmra.mxu3 %vm1276_vm3, %v2444_v5  ;;  %v3724_v31 = vsel %vm3681_vm5, %v3719_v38, %v3723_v50 }
 0x3f7   : > { %v2923_v6 = vpop.f32.mrf.mxu2 }
 0x3f8   : > { %v3119_v45 = vadd.f32 %v2923_v6, %v2226_v4  ;;  %v4191_v52 = vpop.f32.mrf.mxu0  ;;  %v2227_v34 = vpop.f32.mrf.mxu1  ;;  %v17874_v6 = vld [vmem:[#allocation75_spill] sm:$0xff] }
 0x3f9   : > { %v12825_v16 = vadd.f32 %v4191_v52, %v11502_v55  ;;  %v3445_v29 = vpop.f32.mrf.mxu3  ;;  %v2228_v24 = vadd.f32 %v2227_v34, %v12706_v11  ;;  %v2446_v11 = vsel %vm2325_vm4, %v2443_v8, %v2445_v62  ;;  %v17876_v34 = vld [vmem:[#allocation65_spill] sm:$0xff] }
 0x3fa   : > { %v12827_v40 = vadd.f32 %v3445_v29, %v3119_v45  ;;  %v3725_v29 = vrot.slane %v17876_v34, 1 }
 0x3fc   : > { %17873 = vst [vmem:[#allocation242_spill] sm:$0xff] %v12827_v40 }
 0x3ff   : > { %v2925_v22 = vpop.f32.mrf.mxu2 }
 0x400   : > { %v3120_v21 = vadd.f32 %v2925_v22, %v2228_v24  ;;  %v4194_v39 = vpop.f32.mrf.mxu0  ;;  %v2230_v4 = vpop.f32.mrf.mxu1  ;;  %v17877_v24 = vld [vmem:[#allocation58_spill] sm:$0xff] }
 0x401   : > { %v12836_v43 = vadd.f32 %v4194_v39, %v17874_v6  ;;  %v3447_v55 = vpop.f32.mrf.mxu3  ;;  %v2231_v38 = vadd.f32 %v2230_v4, %v12713_v19  ;;  %v3726_v22 = vrot.slane %v17877_v24, 2  ;;  %v17878_v39 = vld [vmem:[#allocation76_spill] sm:$0xff] }
 0x402   : > { %v12838_v52 = vadd.f32 %v3447_v55, %v3120_v21 }
 0x403   : > { %10086 = vmatmul.msk.bf16.gmra.mxu0 %vm1276_vm3, %v3724_v31  ;;  %9926 = vmatmul.msk.bf16.gmra.mxu1 %vm1276_vm3, %v12763_v25  ;;  %v3727_v8 = vor.u32 %v3726_v22, %v3725_v29  ;;  %v17882_v22 = vld [vmem:[#allocation71_spill] sm:$0xff] }
 0x404   : > { %17875 = vst [vmem:[#allocation75_spill] sm:$0xff] %v12838_v52  ;;  %9994 = vmatmul.msk.bf16.gmra.mxu2 %vm1276_vm3, %v2442_v1 }
 0x406   : > { %10066 = vmatmul.msk.bf16.gmra.mxu3 %vm1276_vm3, %v2446_v11 }
 0x407   : > { %v2928_v45 = vpop.f32.mrf.mxu2 }
 0x408   : > { %v3121_v13 = vadd.f32 %v2928_v45, %v2231_v38  ;;  %v4196_v61 = vpop.f32.mrf.mxu0  ;;  %v2232_v21 = vpop.f32.mrf.mxu1  ;;  %v3728_v38 = vsel %vm3681_vm5, %v3723_v50, %v3727_v8  ;;  %v12857_v45 = vld [vmem:[%s10997_s11 + $0x1e8] sm:$0xff] }
 0x409   : > { %v12850_v31 = vadd.f32 %v4196_v61, %v17878_v39  ;;  %v3450_v25 = vpop.f32.mrf.mxu3  ;;  %v2233_v19 = vadd.f32 %v2232_v21, %v12729_v7  ;;  %v2447_v52 = vrot.slane %v12857_v45, 1  ;;  %v3729_v21 = vrot.slane %v17882_v22, 1 }
 0x40a   : > { %v12852_v1 = vadd.f32 %v3450_v25, %v3121_v13  ;;  %v17883_v25 = vld [vmem:[#allocation66_spill] sm:$0xff] }
 0x40b   : > { %v2448_v7 = vsel %vm2325_vm4, %v2445_v62, %v2447_v52 }
 0x40c   : > { %17879 = vst [vmem:[#allocation65_spill] sm:$0xff] %v12852_v1 }
 0x40f   : > { %v2930_v4 = vpop.f32.mrf.mxu2 }
 0x410   : > { %v3122_v6 = vadd.f32 %v2930_v4, %v2233_v19  ;;  %v4199_v55 = vpop.f32.mrf.mxu0  ;;  %v2235_v40 = vpop.f32.mrf.mxu1  ;;  %v3730_v19 = vrot.slane %v17883_v25, 2 }
 0x411   : > { %v12861_v63 = vadd.f32 %v4199_v55, %v17880_v9  ;;  %v3452_v61 = vpop.f32.mrf.mxu3  ;;  %v2236_v50 = vadd.f32 %v2235_v40, %v12736_v49 }
 0x412   : > { %v12863_v39 = vadd.f32 %v3452_v61, %v3122_v6  ;;  %v17884_v6 = vld [vmem:[#allocation80_spill] sm:$0xff]  ;;  %v3731_v62 = vor.u32 %v3730_v19, %v3729_v21  ;;  %v17889_v19 = vld [vmem:[#allocation73_spill] sm:$0xff] }
 0x413   : > { %10087 = vmatmul.msk.bf16.gmra.mxu0 %vm1276_vm3, %v3728_v38  ;;  %9927 = vmatmul.msk.bf16.gmra.mxu1 %vm1276_vm3, %v12786_v48 }
 0x414   : > { %17881 = vst [vmem:[#allocation58_spill] sm:$0xff] %v12863_v39  ;;  %9995 = vmatmul.msk.bf16.gmra.mxu2 %vm1276_vm3, %v2444_v5 }
 0x416   : > { %10067 = vmatmul.msk.bf16.gmra.mxu3 %vm1276_vm3, %v2448_v7 }
 0x417   : > { %v2933_v13 = vpop.f32.mrf.mxu2 }
 0x418   : > { %v3123_v9 = vadd.f32 %v2933_v13, %v2236_v50  ;;  %v4201_v29 = vpop.f32.mrf.mxu0  ;;  %v2237_v4 = vpop.f32.mrf.mxu1  ;;  %v3732_v50 = vsel %vm3681_vm5, %v3727_v8, %v3731_v62  ;;  %v12882_v13 = vld [vmem:[%s10997_s11 + $0x1f0] sm:$0xff] }
 0x419   : > { %v12875_v55 = vadd.f32 %v4201_v29, %v17884_v6  ;;  %v3455_v48 = vpop.f32.mrf.mxu3  ;;  %v2238_v49 = vadd.f32 %v2237_v4, %v12752_v10  ;;  %v2449_v39 = vrot.slane %v12882_v13, 1  ;;  %v3733_v4 = vrot.slane %v17889_v19, 1 }
 0x41a   : > { %v12877_v5 = vadd.f32 %v3455_v48, %v3123_v9  ;;  %v17890_v48 = vld [vmem:[#allocation72_spill] sm:$0xff] }
 0x41b   : > { %v2450_v10 = vsel %vm2325_vm4, %v2447_v52, %v2449_v39 }
 0x41c   : > { %17885 = vst [vmem:[#allocation76_spill] sm:$0xff] %v12877_v5 }
 0x41f   : > { %v2935_v40 = vpop.f32.mrf.mxu2 }
 0x420   : > { %v3124_v38 = vadd.f32 %v2935_v40, %v2238_v49  ;;  %v4204_v61 = vpop.f32.mrf.mxu0  ;;  %v2240_v1 = vpop.f32.mrf.mxu1  ;;  %v3734_v49 = vrot.slane %v17890_v48, 2 }
 0x421   : > { %v12886_v56 = vadd.f32 %v4204_v61, %v17886_v54  ;;  %v3457_v29 = vpop.f32.mrf.mxu3  ;;  %v2241_v8 = vadd.f32 %v2240_v1, %v12759_v53 }
 0x422   : > { %v12888_v6 = vadd.f32 %v3457_v29, %v3124_v38  ;;  %v17891_v38 = vld [vmem:[#allocation84_spill] sm:$0xff]  ;;  %v3735_v52 = vor.u32 %v3734_v49, %v3733_v4  ;;  %v17897_v49 = vld [vmem:[#allocation77_spill] sm:$0xff] }
 0x423   : > { %17887 = vst [vmem:[#allocation79_spill] sm:$0xff] %v12886_v56  ;;  %10088 = vmatmul.msk.bf16.gmra.mxu0 %vm1276_vm3, %v3732_v50  ;;  %9928 = vmatmul.msk.bf16.gmra.mxu1 %vm1276_vm3, %v12807_v46 }
 0x424   : > { %17888 = vst [vmem:[#allocation71_spill] sm:$0xff] %v12888_v6  ;;  %9996 = vmatmul.msk.bf16.gmra.mxu2 %vm1276_vm3, %v2446_v11 }
 0x426   : > { %10068 = vmatmul.msk.bf16.gmra.mxu3 %vm1276_vm3, %v2450_v10 }
 0x427   : > { %v2938_v9 = vpop.f32.mrf.mxu2 }
 0x428   : > { %v3125_v54 = vadd.f32 %v2938_v9, %v2241_v8  ;;  %v4206_v21 = vpop.f32.mrf.mxu0  ;;  %v2242_v40 = vpop.f32.mrf.mxu1  ;;  %v3736_v8 = vsel %vm3681_vm5, %v3731_v62, %v3735_v52  ;;  %v12907_v9 = vld [vmem:[%s10997_s11 + $0x1f8] sm:$0xff] }
 0x429   : > { %v12900_v61 = vadd.f32 %v4206_v21, %v17891_v38  ;;  %v3460_v46 = vpop.f32.mrf.mxu3  ;;  %v2243_v53 = vadd.f32 %v2242_v40, %v12775_v30  ;;  %v2451_v6 = vrot.slane %v12907_v9, 1  ;;  %v3737_v40 = vrot.slane %v17897_v49, 1 }
 0x42a   : > { %v12902_v11 = vadd.f32 %v3460_v46, %v3125_v54  ;;  %v17898_v46 = vld [vmem:[#allocation74_spill] sm:$0xff] }
 0x42b   : > { %17892 = vst [vmem:[#allocation66_spill] sm:$0xff] %v12900_v61  ;;  %v2452_v30 = vsel %vm2325_vm4, %v2449_v39, %v2451_v6 }
 0x42c   : > { %17893 = vst [vmem:[#allocation80_spill] sm:$0xff] %v12902_v11 }
 0x42f   : > { %v2940_v1 = vpop.f32.mrf.mxu2 }
 0x430   : > { %v3126_v50 = vadd.f32 %v2940_v1, %v2243_v53  ;;  %v4209_v29 = vpop.f32.mrf.mxu0  ;;  %v2245_v5 = vpop.f32.mrf.mxu1  ;;  %v3738_v53 = vrot.slane %v17898_v46, 2 }
 0x431   : > { %v12911_v17 = vadd.f32 %v4209_v29, %v17894_v23  ;;  %v3462_v21 = vpop.f32.mrf.mxu3  ;;  %v2246_v62 = vadd.f32 %v2245_v5, %v12782_v60 }
 0x432   : > { %v12913_v38 = vadd.f32 %v3462_v21, %v3126_v50  ;;  %v17899_v50 = vld [vmem:[#allocation88_spill] sm:$0xff]  ;;  %v3739_v39 = vor.u32 %v3738_v53, %v3737_v40 }
 0x433   : > { %17895 = vst [vmem:[#allocation83_spill] sm:$0xff] %v12911_v17  ;;  %10089 = vmatmul.msk.bf16.gmra.mxu0 %vm1276_vm3, %v3736_v8  ;;  %9929 = vmatmul.msk.bf16.gmra.mxu1 %vm1276_vm3, %v12832_v47  ;;  %v17912_v17 = vld [vmem:[#allocation95_spill] sm:$0xff] }
 0x434   : > { %17896 = vst [vmem:[#allocation73_spill] sm:$0xff] %v12913_v38  ;;  %9997 = vmatmul.msk.bf16.gmra.mxu2 %vm1276_vm3, %v2448_v7 }
 0x436   : > { %10069 = vmatmul.msk.bf16.gmra.mxu3 %vm1276_vm3, %v2452_v30 }
 0x437   : > { %v2943_v54 = vpop.f32.mrf.mxu2 }
 0x438   : > { %v3127_v23 = vadd.f32 %v2943_v54, %v2246_v62  ;;  %v4211_v4 = vpop.f32.mrf.mxu0  ;;  %v2247_v1 = vpop.f32.mrf.mxu1  ;;  %v3740_v62 = vsel %vm3681_vm5, %v3735_v52, %v3739_v39  ;;  %v12932_v54 = vld [vmem:[%s10997_s11 + $0x200] sm:$0xff]  ;;  %v17905_v52 = vld [vmem:[#allocation38_spill] sm:$0xff] }
 0x439   : > { %v12925_v29 = vadd.f32 %v4211_v4, %v17899_v50  ;;  %v3465_v47 = vpop.f32.mrf.mxu3  ;;  %v2248_v60 = vadd.f32 %v2247_v1, %v12798_v57  ;;  %v2453_v38 = vrot.slane %v12932_v54, 1  ;;  %v17906_v1 = vld [vmem:[#allocation81_spill] sm:$0xff] }
 0x43a   : > { %v12927_v7 = vadd.f32 %v3465_v47, %v3127_v23  ;;  %v3741_v47 = vrot.slane %v17906_v1, 1 }
 0x43b   : > { %17900 = vst [vmem:[#allocation72_spill] sm:$0xff] %v12925_v29  ;;  %v2454_v57 = vsel %vm2325_vm4, %v2451_v6, %v2453_v38 }
 0x43c   : > { %17901 = vst [vmem:[#allocation84_spill] sm:$0xff] %v12927_v7 }
 0x43f   : > { %v2945_v5 = vpop.f32.mrf.mxu2 }
 0x440   : > { %v3128_v8 = vadd.f32 %v2945_v5, %v2248_v60  ;;  %v4214_v21 = vpop.f32.mrf.mxu0  ;;  %v2250_v11 = vpop.f32.mrf.mxu1  ;;  %v17907_v60 = vld [vmem:[#allocation78_spill] sm:$0xff] }
 0x441   : > { %v12936_v14 = vadd.f32 %v4214_v21, %v17902_v27  ;;  %v3467_v4 = vpop.f32.mrf.mxu3  ;;  %v2251_v23 = vadd.f32 %v2250_v11, %v17905_v52  ;;  %v3742_v5 = vrot.slane %v17907_v60, 2  ;;  %v17908_v21 = vld [vmem:[#allocation92_spill] sm:$0xff] }
 0x442   : > { %v12938_v50 = vadd.f32 %v3467_v4, %v3128_v8  ;;  %v17911_v4 = vld [vmem:[#allocation40_spill] sm:$0xff] }
 0x443   : > { %17903 = vst [vmem:[#allocation87_spill] sm:$0xff] %v12936_v14  ;;  %10090 = vmatmul.msk.bf16.gmra.mxu0 %vm1276_vm3, %v3740_v62  ;;  %9930 = vmatmul.msk.bf16.gmra.mxu1 %vm1276_vm3, %v12857_v45  ;;  %v3743_v6 = vor.u32 %v3742_v5, %v3741_v47 }
 0x444   : > { %17904 = vst [vmem:[#allocation77_spill] sm:$0xff] %v12938_v50  ;;  %9998 = vmatmul.msk.bf16.gmra.mxu2 %vm1276_vm3, %v2450_v10 }
 0x446   : > { %10070 = vmatmul.msk.bf16.gmra.mxu3 %vm1276_vm3, %v2454_v57 }
 0x447   : > { %v2948_v40 = vpop.f32.mrf.mxu2 }
 0x448   : > { %v3129_v27 = vadd.f32 %v2948_v40, %v2251_v23  ;;  %v4216_v53 = vpop.f32.mrf.mxu0  ;;  %v2252_v8 = vpop.f32.mrf.mxu1  ;;  %v3744_v23 = vsel %vm3681_vm5, %v3739_v39, %v3743_v6  ;;  %v12957_v40 = vld [vmem:[%s10997_s11 + $0x208] sm:$0xff] }
 0x449   : > { %v12950_v62 = vadd.f32 %v4216_v53, %v17908_v21  ;;  %v3470_v45 = vpop.f32.mrf.mxu3  ;;  %v2253_v11 = vadd.f32 %v2252_v8, %v17911_v4  ;;  %v2455_v14 = vrot.slane %v12957_v40, 1  ;;  %v17916_v8 = vld [vmem:[#allocation85_spill] sm:$0xff] }
 0x44a   : > { %v12952_v10 = vadd.f32 %v3470_v45, %v3129_v27  ;;  %v17915_v27 = vld [vmem:[#allocation43_spill] sm:$0xff]  ;;  %v17917_v45 = vld [vmem:[#allocation82_spill] sm:$0xff] }
 0x44b   : > { %17909 = vst [vmem:[#allocation88_spill] sm:$0xff] %v12950_v62  ;;  %v2456_v39 = vsel %vm2325_vm4, %v2453_v38, %v2455_v14  ;;  %v3746_v4 = vrot.slane %v17917_v45, 2  ;;  %v17922_v45 = vld [vmem:[#allocation99_spill] sm:$0xff] }
 0x44c   : > { %17910 = vst [vmem:[#allocation91_spill] sm:$0xff] %v12952_v10 }
 0x44f   : > { %v2950_v52 = vpop.f32.mrf.mxu2 }
 0x450   : > { %v3130_v50 = vadd.f32 %v2950_v52, %v2253_v11  ;;  %v4219_v7 = vpop.f32.mrf.mxu0  ;;  %v2255_v29 = vpop.f32.mrf.mxu1  ;;  %v17918_v52 = vld [vmem:[#allocation96_spill] sm:$0xff] }
 0x451   : > { %v12961_v60 = vadd.f32 %v4219_v7, %v17912_v17  ;;  %v3472_v53 = vpop.f32.mrf.mxu3  ;;  %v2256_v47 = vadd.f32 %v2255_v29, %v17915_v27 }
 0x452   : > { %v12963_v21 = vadd.f32 %v3472_v53, %v3130_v50  ;;  %v3745_v50 = vrot.slane %v17916_v8, 1  ;;  %v17921_v53 = vld [vmem:[#allocation46_spill] sm:$0xff] }
 0x453   : > { %17913 = vst [vmem:[#allocation38_spill] sm:$0xff] %v12961_v60  ;;  %10091 = vmatmul.msk.bf16.gmra.mxu0 %vm1276_vm3, %v3744_v23  ;;  %9931 = vmatmul.msk.bf16.gmra.mxu1 %vm1276_vm3, %v12882_v13 }
 0x454   : > { %17914 = vst [vmem:[#allocation92_spill] sm:$0xff] %v12963_v21  ;;  %9999 = vmatmul.msk.bf16.gmra.mxu2 %vm1276_vm3, %v2452_v30  ;;  %v3747_v38 = vor.u32 %v3746_v4, %v3745_v50 }
 0x456   : > { %10071 = vmatmul.msk.bf16.gmra.mxu3 %vm1276_vm3, %v2456_v39 }
 0x457   : > { %v2953_v5 = vpop.f32.mrf.mxu2 }
 0x458   : > { %v3131_v17 = vadd.f32 %v2953_v5, %v2256_v47  ;;  %v4221_v7 = vpop.f32.mrf.mxu0  ;;  %v2257_v11 = vpop.f32.mrf.mxu1  ;;  %v3748_v47 = vsel %vm3681_vm5, %v3743_v6, %v3747_v38  ;;  %v12982_v5 = vld [vmem:[%s10997_s11 + $0x210] sm:$0xff] }
 0x459   : > { %v12975_v23 = vadd.f32 %v4221_v7, %v17918_v52  ;;  %v3475_v13 = vpop.f32.mrf.mxu3  ;;  %v2258_v29 = vadd.f32 %v2257_v11, %v17921_v53  ;;  %v2457_v60 = vrot.slane %v12982_v5, 1  ;;  %v17926_v11 = vld [vmem:[#allocation89_spill] sm:$0xff] }
 0x45a   : > { %v12977_v30 = vadd.f32 %v3475_v13, %v3131_v17  ;;  %v17925_v17 = vld [vmem:[#allocation49_spill] sm:$0xff]  ;;  %v17927_v13 = vld [vmem:[#allocation86_spill] sm:$0xff] }
 0x45b   : > { %17919 = vst [vmem:[#allocation40_spill] sm:$0xff] %v12975_v23  ;;  %v2458_v6 = vsel %vm2325_vm4, %v2455_v14, %v2457_v60  ;;  %v3750_v53 = vrot.slane %v17927_v13, 2  ;;  %v17932_v13 = vld [vmem:[#allocation103_spill] sm:$0xff] }
 0x45c   : > { %17920 = vst [vmem:[#allocation95_spill] sm:$0xff] %v12977_v30 }
 0x45f   : > { %v2955_v27 = vpop.f32.mrf.mxu2 }
 0x460   : > { %v3132_v21 = vadd.f32 %v2955_v27, %v2258_v29  ;;  %v4224_v10 = vpop.f32.mrf.mxu0  ;;  %v2260_v62 = vpop.f32.mrf.mxu1  ;;  %v17928_v27 = vld [vmem:[#allocation100_spill] sm:$0xff] }
 0x461   : > { %v12986_v8 = vadd.f32 %v4224_v10, %v17922_v45  ;;  %v3477_v7 = vpop.f32.mrf.mxu3  ;;  %v2261_v50 = vadd.f32 %v2260_v62, %v17925_v17 }
 0x462   : > { %v12988_v52 = vadd.f32 %v3477_v7, %v3132_v21  ;;  %v3749_v21 = vrot.slane %v17926_v11, 1  ;;  %v17931_v7 = vld [vmem:[#allocation52_spill] sm:$0xff]  ;;  %v17942_v11 = vld [vmem:[#allocation107_spill] sm:$0xff] }
 0x463   : > { %17923 = vst [vmem:[#allocation43_spill] sm:$0xff] %v12986_v8  ;;  %10092 = vmatmul.msk.bf16.gmra.mxu0 %vm1276_vm3, %v3748_v47  ;;  %9932 = vmatmul.msk.bf16.gmra.mxu1 %vm1276_vm3, %v12907_v9 }
 0x464   : > { %17924 = vst [vmem:[#allocation96_spill] sm:$0xff] %v12988_v52  ;;  %10000 = vmatmul.msk.bf16.gmra.mxu2 %vm1276_vm3, %v2454_v57  ;;  %v3751_v14 = vor.u32 %v3750_v53, %v3749_v21  ;;  %v17935_v21 = vld [vmem:[#allocation55_spill] sm:$0xff] }
 0x466   : > { %10072 = vmatmul.msk.bf16.gmra.mxu3 %vm1276_vm3, %v2458_v6 }
 0x467   : > { %v2958_v4 = vpop.f32.mrf.mxu2 }
 0x468   : > { %v3133_v10 = vadd.f32 %v2958_v4, %v2261_v50  ;;  %v4226_v45 = vpop.f32.mrf.mxu0  ;;  %v2262_v29 = vpop.f32.mrf.mxu1  ;;  %v3752_v50 = vsel %vm3681_vm5, %v3747_v38, %v3751_v14  ;;  %v13007_v4 = vld [vmem:[%s10997_s11 + $0x218] sm:$0xff] }
 0x469   : > { %v13000_v47 = vadd.f32 %v4226_v45, %v17928_v27  ;;  %v3480_v9 = vpop.f32.mrf.mxu3  ;;  %v2263_v62 = vadd.f32 %v2262_v29, %v17931_v7  ;;  %v13010_v8 = vrot.slane %v13007_v4, 1  ;;  %v17936_v29 = vld [vmem:[#allocation93_spill] sm:$0xff]  ;;  %v17937_v7 = vld [vmem:[#allocation90_spill] sm:$0xff] }
 0x46a   : > { %v13002_v57 = vadd.f32 %v3480_v9, %v3133_v10  ;;  %v3753_v9 = vrot.slane %v17936_v29, 1 }
 0x46b   : > { %17929 = vst [vmem:[#allocation46_spill] sm:$0xff] %v13000_v47  ;;  %v13023_v38 = vsel %vm2325_vm4, %v2457_v60, %v13010_v8 }
 0x46c   : > { %17930 = vst [vmem:[#allocation99_spill] sm:$0xff] %v13002_v57 }
 0x46f   : > { %v2960_v17 = vpop.f32.mrf.mxu2 }
 0x470   : > { %v3134_v52 = vadd.f32 %v2960_v17, %v2263_v62  ;;  %v4229_v30 = vpop.f32.mrf.mxu0  ;;  %v2265_v23 = vpop.f32.mrf.mxu1  ;;  %v3754_v62 = vrot.slane %v17937_v7, 2  ;;  %v17938_v17 = vld [vmem:[#allocation104_spill] sm:$0xff] }
 0x471   : > { %v13013_v45 = vadd.f32 %v4229_v30, %v17932_v13  ;;  %v3482_v27 = vpop.f32.mrf.mxu3  ;;  %v2266_v53 = vadd.f32 %v2265_v23, %v17935_v21  ;;  %v17941_v23 = vld [vmem:[#allocation59_spill] sm:$0xff] }
 0x472   : > { %v13015_v10 = vadd.f32 %v3482_v27, %v3134_v52  ;;  %v3755_v27 = vor.u32 %v3754_v62, %v3753_v9 }
 0x473   : > { %17933 = vst [vmem:[#allocation49_spill] sm:$0xff] %v13013_v45  ;;  %10093 = vmatmul.msk.bf16.gmra.mxu0 %vm1276_vm3, %v3752_v50  ;;  %9933 = vmatmul.msk.bf16.gmra.mxu1 %vm1276_vm3, %v12932_v54 }
 0x474   : > { %17934 = vst [vmem:[#allocation100_spill] sm:$0xff] %v13015_v10  ;;  %10001 = vmatmul.msk.bf16.gmra.mxu2 %vm1276_vm3, %v2456_v39 }
 0x476   : > { %10073 = vmatmul.msk.bf16.gmra.mxu3 %vm1276_vm3, %v13023_v38 }
 0x477   : > { %v2963_v30 = vpop.f32.mrf.mxu2 }
 0x478   : > { %v3135_v52 = vadd.f32 %v2963_v30, %v2266_v53  ;;  %v4231_v13 = vpop.f32.mrf.mxu0  ;;  %v2267_v54 = vpop.f32.mrf.mxu1  ;;  %v3756_v53 = vsel %vm3681_vm5, %v3751_v14, %v3755_v27  ;;  %v10697_v30 = vld [vmem:[%s10997_s11 + $0x220] sm:$0xff]   ;;  %v17945_v14 = vld [vmem:[#allocation62_spill] sm:$0xff] }
 0x479   : > { %v13031_v39 = vadd.f32 %v4231_v13, %v17938_v17  ;;  %v3485_v50 = vpop.f32.mrf.mxu3  ;;  %v2268_v21 = vadd.f32 %v2267_v54, %v17941_v23  ;;  %v3170_v47 = vrot.slane %v10697_v30, 1  ;;  %v17950_v23 = vld [vmem:[#allocation27_spill] sm:$0xff] }
 0x47a   : > { %v13033_v60 = vadd.f32 %v3485_v50, %v3135_v52  ;;  %v17948_v50 = vld [vmem:[#allocation108_spill] sm:$0xff] }
 0x47b   : > { %17939 = vst [vmem:[#allocation52_spill] sm:$0xff] %v13031_v39  ;;  %v17953_v39 = vld [vmem:[#allocation67_spill] sm:$0xff] }
 0x47c   : > { %17940 = vst [vmem:[#allocation103_spill] sm:$0xff] %v13033_v60 }
 0x47f   : > { %v2965_v10 = vpop.f32.mrf.mxu2 }
 0x480   : > { %v3136_v57 = vadd.f32 %v2965_v10, %v2268_v21  ;;  %v4234_v45 = vpop.f32.mrf.mxu0  ;;  %v2270_v29 = vpop.f32.mrf.mxu1  ;;  %v3171_v10 = vsel %vm2325_vm4, %v13010_v8, %v3170_v47  ;;  %v4807_v21 = vshrl.u32 %v17950_v23, 16 }
 0x481   : > { %v13039_v7 = vadd.f32 %v4234_v45, %v17942_v11  ;;  %v3487_v1 = vpop.f32.mrf.mxu3  ;;  %v2271_v52 = vadd.f32 %v2270_v29, %v17945_v14  ;;  %v17946_v45 = vld [vmem:[#allocation97_spill] sm:$0xff]  ;;  %v17951_v29 = vunpack.c.h.b16 %v17950_v23 }
 0x482   : > { %v13041_v13 = vadd.f32 %v3487_v1, %v3136_v57  ;;  %v3757_v9 = vrot.slane %v17946_v45, 1  ;;  %v17947_v1 = vld [vmem:[#allocation94_spill] sm:$0xff]  ;;  %v4809_v60 = vrot.slane %v4807_v21, 3 }
 0x483   : > { %17943 = vst [vmem:[#allocation55_spill] sm:$0xff] %v13039_v7  ;;  %10094 = vmatmul.msk.bf16.gmra.mxu0 %vm1276_vm3, %v3756_v53  ;;  %9934 = vmatmul.msk.bf16.gmra.mxu1 %vm1276_vm3, %v12957_v40  ;;  %v3758_v57 = vrot.slane %v17947_v1, 2  ;;  %v4810_v53 = vshll.u32 %v17950_v23, 16  ;;  %v5523_v30 = vpack.c.b16 %v17951_v29, %v17951_v29 }
 0x484   : > { %17944 = vst [vmem:[#allocation104_spill] sm:$0xff] %v13041_v13  ;;  %10002 = vmatmul.msk.bf16.gmra.mxu2 %vm1276_vm3, %v2458_v6  ;;  %v10526_v13 = vld [vmem:[%s10997_s11 + $0x228] sm:$0xff] }
 0x485   : > { %v3759_v14 = vor.u32 %v3758_v57, %v3757_v9  ;;  %v6317_v7 = vshll.u32 %v5523_v30, 16  ;;  %v3172_v23 = vrot.slane %v10526_v13, 1  ;;  %v17956_v13 = vld [vmem:[#allocation39_spill] sm:$0xff] }
 0x486   : > { %10074 = vmatmul.msk.bf16.gmra.mxu3 %vm1276_vm3, %v3171_v10 }
 0x487   : > { %v2968_v11 = vpop.f32.mrf.mxu2  ;;  %v6319_v45 = vrot.slane %v6317_v7, 3  ;;  %v3760_v56 = vsel %vm3681_vm5, %v3755_v27, %v3759_v14  ;;  %v10618_v27 = vld [vmem:[%s10997_s11 + $0x230] sm:$0xff]  }
 0x488   : > { %v3137_v62 = vadd.f32 %v2968_v11, %v2271_v52  ;;  %v4236_v54 = vpop.f32.mrf.mxu0  ;;  %v2272_v17 = vpop.f32.mrf.mxu1  ;;  %v4812_v52 = vrot.slane %v4810_v53, 4  ;;  %v6314_v11 = vshrl.u32 %v5523_v30, 16  ;;  %v17954_v53 = vld [vmem:[#allocation111_spill] sm:$0xff] }
 0x489   : > { %v13054_v40 = vadd.f32 %v4236_v54, %v17948_v50  ;;  %v3490_v6 = vpop.f32.mrf.mxu3  ;;  %v2273_v54 = vadd.f32 %v2272_v17, %v17953_v39 }
 0x48a   : > { %v13061_v10 = vadd.f32 %v3490_v6, %v3137_v62  ;;  %v4813_v50 = vor.u32 %v4812_v52, %v4809_v60  ;;  %v6316_v1 = vrot.slane %v6314_v11, 2  ;;  %v10535_v11 = vunpack.c.l.b16 %v10618_v27 }
 0x48b   : > { %17949 = vst [vmem:[#allocation59_spill] sm:$0xff] %v13054_v40  ;;  %v5524_v40 = vrot.slane %v5523_v30, 1 }
 0x48c   : > { %17952 = vst [vmem:[#allocation107_spill] sm:$0xff] %v13061_v10  ;;  %v5019_v9 = vand.u32 %v4813_v50, %v11006_v12  ;;  %v6320_v6 = vor.u32 %v6319_v45, %v6316_v1 }
 0x48d   : > { %v5535_v57 = vand.u32 %v5524_v40, %v11006_v12  ;;  %v17957_v40 = vld [vmem:[#allocation101_spill] sm:$0xff] }
 0x48e   : > { %5028 = vmatpush.bf16.msra.mxu1 %v5019_v9  ;;  %v6526_v7 = vand.u32 %v6320_v6, %v11006_v12  ;;  %v3761_v30 = vrot.slane %v17957_v40, 1  ;;  %v13090_v9 = vpack.c.b16 %v10535_v11, %v10535_v11  ;;  %v17966_v11 = vld [vmem:[#allocation45_spill] sm:$0xff] }
 0x48f   : > { %v2970_v61 = vpop.f32.mrf.mxu2  ;;  %5544 = vmatpush.bf16.msra.mxu2 %v5535_v57  ;;  %v17962_v57 = vld [vmem:[#allocation34_spill] sm:$0xff] }
 0x490   : > { %v3138_v46 = vadd.f32 %v2970_v61, %v2273_v54  ;;  %v4239_v62 = vpop.f32.mrf.mxu0  ;;  %v2275_v21 = vpop.f32.mrf.mxu1  ;;  %v3173_v61 = vsel %vm2325_vm4, %v3170_v47, %v3172_v23  ;;  %6535 = vmatpush.bf16.msra.mxu3 %v6526_v7  ;;  %v17959_v54 = vld [vmem:[#allocation112_spill] sm:$0xff]  ;;  %17961 = vst [vmem:[#allocation27_spill] sm:$0xff] %v13090_v9  ;;  %v2461_v6 = vrot.slane %v17962_v57, 1  ;;  %v3174_v27 = vrot.slane %v13090_v9, 1  ;;  %v17968_v57 = vld [vmem:[#allocation102_spill] sm:$0xff] }
 0x491   : > { %v13069_v29 = vadd.f32 %v4239_v62, %v17954_v53  ;;  %v3492_v39 = vpop.f32.mrf.mxu3  ;;  %v2276_v45 = vadd.f32 %v2275_v21, %v17956_v13  ;;  %v17963_v21 = vld [vmem:[#allocation42_spill] sm:$0xff]  ;;  %v17971_v9 = vld [vmem:[#allocation48_spill] sm:$0xff] }
 0x492   : > { %v13072_v60 = vadd.f32 %v3492_v39, %v3138_v46 }
 0x493   : > { %10095 = vmatmul.msk.bf16.gmra.mxu0 %vm1276_vm3, %v3760_v56  ;;  %9935 = vmatmul.msk.bf16.gmra.mxu1 %vm1276_vm3, %v12982_v5  ;;  %v17958_v56 = vld [vmem:[#allocation98_spill] sm:$0xff] }
 0x494   : > { %17955 = vst [vmem:[#allocation62_spill] sm:$0xff] %v13072_v60  ;;  %10003 = vmatmul.msk.bf16.gmra.mxu2 %vm1276_vm3, %v13023_v38  ;;  %v3762_v52 = vrot.slane %v17958_v56, 2 }
 0x496   : > { %10075 = vmatmul.msk.bf16.gmra.mxu3 %vm1276_vm3, %v3173_v61  ;;  %v3763_v62 = vor.u32 %v3762_v52, %v3761_v30 }
 0x497   : > { %v2973_v1 = vpop.f32.mrf.mxu2 }
 0x498   : > { %v3139_v17 = vadd.f32 %v2973_v1, %v2276_v45  ;;  %v4241_v46 = vpop.f32.mrf.mxu0  ;;  %v2277_v5 = vpop.f32.mrf.mxu1  ;;  %v3764_v13 = vsel %vm3681_vm5, %v3759_v14, %v3763_v62  ;;  %v17964_v1 = vld [vmem:[#allocation115_spill] sm:$0xff]  ;;  %v3175_v14 = vsel %vm2325_vm4, %v3172_v23, %v3174_v27  ;;  %v6023_v27 = vrot.slane %v11192_v15, 2 }
 0x499   : > { %v13086_v50 = vadd.f32 %v4241_v46, %v17959_v54  ;;  %v3495_v38 = vpop.f32.mrf.mxu3  ;;  %v2278_v53 = vadd.f32 %v2277_v5, %v17963_v21 }
 0x49a   : > { %v13088_v47 = vadd.f32 %v3495_v38, %v3139_v17  ;;  %v2462_v17 = vsel %vm2325_vm4, %v13010_v8, %v2461_v6  ;;  %v17967_v38 = vld [vmem:[#allocation105_spill] sm:$0xff]  ;;  %v3766_v6 = vrot.slane %v17968_v57, 2 }
 0x49b   : > { %v3765_v8 = vrot.slane %v17967_v38, 1 }
 0x49c   : > { %17960 = vst [vmem:[#allocation108_spill] sm:$0xff] %v13088_v47 }
 0x49f   : > { %v2975_v39 = vpop.f32.mrf.mxu2 }
 0x4a0   : > { %v3140_v7 = vadd.f32 %v2975_v39, %v2278_v53  ;;  %v4244_v61 = vpop.f32.mrf.mxu0  ;;  %v2280_v45 = vpop.f32.mrf.mxu1  ;;  %v17969_v39 = vld [vmem:[#allocation116_spill] sm:$0xff] }
 0x4a1   : > { %v13097_v46 = vadd.f32 %v4244_v61, %v17964_v1  ;;  %v3497_v30 = vpop.f32.mrf.mxu3  ;;  %v2281_v5 = vadd.f32 %v2280_v45, %v17966_v11  ;;  %v6024_v45 = vrot.slane %v11139_v59, 3  ;;  %v6026_v1 = vrot.slane %v11227_v28, 2  ;;  %v10699_v11 = vld [vmem:[%s10997_s11 + $0x18] sm:$0xff] }
 0x4a2   : > { %v13101_v52 = vadd.f32 %v3497_v30, %v3140_v7  ;;  %v10698_v30 = vld [vmem:[%s10997_s11 + $0x10] sm:$0xff] }
 0x4a3   : > { %10096 = vmatmul.msk.bf16.gmra.mxu0 %vm1276_vm3, %v3764_v13  ;;  %9936 = vmatmul.msk.bf16.gmra.mxu1 %vm1276_vm3, %v13007_v4  ;;  %v3767_v13 = vor.u32 %v3766_v6, %v3765_v8 }
 0x4a4   : > { %17965 = vst [vmem:[#allocation67_spill] sm:$0xff] %v13101_v52  ;;  %10004 = vmatmul.msk.bf16.gmra.mxu2 %vm1276_vm3, %v2462_v17  ;;  %v6027_v17 = vrot.slane %v11195_v44, 3  ;;  %v17972_v44 = vld [vmem:[#allocation119_spill] sm:$0xff] }
 0x4a5   : > { %v3768_v59 = vsel %vm3681_vm5, %v3763_v62, %v3767_v13 }
 0x4a6   : > { %10076 = vmatmul.msk.bf16.gmra.mxu3 %vm1276_vm3, %v3175_v14  ;;  %v4666_v14 = vrot.slane %v10698_v30, 2  ;;  %v6028_v28 = vor.u32 %v6027_v17, %v6026_v1 }
 0x4a7   : > { %v2978_v54 = vpop.f32.mrf.mxu2 }
 0x4a8   : > { %v3141_v21 = vadd.f32 %v2978_v54, %v2281_v5  ;;  %v4246_v53 = vpop.f32.mrf.mxu0  ;;  %v2282_v4 = vpop.f32.mrf.mxu1  ;;  %v4667_v5 = vrot.slane %v10699_v11, 2  ;;  %v10700_v54 = vld [vmem:[%s10997_s11 + $0x20] sm:$0xff] }
 0x4a9   : > { %v13113_v7 = vadd.f32 %v4246_v53, %v17969_v39  ;;  %v3500_v23 = vpop.f32.mrf.mxu3  ;;  %v4669_v52 = vrot.slane %v10700_v54, 2  ;;  %v10701_v53 = vld [vmem:[%s10997_s11 + $0x28] sm:$0xff] }
 0x4aa   : > { %v13115_v61 = vadd.f32 %v3500_v23, %v3141_v21  ;;  %v4671_v39 = vrot.slane %v10701_v53, 2  ;;  %v2283_v21 = vadd.f32 %v2282_v4, %v17971_v9  ;;  %v6025_v23 = vor.u32 %v6024_v45, %v6023_v27  ;;  %v17975_v4 = vld [vmem:[#allocation51_spill] sm:$0xff] }
 0x4ab   : > { %v4668_v30 = vsel %vm4665_vm6, %v4666_v14, %v4667_v5  ;;  %v17976_v14 = vld [vmem:[#allocation109_spill] sm:$0xff] }
 0x4ac   : > { %17970 = vst [vmem:[#allocation111_spill] sm:$0xff] %v13115_v61  ;;  %v13132_v11 = vsel %vm4665_vm6, %v4669_v52, %v4671_v39  ;;  %v6029_v62 = vsel %vm6022_vm7, %v6025_v23, %v6028_v28  ;;  %v3769_v53 = vrot.slane %v17976_v14, 1  ;;  %v6030_v23 = vrot.slane %v11250_v51, 2 }
 0x4af   : > { %v2980_v8 = vpop.f32.mrf.mxu2 }
 0x4b0   : > { %v3142_v6 = vadd.f32 %v2980_v8, %v2283_v21  ;;  %v4249_v15 = vpop.f32.mrf.mxu0  ;;  %v2285_v61 = vpop.f32.mrf.mxu1  ;;  %v17977_v21 = vld [vmem:[#allocation106_spill] sm:$0xff] }
 0x4b1   : > { %v13128_v47 = vadd.f32 %v4249_v15, %v17972_v44  ;;  %v3502_v54 = vpop.f32.mrf.mxu3  ;;  %v2286_v27 = vadd.f32 %v2285_v61, %v17975_v4  ;;  %v3770_v8 = vrot.slane %v17977_v21, 2  ;;  %v17978_v15 = vld [vmem:[#allocation120_spill] sm:$0xff]  ;;  %v6031_v61 = vrot.slane %v11230_v32, 3 }
 0x4b2   : > { %v13134_v9 = vadd.f32 %v3502_v54, %v3142_v6 }
 0x4b3   : > { %17973 = vst [vmem:[#allocation39_spill] sm:$0xff] %v13128_v47  ;;  %10097 = vmatmul.msk.bf16.gmra.mxu0 %vm1276_vm3, %v3768_v59  ;;  %10145 = vmatmul.msk.bf16.vlgmr.msra.gmra.mxu1 %vm1276_vm3, %v4668_v30  ;;  %v3771_v54 = vor.u32 %v3770_v8, %v3769_v53  ;;  %v6032_v47 = vor.u32 %v6031_v61, %v6030_v23  ;;  %v17985_v8 = vld [vmem:[#allocation113_spill] sm:$0xff]  ;;  %v17987_v23 = vld [vmem:[#allocation124_spill] sm:$0xff] }
 0x4b4   : > { %17974 = vst [vmem:[#allocation101_spill] sm:$0xff] %v13134_v9  ;;  %10217 = vmatmul.msk.bf16.vlgmr.msra.gmra.mxu2 %vm1276_vm3, %v13132_v11 }
 0x4b5   : > { %v3772_v12 = vsel %vm3681_vm5, %v3767_v13, %v3771_v54  ;;  %v6033_v13 = vsel %vm6022_vm7, %v6028_v28, %v6032_v47  ;;  %v6034_v28 = vrot.slane %v11270_v0, 2 }
 0x4b6   : > { %10285 = vmatmul.msk.bf16.vlgmr.msra.gmra.mxu3 %vm1276_vm3, %v6029_v62  ;;  %v10702_v62 = vld [vmem:[%s10997_s11 + $0x30] sm:$0xff] }
 0x4b7   : > { %v2983_v45 = vpop.f32.mrf.mxu2  ;;  %v4673_v4 = vrot.slane %v10702_v62, 2 }
 0x4b8   : > { %v3143_v1 = vadd.f32 %v2983_v45, %v2286_v27  ;;  %v4251_v17 = vpop.f32.mrf.mxu0  ;;  %v2287_v6 = vpop.f32.mrf.mxu1  ;;  %v17981_v27 = vld [vmem:[#allocation54_spill] sm:$0xff] }
 0x4b9   : > { %v13146_v59 = vadd.f32 %v4251_v17, %v17978_v15  ;;  %v3505_v44 = vpop.f32.mrf.mxu3  ;;  %v2288_v45 = vadd.f32 %v2287_v6, %v17981_v27  ;;  %v17982_v15 = vld [vmem:[#allocation123_spill] sm:$0xff]  ;;  %v13160_v51 = vsel %vm4665_vm6, %v4671_v39, %v4673_v4  ;;  %v17986_v6 = vld [vmem:[#allocation110_spill] sm:$0xff] }
 0x4ba   : > { %v13148_v30 = vadd.f32 %v3505_v44, %v3143_v1  ;;  %v4670_v1 = vsel %vm4665_vm6, %v4667_v5, %v4669_v52  ;;  %v3774_v44 = vrot.slane %v17986_v6, 2 }
 0x4bb   : > { %17979 = vst [vmem:[#allocation98_spill] sm:$0xff] %v13146_v59 }
 0x4bc   : > { %17980 = vst [vmem:[#allocation112_spill] sm:$0xff] %v13148_v30 }
 0x4bf   : > { %v2985_v9 = vpop.f32.mrf.mxu2 }
 0x4c0   : > { %v3144_v60 = vadd.f32 %v2985_v9, %v2288_v45  ;;  %v4254_v10 = vpop.f32.mrf.mxu0  ;;  %v2290_v17 = vpop.f32.mrf.mxu1 }
 0x4c1   : > { %v13156_v59 = vadd.f32 %v4254_v10, %v17982_v15  ;;  %v3507_v32 = vpop.f32.mrf.mxu3  ;;  %v17984_v10 = vld [vmem:[#allocation57_spill] sm:$0xff]  ;;  %v10703_v15 = vld [vmem:[%s10997_s11 + $0x38] sm:$0xff] }
 0x4c2   : > { %v13162_v53 = vadd.f32 %v3507_v32, %v3144_v60  ;;  %v2291_v9 = vadd.f32 %v2290_v17, %v17984_v10  ;;  %v3773_v60 = vrot.slane %v17985_v8, 1  ;;  %v6035_v17 = vrot.slane %v11253_v41, 3  ;;  %v17990_v32 = vld [vmem:[#allocation61_spill] sm:$0xff] }
 0x4c3   : > { %10098 = vmatmul.msk.bf16.gmra.mxu0 %vm1276_vm3, %v3772_v12  ;;  %10146 = vmatmul.msk.bf16.gmra.mxu1 %vm1276_vm3, %v4670_v1  ;;  %v4675_v1 = vrot.slane %v10703_v15, 2  ;;  %v17996_v15 = vld [vmem:[#allocation114_spill] sm:$0xff] }
 0x4c4   : > { %17983 = vst [vmem:[#allocation34_spill] sm:$0xff] %v13162_v53  ;;  %10218 = vmatmul.msk.bf16.gmra.mxu2 %vm1276_vm3, %v13160_v51  ;;  %v3775_v45 = vor.u32 %v3774_v44, %v3773_v60  ;;  %v6036_v30 = vor.u32 %v6035_v17, %v6034_v28  ;;  %v17995_v28 = vld [vmem:[#allocation117_spill] sm:$0xff] }
 0x4c5   : > { %v3777_v17 = vrot.slane %v17995_v28, 1 }
 0x4c6   : > { %10286 = vmatmul.msk.bf16.gmra.mxu3 %vm1276_vm3, %v6033_v13  ;;  %v3776_v53 = vsel %vm3681_vm5, %v3771_v54, %v3775_v45  ;;  %v6037_v41 = vsel %vm6022_vm7, %v6032_v47, %v6036_v30  ;;  %v17994_v54 = vld [vmem:[#allocation64_spill] sm:$0xff]  ;;  %v6038_v47 = vrot.slane %v11289_v2, 2 }
 0x4c7   : > { %v2988_v52 = vpop.f32.mrf.mxu2 }
 0x4c8   : > { %v3145_v5 = vadd.f32 %v2988_v52, %v2291_v9  ;;  %v4256_v39 = vpop.f32.mrf.mxu0  ;;  %v2292_v12 = vpop.f32.mrf.mxu1 }
 0x4c9   : > { %v13174_v61 = vadd.f32 %v4256_v39, %v17987_v23  ;;  %v3510_v62 = vpop.f32.mrf.mxu3  ;;  %v2293_v13 = vadd.f32 %v2292_v12, %v17990_v32  ;;  %v17991_v23 = vld [vmem:[#allocation127_spill] sm:$0xff] }
 0x4ca   : > { %v13176_v27 = vadd.f32 %v3510_v62, %v3145_v5  ;;  %v13187_v5 = vsel %vm4665_vm6, %v4673_v4, %v4675_v1 }
 0x4cb   : > { %17988 = vst [vmem:[#allocation42_spill] sm:$0xff] %v13174_v61 }
 0x4cc   : > { %17989 = vst [vmem:[#allocation115_spill] sm:$0xff] %v13176_v27 }
 0x4cf   : > { %v2990_v10 = vpop.f32.mrf.mxu2 }
 0x4d0   : > { %v3146_v9 = vadd.f32 %v2990_v10, %v2293_v13  ;;  %v4259_v52 = vpop.f32.mrf.mxu0  ;;  %v2295_v39 = vpop.f32.mrf.mxu1  ;;  %v17997_v13 = vld [vmem:[#allocation128_spill] sm:$0xff] }
 0x4d1   : > { %v13184_v61 = vadd.f32 %v4259_v52, %v17991_v23  ;;  %v3512_v0 = vpop.f32.mrf.mxu3  ;;  %v2296_v44 = vadd.f32 %v2295_v39, %v17994_v54  ;;  %v6039_v39 = vrot.slane %v11273_v3, 3  ;;  %v10704_v23 = vld [vmem:[%s10997_s11 + $0x40] sm:$0xff] }
 0x4d2   : > { %v13189_v60 = vadd.f32 %v3512_v0, %v3146_v9  ;;  %v4677_v0 = vrot.slane %v10704_v23, 2 }
 0x4d3   : > { %17992 = vst [vmem:[#allocation45_spill] sm:$0xff] %v13184_v61  ;;  %10099 = vmatmul.msk.bf16.gmra.mxu0 %vm1276_vm3, %v3776_v53  ;;  %10147 = vmatmul.msk.bf16.gmra.mxu1 %vm1276_vm3, %v13132_v11  ;;  %v3778_v53 = vrot.slane %v17996_v15, 2  ;;  %v6040_v61 = vor.u32 %v6039_v39, %v6038_v47  ;;  %v18006_v39 = vld [vmem:[#allocation118_spill] sm:$0xff] }
 0x4d4   : > { %17993 = vst [vmem:[#allocation105_spill] sm:$0xff] %v13189_v60  ;;  %10219 = vmatmul.msk.bf16.gmra.mxu2 %vm1276_vm3, %v13187_v5 }
 0x4d5   : > { %v3779_v52 = vor.u32 %v3778_v53, %v3777_v17  ;;  %v6041_v3 = vsel %vm6022_vm7, %v6036_v30, %v6040_v61  ;;  %v6042_v30 = vrot.slane %v11316_v18, 2 }
 0x4d6   : > { %10287 = vmatmul.msk.bf16.gmra.mxu3 %vm1276_vm3, %v6037_v41  ;;  %v18000_v41 = vld [vmem:[#allocation69_spill] sm:$0xff] }
 0x4d7   : > { %v2993_v4 = vpop.f32.mrf.mxu2  ;;  %v3780_v27 = vsel %vm3681_vm5, %v3775_v45, %v3779_v52  ;;  %v18004_v45 = vld [vmem:[#allocation41_spill] sm:$0xff] }
 0x4d8   : > { %v3147_v12 = vadd.f32 %v2993_v4, %v2296_v44  ;;  %v4261_v62 = vpop.f32.mrf.mxu0  ;;  %v2297_v32 = vpop.f32.mrf.mxu1 }
 0x4d9   : > { %v13202_v11 = vadd.f32 %v4261_v62, %v17997_v13  ;;  %v3515_v10 = vpop.f32.mrf.mxu3  ;;  %v2298_v54 = vadd.f32 %v2297_v32, %v18000_v41  ;;  %v18001_v13 = vld [vmem:[#allocation131_spill] sm:$0xff]  ;;  %v18007_v41 = vld [vmem:[#allocation132_spill] sm:$0xff] }
 0x4da   : > { %v13204_v9 = vadd.f32 %v3515_v10, %v3147_v12  ;;  %v13215_v12 = vsel %vm4665_vm6, %v4675_v1, %v4677_v0  ;;  %v18005_v10 = vld [vmem:[#allocation121_spill] sm:$0xff] }
 0x4db   : > { %17998 = vst [vmem:[#allocation102_spill] sm:$0xff] %v13202_v11  ;;  %v3781_v47 = vrot.slane %v18005_v10, 1 }
 0x4dc   : > { %17999 = vst [vmem:[#allocation116_spill] sm:$0xff] %v13204_v9 }
 0x4df   : > { %v2995_v44 = vpop.f32.mrf.mxu2 }
 0x4e0   : > { %v3148_v4 = vadd.f32 %v2995_v44, %v2298_v54  ;;  %v4264_v60 = vpop.f32.mrf.mxu0  ;;  %v2300_v62 = vpop.f32.mrf.mxu1 }
 0x4e1   : > { %v13212_v11 = vadd.f32 %v4264_v60, %v18001_v13  ;;  %v3517_v2 = vpop.f32.mrf.mxu3  ;;  %v2301_v60 = vadd.f32 %v2300_v62, %v18004_v45  ;;  %v6043_v62 = vrot.slane %v11292_v42, 3  ;;  %v10705_v13 = vld [vmem:[%s10997_s11 + $0x48] sm:$0xff] }
 0x4e2   : > { %v13217_v17 = vadd.f32 %v3517_v2, %v3148_v4  ;;  %v4679_v2 = vrot.slane %v10705_v13, 2 }
 0x4e3   : > { %18002 = vst [vmem:[#allocation48_spill] sm:$0xff] %v13212_v11  ;;  %10100 = vmatmul.msk.bf16.gmra.mxu0 %vm1276_vm3, %v3780_v27  ;;  %10148 = vmatmul.msk.bf16.gmra.mxu1 %vm1276_vm3, %v13160_v51  ;;  %v3782_v27 = vrot.slane %v18006_v39, 2  ;;  %v6044_v11 = vor.u32 %v6043_v62, %v6042_v30  ;;  %v18016_v62 = vld [vmem:[#allocation122_spill] sm:$0xff] }
 0x4e4   : > { %18003 = vst [vmem:[#allocation119_spill] sm:$0xff] %v13217_v17  ;;  %10220 = vmatmul.msk.bf16.gmra.mxu2 %vm1276_vm3, %v13215_v12 }
 0x4e5   : > { %v3783_v4 = vor.u32 %v3782_v27, %v3781_v47  ;;  %v6045_v42 = vsel %vm6022_vm7, %v6040_v61, %v6044_v11  ;;  %v6046_v61 = vrot.slane %v11351_v26, 2 }
 0x4e6   : > { %10288 = vmatmul.msk.bf16.gmra.mxu3 %vm1276_vm3, %v6041_v3  ;;  %v18010_v3 = vld [vmem:[#allocation44_spill] sm:$0xff] }
 0x4e7   : > { %v2998_v1 = vpop.f32.mrf.mxu2  ;;  %v3784_v9 = vsel %vm3681_vm5, %v3779_v52, %v3783_v4  ;;  %v18014_v52 = vld [vmem:[#allocation47_spill] sm:$0xff] }
 0x4e8   : > { %v3149_v53 = vadd.f32 %v2998_v1, %v2301_v60  ;;  %v4266_v32 = vpop.f32.mrf.mxu0  ;;  %v2302_v23 = vpop.f32.mrf.mxu1 }
 0x4e9   : > { %v13230_v51 = vadd.f32 %v4266_v32, %v18007_v41  ;;  %v3520_v54 = vpop.f32.mrf.mxu3  ;;  %v2303_v45 = vadd.f32 %v2302_v23, %v18010_v3  ;;  %v18011_v41 = vld [vmem:[#allocation135_spill] sm:$0xff]  ;;  %v18017_v3 = vld [vmem:[#allocation136_spill] sm:$0xff] }
 0x4ea   : > { %v13232_v44 = vadd.f32 %v3520_v54, %v3149_v53  ;;  %v13243_v53 = vsel %vm4665_vm6, %v4677_v0, %v4679_v2  ;;  %v18015_v54 = vld [vmem:[#allocation125_spill] sm:$0xff] }
 0x4eb   : > { %18008 = vst [vmem:[#allocation51_spill] sm:$0xff] %v13230_v51  ;;  %v3785_v30 = vrot.slane %v18015_v54, 1 }
 0x4ec   : > { %18009 = vst [vmem:[#allocation109_spill] sm:$0xff] %v13232_v44 }
 0x4ef   : > { %v3000_v60 = vpop.f32.mrf.mxu2 }
 0x4f0   : > { %v3150_v1 = vadd.f32 %v3000_v60, %v2303_v45  ;;  %v4269_v17 = vpop.f32.mrf.mxu0  ;;  %v2305_v32 = vpop.f32.mrf.mxu1 }
 0x4f1   : > { %v13240_v51 = vadd.f32 %v4269_v17, %v18011_v41  ;;  %v3522_v18 = vpop.f32.mrf.mxu3  ;;  %v2306_v17 = vadd.f32 %v2305_v32, %v18014_v52  ;;  %v6047_v32 = vrot.slane %v11319_v58, 3  ;;  %v10706_v41 = vld [vmem:[%s10997_s11 + $0x50] sm:$0xff] }
 0x4f2   : > { %v13245_v47 = vadd.f32 %v3522_v18, %v3150_v1  ;;  %v4681_v18 = vrot.slane %v10706_v41, 2 }
 0x4f3   : > { %18012 = vst [vmem:[#allocation106_spill] sm:$0xff] %v13240_v51  ;;  %10101 = vmatmul.msk.bf16.gmra.mxu0 %vm1276_vm3, %v3784_v9  ;;  %10149 = vmatmul.msk.bf16.gmra.mxu1 %vm1276_vm3, %v13187_v5  ;;  %v3786_v9 = vrot.slane %v18016_v62, 2  ;;  %v6048_v51 = vor.u32 %v6047_v32, %v6046_v61  ;;  %v18026_v32 = vld [vmem:[#allocation126_spill] sm:$0xff] }
 0x4f4   : > { %18013 = vst [vmem:[#allocation120_spill] sm:$0xff] %v13245_v47  ;;  %10221 = vmatmul.msk.bf16.gmra.mxu2 %vm1276_vm3, %v13243_v53 }
 0x4f5   : > { %v3787_v1 = vor.u32 %v3786_v9, %v3785_v30  ;;  %v6049_v58 = vsel %vm6022_vm7, %v6044_v11, %v6048_v51  ;;  %v6050_v11 = vrot.slane %v11386_v20, 2 }
 0x4f6   : > { %10289 = vmatmul.msk.bf16.gmra.mxu3 %vm1276_vm3, %v6045_v42  ;;  %v18020_v42 = vld [vmem:[#allocation50_spill] sm:$0xff] }
 0x4f7   : > { %v3003_v0 = vpop.f32.mrf.mxu2  ;;  %v3788_v44 = vsel %vm3681_vm5, %v3783_v4, %v3787_v1  ;;  %v18024_v4 = vld [vmem:[#allocation53_spill] sm:$0xff] }
 0x4f8   : > { %v3151_v27 = vadd.f32 %v3003_v0, %v2306_v17  ;;  %v4271_v23 = vpop.f32.mrf.mxu0  ;;  %v2307_v13 = vpop.f32.mrf.mxu1 }
 0x4f9   : > { %v13258_v5 = vadd.f32 %v4271_v23, %v18017_v3  ;;  %v3525_v45 = vpop.f32.mrf.mxu3  ;;  %v2308_v52 = vadd.f32 %v2307_v13, %v18020_v42  ;;  %v18021_v3 = vld [vmem:[#allocation139_spill] sm:$0xff]  ;;  %v18027_v42 = vld [vmem:[#allocation140_spill] sm:$0xff] }
 0x4fa   : > { %v13260_v60 = vadd.f32 %v3525_v45, %v3151_v27  ;;  %v13271_v27 = vsel %vm4665_vm6, %v4679_v2, %v4681_v18  ;;  %v18025_v45 = vld [vmem:[#allocation129_spill] sm:$0xff] }
 0x4fb   : > { %18018 = vst [vmem:[#allocation54_spill] sm:$0xff] %v13258_v5  ;;  %v3789_v61 = vrot.slane %v18025_v45, 1 }
 0x4fc   : > { %18019 = vst [vmem:[#allocation123_spill] sm:$0xff] %v13260_v60 }
 0x4ff   : > { %v3005_v17 = vpop.f32.mrf.mxu2 }
 0x500   : > { %v3152_v0 = vadd.f32 %v3005_v17, %v2308_v52  ;;  %v4274_v47 = vpop.f32.mrf.mxu0  ;;  %v2310_v23 = vpop.f32.mrf.mxu1 }
 0x501   : > { %v13268_v5 = vadd.f32 %v4274_v47, %v18021_v3  ;;  %v3527_v26 = vpop.f32.mrf.mxu3  ;;  %v2311_v47 = vadd.f32 %v2310_v23, %v18024_v4  ;;  %v6051_v23 = vrot.slane %v11354_v37, 3  ;;  %v10707_v3 = vld [vmem:[%s10997_s11 + $0x58] sm:$0xff] }
 0x502   : > { %v13273_v30 = vadd.f32 %v3527_v26, %v3152_v0  ;;  %v4683_v26 = vrot.slane %v10707_v3, 2 }
 0x503   : > { %18022 = vst [vmem:[#allocation57_spill] sm:$0xff] %v13268_v5  ;;  %10102 = vmatmul.msk.bf16.gmra.mxu0 %vm1276_vm3, %v3788_v44  ;;  %10150 = vmatmul.msk.bf16.gmra.mxu1 %vm1276_vm3, %v13215_v12  ;;  %v3790_v44 = vrot.slane %v18026_v32, 2  ;;  %v6052_v5 = vor.u32 %v6051_v23, %v6050_v11  ;;  %v18036_v23 = vld [vmem:[#allocation130_spill] sm:$0xff] }
 0x504   : > { %18023 = vst [vmem:[#allocation113_spill] sm:$0xff] %v13273_v30  ;;  %10222 = vmatmul.msk.bf16.gmra.mxu2 %vm1276_vm3, %v13271_v27 }
 0x505   : > { %v3791_v0 = vor.u32 %v3790_v44, %v3789_v61  ;;  %v6053_v37 = vsel %vm6022_vm7, %v6048_v51, %v6052_v5  ;;  %v6054_v51 = vrot.slane %v11421_v36, 2 }
 0x506   : > { %10290 = vmatmul.msk.bf16.gmra.mxu3 %vm1276_vm3, %v6049_v58  ;;  %v18030_v58 = vld [vmem:[#allocation56_spill] sm:$0xff] }
 0x507   : > { %v3008_v2 = vpop.f32.mrf.mxu2  ;;  %v3792_v60 = vsel %vm3681_vm5, %v3787_v1, %v3791_v0  ;;  %v18034_v1 = vld [vmem:[#allocation60_spill] sm:$0xff] }
 0x508   : > { %v3153_v9 = vadd.f32 %v3008_v2, %v2311_v47  ;;  %v4276_v13 = vpop.f32.mrf.mxu0  ;;  %v2312_v41 = vpop.f32.mrf.mxu1 }
 0x509   : > { %v13286_v12 = vadd.f32 %v4276_v13, %v18027_v42  ;;  %v3530_v52 = vpop.f32.mrf.mxu3  ;;  %v2313_v4 = vadd.f32 %v2312_v41, %v18030_v58  ;;  %v18031_v42 = vld [vmem:[#allocation143_spill] sm:$0xff]  ;;  %v18037_v58 = vld [vmem:[#allocation144_spill] sm:$0xff] }
 0x50a   : > { %v13288_v17 = vadd.f32 %v3530_v52, %v3153_v9  ;;  %v13299_v9 = vsel %vm4665_vm6, %v4681_v18, %v4683_v26  ;;  %v18035_v52 = vld [vmem:[#allocation133_spill] sm:$0xff] }
 0x50b   : > { %18028 = vst [vmem:[#allocation110_spill] sm:$0xff] %v13286_v12  ;;  %v3793_v11 = vrot.slane %v18035_v52, 1 }
 0x50c   : > { %18029 = vst [vmem:[#allocation124_spill] sm:$0xff] %v13288_v17 }
 0x50f   : > { %v3010_v47 = vpop.f32.mrf.mxu2 }
 0x510   : > { %v3154_v2 = vadd.f32 %v3010_v47, %v2313_v4  ;;  %v4279_v30 = vpop.f32.mrf.mxu0  ;;  %v2315_v13 = vpop.f32.mrf.mxu1 }
 0x511   : > { %v13296_v12 = vadd.f32 %v4279_v30, %v18031_v42  ;;  %v3532_v20 = vpop.f32.mrf.mxu3  ;;  %v2316_v30 = vadd.f32 %v2315_v13, %v18034_v1  ;;  %v6055_v13 = vrot.slane %v11389_v33, 3  ;;  %v10708_v42 = vld [vmem:[%s10997_s11 + $0x60] sm:$0xff] }
 0x512   : > { %v13301_v61 = vadd.f32 %v3532_v20, %v3154_v2  ;;  %v4685_v20 = vrot.slane %v10708_v42, 2 }
 0x513   : > { %18032 = vst [vmem:[#allocation61_spill] sm:$0xff] %v13296_v12  ;;  %10103 = vmatmul.msk.bf16.gmra.mxu0 %vm1276_vm3, %v3792_v60  ;;  %10151 = vmatmul.msk.bf16.gmra.mxu1 %vm1276_vm3, %v13243_v53  ;;  %v3794_v60 = vrot.slane %v18036_v23, 2  ;;  %v6056_v12 = vor.u32 %v6055_v13, %v6054_v51  ;;  %v18046_v13 = vld [vmem:[#allocation134_spill] sm:$0xff] }
 0x514   : > { %18033 = vst [vmem:[#allocation127_spill] sm:$0xff] %v13301_v61  ;;  %10223 = vmatmul.msk.bf16.gmra.mxu2 %vm1276_vm3, %v13299_v9 }
 0x515   : > { %v3795_v2 = vor.u32 %v3794_v60, %v3793_v11  ;;  %v6057_v33 = vsel %vm6022_vm7, %v6052_v5, %v6056_v12  ;;  %v6058_v5 = vrot.slane %v17876_v34, 2 }
 0x516   : > { %10291 = vmatmul.msk.bf16.gmra.mxu3 %vm1276_vm3, %v6053_v37  ;;  %v18040_v37 = vld [vmem:[#allocation63_spill] sm:$0xff] }
 0x517   : > { %v3013_v18 = vpop.f32.mrf.mxu2  ;;  %v3796_v17 = vsel %vm3681_vm5, %v3791_v0, %v3795_v2  ;;  %v18044_v0 = vld [vmem:[#allocation68_spill] sm:$0xff] }
 0x518   : > { %v3155_v44 = vadd.f32 %v3013_v18, %v2316_v30  ;;  %v4281_v41 = vpop.f32.mrf.mxu0  ;;  %v2317_v3 = vpop.f32.mrf.mxu1 }
 0x519   : > { %v13314_v53 = vadd.f32 %v4281_v41, %v18037_v58  ;;  %v3535_v4 = vpop.f32.mrf.mxu3  ;;  %v2318_v1 = vadd.f32 %v2317_v3, %v18040_v37  ;;  %v18041_v58 = vld [vmem:[#allocation147_spill] sm:$0xff]  ;;  %v18047_v37 = vld [vmem:[#allocation148_spill] sm:$0xff] }
 0x51a   : > { %v13316_v47 = vadd.f32 %v3535_v4, %v3155_v44  ;;  %v13327_v44 = vsel %vm4665_vm6, %v4683_v26, %v4685_v20  ;;  %v18045_v4 = vld [vmem:[#allocation137_spill] sm:$0xff] }
 0x51b   : > { %18038 = vst [vmem:[#allocation64_spill] sm:$0xff] %v13314_v53  ;;  %v3797_v51 = vrot.slane %v18045_v4, 1 }
 0x51c   : > { %18039 = vst [vmem:[#allocation117_spill] sm:$0xff] %v13316_v47 }
 0x51f   : > { %v3015_v30 = vpop.f32.mrf.mxu2 }
 0x520   : > { %v3156_v18 = vadd.f32 %v3015_v30, %v2318_v1  ;;  %v4284_v61 = vpop.f32.mrf.mxu0  ;;  %v2320_v41 = vpop.f32.mrf.mxu1 }
 0x521   : > { %v13324_v53 = vadd.f32 %v4284_v61, %v18041_v58  ;;  %v3537_v36 = vpop.f32.mrf.mxu3  ;;  %v2321_v61 = vadd.f32 %v2320_v41, %v18044_v0  ;;  %v6059_v41 = vrot.slane %v17877_v24, 3  ;;  %v10709_v58 = vld [vmem:[%s10997_s11 + $0x68] sm:$0xff] }
 0x522   : > { %v13329_v11 = vadd.f32 %v3537_v36, %v3156_v18  ;;  %v4687_v36 = vrot.slane %v10709_v58, 2  ;;  %v18054_v58 = vld [vmem:[#allocation152_spill] sm:$0xff] }
 0x523   : > { %18042 = vst [vmem:[#allocation114_spill] sm:$0xff] %v13324_v53  ;;  %10104 = vmatmul.msk.bf16.gmra.mxu0 %vm1276_vm3, %v3796_v17  ;;  %10152 = vmatmul.msk.bf16.gmra.mxu1 %vm1276_vm3, %v13271_v27  ;;  %v3798_v17 = vrot.slane %v18046_v13, 2  ;;  %v6060_v53 = vor.u32 %v6059_v41, %v6058_v5  ;;  %v18053_v5 = vld [vmem:[#allocation138_spill] sm:$0xff] }
 0x524   : > { %18043 = vst [vmem:[#allocation128_spill] sm:$0xff] %v13329_v11  ;;  %10224 = vmatmul.msk.bf16.gmra.mxu2 %vm1276_vm3, %v13327_v44  ;;  %v3802_v41 = vrot.slane %v18053_v5, 2 }
 0x525   : > { %v3799_v18 = vor.u32 %v3798_v17, %v3797_v51  ;;  %v13355_v51 = vsel %vm4665_vm6, %v4685_v20, %v4687_v36 }
 0x526   : > { %10292 = vmatmul.msk.bf16.gmra.mxu3 %vm1276_vm3, %v6057_v33  ;;  %v18049_v33 = vld [vmem:[#allocation70_spill] sm:$0xff] }
 0x527   : > { %v3018_v26 = vpop.f32.mrf.mxu2  ;;  %v3800_v47 = vsel %vm3681_vm5, %v3795_v2, %v3799_v18  ;;  %v6061_v2 = vsel %vm6022_vm7, %v6056_v12, %v6060_v53  ;;  %v6062_v12 = vrot.slane %v17882_v22, 2 }
 0x528   : > { %v3157_v60 = vadd.f32 %v3018_v26, %v2321_v61  ;;  %v4286_v3 = vpop.f32.mrf.mxu0  ;;  %v2322_v42 = vpop.f32.mrf.mxu1 }
 0x529   : > { %v13342_v27 = vadd.f32 %v4286_v3, %v18047_v37  ;;  %v3540_v1 = vpop.f32.mrf.mxu3  ;;  %v2323_v0 = vadd.f32 %v2322_v42, %v18049_v33  ;;  %v18050_v3 = vld [vmem:[#allocation151_spill] sm:$0xff] }
 0x52a   : > { %v13344_v30 = vadd.f32 %v3540_v1, %v3157_v60  ;;  %v18052_v1 = vld [vmem:[#allocation141_spill] sm:$0xff] }
 0x52c   : > { %18048 = vst [vmem:[#allocation69_spill] sm:$0xff] %v13344_v30 }
 0x52f   : > { %v3020_v61 = vpop.f32.mrf.mxu2 }
 0x530   : > { %v3158_v26 = vadd.f32 %v3020_v61, %v2323_v0  ;;  %v4289_v11 = vpop.f32.mrf.mxu0  ;;  %v5030_v60 = vpop.f32.mrf.mxu1 }
 0x531   : > { %v13352_v37 = vadd.f32 %v4289_v11, %v18050_v3  ;;  %v3542_v34 = vpop.f32.mrf.mxu3  ;;  %v5370_v24 = vadd.f32 %v5030_v60, %v12811_v35  ;;  %v3801_v35 = vrot.slane %v18052_v1, 1  ;;  %v6063_v3 = vrot.slane %v17883_v25, 3  ;;  %v10710_v60 = vld [vmem:[%s10997_s11 + $0x70] sm:$0xff] }
 0x532   : > { %v13358_v17 = vadd.f32 %v3542_v34, %v3158_v26  ;;  %v4689_v34 = vrot.slane %v10710_v60, 2 }
 0x533   : > { %10105 = vmatmul.msk.bf16.gmra.mxu0 %vm1276_vm3, %v3800_v47  ;;  %10153 = vmatmul.msk.bf16.gmra.mxu1 %vm1276_vm3, %v13299_v9  ;;  %v3803_v26 = vor.u32 %v3802_v41, %v3801_v35 }
 0x534   : > { %18051 = vst [vmem:[#allocation131_spill] sm:$0xff] %v13358_v17  ;;  %10225 = vmatmul.msk.bf16.gmra.mxu2 %vm1276_vm3, %v13355_v51 }
 0x535   : > { %v3804_v17 = vsel %vm3681_vm5, %v3799_v18, %v3803_v26 }
 0x536   : > { %10293 = vmatmul.msk.bf16.gmra.mxu3 %vm1276_vm3, %v6061_v2 }
 0x537   : > { %v5546_v20 = vpop.f32.mrf.mxu2 }
 0x538   : > { %v5886_v11 = vadd.f32 %v5546_v20, %v5370_v24  ;;  %v4291_v42 = vpop.f32.mrf.mxu0  ;;  %v5032_v33 = vpop.f32.mrf.mxu1 }
 0x539   : > { %v13370_v47 = vadd.f32 %v4291_v42, %v18054_v58  ;;  %v5371_v9 = vadd.f32 %v5032_v33, %v12825_v16  ;;  %v6537_v0 = vpop.f32.mrf.mxu3  ;;  %v6064_v42 = vor.u32 %v6063_v3, %v6062_v12  ;;  %v18056_v58 = vld [vmem:[#allocation155_spill] sm:$0xff]  ;;  %v18060_v3 = vld [vmem:[#allocation156_spill] sm:$0xff] }
 0x53a   : > { %v13373_v61 = vadd.f32 %v6537_v0, %v5886_v11  ;;  %v13383_v11 = vsel %vm4665_vm6, %v4687_v36, %v4689_v34  ;;  %v18059_v0 = vld [vmem:[#allocation142_spill] sm:$0xff] }
 0x53b   : > { %v6065_v25 = vsel %vm6022_vm7, %v6060_v53, %v6064_v42  ;;  %v3806_v12 = vrot.slane %v18059_v0, 2  ;;  %v6066_v53 = vrot.slane %v17889_v19, 2 }
 0x53c   : > { %18055 = vst [vmem:[#allocation41_spill] sm:$0xff] %v13373_v61 }
 0x53f   : > { %v5548_v24 = vpop.f32.mrf.mxu2 }
 0x540   : > { %v5887_v2 = vadd.f32 %v5548_v24, %v5371_v9  ;;  %v4294_v20 = vpop.f32.mrf.mxu0  ;;  %v5035_v16 = vpop.f32.mrf.mxu1 }
 0x541   : > { %v13380_v30 = vadd.f32 %v4294_v20, %v18056_v58  ;;  %v5372_v35 = vadd.f32 %v5035_v16, %v12836_v43  ;;  %v6539_v22 = vpop.f32.mrf.mxu3  ;;  %v18058_v43 = vld [vmem:[#allocation145_spill] sm:$0xff]  ;;  %v6067_v58 = vrot.slane %v17890_v48, 3  ;;  %v10711_v16 = vld [vmem:[%s10997_s11 + $0x78] sm:$0xff] }
 0x542   : > { %v13386_v41 = vadd.f32 %v6539_v22, %v5887_v2  ;;  %v3805_v9 = vrot.slane %v18058_v43, 1 }
 0x543   : > { %10106 = vmatmul.msk.bf16.gmra.mxu0 %vm1276_vm3, %v3804_v17  ;;  %10154 = vmatmul.msk.bf16.gmra.mxu1 %vm1276_vm3, %v13327_v44 }
 0x544   : > { %18057 = vst [vmem:[#allocation121_spill] sm:$0xff] %v13386_v41  ;;  %10226 = vmatmul.msk.bf16.gmra.mxu2 %vm1276_vm3, %v13383_v11  ;;  %v3807_v20 = vor.u32 %v3806_v12, %v3805_v9 }
 0x546   : > { %10294 = vmatmul.msk.bf16.gmra.mxu3 %vm1276_vm3, %v6065_v25  ;;  %v3808_v41 = vsel %vm3681_vm5, %v3803_v26, %v3807_v20 }
 0x547   : > { %v5551_v18 = vpop.f32.mrf.mxu2 }
 0x548   : > { %v5888_v36 = vadd.f32 %v5551_v18, %v5372_v35  ;;  %v4296_v33 = vpop.f32.mrf.mxu0  ;;  %v5037_v60 = vpop.f32.mrf.mxu1  ;;  %v4691_v35 = vrot.slane %v10711_v16, 2 }
 0x549   : > { %v13398_v17 = vadd.f32 %v4296_v33, %v18060_v3  ;;  %v5373_v44 = vadd.f32 %v5037_v60, %v12850_v31  ;;  %v6542_v24 = vpop.f32.mrf.mxu3  ;;  %v6068_v33 = vor.u32 %v6067_v58, %v6066_v53  ;;  %v18062_v3 = vld [vmem:[#allocation159_spill] sm:$0xff]  ;;  %v18067_v58 = vld [vmem:[#allocation160_spill] sm:$0xff] }
 0x54a   : > { %v13401_v2 = vadd.f32 %v6542_v24, %v5888_v36  ;;  %v13411_v36 = vsel %vm4665_vm6, %v4689_v34, %v4691_v35  ;;  %v18066_v24 = vld [vmem:[#allocation146_spill] sm:$0xff] }
 0x54b   : > { %v6069_v48 = vsel %vm6022_vm7, %v6064_v42, %v6068_v33  ;;  %v3810_v53 = vrot.slane %v18066_v24, 2  ;;  %v6070_v42 = vrot.slane %v17897_v49, 2 }
 0x54c   : > { %18061 = vst [vmem:[#allocation118_spill] sm:$0xff] %v13401_v2 }
 0x54f   : > { %v5553_v22 = vpop.f32.mrf.mxu2 }
 0x550   : > { %v5889_v25 = vadd.f32 %v5553_v22, %v5373_v44  ;;  %v4299_v18 = vpop.f32.mrf.mxu0  ;;  %v5040_v31 = vpop.f32.mrf.mxu1 }
 0x551   : > { %v13408_v61 = vadd.f32 %v4299_v18, %v18062_v3  ;;  %v5374_v9 = vadd.f32 %v5040_v31, %v12861_v63  ;;  %v6544_v19 = vpop.f32.mrf.mxu3  ;;  %v18065_v63 = vld [vmem:[#allocation149_spill] sm:$0xff]  ;;  %v18070_v3 = vld [vmem:[#allocation74_spill] sm:$0xff] }
 0x552   : > { %v13414_v12 = vadd.f32 %v6544_v19, %v5889_v25  ;;  %v3809_v44 = vrot.slane %v18065_v63, 1  ;;  %v6071_v31 = vrot.slane %v18070_v3, 3  ;;  %v18076_v3 = vld [vmem:[#allocation150_spill] sm:$0xff] }
 0x553   : > { %18063 = vst [vmem:[#allocation132_spill] sm:$0xff] %v13408_v61  ;;  %10107 = vmatmul.msk.bf16.gmra.mxu0 %vm1276_vm3, %v3808_v41  ;;  %10155 = vmatmul.msk.bf16.gmra.mxu1 %vm1276_vm3, %v13355_v51 }
 0x554   : > { %18064 = vst [vmem:[#allocation44_spill] sm:$0xff] %v13414_v12  ;;  %10227 = vmatmul.msk.bf16.gmra.mxu2 %vm1276_vm3, %v13411_v36  ;;  %v3811_v18 = vor.u32 %v3810_v53, %v3809_v44  ;;  %v18073_v44 = vld [vmem:[#allocation79_spill] sm:$0xff] }
 0x556   : > { %10295 = vmatmul.msk.bf16.gmra.mxu3 %vm1276_vm3, %v6069_v48  ;;  %v3812_v2 = vsel %vm3681_vm5, %v3807_v20, %v3811_v18 }
 0x557   : > { %v5556_v26 = vpop.f32.mrf.mxu2 }
 0x558   : > { %v5890_v34 = vadd.f32 %v5556_v26, %v5374_v9  ;;  %v4301_v60 = vpop.f32.mrf.mxu0  ;;  %v5042_v16 = vpop.f32.mrf.mxu1  ;;  %v10712_v9 = vld [vmem:[%s10997_s11 + $0x80] sm:$0xff] }
 0x559   : > { %v13426_v41 = vadd.f32 %v4301_v60, %v18067_v58  ;;  %v5375_v51 = vadd.f32 %v5042_v16, %v12875_v55  ;;  %v6547_v22 = vpop.f32.mrf.mxu3  ;;  %v4693_v19 = vrot.slane %v10712_v9, 2  ;;  %v6072_v60 = vor.u32 %v6071_v31, %v6070_v42  ;;  %v18071_v58 = vld [vmem:[#allocation163_spill] sm:$0xff]  ;;  %v18077_v9 = vld [vmem:[#allocation164_spill] sm:$0xff] }
 0x55a   : > { %v13429_v25 = vadd.f32 %v6547_v22, %v5890_v34  ;;  %v18075_v22 = vld [vmem:[#allocation153_spill] sm:$0xff]  ;;  %v3814_v31 = vrot.slane %v18076_v3, 2 }
 0x55b   : > { %18068 = vst [vmem:[#allocation135_spill] sm:$0xff] %v13426_v41  ;;  %v13439_v34 = vsel %vm4665_vm6, %v4691_v35, %v4693_v19  ;;  %v6073_v20 = vsel %vm6022_vm7, %v6068_v33, %v6072_v60  ;;  %v3813_v42 = vrot.slane %v18075_v22, 1  ;;  %v18081_v33 = vld [vmem:[#allocation81_spill] sm:$0xff] }
 0x55c   : > { %18069 = vst [vmem:[#allocation47_spill] sm:$0xff] %v13429_v25 }
 0x55f   : > { %v5558_v48 = vpop.f32.mrf.mxu2 }
 0x560   : > { %v5891_v26 = vadd.f32 %v5558_v48, %v5375_v51  ;;  %v4304_v12 = vpop.f32.mrf.mxu0  ;;  %v5045_v55 = vpop.f32.mrf.mxu1 }
 0x561   : > { %v13436_v41 = vadd.f32 %v4304_v12, %v18071_v58  ;;  %v5376_v53 = vadd.f32 %v5045_v55, %v18073_v44  ;;  %v6549_v49 = vpop.f32.mrf.mxu3  ;;  %v3815_v44 = vor.u32 %v3814_v31, %v3813_v42  ;;  %v18085_v42 = vld [vmem:[#allocation83_spill] sm:$0xff] }
 0x562   : > { %v13442_v16 = vadd.f32 %v6549_v49, %v5891_v26  ;;  %v6074_v49 = vrot.slane %v18081_v33, 2 }
 0x563   : > { %18072 = vst [vmem:[#allocation125_spill] sm:$0xff] %v13436_v41  ;;  %10108 = vmatmul.msk.bf16.gmra.mxu0 %vm1276_vm3, %v3812_v2  ;;  %10156 = vmatmul.msk.bf16.gmra.mxu1 %vm1276_vm3, %v13383_v11  ;;  %v18079_v11 = vld [vmem:[#allocation66_spill] sm:$0xff]  ;;  %v3816_v3 = vsel %vm3681_vm5, %v3811_v18, %v3815_v44 }
 0x564   : > { %18074 = vst [vmem:[#allocation122_spill] sm:$0xff] %v13442_v16  ;;  %10228 = vmatmul.msk.bf16.gmra.mxu2 %vm1276_vm3, %v13439_v34 }
 0x566   : > { %10296 = vmatmul.msk.bf16.gmra.mxu3 %vm1276_vm3, %v6073_v20  ;;  %v18082_v20 = vld [vmem:[#allocation78_spill] sm:$0xff] }
 0x567   : > { %v5561_v35 = vpop.f32.mrf.mxu2  ;;  %v6075_v16 = vrot.slane %v18082_v20, 3 }
 0x568   : > { %v5892_v12 = vadd.f32 %v5561_v35, %v5376_v53  ;;  %v4306_v51 = vpop.f32.mrf.mxu0  ;;  %v5047_v48 = vpop.f32.mrf.mxu1  ;;  %v10713_v53 = vld [vmem:[%s10997_s11 + $0x88] sm:$0xff] }
 0x569   : > { %v13454_v2 = vadd.f32 %v4306_v51, %v18077_v9  ;;  %v5377_v26 = vadd.f32 %v5047_v48, %v18079_v11  ;;  %v6552_v58 = vpop.f32.mrf.mxu3  ;;  %v4695_v35 = vrot.slane %v10713_v53, 2  ;;  %v6076_v51 = vor.u32 %v6075_v16, %v6074_v49  ;;  %v18083_v9 = vld [vmem:[#allocation167_spill] sm:$0xff]  ;;  %v18087_v16 = vld [vmem:[#allocation157_spill] sm:$0xff]  ;;  %v18089_v49 = vld [vmem:[#allocation168_spill] sm:$0xff] }
 0x56a   : > { %v13457_v55 = vadd.f32 %v6552_v58, %v5892_v12 }
 0x56b   : > { %18078 = vst [vmem:[#allocation136_spill] sm:$0xff] %v13454_v2  ;;  %v13467_v12 = vsel %vm4665_vm6, %v4693_v19, %v4695_v35 }
 0x56c   : > { %18080 = vst [vmem:[#allocation50_spill] sm:$0xff] %v13457_v55 }
 0x56f   : > { %v5563_v25 = vpop.f32.mrf.mxu2 }
 0x570   : > { %v5893_v41 = vadd.f32 %v5563_v25, %v5377_v26  ;;  %v4309_v61 = vpop.f32.mrf.mxu0  ;;  %v5050_v48 = vpop.f32.mrf.mxu1  ;;  %v3817_v26 = vrot.slane %v18087_v16, 1 }
 0x571   : > { %v13464_v2 = vadd.f32 %v4309_v61, %v18083_v9  ;;  %v5378_v31 = vadd.f32 %v5050_v48, %v18085_v42  ;;  %v6554_v11 = vpop.f32.mrf.mxu3  ;;  %v6077_v61 = vsel %vm6022_vm7, %v6072_v60, %v6076_v51  ;;  %v18093_v60 = vld [vmem:[#allocation85_spill] sm:$0xff] }
 0x572   : > { %v13470_v58 = vadd.f32 %v6554_v11, %v5893_v41  ;;  %v18088_v41 = vld [vmem:[#allocation154_spill] sm:$0xff]  ;;  %v6078_v11 = vrot.slane %v18093_v60, 2 }
 0x573   : > { %18084 = vst [vmem:[#allocation139_spill] sm:$0xff] %v13464_v2  ;;  %10109 = vmatmul.msk.bf16.gmra.mxu0 %vm1276_vm3, %v3816_v3  ;;  %10157 = vmatmul.msk.bf16.gmra.mxu1 %vm1276_vm3, %v13411_v36  ;;  %v3818_v33 = vrot.slane %v18088_v41, 2  ;;  %v18091_v36 = vld [vmem:[#allocation72_spill] sm:$0xff] }
 0x574   : > { %18086 = vst [vmem:[#allocation53_spill] sm:$0xff] %v13470_v58  ;;  %10229 = vmatmul.msk.bf16.gmra.mxu2 %vm1276_vm3, %v13467_v12 }
 0x575   : > { %v3819_v42 = vor.u32 %v3818_v33, %v3817_v26  ;;  %v18097_v26 = vld [vmem:[#allocation87_spill] sm:$0xff] }
 0x576   : > { %10297 = vmatmul.msk.bf16.gmra.mxu3 %vm1276_vm3, %v6077_v61  ;;  %v18094_v61 = vld [vmem:[#allocation82_spill] sm:$0xff] }
 0x577   : > { %v5566_v25 = vpop.f32.mrf.mxu2  ;;  %v6079_v58 = vrot.slane %v18094_v61, 3  ;;  %v3820_v41 = vsel %vm3681_vm5, %v3815_v44, %v3819_v42 }
 0x578   : > { %v5894_v18 = vadd.f32 %v5566_v25, %v5378_v31  ;;  %v4311_v19 = vpop.f32.mrf.mxu0  ;;  %v5052_v20 = vpop.f32.mrf.mxu1  ;;  %v10714_v31 = vld [vmem:[%s10997_s11 + $0x90] sm:$0xff] }
 0x579   : > { %v13482_v3 = vadd.f32 %v4311_v19, %v18089_v49  ;;  %v5379_v53 = vadd.f32 %v5052_v20, %v18091_v36  ;;  %v6557_v9 = vpop.f32.mrf.mxu3  ;;  %v4697_v25 = vrot.slane %v10714_v31, 2  ;;  %v6080_v19 = vor.u32 %v6079_v58, %v6078_v11  ;;  %v18095_v49 = vld [vmem:[#allocation171_spill] sm:$0xff]  ;;  %v18101_v11 = vld [vmem:[#allocation172_spill] sm:$0xff] }
 0x57a   : > { %v13485_v48 = vadd.f32 %v6557_v9, %v5894_v18 }
 0x57b   : > { %18090 = vst [vmem:[#allocation129_spill] sm:$0xff] %v13482_v3  ;;  %v13495_v18 = vsel %vm4665_vm6, %v4695_v35, %v4697_v25 }
 0x57c   : > { %18092 = vst [vmem:[#allocation126_spill] sm:$0xff] %v13485_v48 }
 0x57f   : > { %v5568_v55 = vpop.f32.mrf.mxu2 }
 0x580   : > { %v5895_v2 = vadd.f32 %v5568_v55, %v5379_v53  ;;  %v4314_v16 = vpop.f32.mrf.mxu0  ;;  %v5055_v20 = vpop.f32.mrf.mxu1  ;;  %v6081_v55 = vsel %vm6022_vm7, %v6076_v51, %v6080_v19  ;;  %v18105_v51 = vld [vmem:[#allocation89_spill] sm:$0xff] }
 0x581   : > { %v13492_v3 = vadd.f32 %v4314_v16, %v18095_v49  ;;  %v5380_v33 = vadd.f32 %v5055_v20, %v18097_v26  ;;  %v6559_v36 = vpop.f32.mrf.mxu3  ;;  %v18099_v16 = vld [vmem:[#allocation161_spill] sm:$0xff] }
 0x582   : > { %v13498_v9 = vadd.f32 %v6559_v36, %v5895_v2  ;;  %v3821_v53 = vrot.slane %v18099_v16, 1  ;;  %v18100_v2 = vld [vmem:[#allocation158_spill] sm:$0xff]  ;;  %v6082_v36 = vrot.slane %v18105_v51, 2 }
 0x583   : > { %18096 = vst [vmem:[#allocation140_spill] sm:$0xff] %v13492_v3  ;;  %10110 = vmatmul.msk.bf16.gmra.mxu0 %vm1276_vm3, %v3820_v41  ;;  %10158 = vmatmul.msk.bf16.gmra.mxu1 %vm1276_vm3, %v13439_v34  ;;  %v3822_v60 = vrot.slane %v18100_v2, 2  ;;  %v18103_v34 = vld [vmem:[#allocation88_spill] sm:$0xff] }
 0x584   : > { %18098 = vst [vmem:[#allocation56_spill] sm:$0xff] %v13498_v9  ;;  %10230 = vmatmul.msk.bf16.gmra.mxu2 %vm1276_vm3, %v13495_v18 }
 0x585   : > { %v3823_v26 = vor.u32 %v3822_v60, %v3821_v53  ;;  %v18109_v53 = vld [vmem:[#allocation38_spill] sm:$0xff] }
 0x586   : > { %10298 = vmatmul.msk.bf16.gmra.mxu3 %vm1276_vm3, %v6081_v55  ;;  %v18106_v55 = vld [vmem:[#allocation86_spill] sm:$0xff] }
 0x587   : > { %v5571_v44 = vpop.f32.mrf.mxu2  ;;  %v6083_v9 = vrot.slane %v18106_v55, 3  ;;  %v3824_v2 = vsel %vm3681_vm5, %v3819_v42, %v3823_v26 }
 0x588   : > { %v5896_v35 = vadd.f32 %v5571_v44, %v5380_v33  ;;  %v4316_v58 = vpop.f32.mrf.mxu0  ;;  %v5057_v61 = vpop.f32.mrf.mxu1  ;;  %v10715_v33 = vld [vmem:[%s10997_s11 + $0x98] sm:$0xff] }
 0x589   : > { %v13510_v41 = vadd.f32 %v4316_v58, %v18101_v11  ;;  %v5381_v31 = vadd.f32 %v5057_v61, %v18103_v34  ;;  %v6562_v49 = vpop.f32.mrf.mxu3  ;;  %v4699_v44 = vrot.slane %v10715_v33, 2  ;;  %v6084_v58 = vor.u32 %v6083_v9, %v6082_v36  ;;  %v18107_v11 = vld [vmem:[#allocation175_spill] sm:$0xff]  ;;  %v18113_v36 = vld [vmem:[#allocation176_spill] sm:$0xff] }
 0x58a   : > { %v13513_v20 = vadd.f32 %v6562_v49, %v5896_v35 }
 0x58b   : > { %18102 = vst [vmem:[#allocation143_spill] sm:$0xff] %v13510_v41  ;;  %v13523_v35 = vsel %vm4665_vm6, %v4697_v25, %v4699_v44 }
 0x58c   : > { %18104 = vst [vmem:[#allocation60_spill] sm:$0xff] %v13513_v20 }
 0x58f   : > { %v5573_v48 = vpop.f32.mrf.mxu2 }
 0x590   : > { %v5897_v3 = vadd.f32 %v5573_v48, %v5381_v31  ;;  %v4319_v16 = vpop.f32.mrf.mxu0  ;;  %v5060_v61 = vpop.f32.mrf.mxu1  ;;  %v6085_v48 = vsel %vm6022_vm7, %v6080_v19, %v6084_v58  ;;  %v18117_v19 = vld [vmem:[#allocation93_spill] sm:$0xff] }
 0x591   : > { %v13520_v41 = vadd.f32 %v4319_v16, %v18107_v11  ;;  %v5382_v60 = vadd.f32 %v5060_v61, %v18109_v53  ;;  %v6564_v34 = vpop.f32.mrf.mxu3  ;;  %v18111_v16 = vld [vmem:[#allocation165_spill] sm:$0xff] }
 0x592   : > { %v13526_v49 = vadd.f32 %v6564_v34, %v5897_v3  ;;  %v3825_v31 = vrot.slane %v18111_v16, 1  ;;  %v18112_v3 = vld [vmem:[#allocation162_spill] sm:$0xff]  ;;  %v6086_v34 = vrot.slane %v18117_v19, 2 }
 0x593   : > { %18108 = vst [vmem:[#allocation133_spill] sm:$0xff] %v13520_v41  ;;  %10111 = vmatmul.msk.bf16.gmra.mxu0 %vm1276_vm3, %v3824_v2  ;;  %10159 = vmatmul.msk.bf16.gmra.mxu1 %vm1276_vm3, %v13467_v12  ;;  %v3826_v51 = vrot.slane %v18112_v3, 2  ;;  %v18115_v12 = vld [vmem:[#allocation40_spill] sm:$0xff] }
 0x594   : > { %18110 = vst [vmem:[#allocation130_spill] sm:$0xff] %v13526_v49  ;;  %10231 = vmatmul.msk.bf16.gmra.mxu2 %vm1276_vm3, %v13523_v35 }
 0x595   : > { %v3827_v53 = vor.u32 %v3826_v51, %v3825_v31  ;;  %v18121_v31 = vld [vmem:[#allocation43_spill] sm:$0xff] }
 0x596   : > { %10299 = vmatmul.msk.bf16.gmra.mxu3 %vm1276_vm3, %v6085_v48  ;;  %v18118_v48 = vld [vmem:[#allocation90_spill] sm:$0xff] }
 0x597   : > { %v5576_v42 = vpop.f32.mrf.mxu2  ;;  %v6087_v20 = vrot.slane %v18118_v48, 3  ;;  %v3828_v3 = vsel %vm3681_vm5, %v3823_v26, %v3827_v53 }
 0x598   : > { %v5898_v25 = vadd.f32 %v5576_v42, %v5382_v60  ;;  %v4321_v9 = vpop.f32.mrf.mxu0  ;;  %v5062_v55 = vpop.f32.mrf.mxu1  ;;  %v10716_v60 = vld [vmem:[%s10997_s11 + $0xa0] sm:$0xff] }
 0x599   : > { %v13538_v2 = vadd.f32 %v4321_v9, %v18113_v36  ;;  %v5383_v33 = vadd.f32 %v5062_v55, %v18115_v12  ;;  %v6567_v11 = vpop.f32.mrf.mxu3  ;;  %v4701_v42 = vrot.slane %v10716_v60, 2  ;;  %v6088_v9 = vor.u32 %v6087_v20, %v6086_v34  ;;  %v18119_v36 = vld [vmem:[#allocation179_spill] sm:$0xff]  ;;  %v18125_v34 = vld [vmem:[#allocation180_spill] sm:$0xff] }
 0x59a   : > { %v13541_v61 = vadd.f32 %v6567_v11, %v5898_v25 }
 0x59b   : > { %18114 = vst [vmem:[#allocation144_spill] sm:$0xff] %v13538_v2  ;;  %v13551_v25 = vsel %vm4665_vm6, %v4699_v44, %v4701_v42  ;;  %v6089_v20 = vsel %vm6022_vm7, %v6084_v58, %v6088_v9  ;;  %v18129_v58 = vld [vmem:[#allocation97_spill] sm:$0xff] }
 0x59c   : > { %18116 = vst [vmem:[#allocation63_spill] sm:$0xff] %v13541_v61 }
 0x59f   : > { %v5578_v49 = vpop.f32.mrf.mxu2 }
 0x5a0   : > { %v5899_v41 = vadd.f32 %v5578_v49, %v5383_v33  ;;  %v4324_v16 = vpop.f32.mrf.mxu0  ;;  %v5065_v55 = vpop.f32.mrf.mxu1 }
 0x5a1   : > { %v13548_v2 = vadd.f32 %v4324_v16, %v18119_v36  ;;  %v5384_v51 = vadd.f32 %v5065_v55, %v18121_v31  ;;  %v6569_v12 = vpop.f32.mrf.mxu3  ;;  %v18123_v16 = vld [vmem:[#allocation169_spill] sm:$0xff] }
 0x5a2   : > { %v13554_v11 = vadd.f32 %v6569_v12, %v5899_v41  ;;  %v3829_v33 = vrot.slane %v18123_v16, 1  ;;  %v18124_v41 = vld [vmem:[#allocation166_spill] sm:$0xff]  ;;  %v6090_v12 = vrot.slane %v18129_v58, 2 }
 0x5a3   : > { %18120 = vst [vmem:[#allocation147_spill] sm:$0xff] %v13548_v2  ;;  %10112 = vmatmul.msk.bf16.gmra.mxu0 %vm1276_vm3, %v3828_v3  ;;  %10160 = vmatmul.msk.bf16.gmra.mxu1 %vm1276_vm3, %v13495_v18  ;;  %v3830_v19 = vrot.slane %v18124_v41, 2  ;;  %v18127_v18 = vld [vmem:[#allocation46_spill] sm:$0xff] }
 0x5a4   : > { %18122 = vst [vmem:[#allocation68_spill] sm:$0xff] %v13554_v11  ;;  %10232 = vmatmul.msk.bf16.gmra.mxu2 %vm1276_vm3, %v13551_v25 }
 0x5a5   : > { %v3831_v31 = vor.u32 %v3830_v19, %v3829_v33  ;;  %v18133_v33 = vld [vmem:[#allocation49_spill] sm:$0xff] }
 0x5a6   : > { %10300 = vmatmul.msk.bf16.gmra.mxu3 %vm1276_vm3, %v6089_v20  ;;  %v18130_v20 = vld [vmem:[#allocation94_spill] sm:$0xff] }
 0x5a7   : > { %v5581_v26 = vpop.f32.mrf.mxu2  ;;  %v6091_v61 = vrot.slane %v18130_v20, 3  ;;  %v3832_v41 = vsel %vm3681_vm5, %v3827_v53, %v3831_v31 }
 0x5a8   : > { %v5900_v44 = vadd.f32 %v5581_v26, %v5384_v51  ;;  %v4326_v49 = vpop.f32.mrf.mxu0  ;;  %v5067_v48 = vpop.f32.mrf.mxu1  ;;  %v10717_v51 = vld [vmem:[%s10997_s11 + $0xa8] sm:$0xff] }
 0x5a9   : > { %v13566_v3 = vadd.f32 %v4326_v49, %v18125_v34  ;;  %v5385_v60 = vadd.f32 %v5067_v48, %v18127_v18  ;;  %v6572_v36 = vpop.f32.mrf.mxu3  ;;  %v4703_v26 = vrot.slane %v10717_v51, 2  ;;  %v6092_v49 = vor.u32 %v6091_v61, %v6090_v12  ;;  %v18131_v34 = vld [vmem:[#allocation183_spill] sm:$0xff]  ;;  %v18137_v12 = vld [vmem:[#allocation184_spill] sm:$0xff] }
 0x5aa   : > { %v13569_v55 = vadd.f32 %v6572_v36, %v5900_v44 }
 0x5ab   : > { %18126 = vst [vmem:[#allocation137_spill] sm:$0xff] %v13566_v3  ;;  %v13579_v44 = vsel %vm4665_vm6, %v4701_v42, %v4703_v26  ;;  %v6093_v61 = vsel %vm6022_vm7, %v6088_v9, %v6092_v49  ;;  %v6094_v9 = vrot.slane %v17957_v40, 2 }
 0x5ac   : > { %18128 = vst [vmem:[#allocation134_spill] sm:$0xff] %v13569_v55 }
 0x5af   : > { %v5583_v11 = vpop.f32.mrf.mxu2 }
 0x5b0   : > { %v5901_v2 = vadd.f32 %v5583_v11, %v5385_v60  ;;  %v4329_v16 = vpop.f32.mrf.mxu0  ;;  %v5070_v48 = vpop.f32.mrf.mxu1 }
 0x5b1   : > { %v13576_v3 = vadd.f32 %v4329_v16, %v18131_v34  ;;  %v5386_v19 = vadd.f32 %v5070_v48, %v18133_v33  ;;  %v6574_v18 = vpop.f32.mrf.mxu3  ;;  %v18135_v16 = vld [vmem:[#allocation173_spill] sm:$0xff] }
 0x5b2   : > { %v13582_v36 = vadd.f32 %v6574_v18, %v5901_v2  ;;  %v3833_v60 = vrot.slane %v18135_v16, 1  ;;  %v18136_v2 = vld [vmem:[#allocation170_spill] sm:$0xff]  ;;  %v6095_v18 = vrot.slane %v17958_v56, 3 }
 0x5b3   : > { %18132 = vst [vmem:[#allocation148_spill] sm:$0xff] %v13576_v3  ;;  %10113 = vmatmul.msk.bf16.gmra.mxu0 %vm1276_vm3, %v3832_v41  ;;  %10161 = vmatmul.msk.bf16.gmra.mxu1 %vm1276_vm3, %v13523_v35  ;;  %v3834_v58 = vrot.slane %v18136_v2, 2  ;;  %v18139_v35 = vld [vmem:[#allocation52_spill] sm:$0xff] }
 0x5b4   : > { %18134 = vst [vmem:[#allocation70_spill] sm:$0xff] %v13582_v36  ;;  %10233 = vmatmul.msk.bf16.gmra.mxu2 %vm1276_vm3, %v13579_v44 }
 0x5b5   : > { %v3835_v33 = vor.u32 %v3834_v58, %v3833_v60  ;;  %v18143_v60 = vld [vmem:[#allocation55_spill] sm:$0xff] }
 0x5b6   : > { %10301 = vmatmul.msk.bf16.gmra.mxu3 %vm1276_vm3, %v6093_v61 }
 0x5b7   : > { %v5586_v53 = vpop.f32.mrf.mxu2  ;;  %v3836_v3 = vsel %vm3681_vm5, %v3831_v31, %v3835_v33 }
 0x5b8   : > { %v5902_v42 = vadd.f32 %v5586_v53, %v5386_v19  ;;  %v4331_v11 = vpop.f32.mrf.mxu0  ;;  %v5072_v20 = vpop.f32.mrf.mxu1  ;;  %v10718_v19 = vld [vmem:[%s10997_s11 + $0xb0] sm:$0xff] }
 0x5b9   : > { %v13594_v41 = vadd.f32 %v4331_v11, %v18137_v12  ;;  %v5387_v51 = vadd.f32 %v5072_v20, %v18139_v35  ;;  %v6577_v34 = vpop.f32.mrf.mxu3  ;;  %v4705_v61 = vrot.slane %v10718_v19, 2  ;;  %v6096_v11 = vor.u32 %v6095_v18, %v6094_v9  ;;  %v18141_v12 = vld [vmem:[#allocation187_spill] sm:$0xff]  ;;  %v18147_v18 = vld [vmem:[#allocation188_spill] sm:$0xff] }
 0x5ba   : > { %v13597_v48 = vadd.f32 %v6577_v34, %v5902_v42 }
 0x5bb   : > { %18138 = vst [vmem:[#allocation151_spill] sm:$0xff] %v13594_v41  ;;  %v13607_v42 = vsel %vm4665_vm6, %v4703_v26, %v4705_v61  ;;  %v6097_v56 = vsel %vm6022_vm7, %v6092_v49, %v6096_v11  ;;  %v6098_v49 = vrot.slane %v17967_v38, 2 }
 0x5bc   : > { %18140 = vst [vmem:[#allocation141_spill] sm:$0xff] %v13597_v48 }
 0x5bf   : > { %v5588_v53 = vpop.f32.mrf.mxu2 }
 0x5c0   : > { %v5903_v55 = vadd.f32 %v5588_v53, %v5387_v51  ;;  %v4334_v36 = vpop.f32.mrf.mxu0  ;;  %v5075_v20 = vpop.f32.mrf.mxu1  ;;  %v18145_v51 = vld [vmem:[#allocation177_spill] sm:$0xff] }
 0x5c1   : > { %v13604_v41 = vadd.f32 %v4334_v36, %v18141_v12  ;;  %v5388_v58 = vadd.f32 %v5075_v20, %v18143_v60  ;;  %v6579_v40 = vpop.f32.mrf.mxu3  ;;  %v3837_v34 = vrot.slane %v18145_v51, 1 }
 0x5c2   : > { %v13610_v35 = vadd.f32 %v6579_v40, %v5903_v55  ;;  %v18146_v55 = vld [vmem:[#allocation174_spill] sm:$0xff]  ;;  %v6099_v40 = vrot.slane %v17968_v57, 3 }
 0x5c3   : > { %18142 = vst [vmem:[#allocation138_spill] sm:$0xff] %v13604_v41  ;;  %10114 = vmatmul.msk.bf16.gmra.mxu0 %vm1276_vm3, %v3836_v3  ;;  %10162 = vmatmul.msk.bf16.gmra.mxu1 %vm1276_vm3, %v13551_v25  ;;  %v3838_v9 = vrot.slane %v18146_v55, 2  ;;  %v18149_v25 = vld [vmem:[#allocation59_spill] sm:$0xff] }
 0x5c4   : > { %18144 = vst [vmem:[#allocation152_spill] sm:$0xff] %v13610_v35  ;;  %10234 = vmatmul.msk.bf16.gmra.mxu2 %vm1276_vm3, %v13607_v42 }
 0x5c5   : > { %v3839_v60 = vor.u32 %v3838_v9, %v3837_v34 }
 0x5c6   : > { %10302 = vmatmul.msk.bf16.gmra.mxu3 %vm1276_vm3, %v6097_v56 }
 0x5c7   : > { %v5591_v31 = vpop.f32.mrf.mxu2  ;;  %v3840_v41 = vsel %vm3681_vm5, %v3835_v33, %v3839_v60 }
 0x5c8   : > { %v5904_v26 = vadd.f32 %v5591_v31, %v5388_v58  ;;  %v4336_v36 = vpop.f32.mrf.mxu0  ;;  %v5077_v19 = vpop.f32.mrf.mxu1  ;;  %v10719_v58 = vld [vmem:[%s10997_s11 + $0xb8] sm:$0xff] }
 0x5c9   : > { %v13622_v3 = vadd.f32 %v4336_v36, %v18147_v18  ;;  %v5389_v53 = vadd.f32 %v5077_v19, %v18149_v25  ;;  %v6582_v12 = vpop.f32.mrf.mxu3  ;;  %v4707_v56 = vrot.slane %v10719_v58, 2  ;;  %v6100_v36 = vor.u32 %v6099_v40, %v6098_v49  ;;  %v18151_v18 = vld [vmem:[#allocation191_spill] sm:$0xff] }
 0x5ca   : > { %v13625_v20 = vadd.f32 %v6582_v12, %v5904_v26  ;;  %v18155_v12 = vld [vmem:[#allocation192_spill] sm:$0xff] }
 0x5cb   : > { %18148 = vst [vmem:[#allocation155_spill] sm:$0xff] %v13622_v3  ;;  %v13635_v26 = vsel %vm4665_vm6, %v4705_v61, %v4707_v56  ;;  %v6101_v57 = vsel %vm6022_vm7, %v6096_v11, %v6100_v36  ;;  %v6102_v11 = vrot.slane %v17976_v14, 2 }
 0x5cc   : > { %18150 = vst [vmem:[#allocation145_spill] sm:$0xff] %v13625_v20 }
 0x5cf   : > { %v5593_v31 = vpop.f32.mrf.mxu2 }
 0x5d0   : > { %v5905_v35 = vadd.f32 %v5593_v31, %v5389_v53  ;;  %v4339_v48 = vpop.f32.mrf.mxu0  ;;  %v5080_v19 = vpop.f32.mrf.mxu1 }
 0x5d1   : > { %v13632_v3 = vadd.f32 %v4339_v48, %v18151_v18  ;;  %v5390_v34 = vadd.f32 %v5080_v19, %v13069_v29  ;;  %v6584_v38 = vpop.f32.mrf.mxu3  ;;  %v18153_v29 = vld [vmem:[#allocation181_spill] sm:$0xff]  ;;  %v6103_v18 = vrot.slane %v17977_v21, 3 }
 0x5d2   : > { %v13638_v9 = vadd.f32 %v6584_v38, %v5905_v35  ;;  %v3841_v25 = vrot.slane %v18153_v29, 1  ;;  %v18154_v35 = vld [vmem:[#allocation178_spill] sm:$0xff]  ;;  %v10720_v19 = vld [vmem:[%s10997_s11 + $0xc0] sm:$0xff] }
 0x5d3   : > { %10115 = vmatmul.msk.bf16.gmra.mxu0 %vm1276_vm3, %v3840_v41  ;;  %10163 = vmatmul.msk.bf16.gmra.mxu1 %vm1276_vm3, %v13579_v44  ;;  %v3842_v53 = vrot.slane %v18154_v35, 2 }
 0x5d4   : > { %18152 = vst [vmem:[#allocation142_spill] sm:$0xff] %v13638_v9  ;;  %10235 = vmatmul.msk.bf16.gmra.mxu2 %vm1276_vm3, %v13635_v26 }
 0x5d5   : > { %v3843_v31 = vor.u32 %v3842_v53, %v3841_v25 }
 0x5d6   : > { %10303 = vmatmul.msk.bf16.gmra.mxu3 %vm1276_vm3, %v6101_v57 }
 0x5d7   : > { %v5596_v48 = vpop.f32.mrf.mxu2  ;;  %v3844_v9 = vsel %vm3681_vm5, %v3839_v60, %v3843_v31 }
 0x5d8   : > { %v5906_v33 = vadd.f32 %v5596_v48, %v5390_v34  ;;  %v4341_v61 = vpop.f32.mrf.mxu0  ;;  %v5082_v49 = vpop.f32.mrf.mxu1  ;;  %v4709_v34 = vrot.slane %v10720_v19, 2 }
 0x5d9   : > { %v13650_v41 = vadd.f32 %v4341_v61, %v18155_v12  ;;  %v5391_v44 = vadd.f32 %v5082_v49, %v13086_v50  ;;  %v6587_v40 = vpop.f32.mrf.mxu3  ;;  %v6104_v61 = vor.u32 %v6103_v18, %v6102_v11  ;;  %v18157_v12 = vld [vmem:[#allocation195_spill] sm:$0xff]  ;;  %v18161_v18 = vld [vmem:[#allocation196_spill] sm:$0xff] }
 0x5da   : > { %v13653_v58 = vadd.f32 %v6587_v40, %v5906_v33  ;;  %v13663_v33 = vsel %vm4665_vm6, %v4707_v56, %v4709_v34  ;;  %v18160_v40 = vld [vmem:[#allocation182_spill] sm:$0xff] }
 0x5db   : > { %v6105_v21 = vsel %vm6022_vm7, %v6100_v36, %v6104_v61  ;;  %v3846_v11 = vrot.slane %v18160_v40, 2  ;;  %v6106_v36 = vrot.slane %v17985_v8, 2 }
 0x5dc   : > { %18156 = vst [vmem:[#allocation156_spill] sm:$0xff] %v13653_v58 }
 0x5df   : > { %v5598_v38 = vpop.f32.mrf.mxu2 }
 0x5e0   : > { %v5907_v57 = vadd.f32 %v5598_v38, %v5391_v44  ;;  %v4344_v48 = vpop.f32.mrf.mxu0  ;;  %v5085_v50 = vpop.f32.mrf.mxu1 }
 0x5e1   : > { %v13660_v20 = vadd.f32 %v4344_v48, %v18157_v12  ;;  %v5392_v25 = vadd.f32 %v5085_v50, %v13097_v46  ;;  %v6589_v14 = vpop.f32.mrf.mxu3  ;;  %v18159_v46 = vld [vmem:[#allocation185_spill] sm:$0xff]  ;;  %v6107_v12 = vrot.slane %v17986_v6, 3  ;;  %v10721_v50 = vld [vmem:[%s10997_s11 + $0xc8] sm:$0xff] }
 0x5e2   : > { %v13666_v53 = vadd.f32 %v6589_v14, %v5907_v57  ;;  %v3845_v44 = vrot.slane %v18159_v46, 1 }
 0x5e3   : > { %10116 = vmatmul.msk.bf16.gmra.mxu0 %vm1276_vm3, %v3844_v9  ;;  %10164 = vmatmul.msk.bf16.gmra.mxu1 %vm1276_vm3, %v13607_v42 }
 0x5e4   : > { %18158 = vst [vmem:[#allocation159_spill] sm:$0xff] %v13666_v53  ;;  %10236 = vmatmul.msk.bf16.gmra.mxu2 %vm1276_vm3, %v13663_v33  ;;  %v3847_v48 = vor.u32 %v3846_v11, %v3845_v44  ;;  %v18165_v44 = vld [vmem:[#allocation39_spill] sm:$0xff] }
 0x5e6   : > { %10304 = vmatmul.msk.bf16.gmra.mxu3 %vm1276_vm3, %v6105_v21  ;;  %v3848_v53 = vsel %vm3681_vm5, %v3843_v31, %v3847_v48 }
 0x5e7   : > { %v5601_v60 = vpop.f32.mrf.mxu2 }
 0x5e8   : > { %v5908_v56 = vadd.f32 %v5601_v60, %v5392_v25  ;;  %v4346_v49 = vpop.f32.mrf.mxu0  ;;  %v5087_v19 = vpop.f32.mrf.mxu1  ;;  %v4711_v25 = vrot.slane %v10721_v50, 2 }
 0x5e9   : > { %v13678_v9 = vadd.f32 %v4346_v49, %v18161_v18  ;;  %v5393_v42 = vadd.f32 %v5087_v19, %v13113_v7  ;;  %v6592_v38 = vpop.f32.mrf.mxu3  ;;  %v6108_v49 = vor.u32 %v6107_v12, %v6106_v36  ;;  %v18163_v18 = vld [vmem:[#allocation199_spill] sm:$0xff]  ;;  %v18168_v12 = vld [vmem:[#allocation186_spill] sm:$0xff] }
 0x5ea   : > { %v13681_v57 = vadd.f32 %v6592_v38, %v5908_v56  ;;  %v13691_v56 = vsel %vm4665_vm6, %v4709_v34, %v4711_v25  ;;  %v18167_v38 = vld [vmem:[#allocation189_spill] sm:$0xff]  ;;  %v3850_v50 = vrot.slane %v18168_v12, 2 }
 0x5eb   : > { %v6109_v6 = vsel %vm6022_vm7, %v6104_v61, %v6108_v49  ;;  %v3849_v36 = vrot.slane %v18167_v38, 1  ;;  %v6110_v61 = vrot.slane %v17995_v28, 2 }
 0x5ec   : > { %18162 = vst [vmem:[#allocation149_spill] sm:$0xff] %v13681_v57 }
 0x5ef   : > { %v5603_v14 = vpop.f32.mrf.mxu2 }
 0x5f0   : > { %v5909_v21 = vadd.f32 %v5603_v14, %v5393_v42  ;;  %v4349_v60 = vpop.f32.mrf.mxu0  ;;  %v5090_v7 = vpop.f32.mrf.mxu1  ;;  %v18169_v14 = vld [vmem:[#allocation200_spill] sm:$0xff] }
 0x5f1   : > { %v13688_v58 = vadd.f32 %v4349_v60, %v18163_v18  ;;  %v5394_v11 = vadd.f32 %v5090_v7, %v18165_v44  ;;  %v6594_v8 = vpop.f32.mrf.mxu3  ;;  %v3851_v44 = vor.u32 %v3850_v50, %v3849_v36 }
 0x5f2   : > { %v13694_v19 = vadd.f32 %v6594_v8, %v5909_v21  ;;  %v6111_v8 = vrot.slane %v17996_v15, 3 }
 0x5f3   : > { %18164 = vst [vmem:[#allocation146_spill] sm:$0xff] %v13688_v58  ;;  %10117 = vmatmul.msk.bf16.gmra.mxu0 %vm1276_vm3, %v3848_v53  ;;  %10165 = vmatmul.msk.bf16.gmra.mxu1 %vm1276_vm3, %v13635_v26  ;;  %v18171_v26 = vld [vmem:[#allocation98_spill] sm:$0xff]  ;;  %v3852_v58 = vsel %vm3681_vm5, %v3847_v48, %v3851_v44 }
 0x5f4   : > { %18166 = vst [vmem:[#allocation160_spill] sm:$0xff] %v13694_v19  ;;  %10237 = vmatmul.msk.bf16.gmra.mxu2 %vm1276_vm3, %v13691_v56 }
 0x5f6   : > { %10305 = vmatmul.msk.bf16.gmra.mxu3 %vm1276_vm3, %v6109_v6 }
 0x5f7   : > { %v5606_v31 = vpop.f32.mrf.mxu2 }
 0x5f8   : > { %v5910_v34 = vadd.f32 %v5606_v31, %v5394_v11  ;;  %v4351_v42 = vpop.f32.mrf.mxu0  ;;  %v5092_v21 = vpop.f32.mrf.mxu1  ;;  %v10722_v11 = vld [vmem:[%s10997_s11 + $0xd0] sm:$0xff] }
 0x5f9   : > { %v13706_v53 = vadd.f32 %v4351_v42, %v18169_v14  ;;  %v5395_v60 = vadd.f32 %v5092_v21, %v18171_v26  ;;  %v6597_v18 = vpop.f32.mrf.mxu3  ;;  %v4713_v6 = vrot.slane %v10722_v11, 2  ;;  %v6112_v42 = vor.u32 %v6111_v8, %v6110_v61  ;;  %v18173_v14 = vld [vmem:[#allocation203_spill] sm:$0xff] }
 0x5fa   : > { %v13709_v7 = vadd.f32 %v6597_v18, %v5910_v34  ;;  %v18177_v18 = vld [vmem:[#allocation204_spill] sm:$0xff] }
 0x5fb   : > { %18170 = vst [vmem:[#allocation74_spill] sm:$0xff] %v13706_v53  ;;  %v13719_v34 = vsel %vm4665_vm6, %v4711_v25, %v4713_v6  ;;  %v6113_v15 = vsel %vm6022_vm7, %v6108_v49, %v6112_v42  ;;  %v6114_v49 = vrot.slane %v18005_v10, 2 }
 0x5fc   : > { %18172 = vst [vmem:[#allocation163_spill] sm:$0xff] %v13709_v7 }
 0x5ff   : > { %v5608_v31 = vpop.f32.mrf.mxu2 }
 0x600   : > { %v5911_v19 = vadd.f32 %v5608_v31, %v5395_v60  ;;  %v4354_v57 = vpop.f32.mrf.mxu0  ;;  %v5095_v21 = vpop.f32.mrf.mxu1 }
 0x601   : > { %v13716_v53 = vadd.f32 %v4354_v57, %v18173_v14  ;;  %v5396_v36 = vadd.f32 %v5095_v21, %v13156_v59  ;;  %v6599_v28 = vpop.f32.mrf.mxu3  ;;  %v18175_v59 = vld [vmem:[#allocation193_spill] sm:$0xff]  ;;  %v6115_v21 = vrot.slane %v18006_v39, 3 }
 0x602   : > { %v13722_v50 = vadd.f32 %v6599_v28, %v5911_v19  ;;  %v3853_v26 = vrot.slane %v18175_v59, 1  ;;  %v18176_v19 = vld [vmem:[#allocation190_spill] sm:$0xff] }
 0x603   : > { %10118 = vmatmul.msk.bf16.gmra.mxu0 %vm1276_vm3, %v3852_v58  ;;  %10166 = vmatmul.msk.bf16.gmra.mxu1 %vm1276_vm3, %v13663_v33  ;;  %v3854_v60 = vrot.slane %v18176_v19, 2  ;;  %v18179_v33 = vld [vmem:[#allocation42_spill] sm:$0xff] }
 0x604   : > { %18174 = vst [vmem:[#allocation79_spill] sm:$0xff] %v13722_v50  ;;  %10238 = vmatmul.msk.bf16.gmra.mxu2 %vm1276_vm3, %v13719_v34 }
 0x605   : > { %v3855_v14 = vor.u32 %v3854_v60, %v3853_v26  ;;  %v18183_v26 = vld [vmem:[#allocation45_spill] sm:$0xff] }
 0x606   : > { %10306 = vmatmul.msk.bf16.gmra.mxu3 %vm1276_vm3, %v6113_v15 }
 0x607   : > { %v5611_v57 = vpop.f32.mrf.mxu2  ;;  %v3856_v7 = vsel %vm3681_vm5, %v3851_v44, %v3855_v14 }
 0x608   : > { %v5912_v48 = vadd.f32 %v5611_v57, %v5396_v36  ;;  %v4356_v25 = vpop.f32.mrf.mxu0  ;;  %v5097_v61 = vpop.f32.mrf.mxu1  ;;  %v10723_v36 = vld [vmem:[%s10997_s11 + $0xd8] sm:$0xff] }
 0x609   : > { %v13734_v58 = vadd.f32 %v4356_v25, %v18177_v18  ;;  %v5397_v8 = vadd.f32 %v5097_v61, %v18179_v33  ;;  %v6602_v11 = vpop.f32.mrf.mxu3  ;;  %v4715_v28 = vrot.slane %v10723_v36, 2  ;;  %v6116_v25 = vor.u32 %v6115_v21, %v6114_v49  ;;  %v18181_v18 = vld [vmem:[#allocation207_spill] sm:$0xff]  ;;  %v18186_v49 = vld [vmem:[#allocation194_spill] sm:$0xff]  ;;  %v18187_v36 = vld [vmem:[#allocation208_spill] sm:$0xff] }
 0x60a   : > { %v13737_v31 = vadd.f32 %v6602_v11, %v5912_v48  ;;  %v3858_v21 = vrot.slane %v18186_v49, 2 }
 0x60b   : > { %18178 = vst [vmem:[#allocation153_spill] sm:$0xff] %v13734_v58  ;;  %v13747_v48 = vsel %vm4665_vm6, %v4713_v6, %v4715_v28  ;;  %v6117_v39 = vsel %vm6022_vm7, %v6112_v42, %v6116_v25  ;;  %v6118_v42 = vrot.slane %v18015_v54, 2 }
 0x60c   : > { %18180 = vst [vmem:[#allocation164_spill] sm:$0xff] %v13737_v31 }
 0x60f   : > { %v5613_v15 = vpop.f32.mrf.mxu2 }
 0x610   : > { %v5913_v57 = vadd.f32 %v5613_v15, %v5397_v8  ;;  %v4359_v50 = vpop.f32.mrf.mxu0  ;;  %v5100_v61 = vpop.f32.mrf.mxu1  ;;  %v18185_v8 = vld [vmem:[#allocation197_spill] sm:$0xff] }
 0x611   : > { %v13744_v58 = vadd.f32 %v4359_v50, %v18181_v18  ;;  %v5398_v60 = vadd.f32 %v5100_v61, %v18183_v26  ;;  %v6604_v10 = vpop.f32.mrf.mxu3  ;;  %v3857_v11 = vrot.slane %v18185_v8, 1 }
 0x612   : > { %v13750_v33 = vadd.f32 %v6604_v10, %v5913_v57  ;;  %v6119_v10 = vrot.slane %v18016_v62, 3 }
 0x613   : > { %18182 = vst [vmem:[#allocation66_spill] sm:$0xff] %v13744_v58  ;;  %10119 = vmatmul.msk.bf16.gmra.mxu0 %vm1276_vm3, %v3856_v7  ;;  %10167 = vmatmul.msk.bf16.gmra.mxu1 %vm1276_vm3, %v13691_v56  ;;  %v18189_v56 = vld [vmem:[#allocation102_spill] sm:$0xff]  ;;  %v3859_v26 = vor.u32 %v3858_v21, %v3857_v11  ;;  %v18193_v11 = vld [vmem:[#allocation48_spill] sm:$0xff] }
 0x614   : > { %18184 = vst [vmem:[#allocation81_spill] sm:$0xff] %v13750_v33  ;;  %10239 = vmatmul.msk.bf16.gmra.mxu2 %vm1276_vm3, %v13747_v48 }
 0x615   : > { %v3860_v58 = vsel %vm3681_vm5, %v3855_v14, %v3859_v26 }
 0x616   : > { %10307 = vmatmul.msk.bf16.gmra.mxu3 %vm1276_vm3, %v6117_v39 }
 0x617   : > { %v5616_v44 = vpop.f32.mrf.mxu2 }
 0x618   : > { %v5914_v6 = vadd.f32 %v5616_v44, %v5398_v60  ;;  %v4361_v50 = vpop.f32.mrf.mxu0  ;;  %v5102_v15 = vpop.f32.mrf.mxu1  ;;  %v10724_v60 = vld [vmem:[%s10997_s11 + $0xe0] sm:$0xff] }
 0x619   : > { %v13762_v7 = vadd.f32 %v4361_v50, %v18187_v36  ;;  %v5399_v57 = vadd.f32 %v5102_v15, %v18189_v56  ;;  %v6607_v18 = vpop.f32.mrf.mxu3  ;;  %v4717_v39 = vrot.slane %v10724_v60, 2  ;;  %v6120_v50 = vor.u32 %v6119_v10, %v6118_v42  ;;  %v18191_v36 = vld [vmem:[#allocation211_spill] sm:$0xff]  ;;  %v18197_v10 = vld [vmem:[#allocation212_spill] sm:$0xff] }
 0x61a   : > { %v13765_v61 = vadd.f32 %v6607_v18, %v5914_v6 }
 0x61b   : > { %18188 = vst [vmem:[#allocation78_spill] sm:$0xff] %v13762_v7  ;;  %v13775_v6 = vsel %vm4665_vm6, %v4715_v28, %v4717_v39  ;;  %v6121_v62 = vsel %vm6022_vm7, %v6116_v25, %v6120_v50  ;;  %v6122_v25 = vrot.slane %v18025_v45, 2 }
 0x61c   : > { %18190 = vst [vmem:[#allocation167_spill] sm:$0xff] %v13765_v61 }
 0x61f   : > { %v5618_v44 = vpop.f32.mrf.mxu2 }
 0x620   : > { %v5915_v31 = vadd.f32 %v5618_v44, %v5399_v57  ;;  %v4364_v33 = vpop.f32.mrf.mxu0  ;;  %v5105_v15 = vpop.f32.mrf.mxu1  ;;  %v18195_v57 = vld [vmem:[#allocation201_spill] sm:$0xff] }
 0x621   : > { %v13772_v7 = vadd.f32 %v4364_v33, %v18191_v36  ;;  %v5400_v21 = vadd.f32 %v5105_v15, %v18193_v11  ;;  %v6609_v54 = vpop.f32.mrf.mxu3  ;;  %v3861_v18 = vrot.slane %v18195_v57, 1 }
 0x622   : > { %v13778_v56 = vadd.f32 %v6609_v54, %v5915_v31  ;;  %v18196_v31 = vld [vmem:[#allocation198_spill] sm:$0xff]  ;;  %v6123_v54 = vrot.slane %v18026_v32, 3 }
 0x623   : > { %18192 = vst [vmem:[#allocation83_spill] sm:$0xff] %v13772_v7  ;;  %10120 = vmatmul.msk.bf16.gmra.mxu0 %vm1276_vm3, %v3860_v58  ;;  %10168 = vmatmul.msk.bf16.gmra.mxu1 %vm1276_vm3, %v13719_v34  ;;  %v3862_v42 = vrot.slane %v18196_v31, 2  ;;  %v18199_v34 = vld [vmem:[#allocation51_spill] sm:$0xff] }
 0x624   : > { %18194 = vst [vmem:[#allocation168_spill] sm:$0xff] %v13778_v56  ;;  %10240 = vmatmul.msk.bf16.gmra.mxu2 %vm1276_vm3, %v13775_v6 }
 0x625   : > { %v3863_v11 = vor.u32 %v3862_v42, %v3861_v18  ;;  %v18203_v18 = vld [vmem:[#allocation106_spill] sm:$0xff] }
 0x626   : > { %10308 = vmatmul.msk.bf16.gmra.mxu3 %vm1276_vm3, %v6121_v62 }
 0x627   : > { %v5621_v14 = vpop.f32.mrf.mxu2  ;;  %v3864_v7 = vsel %vm3681_vm5, %v3859_v26, %v3863_v11 }
 0x628   : > { %v5916_v28 = vadd.f32 %v5621_v14, %v5400_v21  ;;  %v4366_v33 = vpop.f32.mrf.mxu0  ;;  %v5107_v60 = vpop.f32.mrf.mxu1  ;;  %v10725_v21 = vld [vmem:[%s10997_s11 + $0xe8] sm:$0xff] }
 0x629   : > { %v13790_v58 = vadd.f32 %v4366_v33, %v18197_v10  ;;  %v5401_v44 = vadd.f32 %v5107_v60, %v18199_v34  ;;  %v6612_v36 = vpop.f32.mrf.mxu3  ;;  %v4719_v62 = vrot.slane %v10725_v21, 2  ;;  %v6124_v33 = vor.u32 %v6123_v54, %v6122_v25  ;;  %v18201_v10 = vld [vmem:[#allocation215_spill] sm:$0xff]  ;;  %v18207_v54 = vld [vmem:[#allocation216_spill] sm:$0xff] }
 0x62a   : > { %v13793_v15 = vadd.f32 %v6612_v36, %v5916_v28 }
 0x62b   : > { %18198 = vst [vmem:[#allocation72_spill] sm:$0xff] %v13790_v58  ;;  %v13803_v28 = vsel %vm4665_vm6, %v4717_v39, %v4719_v62  ;;  %v6125_v32 = vsel %vm6022_vm7, %v6120_v50, %v6124_v33  ;;  %v6126_v50 = vrot.slane %v18035_v52, 2 }
 0x62c   : > { %18200 = vst [vmem:[#allocation85_spill] sm:$0xff] %v13793_v15 }
 0x62f   : > { %v5623_v14 = vpop.f32.mrf.mxu2 }
 0x630   : > { %v5917_v61 = vadd.f32 %v5623_v14, %v5401_v44  ;;  %v4369_v56 = vpop.f32.mrf.mxu0  ;;  %v5110_v60 = vpop.f32.mrf.mxu1  ;;  %v18205_v44 = vld [vmem:[#allocation205_spill] sm:$0xff] }
 0x631   : > { %v13800_v58 = vadd.f32 %v4369_v56, %v18201_v10  ;;  %v5402_v42 = vadd.f32 %v5110_v60, %v18203_v18  ;;  %v6614_v45 = vpop.f32.mrf.mxu3  ;;  %v3865_v36 = vrot.slane %v18205_v44, 1 }
 0x632   : > { %v13806_v34 = vadd.f32 %v6614_v45, %v5917_v61  ;;  %v18206_v61 = vld [vmem:[#allocation202_spill] sm:$0xff]  ;;  %v6127_v45 = vrot.slane %v18036_v23, 3 }
 0x633   : > { %18202 = vst [vmem:[#allocation82_spill] sm:$0xff] %v13800_v58  ;;  %10121 = vmatmul.msk.bf16.gmra.mxu0 %vm1276_vm3, %v3864_v7  ;;  %10169 = vmatmul.msk.bf16.gmra.mxu1 %vm1276_vm3, %v13747_v48  ;;  %v3866_v25 = vrot.slane %v18206_v61, 2  ;;  %v18209_v48 = vld [vmem:[#allocation54_spill] sm:$0xff] }
 0x634   : > { %18204 = vst [vmem:[#allocation171_spill] sm:$0xff] %v13806_v34  ;;  %10241 = vmatmul.msk.bf16.gmra.mxu2 %vm1276_vm3, %v13803_v28 }
 0x635   : > { %v3867_v18 = vor.u32 %v3866_v25, %v3865_v36  ;;  %v18213_v36 = vld [vmem:[#allocation57_spill] sm:$0xff] }
 0x636   : > { %10309 = vmatmul.msk.bf16.gmra.mxu3 %vm1276_vm3, %v6125_v32 }
 0x637   : > { %v5626_v26 = vpop.f32.mrf.mxu2  ;;  %v3868_v58 = vsel %vm3681_vm5, %v3863_v11, %v3867_v18 }
 0x638   : > { %v5918_v39 = vadd.f32 %v5626_v26, %v5402_v42  ;;  %v4371_v56 = vpop.f32.mrf.mxu0  ;;  %v5112_v21 = vpop.f32.mrf.mxu1  ;;  %v10726_v42 = vld [vmem:[%s10997_s11 + $0xf0] sm:$0xff] }
 0x639   : > { %v13818_v7 = vadd.f32 %v4371_v56, %v18207_v54  ;;  %v5403_v14 = vadd.f32 %v5112_v21, %v18209_v48  ;;  %v6617_v10 = vpop.f32.mrf.mxu3  ;;  %v4721_v32 = vrot.slane %v10726_v42, 2  ;;  %v6128_v56 = vor.u32 %v6127_v45, %v6126_v50  ;;  %v18211_v54 = vld [vmem:[#allocation219_spill] sm:$0xff]  ;;  %v18217_v45 = vld [vmem:[#allocation220_spill] sm:$0xff] }
 0x63a   : > { %v13821_v60 = vadd.f32 %v6617_v10, %v5918_v39 }
 0x63b   : > { %18208 = vst [vmem:[#allocation87_spill] sm:$0xff] %v13818_v7  ;;  %v13831_v39 = vsel %vm4665_vm6, %v4719_v62, %v4721_v32  ;;  %v6129_v23 = vsel %vm6022_vm7, %v6124_v33, %v6128_v56  ;;  %v6130_v33 = vrot.slane %v18045_v4, 2 }
 0x63c   : > { %18210 = vst [vmem:[#allocation172_spill] sm:$0xff] %v13821_v60 }
 0x63f   : > { %v5628_v26 = vpop.f32.mrf.mxu2 }
 0x640   : > { %v5919_v15 = vadd.f32 %v5628_v26, %v5403_v14  ;;  %v4374_v34 = vpop.f32.mrf.mxu0  ;;  %v5115_v21 = vpop.f32.mrf.mxu1  ;;  %v18215_v14 = vld [vmem:[#allocation209_spill] sm:$0xff] }
 0x641   : > { %v13828_v7 = vadd.f32 %v4374_v34, %v18211_v54  ;;  %v5404_v25 = vadd.f32 %v5115_v21, %v18213_v36  ;;  %v6619_v52 = vpop.f32.mrf.mxu3  ;;  %v3869_v10 = vrot.slane %v18215_v14, 1 }
 0x642   : > { %v13834_v48 = vadd.f32 %v6619_v52, %v5919_v15  ;;  %v18216_v15 = vld [vmem:[#allocation206_spill] sm:$0xff]  ;;  %v6131_v52 = vrot.slane %v18046_v13, 3 }
 0x643   : > { %18212 = vst [vmem:[#allocation88_spill] sm:$0xff] %v13828_v7  ;;  %10122 = vmatmul.msk.bf16.gmra.mxu0 %vm1276_vm3, %v3868_v58  ;;  %10170 = vmatmul.msk.bf16.gmra.mxu1 %vm1276_vm3, %v13775_v6  ;;  %v3870_v50 = vrot.slane %v18216_v15, 2  ;;  %v18219_v6 = vld [vmem:[#allocation110_spill] sm:$0xff] }
 0x644   : > { %18214 = vst [vmem:[#allocation89_spill] sm:$0xff] %v13834_v48  ;;  %10242 = vmatmul.msk.bf16.gmra.mxu2 %vm1276_vm3, %v13831_v39 }
 0x645   : > { %v3871_v36 = vor.u32 %v3870_v50, %v3869_v10  ;;  %v18223_v10 = vld [vmem:[#allocation61_spill] sm:$0xff] }
 0x646   : > { %10310 = vmatmul.msk.bf16.gmra.mxu3 %vm1276_vm3, %v6129_v23 }
 0x647   : > { %v5631_v11 = vpop.f32.mrf.mxu2  ;;  %v3872_v7 = vsel %vm3681_vm5, %v3867_v18, %v3871_v36 }
 0x648   : > { %v5920_v62 = vadd.f32 %v5631_v11, %v5404_v25  ;;  %v4376_v34 = vpop.f32.mrf.mxu0  ;;  %v5117_v42 = vpop.f32.mrf.mxu1  ;;  %v10727_v25 = vld [vmem:[%s10997_s11 + $0xf8] sm:$0xff] }
 0x649   : > { %v13846_v58 = vadd.f32 %v4376_v34, %v18217_v45  ;;  %v5405_v26 = vadd.f32 %v5117_v42, %v18219_v6  ;;  %v6622_v54 = vpop.f32.mrf.mxu3  ;;  %v4723_v23 = vrot.slane %v10727_v25, 2  ;;  %v6132_v34 = vor.u32 %v6131_v52, %v6130_v33  ;;  %v18221_v45 = vld [vmem:[#allocation222_spill] sm:$0xff]  ;;  %v18227_v52 = vld [vmem:[#allocation223_spill] sm:$0xff] }
 0x64a   : > { %v13849_v21 = vadd.f32 %v6622_v54, %v5920_v62 }
 0x64b   : > { %18218 = vst [vmem:[#allocation86_spill] sm:$0xff] %v13846_v58  ;;  %v13859_v62 = vsel %vm4665_vm6, %v4721_v32, %v4723_v23  ;;  %v6133_v13 = vsel %vm6022_vm7, %v6128_v56, %v6132_v34  ;;  %v6134_v56 = vrot.slane %v18052_v1, 2 }
 0x64c   : > { %18220 = vst [vmem:[#allocation175_spill] sm:$0xff] %v13849_v21 }
 0x64f   : > { %v5633_v11 = vpop.f32.mrf.mxu2 }
 0x650   : > { %v5921_v48 = vadd.f32 %v5633_v11, %v5405_v26  ;;  %v4379_v60 = vpop.f32.mrf.mxu0  ;;  %v5120_v42 = vpop.f32.mrf.mxu1  ;;  %v18225_v26 = vld [vmem:[#allocation213_spill] sm:$0xff] }
 0x651   : > { %v13856_v58 = vadd.f32 %v4379_v60, %v18221_v45  ;;  %v5406_v50 = vadd.f32 %v5120_v42, %v18223_v10  ;;  %v6624_v4 = vpop.f32.mrf.mxu3  ;;  %v3873_v54 = vrot.slane %v18225_v26, 1 }
 0x652   : > { %v13862_v6 = vadd.f32 %v6624_v4, %v5921_v48  ;;  %v18226_v48 = vld [vmem:[#allocation210_spill] sm:$0xff]  ;;  %v6135_v4 = vrot.slane %v18053_v5, 3 }
 0x653   : > { %18222 = vst [vmem:[#allocation38_spill] sm:$0xff] %v13856_v58  ;;  %10123 = vmatmul.msk.bf16.gmra.mxu0 %vm1276_vm3, %v3872_v7  ;;  %10171 = vmatmul.msk.bf16.gmra.mxu1 %vm1276_vm3, %v13803_v28  ;;  %v3874_v33 = vrot.slane %v18226_v48, 2  ;;  %v18229_v28 = vld [vmem:[#allocation64_spill] sm:$0xff] }
 0x654   : > { %18224 = vst [vmem:[#allocation176_spill] sm:$0xff] %v13862_v6  ;;  %10243 = vmatmul.msk.bf16.gmra.mxu2 %vm1276_vm3, %v13859_v62 }
 0x655   : > { %v3875_v10 = vor.u32 %v3874_v33, %v3873_v54  ;;  %v18232_v54 = vld [vmem:[#allocation114_spill] sm:$0xff] }
 0x656   : > { %10311 = vmatmul.msk.bf16.gmra.mxu3 %vm1276_vm3, %v6133_v13 }
 0x657   : > { %v5636_v60 = vpop.f32.mrf.mxu2  ;;  %v3876_v58 = vsel %vm3681_vm5, %v3871_v36, %v3875_v10 }
 0x658   : > { %v5922_v18 = vadd.f32 %v5636_v60, %v5406_v50  ;;  %v4381_v32 = vpop.f32.mrf.mxu0  ;;  %v5122_v25 = vpop.f32.mrf.mxu1  ;;  %v10728_v50 = vld [vmem:[%s10997_s11 + $0x100] sm:$0xff] }
 0x659   : > { %v13874_v7 = vadd.f32 %v4381_v32, %v18227_v52  ;;  %v5407_v11 = vadd.f32 %v5122_v25, %v18229_v28  ;;  %v6627_v45 = vpop.f32.mrf.mxu3  ;;  %v4725_v13 = vrot.slane %v10728_v50, 2  ;;  %v6136_v32 = vor.u32 %v6135_v4, %v6134_v56  ;;  %v18231_v52 = vld [vmem:[#allocation224_spill] sm:$0xff]  ;;  %v18236_v4 = vld [vmem:[#allocation225_spill] sm:$0xff] }
 0x65a   : > { %v13877_v42 = vadd.f32 %v6627_v45, %v5922_v18 }
 0x65b   : > { %18228 = vst [vmem:[#allocation40_spill] sm:$0xff] %v13874_v7  ;;  %v13887_v18 = vsel %vm4665_vm6, %v4723_v23, %v4725_v13  ;;  %v6137_v5 = vsel %vm6022_vm7, %v6132_v34, %v6136_v32  ;;  %v6138_v34 = vrot.slane %v18058_v43, 2 }
 0x65c   : > { %18230 = vst [vmem:[#allocation93_spill] sm:$0xff] %v13877_v42 }
 0x65f   : > { %v5638_v60 = vpop.f32.mrf.mxu2 }
 0x660   : > { %v5923_v6 = vadd.f32 %v5638_v60, %v5407_v11  ;;  %v4384_v21 = vpop.f32.mrf.mxu0  ;;  %v5125_v25 = vpop.f32.mrf.mxu1  ;;  %v18234_v11 = vld [vmem:[#allocation217_spill] sm:$0xff] }
 0x661   : > { %v13884_v7 = vadd.f32 %v4384_v21, %v18231_v52  ;;  %v5408_v33 = vadd.f32 %v5125_v25, %v18232_v54  ;;  %v6629_v1 = vpop.f32.mrf.mxu3  ;;  %v3877_v45 = vrot.slane %v18234_v11, 1  ;;  %v6139_v54 = vrot.slane %v18059_v0, 3 }
 0x662   : > { %v13890_v28 = vadd.f32 %v6629_v1, %v5923_v6  ;;  %v18235_v6 = vld [vmem:[#allocation214_spill] sm:$0xff] }
 0x663   : > { %10124 = vmatmul.msk.bf16.gmra.mxu0 %vm1276_vm3, %v3876_v58  ;;  %10172 = vmatmul.msk.bf16.gmra.mxu1 %vm1276_vm3, %v13831_v39  ;;  %v3878_v56 = vrot.slane %v18235_v6, 2 }
 0x664   : > { %18233 = vst [vmem:[#allocation90_spill] sm:$0xff] %v13890_v28  ;;  %10244 = vmatmul.msk.bf16.gmra.mxu2 %vm1276_vm3, %v13887_v18 }
 0x665   : > { %v3879_v25 = vor.u32 %v3878_v56, %v3877_v45 }
 0x666   : > { %10312 = vmatmul.msk.bf16.gmra.mxu3 %vm1276_vm3, %v6137_v5 }
 0x667   : > { %v5641_v21 = vpop.f32.mrf.mxu2  ;;  %v3880_v42 = vsel %vm3681_vm5, %v3875_v10, %v3879_v25 }
 0x668   : > { %v5924_v36 = vadd.f32 %v5641_v21, %v5408_v33  ;;  %v4386_v23 = vpop.f32.mrf.mxu0  ;;  %v5127_v50 = vpop.f32.mrf.mxu1  ;;  %v10729_v33 = vld [vmem:[%s10997_s11 + $0x108] sm:$0xff] }
 0x669   : > { %v13902_v58 = vadd.f32 %v4386_v23, %v18236_v4  ;;  %v5409_v39 = vadd.f32 %v5127_v50, %v13342_v27  ;;  %v6632_v60 = vpop.f32.mrf.mxu3  ;;  %v4727_v1 = vrot.slane %v10729_v33, 2  ;;  %v6140_v23 = vor.u32 %v6139_v54, %v6138_v34  ;;  %v18239_v4 = vld [vmem:[#allocation226_spill] sm:$0xff]  ;;  %v18243_v34 = vld [vmem:[#allocation227_spill] sm:$0xff] }
 0x66a   : > { %v13905_v52 = vadd.f32 %v6632_v60, %v5924_v36 }
 0x66b   : > { %18237 = vst [vmem:[#allocation179_spill] sm:$0xff] %v13902_v58  ;;  %v13915_v36 = vsel %vm4665_vm6, %v4725_v13, %v4727_v1  ;;  %v6141_v0 = vsel %vm6022_vm7, %v6136_v32, %v6140_v23  ;;  %v6142_v32 = vrot.slane %v18065_v63, 2 }
 0x66c   : > { %18238 = vst [vmem:[#allocation43_spill] sm:$0xff] %v13905_v52 }
 0x66f   : > { %v5643_v5 = vpop.f32.mrf.mxu2 }
 0x670   : > { %v5925_v21 = vadd.f32 %v5643_v5, %v5409_v39  ;;  %v4389_v28 = vpop.f32.mrf.mxu0  ;;  %v5130_v27 = vpop.f32.mrf.mxu1  ;;  %v18242_v39 = vld [vmem:[#allocation218_spill] sm:$0xff] }
 0x671   : > { %v13912_v58 = vadd.f32 %v4389_v28, %v18239_v4  ;;  %v5410_v45 = vadd.f32 %v5130_v27, %v13352_v37  ;;  %v6634_v43 = vpop.f32.mrf.mxu3  ;;  %v18241_v37 = vld [vmem:[#allocation221_spill] sm:$0xff]  ;;  %v3882_v60 = vrot.slane %v18242_v39, 2  ;;  %v6143_v4 = vrot.slane %v18066_v24, 3  ;;  %v10730_v27 = vld [vmem:[%s10997_s11 + $0x110] sm:$0xff] }
 0x672   : > { %v13918_v56 = vadd.f32 %v6634_v43, %v5925_v21  ;;  %v3881_v50 = vrot.slane %v18241_v37, 1 }
 0x673   : > { %10125 = vmatmul.msk.bf16.gmra.mxu0 %vm1276_vm3, %v3880_v42  ;;  %10173 = vmatmul.msk.bf16.gmra.mxu1 %vm1276_vm3, %v13859_v62 }
 0x674   : > { %18240 = vst [vmem:[#allocation180_spill] sm:$0xff] %v13918_v56  ;;  %10245 = vmatmul.msk.bf16.gmra.mxu2 %vm1276_vm3, %v13915_v36  ;;  %v3883_v21 = vor.u32 %v3882_v60, %v3881_v50 }
 0x676   : > { %10313 = vmatmul.msk.bf16.gmra.mxu3 %vm1276_vm3, %v6141_v0  ;;  %v3884_v56 = vsel %vm3681_vm5, %v3879_v25, %v3883_v21 }
 0x677   : > { %v5646_v10 = vpop.f32.mrf.mxu2 }
 0x678   : > { %v5926_v13 = vadd.f32 %v5646_v10, %v5410_v45  ;;  %v4391_v28 = vpop.f32.mrf.mxu0  ;;  %v5132_v54 = vpop.f32.mrf.mxu1  ;;  %v4729_v45 = vrot.slane %v10730_v27, 2 }
 0x679   : > { %v13930_v42 = vadd.f32 %v4391_v28, %v18243_v34  ;;  %v5411_v62 = vadd.f32 %v5132_v54, %v13370_v47  ;;  %v6637_v33 = vpop.f32.mrf.mxu3  ;;  %v6144_v28 = vor.u32 %v6143_v4, %v6142_v32  ;;  %v18245_v34 = vld [vmem:[#allocation228_spill] sm:$0xff]  ;;  %v18250_v4 = vld [vmem:[#allocation229_spill] sm:$0xff] }
 0x67a   : > { %v13933_v5 = vadd.f32 %v6637_v33, %v5926_v13  ;;  %v13943_v13 = vsel %vm4665_vm6, %v4727_v1, %v4729_v45  ;;  %v18249_v33 = vld [vmem:[#allocation6_spill] sm:$0xff] }
 0x67b   : > { %v6145_v24 = vsel %vm6022_vm7, %v6140_v23, %v6144_v28  ;;  %v3886_v32 = vrot.slane %v18249_v33, 2  ;;  %v6146_v23 = vrot.slane %v18075_v22, 2 }
 0x67c   : > { %18244 = vst [vmem:[#allocation46_spill] sm:$0xff] %v13933_v5 }
 0x67f   : > { %v5648_v43 = vpop.f32.mrf.mxu2 }
 0x680   : > { %v5927_v0 = vadd.f32 %v5648_v43, %v5411_v62  ;;  %v4394_v10 = vpop.f32.mrf.mxu0  ;;  %v5135_v47 = vpop.f32.mrf.mxu1 }
 0x681   : > { %v13940_v52 = vadd.f32 %v4394_v10, %v18245_v34  ;;  %v5412_v50 = vadd.f32 %v5135_v47, %v13380_v30  ;;  %v6639_v63 = vpop.f32.mrf.mxu3  ;;  %v18248_v30 = vld [vmem:[#allocation7_spill] sm:$0xff]  ;;  %v18253_v34 = vld [vmem:[#allocation150_spill] sm:$0xff] }
 0x682   : > { %v13946_v60 = vadd.f32 %v6639_v63, %v5927_v0  ;;  %v3885_v62 = vrot.slane %v18248_v30, 1  ;;  %v6147_v47 = vrot.slane %v18253_v34, 3  ;;  %v18259_v34 = vld [vmem:[#allocation8_spill] sm:$0xff] }
 0x683   : > { %18246 = vst [vmem:[#allocation97_spill] sm:$0xff] %v13940_v52  ;;  %10126 = vmatmul.msk.bf16.gmra.mxu0 %vm1276_vm3, %v3884_v56  ;;  %10174 = vmatmul.msk.bf16.gmra.mxu1 %vm1276_vm3, %v13887_v18 }
 0x684   : > { %18247 = vst [vmem:[#allocation94_spill] sm:$0xff] %v13946_v60  ;;  %10246 = vmatmul.msk.bf16.gmra.mxu2 %vm1276_vm3, %v13943_v13  ;;  %v3887_v10 = vor.u32 %v3886_v32, %v3885_v62  ;;  %v18256_v62 = vld [vmem:[#allocation132_spill] sm:$0xff] }
 0x686   : > { %10314 = vmatmul.msk.bf16.gmra.mxu3 %vm1276_vm3, %v6145_v24  ;;  %v3888_v5 = vsel %vm3681_vm5, %v3883_v21, %v3887_v10 }
 0x687   : > { %v5651_v25 = vpop.f32.mrf.mxu2 }
 0x688   : > { %v5928_v1 = vadd.f32 %v5651_v25, %v5412_v50  ;;  %v4396_v54 = vpop.f32.mrf.mxu0  ;;  %v5137_v27 = vpop.f32.mrf.mxu1  ;;  %v10731_v50 = vld [vmem:[%s10997_s11 + $0x118] sm:$0xff] }
 0x689   : > { %v13958_v56 = vadd.f32 %v4396_v54, %v18250_v4  ;;  %v5413_v18 = vadd.f32 %v5137_v27, %v13398_v17  ;;  %v6642_v43 = vpop.f32.mrf.mxu3  ;;  %v4731_v63 = vrot.slane %v10731_v50, 2  ;;  %v6148_v54 = vor.u32 %v6147_v47, %v6146_v23  ;;  %v18254_v4 = vld [vmem:[#allocation230_spill] sm:$0xff]  ;;  %v18260_v50 = vld [vmem:[#allocation231_spill] sm:$0xff] }
 0x68a   : > { %v13961_v0 = vadd.f32 %v6642_v43, %v5928_v1  ;;  %v18258_v43 = vld [vmem:[#allocation15_spill] sm:$0xff]  ;;  %v3890_v47 = vrot.slane %v18259_v34, 2 }
 0x68b   : > { %18251 = vst [vmem:[#allocation183_spill] sm:$0xff] %v13958_v56  ;;  %v13971_v1 = vsel %vm4665_vm6, %v4729_v45, %v4731_v63  ;;  %v6149_v21 = vsel %vm6022_vm7, %v6144_v28, %v6148_v54  ;;  %v3889_v23 = vrot.slane %v18258_v43, 1  ;;  %v18264_v28 = vld [vmem:[#allocation157_spill] sm:$0xff] }
 0x68c   : > { %18252 = vst [vmem:[#allocation49_spill] sm:$0xff] %v13961_v0 }
 0x68f   : > { %v5653_v24 = vpop.f32.mrf.mxu2 }
 0x690   : > { %v5929_v25 = vadd.f32 %v5653_v24, %v5413_v18  ;;  %v4399_v60 = vpop.f32.mrf.mxu0  ;;  %v5140_v17 = vpop.f32.mrf.mxu1 }
 0x691   : > { %v13968_v56 = vadd.f32 %v4399_v60, %v18254_v4  ;;  %v5414_v32 = vadd.f32 %v5140_v17, %v18256_v62  ;;  %v6644_v22 = vpop.f32.mrf.mxu3  ;;  %v3891_v62 = vor.u32 %v3890_v47, %v3889_v23  ;;  %v18268_v23 = vld [vmem:[#allocation125_spill] sm:$0xff] }
 0x692   : > { %v13974_v27 = vadd.f32 %v6644_v22, %v5929_v25  ;;  %v6150_v22 = vrot.slane %v18264_v28, 2 }
 0x693   : > { %18255 = vst [vmem:[#allocation173_spill] sm:$0xff] %v13968_v56  ;;  %10127 = vmatmul.msk.bf16.gmra.mxu0 %vm1276_vm3, %v3888_v5  ;;  %10175 = vmatmul.msk.bf16.gmra.mxu1 %vm1276_vm3, %v13915_v36  ;;  %v18262_v36 = vld [vmem:[#allocation135_spill] sm:$0xff]  ;;  %v3892_v34 = vsel %vm3681_vm5, %v3887_v10, %v3891_v62 }
 0x694   : > { %18257 = vst [vmem:[#allocation170_spill] sm:$0xff] %v13974_v27  ;;  %10247 = vmatmul.msk.bf16.gmra.mxu2 %vm1276_vm3, %v13971_v1 }
 0x696   : > { %10315 = vmatmul.msk.bf16.gmra.mxu3 %vm1276_vm3, %v6149_v21  ;;  %v18265_v21 = vld [vmem:[#allocation154_spill] sm:$0xff] }
 0x697   : > { %v5656_v45 = vpop.f32.mrf.mxu2  ;;  %v6151_v0 = vrot.slane %v18265_v21, 3 }
 0x698   : > { %v5930_v60 = vadd.f32 %v5656_v45, %v5414_v32  ;;  %v4401_v18 = vpop.f32.mrf.mxu0  ;;  %v5142_v24 = vpop.f32.mrf.mxu1  ;;  %v10732_v32 = vld [vmem:[%s10997_s11 + $0x120] sm:$0xff] }
 0x699   : > { %v13986_v5 = vadd.f32 %v4401_v18, %v18260_v50  ;;  %v5415_v25 = vadd.f32 %v5142_v24, %v18262_v36  ;;  %v6647_v4 = vpop.f32.mrf.mxu3  ;;  %v4733_v45 = vrot.slane %v10732_v32, 2  ;;  %v6152_v18 = vor.u32 %v6151_v0, %v6150_v22  ;;  %v18266_v50 = vld [vmem:[#allocation232_spill] sm:$0xff]  ;;  %v18272_v22 = vld [vmem:[#allocation233_spill] sm:$0xff] }
 0x69a   : > { %v13989_v17 = vadd.f32 %v6647_v4, %v5930_v60 }
 0x69b   : > { %18261 = vst [vmem:[#allocation184_spill] sm:$0xff] %v13986_v5  ;;  %v13999_v60 = vsel %vm4665_vm6, %v4731_v63, %v4733_v45 }
 0x69c   : > { %18263 = vst [vmem:[#allocation52_spill] sm:$0xff] %v13989_v17 }
 0x69f   : > { %v5658_v27 = vpop.f32.mrf.mxu2 }
 0x6a0   : > { %v5931_v56 = vadd.f32 %v5658_v27, %v5415_v25  ;;  %v4404_v52 = vpop.f32.mrf.mxu0  ;;  %v5145_v24 = vpop.f32.mrf.mxu1  ;;  %v18270_v27 = vld [vmem:[#allocation21_spill] sm:$0xff] }
 0x6a1   : > { %v13996_v5 = vadd.f32 %v4404_v52, %v18266_v50  ;;  %v5416_v47 = vadd.f32 %v5145_v24, %v18268_v23  ;;  %v6649_v36 = vpop.f32.mrf.mxu3  ;;  %v6153_v52 = vsel %vm6022_vm7, %v6148_v54, %v6152_v18  ;;  %v3893_v25 = vrot.slane %v18270_v27, 1  ;;  %v18276_v54 = vld [vmem:[#allocation161_spill] sm:$0xff] }
 0x6a2   : > { %v14002_v4 = vadd.f32 %v6649_v36, %v5931_v56  ;;  %v18271_v56 = vld [vmem:[#allocation16_spill] sm:$0xff]  ;;  %v6154_v36 = vrot.slane %v18276_v54, 2 }
 0x6a3   : > { %18267 = vst [vmem:[#allocation187_spill] sm:$0xff] %v13996_v5  ;;  %10128 = vmatmul.msk.bf16.gmra.mxu0 %vm1276_vm3, %v3892_v34  ;;  %10176 = vmatmul.msk.bf16.gmra.mxu1 %vm1276_vm3, %v13943_v13  ;;  %v3894_v28 = vrot.slane %v18271_v56, 2  ;;  %v18274_v13 = vld [vmem:[#allocation136_spill] sm:$0xff] }
 0x6a4   : > { %18269 = vst [vmem:[#allocation55_spill] sm:$0xff] %v14002_v4  ;;  %10248 = vmatmul.msk.bf16.gmra.mxu2 %vm1276_vm3, %v13999_v60 }
 0x6a5   : > { %v3895_v23 = vor.u32 %v3894_v28, %v3893_v25  ;;  %v18280_v25 = vld [vmem:[#allocation139_spill] sm:$0xff] }
 0x6a6   : > { %10316 = vmatmul.msk.bf16.gmra.mxu3 %vm1276_vm3, %v6153_v52  ;;  %v18277_v52 = vld [vmem:[#allocation158_spill] sm:$0xff] }
 0x6a7   : > { %v5661_v0 = vpop.f32.mrf.mxu2  ;;  %v6155_v17 = vrot.slane %v18277_v52, 3  ;;  %v3896_v56 = vsel %vm3681_vm5, %v3891_v62, %v3895_v23 }
 0x6a8   : > { %v5932_v10 = vadd.f32 %v5661_v0, %v5416_v47  ;;  %v4406_v63 = vpop.f32.mrf.mxu0  ;;  %v5147_v21 = vpop.f32.mrf.mxu1  ;;  %v10733_v47 = vld [vmem:[%s10997_s11 + $0x128] sm:$0xff] }
 0x6a9   : > { %v14014_v34 = vadd.f32 %v4406_v63, %v18272_v22  ;;  %v5417_v32 = vadd.f32 %v5147_v21, %v18274_v13  ;;  %v6652_v50 = vpop.f32.mrf.mxu3  ;;  %v4735_v0 = vrot.slane %v10733_v47, 2  ;;  %v6156_v63 = vor.u32 %v6155_v17, %v6154_v36  ;;  %v18278_v22 = vld [vmem:[#allocation234_spill] sm:$0xff]  ;;  %v18284_v36 = vld [vmem:[#allocation235_spill] sm:$0xff] }
 0x6aa   : > { %v14017_v24 = vadd.f32 %v6652_v50, %v5932_v10 }
 0x6ab   : > { %18273 = vst [vmem:[#allocation177_spill] sm:$0xff] %v14014_v34  ;;  %v14027_v10 = vsel %vm4665_vm6, %v4733_v45, %v4735_v0  ;;  %v6157_v17 = vsel %vm6022_vm7, %v6152_v18, %v6156_v63  ;;  %v18288_v18 = vld [vmem:[#allocation165_spill] sm:$0xff] }
 0x6ac   : > { %18275 = vst [vmem:[#allocation174_spill] sm:$0xff] %v14017_v24 }
 0x6af   : > { %v5663_v4 = vpop.f32.mrf.mxu2 }
 0x6b0   : > { %v5933_v5 = vadd.f32 %v5663_v4, %v5417_v32  ;;  %v4409_v27 = vpop.f32.mrf.mxu0  ;;  %v5150_v21 = vpop.f32.mrf.mxu1 }
 0x6b1   : > { %v14024_v34 = vadd.f32 %v4409_v27, %v18278_v22  ;;  %v5418_v28 = vadd.f32 %v5150_v21, %v18280_v25  ;;  %v6654_v13 = vpop.f32.mrf.mxu3  ;;  %v18282_v27 = vld [vmem:[#allocation28_spill] sm:$0xff] }
 0x6b2   : > { %v14030_v50 = vadd.f32 %v6654_v13, %v5933_v5  ;;  %v3897_v32 = vrot.slane %v18282_v27, 1  ;;  %v18283_v5 = vld [vmem:[#allocation22_spill] sm:$0xff]  ;;  %v6158_v13 = vrot.slane %v18288_v18, 2  ;;  %v18296_v18 = vld [vmem:[#allocation29_spill] sm:$0xff] }
 0x6b3   : > { %18279 = vst [vmem:[#allocation188_spill] sm:$0xff] %v14024_v34  ;;  %10129 = vmatmul.msk.bf16.gmra.mxu0 %vm1276_vm3, %v3896_v56  ;;  %10177 = vmatmul.msk.bf16.gmra.mxu1 %vm1276_vm3, %v13971_v1  ;;  %v3898_v54 = vrot.slane %v18283_v5, 2  ;;  %v18286_v1 = vld [vmem:[#allocation129_spill] sm:$0xff] }
 0x6b4   : > { %18281 = vst [vmem:[#allocation59_spill] sm:$0xff] %v14030_v50  ;;  %10249 = vmatmul.msk.bf16.gmra.mxu2 %vm1276_vm3, %v14027_v10 }
 0x6b5   : > { %v3899_v25 = vor.u32 %v3898_v54, %v3897_v32  ;;  %v18292_v32 = vld [vmem:[#allocation140_spill] sm:$0xff] }
 0x6b6   : > { %10317 = vmatmul.msk.bf16.gmra.mxu3 %vm1276_vm3, %v6157_v17  ;;  %v18289_v17 = vld [vmem:[#allocation162_spill] sm:$0xff] }
 0x6b7   : > { %v5666_v62 = vpop.f32.mrf.mxu2  ;;  %v6159_v24 = vrot.slane %v18289_v17, 3  ;;  %v3900_v5 = vsel %vm3681_vm5, %v3895_v23, %v3899_v25  ;;  %v372_v23 = vld [vmem:[%s17388_s1 + $0xc] sm:$0x3]  ;;  %v18297_v17 = vld [vmem:[#allocation237_spill] sm:$0xff] }
 0x6b8   : > { %v5934_v45 = vadd.f32 %v5666_v62, %v5418_v28  ;;  %v4411_v4 = vpop.f32.mrf.mxu0  ;;  %v5152_v52 = vpop.f32.mrf.mxu1  ;;  %v10734_v28 = vld [vmem:[%s10997_s11 + $0x130] sm:$0xff] }
 0x6b9   : > { %v14042_v56 = vadd.f32 %v4411_v4, %v18284_v36  ;;  %v5419_v47 = vadd.f32 %v5152_v52, %v18286_v1  ;;  %v6657_v22 = vpop.f32.mrf.mxu3  ;;  %v4737_v62 = vrot.slane %v10734_v28, 2  ;;  %v6160_v4 = vor.u32 %v6159_v24, %v6158_v13  ;;  %v18290_v36 = vld [vmem:[#allocation236_spill] sm:$0xff] }
 0x6ba   : > { %v14045_v21 = vadd.f32 %v6657_v22, %v5934_v45  ;;  %v3902_v13 = vrot.slane %v18296_v18, 2 }
 0x6bb   : > { %18285 = vst [vmem:[#allocation191_spill] sm:$0xff] %v14042_v56  ;;  %v14055_v45 = vsel %vm4665_vm6, %v4735_v0, %v4737_v62  ;;  %v6161_v24 = vsel %vm6022_vm7, %v6156_v63, %v6160_v4  ;;  %v18294_v0 = vld [vmem:[#allocation5_spill] sm:$0xff] }
 0x6bc   : > { %18287 = vst [vmem:[#allocation181_spill] sm:$0xff] %v14045_v21 }
 0x6bf   : > { %v5668_v50 = vpop.f32.mrf.mxu2 }
 0x6c0   : > { %v5935_v34 = vadd.f32 %v5668_v50, %v5419_v47  ;;  %v4414_v27 = vpop.f32.mrf.mxu0  ;;  %v5155_v52 = vpop.f32.mrf.mxu1  ;;  %v7356_v50 = vand.u32 %v18294_v0, %v372_v23  ;;  %v18295_v47 = vld [vmem:[#allocation35_spill] sm:$0xff]  ;;  %v18301_v0 = vld [vmem:[#allocation169_spill] sm:$0xff] }
 0x6c1   : > { %v14052_v56 = vadd.f32 %v4414_v27, %v18290_v36  ;;  %v5420_v54 = vadd.f32 %v5155_v52, %v18292_v32  ;;  %v6659_v1 = vpop.f32.mrf.mxu3  ;;  %v18299_v36 = vld [vmem:[#allocation143_spill] sm:$0xff] }
 0x6c2   : > { %v14058_v22 = vadd.f32 %v6659_v1, %v5935_v34  ;;  %7365 = vmatpush.bf16.msra.mxu0 %v7356_v50 }
 0x6c3   : > { %18291 = vst [vmem:[#allocation178_spill] sm:$0xff] %v14052_v56  ;;  %10130 = vmatmul.msk.bf16.gmra.mxu0 %vm1276_vm3, %v3900_v5  ;;  %10178 = vmatmul.msk.bf16.gmra.mxu1 %vm1276_vm3, %v13999_v60  ;;  %v3901_v60 = vrot.slane %v18295_v47, 1 }
 0x6c4   : > { %18293 = vst [vmem:[#allocation192_spill] sm:$0xff] %v14058_v22  ;;  %10250 = vmatmul.msk.bf16.gmra.mxu2 %vm1276_vm3, %v14055_v45  ;;  %v18302_v22 = vld [vmem:[#allocation166_spill] sm:$0xff] }
 0x6c5   : > { %v3903_v23 = vor.u32 %v3902_v13, %v3901_v60  ;;  %v6163_v50 = vrot.slane %v18302_v22, 3  ;;  %v18305_v60 = vld [vmem:[#allocation133_spill] sm:$0xff] }
 0x6c6   : > { %10318 = vmatmul.msk.bf16.gmra.mxu3 %vm1276_vm3, %v6161_v24  ;;  %v6162_v24 = vrot.slane %v18301_v0, 2 }
 0x6c7   : > { %v5671_v34 = vpop.f32.mrf.mxu2  ;;  %v3904_v18 = vsel %vm3681_vm5, %v3899_v25, %v3903_v23 }
 0x6c8   : > { %v5936_v27 = vadd.f32 %v5671_v34, %v5420_v54  ;;  %v4416_v5 = vpop.f32.mrf.mxu0  ;;  %v5157_v63 = vpop.f32.mrf.mxu1  ;;  %v10735_v54 = vld [vmem:[%s10997_s11 + $0x138] sm:$0xff] }
 0x6c9   : > { %v14074_v28 = vadd.f32 %v4416_v5, %v18297_v17  ;;  %v5421_v52 = vadd.f32 %v5157_v63, %v18299_v36  ;;  %v6662_v32 = vpop.f32.mrf.mxu3  ;;  %v4739_v34 = vrot.slane %v10735_v54, 2  ;;  %v6164_v5 = vor.u32 %v6163_v50, %v6162_v24  ;;  %v18303_v17 = vld [vmem:[#allocation238_spill] sm:$0xff]  ;;  %v18309_v24 = vld [vmem:[#allocation239_spill] sm:$0xff] }
 0x6ca   : > { %v14077_v1 = vadd.f32 %v6662_v32, %v5936_v27 }
 0x6cb   : > { %18298 = vst [vmem:[#allocation195_spill] sm:$0xff] %v14074_v28  ;;  %v14087_v27 = vsel %vm4665_vm6, %v4737_v62, %v4739_v34 }
 0x6cc   : > { %18300 = vst [vmem:[#allocation185_spill] sm:$0xff] %v14077_v1 }
 0x6cf   : > { %v5673_v21 = vpop.f32.mrf.mxu2 }
 0x6d0   : > { %v5937_v56 = vadd.f32 %v5673_v21, %v5421_v52  ;;  %v4419_v47 = vpop.f32.mrf.mxu0  ;;  %v5160_v63 = vpop.f32.mrf.mxu1  ;;  %v6165_v21 = vsel %vm6022_vm7, %v6160_v4, %v6164_v5  ;;  %v6166_v4 = vrot.slane %v18135_v16, 2 }
 0x6d1   : > { %v14084_v28 = vadd.f32 %v4419_v47, %v18303_v17  ;;  %v5422_v13 = vadd.f32 %v5160_v63, %v18305_v60  ;;  %v6664_v36 = vpop.f32.mrf.mxu3  ;;  %v18307_v47 = vld [vmem:[#allocation10_spill] sm:$0xff] }
 0x6d2   : > { %v14090_v32 = vadd.f32 %v6664_v36, %v5937_v56  ;;  %v3905_v52 = vrot.slane %v18307_v47, 1  ;;  %v18308_v56 = vld [vmem:[#allocation9_spill] sm:$0xff]  ;;  %v6167_v36 = vrot.slane %v18136_v2, 3 }
 0x6d3   : > { %18304 = vst [vmem:[#allocation182_spill] sm:$0xff] %v14084_v28  ;;  %10131 = vmatmul.msk.bf16.gmra.mxu0 %vm1276_vm3, %v3904_v18  ;;  %10179 = vmatmul.msk.bf16.gmra.mxu1 %vm1276_vm3, %v14027_v10  ;;  %v3906_v0 = vrot.slane %v18308_v56, 2  ;;  %v18311_v10 = vld [vmem:[#allocation144_spill] sm:$0xff] }
 0x6d4   : > { %18306 = vst [vmem:[#allocation196_spill] sm:$0xff] %v14090_v32  ;;  %10251 = vmatmul.msk.bf16.gmra.mxu2 %vm1276_vm3, %v14087_v27 }
 0x6d5   : > { %v3907_v60 = vor.u32 %v3906_v0, %v3905_v52  ;;  %v18315_v52 = vld [vmem:[#allocation147_spill] sm:$0xff] }
 0x6d6   : > { %10319 = vmatmul.msk.bf16.gmra.mxu3 %vm1276_vm3, %v6165_v21 }
 0x6d7   : > { %v5676_v25 = vpop.f32.mrf.mxu2  ;;  %v3908_v28 = vsel %vm3681_vm5, %v3903_v23, %v3907_v60 }
 0x6d8   : > { %v5938_v62 = vadd.f32 %v5676_v25, %v5422_v13  ;;  %v4421_v22 = vpop.f32.mrf.mxu0  ;;  %v5162_v50 = vpop.f32.mrf.mxu1  ;;  %v10736_v13 = vld [vmem:[%s10997_s11 + $0x140] sm:$0xff] }
 0x6d9   : > { %v14102_v18 = vadd.f32 %v4421_v22, %v18309_v24  ;;  %v5423_v54 = vadd.f32 %v5162_v50, %v18311_v10  ;;  %v6667_v17 = vpop.f32.mrf.mxu3  ;;  %v4741_v21 = vrot.slane %v10736_v13, 2  ;;  %v6168_v22 = vor.u32 %v6167_v36, %v6166_v4  ;;  %v18313_v24 = vld [vmem:[#allocation240_spill] sm:$0xff]  ;;  %v18319_v36 = vld [vmem:[#allocation241_spill] sm:$0xff] }
 0x6da   : > { %v14105_v63 = vadd.f32 %v6667_v17, %v5938_v62 }
 0x6db   : > { %18310 = vst [vmem:[#allocation199_spill] sm:$0xff] %v14102_v18  ;;  %v14115_v62 = vsel %vm4665_vm6, %v4739_v34, %v4741_v21  ;;  %v6169_v2 = vsel %vm6022_vm7, %v6164_v5, %v6168_v22  ;;  %v6170_v5 = vrot.slane %v18145_v51, 2 }
 0x6dc   : > { %18312 = vst [vmem:[#allocation39_spill] sm:$0xff] %v14105_v63 }
 0x6df   : > { %v5678_v25 = vpop.f32.mrf.mxu2 }
 0x6e0   : > { %v5939_v32 = vadd.f32 %v5678_v25, %v5423_v54  ;;  %v4424_v1 = vpop.f32.mrf.mxu0  ;;  %v5165_v50 = vpop.f32.mrf.mxu1  ;;  %v18317_v54 = vld [vmem:[#allocation17_spill] sm:$0xff] }
 0x6e1   : > { %v14112_v18 = vadd.f32 %v4424_v1, %v18313_v24  ;;  %v5424_v0 = vadd.f32 %v5165_v50, %v18315_v52  ;;  %v6669_v16 = vpop.f32.mrf.mxu3  ;;  %v3909_v17 = vrot.slane %v18317_v54, 1 }
 0x6e2   : > { %v14118_v10 = vadd.f32 %v6669_v16, %v5939_v32  ;;  %v18318_v32 = vld [vmem:[#allocation11_spill] sm:$0xff]  ;;  %v6171_v16 = vrot.slane %v18146_v55, 3 }
 0x6e3   : > { %18314 = vst [vmem:[#allocation189_spill] sm:$0xff] %v14112_v18  ;;  %10132 = vmatmul.msk.bf16.gmra.mxu0 %vm1276_vm3, %v3908_v28  ;;  %10180 = vmatmul.msk.bf16.gmra.mxu1 %vm1276_vm3, %v14055_v45  ;;  %v3910_v4 = vrot.slane %v18318_v32, 2  ;;  %v18321_v45 = vld [vmem:[#allocation137_spill] sm:$0xff] }
 0x6e4   : > { %18316 = vst [vmem:[#allocation186_spill] sm:$0xff] %v14118_v10  ;;  %10252 = vmatmul.msk.bf16.gmra.mxu2 %vm1276_vm3, %v14115_v62 }
 0x6e5   : > { %v3911_v52 = vor.u32 %v3910_v4, %v3909_v17  ;;  %v18325_v17 = vld [vmem:[#allocation148_spill] sm:$0xff] }
 0x6e6   : > { %10320 = vmatmul.msk.bf16.gmra.mxu3 %vm1276_vm3, %v6169_v2 }
 0x6e7   : > { %v5681_v1 = vpop.f32.mrf.mxu2  ;;  %v3912_v18 = vsel %vm3681_vm5, %v3907_v60, %v3911_v52 }
 0x6e8   : > { %v5940_v23 = vadd.f32 %v5681_v1, %v5424_v0  ;;  %v4426_v34 = vpop.f32.mrf.mxu0  ;;  %v5167_v13 = vpop.f32.mrf.mxu1  ;;  %v10737_v0 = vld [vmem:[%s10997_s11 + $0x148] sm:$0xff] }
 0x6e9   : > { %v14130_v28 = vadd.f32 %v4426_v34, %v18319_v36  ;;  %v5425_v25 = vadd.f32 %v5167_v13, %v18321_v45  ;;  %v6672_v24 = vpop.f32.mrf.mxu3  ;;  %v4743_v2 = vrot.slane %v10737_v0, 2  ;;  %v6172_v34 = vor.u32 %v6171_v16, %v6170_v5  ;;  %v18323_v36 = vld [vmem:[#allocation242_spill] sm:$0xff]  ;;  %v18329_v16 = vld [vmem:[#allocation75_spill] sm:$0xff] }
 0x6ea   : > { %v14133_v50 = vadd.f32 %v6672_v24, %v5940_v23 }
 0x6eb   : > { %18320 = vst [vmem:[#allocation200_spill] sm:$0xff] %v14130_v28  ;;  %v14143_v23 = vsel %vm4665_vm6, %v4741_v21, %v4743_v2  ;;  %v6173_v55 = vsel %vm6022_vm7, %v6168_v22, %v6172_v34  ;;  %v6174_v22 = vrot.slane %v18153_v29, 2 }
 0x6ec   : > { %18322 = vst [vmem:[#allocation98_spill] sm:$0xff] %v14133_v50 }
 0x6ef   : > { %v5683_v1 = vpop.f32.mrf.mxu2 }
 0x6f0   : > { %v5941_v10 = vadd.f32 %v5683_v1, %v5425_v25  ;;  %v4429_v63 = vpop.f32.mrf.mxu0  ;;  %v5170_v13 = vpop.f32.mrf.mxu1  ;;  %v18327_v25 = vld [vmem:[#allocation23_spill] sm:$0xff] }
 0x6f1   : > { %v14140_v28 = vadd.f32 %v4429_v63, %v18323_v36  ;;  %v5426_v4 = vadd.f32 %v5170_v13, %v18325_v17  ;;  %v6674_v51 = vpop.f32.mrf.mxu3  ;;  %v3913_v24 = vrot.slane %v18327_v25, 1 }
 0x6f2   : > { %v14146_v45 = vadd.f32 %v6674_v51, %v5941_v10  ;;  %v18328_v10 = vld [vmem:[#allocation18_spill] sm:$0xff]  ;;  %v6175_v51 = vrot.slane %v18154_v35, 3 }
 0x6f3   : > { %18324 = vst [vmem:[#allocation203_spill] sm:$0xff] %v14140_v28  ;;  %10133 = vmatmul.msk.bf16.gmra.mxu0 %vm1276_vm3, %v3912_v18  ;;  %10181 = vmatmul.msk.bf16.gmra.mxu1 %vm1276_vm3, %v14087_v27  ;;  %v3914_v5 = vrot.slane %v18328_v10, 2  ;;  %v18331_v27 = vld [vmem:[#allocation151_spill] sm:$0xff] }
 0x6f4   : > { %18326 = vst [vmem:[#allocation193_spill] sm:$0xff] %v14146_v45  ;;  %10253 = vmatmul.msk.bf16.gmra.mxu2 %vm1276_vm3, %v14143_v23 }
 0x6f5   : > { %v3915_v17 = vor.u32 %v3914_v5, %v3913_v24  ;;  %v18335_v24 = vld [vmem:[#allocation138_spill] sm:$0xff] }
 0x6f6   : > { %10321 = vmatmul.msk.bf16.gmra.mxu3 %vm1276_vm3, %v6173_v55 }
 0x6f7   : > { %v5686_v63 = vpop.f32.mrf.mxu2  ;;  %v3916_v28 = vsel %vm3681_vm5, %v3911_v52, %v3915_v17 }
 0x6f8   : > { %v5942_v60 = vadd.f32 %v5686_v63, %v5426_v4  ;;  %v4431_v21 = vpop.f32.mrf.mxu0  ;;  %v5172_v0 = vpop.f32.mrf.mxu1  ;;  %v10738_v4 = vld [vmem:[%s10997_s11 + $0x150] sm:$0xff] }
 0x6f9   : > { %v14158_v18 = vadd.f32 %v4431_v21, %v18329_v16  ;;  %v5427_v1 = vadd.f32 %v5172_v0, %v18331_v27  ;;  %v6677_v36 = vpop.f32.mrf.mxu3  ;;  %v4745_v55 = vrot.slane %v10738_v4, 2  ;;  %v6176_v21 = vor.u32 %v6175_v51, %v6174_v22  ;;  %v18333_v16 = vld [vmem:[#allocation65_spill] sm:$0xff]  ;;  %v18339_v51 = vld [vmem:[#allocation58_spill] sm:$0xff] }
 0x6fa   : > { %v14161_v13 = vadd.f32 %v6677_v36, %v5942_v60 }
 0x6fb   : > { %18330 = vst [vmem:[#allocation190_spill] sm:$0xff] %v14158_v18  ;;  %v14171_v60 = vsel %vm4665_vm6, %v4743_v2, %v4745_v55  ;;  %v6177_v35 = vsel %vm6022_vm7, %v6172_v34, %v6176_v21  ;;  %v6178_v34 = vrot.slane %v18159_v46, 2 }
 0x6fc   : > { %18332 = vst [vmem:[#allocation204_spill] sm:$0xff] %v14161_v13 }
 0x6ff   : > { %v5688_v63 = vpop.f32.mrf.mxu2 }
 0x700   : > { %v5943_v45 = vadd.f32 %v5688_v63, %v5427_v1  ;;  %v4434_v50 = vpop.f32.mrf.mxu0  ;;  %v5175_v0 = vpop.f32.mrf.mxu1  ;;  %v18337_v1 = vld [vmem:[#allocation30_spill] sm:$0xff] }
 0x701   : > { %v14168_v18 = vadd.f32 %v4434_v50, %v18333_v16  ;;  %v5428_v5 = vadd.f32 %v5175_v0, %v18335_v24  ;;  %v6679_v29 = vpop.f32.mrf.mxu3  ;;  %v3917_v36 = vrot.slane %v18337_v1, 1 }
 0x702   : > { %v14174_v27 = vadd.f32 %v6679_v29, %v5943_v45  ;;  %v18338_v45 = vld [vmem:[#allocation24_spill] sm:$0xff]  ;;  %v6179_v29 = vrot.slane %v18160_v40, 3 }
 0x703   : > { %18334 = vst [vmem:[#allocation42_spill] sm:$0xff] %v14168_v18  ;;  %10134 = vmatmul.msk.bf16.gmra.mxu0 %vm1276_vm3, %v3916_v28  ;;  %10182 = vmatmul.msk.bf16.gmra.mxu1 %vm1276_vm3, %v14115_v62  ;;  %v3918_v22 = vrot.slane %v18338_v45, 2  ;;  %v18341_v62 = vld [vmem:[#allocation155_spill] sm:$0xff] }
 0x704   : > { %18336 = vst [vmem:[#allocation207_spill] sm:$0xff] %v14174_v27  ;;  %10254 = vmatmul.msk.bf16.gmra.mxu2 %vm1276_vm3, %v14171_v60 }
 0x705   : > { %v3919_v24 = vor.u32 %v3918_v22, %v3917_v36 }
 0x706   : > { %10322 = vmatmul.msk.bf16.gmra.mxu3 %vm1276_vm3, %v6177_v35 }
 0x707   : > { %v5691_v50 = vpop.f32.mrf.mxu2  ;;  %v3920_v18 = vsel %vm3681_vm5, %v3915_v17, %v3919_v24 }
 0x708   : > { %v5944_v52 = vadd.f32 %v5691_v50, %v5428_v5  ;;  %v4436_v2 = vpop.f32.mrf.mxu0  ;;  %v5177_v4 = vpop.f32.mrf.mxu1  ;;  %v10739_v5 = vld [vmem:[%s10997_s11 + $0x158] sm:$0xff] }
 0x709   : > { %v14186_v28 = vadd.f32 %v4436_v2, %v18339_v51  ;;  %v5429_v63 = vadd.f32 %v5177_v4, %v18341_v62  ;;  %v6682_v16 = vpop.f32.mrf.mxu3  ;;  %v4747_v35 = vrot.slane %v10739_v5, 2  ;;  %v6180_v2 = vor.u32 %v6179_v29, %v6178_v34  ;;  %v18343_v51 = vld [vmem:[#allocation76_spill] sm:$0xff] }
 0x70a   : > { %v14189_v0 = vadd.f32 %v6682_v16, %v5944_v52  ;;  %v18347_v16 = vld [vmem:[#allocation71_spill] sm:$0xff] }
 0x70b   : > { %18340 = vst [vmem:[#allocation45_spill] sm:$0xff] %v14186_v28  ;;  %v14199_v52 = vsel %vm4665_vm6, %v4745_v55, %v4747_v35  ;;  %v6181_v40 = vsel %vm6022_vm7, %v6176_v21, %v6180_v2  ;;  %v6182_v21 = vrot.slane %v18167_v38, 2 }
 0x70c   : > { %18342 = vst [vmem:[#allocation197_spill] sm:$0xff] %v14189_v0 }
 0x70f   : > { %v5693_v50 = vpop.f32.mrf.mxu2 }
 0x710   : > { %v5945_v27 = vadd.f32 %v5693_v50, %v5429_v63  ;;  %v4439_v13 = vpop.f32.mrf.mxu0  ;;  %v5180_v4 = vpop.f32.mrf.mxu1 }
 0x711   : > { %v14196_v28 = vadd.f32 %v4439_v13, %v18343_v51  ;;  %v5430_v36 = vadd.f32 %v5180_v4, %v13632_v3  ;;  %v6684_v46 = vpop.f32.mrf.mxu3  ;;  %v18345_v3 = vld [vmem:[#allocation36_spill] sm:$0xff]  ;;  %v6183_v51 = vrot.slane %v18168_v12, 3  ;;  %v10740_v4 = vld [vmem:[%s10997_s11 + $0x160] sm:$0xff] }
 0x712   : > { %v14202_v22 = vadd.f32 %v6684_v46, %v5945_v27  ;;  %v3921_v62 = vrot.slane %v18345_v3, 1  ;;  %v18346_v27 = vld [vmem:[#allocation31_spill] sm:$0xff] }
 0x713   : > { %10135 = vmatmul.msk.bf16.gmra.mxu0 %vm1276_vm3, %v3920_v18  ;;  %10183 = vmatmul.msk.bf16.gmra.mxu1 %vm1276_vm3, %v14143_v23  ;;  %v3922_v63 = vrot.slane %v18346_v27, 2 }
 0x714   : > { %18344 = vst [vmem:[#allocation194_spill] sm:$0xff] %v14202_v22  ;;  %10255 = vmatmul.msk.bf16.gmra.mxu2 %vm1276_vm3, %v14199_v52 }
 0x715   : > { %v3923_v50 = vor.u32 %v3922_v63, %v3921_v62 }
 0x716   : > { %10323 = vmatmul.msk.bf16.gmra.mxu3 %vm1276_vm3, %v6181_v40 }
 0x717   : > { %v5696_v13 = vpop.f32.mrf.mxu2  ;;  %v3924_v0 = vsel %vm3681_vm5, %v3919_v24, %v3923_v50 }
 0x718   : > { %v5946_v17 = vadd.f32 %v5696_v13, %v5430_v36  ;;  %v4441_v55 = vpop.f32.mrf.mxu0  ;;  %v5182_v34 = vpop.f32.mrf.mxu1  ;;  %v4749_v36 = vrot.slane %v10740_v4, 2 }
 0x719   : > { %v14214_v18 = vadd.f32 %v4441_v55, %v18347_v16  ;;  %v5431_v23 = vadd.f32 %v5182_v34, %v13650_v41  ;;  %v6687_v29 = vpop.f32.mrf.mxu3  ;;  %v6184_v55 = vor.u32 %v6183_v51, %v6182_v21  ;;  %v18349_v16 = vld [vmem:[#allocation80_spill] sm:$0xff]  ;;  %v18353_v51 = vld [vmem:[#allocation73_spill] sm:$0xff] }
 0x71a   : > { %v14217_v5 = vadd.f32 %v6687_v29, %v5946_v17  ;;  %v14227_v17 = vsel %vm4665_vm6, %v4747_v35, %v4749_v36  ;;  %v18352_v29 = vld [vmem:[#allocation12_spill] sm:$0xff] }
 0x71b   : > { %v6185_v12 = vsel %vm6022_vm7, %v6180_v2, %v6184_v55  ;;  %v3926_v21 = vrot.slane %v18352_v29, 2  ;;  %v6186_v2 = vrot.slane %v18175_v59, 2 }
 0x71c   : > { %18348 = vst [vmem:[#allocation208_spill] sm:$0xff] %v14217_v5 }
 0x71f   : > { %v5698_v46 = vpop.f32.mrf.mxu2 }
 0x720   : > { %v5947_v40 = vadd.f32 %v5698_v46, %v5431_v23  ;;  %v4444_v13 = vpop.f32.mrf.mxu0  ;;  %v5185_v41 = vpop.f32.mrf.mxu1 }
 0x721   : > { %v14224_v22 = vadd.f32 %v4444_v13, %v18349_v16  ;;  %v5432_v62 = vadd.f32 %v5185_v41, %v13660_v20  ;;  %v6689_v38 = vpop.f32.mrf.mxu3  ;;  %v18351_v20 = vld [vmem:[#allocation13_spill] sm:$0xff]  ;;  %v6187_v16 = vrot.slane %v18176_v19, 3  ;;  %v10741_v41 = vld [vmem:[%s10997_s11 + $0x168] sm:$0xff] }
 0x722   : > { %v14230_v63 = vadd.f32 %v6689_v38, %v5947_v40  ;;  %v3925_v23 = vrot.slane %v18351_v20, 1 }
 0x723   : > { %10136 = vmatmul.msk.bf16.gmra.mxu0 %vm1276_vm3, %v3924_v0  ;;  %10184 = vmatmul.msk.bf16.gmra.mxu1 %vm1276_vm3, %v14171_v60 }
 0x724   : > { %18350 = vst [vmem:[#allocation102_spill] sm:$0xff] %v14230_v63  ;;  %10256 = vmatmul.msk.bf16.gmra.mxu2 %vm1276_vm3, %v14227_v17  ;;  %v3927_v13 = vor.u32 %v3926_v21, %v3925_v23  ;;  %v18357_v23 = vld [vmem:[#allocation146_spill] sm:$0xff] }
 0x726   : > { %10324 = vmatmul.msk.bf16.gmra.mxu3 %vm1276_vm3, %v6185_v12  ;;  %v3928_v5 = vsel %vm3681_vm5, %v3923_v50, %v3927_v13 }
 0x727   : > { %v5701_v24 = vpop.f32.mrf.mxu2 }
 0x728   : > { %v5948_v35 = vadd.f32 %v5701_v24, %v5432_v62  ;;  %v4446_v34 = vpop.f32.mrf.mxu0  ;;  %v5187_v4 = vpop.f32.mrf.mxu1  ;;  %v4751_v62 = vrot.slane %v10741_v41, 2 }
 0x729   : > { %v14242_v0 = vadd.f32 %v4446_v34, %v18353_v51  ;;  %v5433_v60 = vadd.f32 %v5187_v4, %v13678_v9  ;;  %v6692_v46 = vpop.f32.mrf.mxu3  ;;  %v6188_v34 = vor.u32 %v6187_v16, %v6186_v2  ;;  %v18355_v51 = vld [vmem:[#allocation84_spill] sm:$0xff]  ;;  %v18360_v16 = vld [vmem:[#allocation14_spill] sm:$0xff] }
 0x72a   : > { %v14245_v40 = vadd.f32 %v6692_v46, %v5948_v35  ;;  %v14255_v35 = vsel %vm4665_vm6, %v4749_v36, %v4751_v62  ;;  %v18359_v46 = vld [vmem:[#allocation19_spill] sm:$0xff]  ;;  %v3930_v41 = vrot.slane %v18360_v16, 2 }
 0x72b   : > { %v6189_v19 = vsel %vm6022_vm7, %v6184_v55, %v6188_v34  ;;  %v3929_v2 = vrot.slane %v18359_v46, 1  ;;  %v6190_v55 = vrot.slane %v18185_v8, 2 }
 0x72c   : > { %18354 = vst [vmem:[#allocation211_spill] sm:$0xff] %v14245_v40 }
 0x72f   : > { %v5703_v38 = vpop.f32.mrf.mxu2 }
 0x730   : > { %v5949_v12 = vadd.f32 %v5703_v38, %v5433_v60  ;;  %v4449_v24 = vpop.f32.mrf.mxu0  ;;  %v5190_v9 = vpop.f32.mrf.mxu1  ;;  %v18361_v38 = vld [vmem:[#allocation77_spill] sm:$0xff] }
 0x731   : > { %v14252_v63 = vadd.f32 %v4449_v24, %v18355_v51  ;;  %v5434_v21 = vadd.f32 %v5190_v9, %v18357_v23  ;;  %v6694_v59 = vpop.f32.mrf.mxu3  ;;  %v3931_v23 = vor.u32 %v3930_v41, %v3929_v2 }
 0x732   : > { %v14258_v4 = vadd.f32 %v6694_v59, %v5949_v12  ;;  %v6191_v59 = vrot.slane %v18186_v49, 3 }
 0x733   : > { %18356 = vst [vmem:[#allocation48_spill] sm:$0xff] %v14252_v63  ;;  %10137 = vmatmul.msk.bf16.gmra.mxu0 %vm1276_vm3, %v3928_v5  ;;  %10185 = vmatmul.msk.bf16.gmra.mxu1 %vm1276_vm3, %v14199_v52  ;;  %v18363_v52 = vld [vmem:[#allocation74_spill] sm:$0xff]  ;;  %v3932_v63 = vsel %vm3681_vm5, %v3927_v13, %v3931_v23 }
 0x734   : > { %18358 = vst [vmem:[#allocation201_spill] sm:$0xff] %v14258_v4  ;;  %10257 = vmatmul.msk.bf16.gmra.mxu2 %vm1276_vm3, %v14255_v35 }
 0x736   : > { %10325 = vmatmul.msk.bf16.gmra.mxu3 %vm1276_vm3, %v6189_v19 }
 0x737   : > { %v5706_v50 = vpop.f32.mrf.mxu2 }
 0x738   : > { %v5950_v36 = vadd.f32 %v5706_v50, %v5434_v21  ;;  %v4451_v60 = vpop.f32.mrf.mxu0  ;;  %v5192_v12 = vpop.f32.mrf.mxu1  ;;  %v10742_v21 = vld [vmem:[%s10997_s11 + $0x170] sm:$0xff] }
 0x739   : > { %v14270_v5 = vadd.f32 %v4451_v60, %v18361_v38  ;;  %v5435_v24 = vadd.f32 %v5192_v12, %v18363_v52  ;;  %v6697_v51 = vpop.f32.mrf.mxu3  ;;  %v4753_v19 = vrot.slane %v10742_v21, 2  ;;  %v6192_v60 = vor.u32 %v6191_v59, %v6190_v55  ;;  %v18365_v38 = vld [vmem:[#allocation91_spill] sm:$0xff] }
 0x73a   : > { %v14273_v9 = vadd.f32 %v6697_v51, %v5950_v36  ;;  %v18369_v51 = vld [vmem:[#allocation92_spill] sm:$0xff] }
 0x73b   : > { %18362 = vst [vmem:[#allocation198_spill] sm:$0xff] %v14270_v5  ;;  %v14283_v36 = vsel %vm4665_vm6, %v4751_v62, %v4753_v19  ;;  %v6193_v49 = vsel %vm6022_vm7, %v6188_v34, %v6192_v60  ;;  %v6194_v34 = vrot.slane %v18195_v57, 2 }
 0x73c   : > { %18364 = vst [vmem:[#allocation212_spill] sm:$0xff] %v14273_v9 }
 0x73f   : > { %v5708_v50 = vpop.f32.mrf.mxu2 }
 0x740   : > { %v5951_v40 = vadd.f32 %v5708_v50, %v5435_v24  ;;  %v4454_v4 = vpop.f32.mrf.mxu0  ;;  %v5195_v12 = vpop.f32.mrf.mxu1 }
 0x741   : > { %v14280_v5 = vadd.f32 %v4454_v4, %v18365_v38  ;;  %v5436_v2 = vadd.f32 %v5195_v12, %v13716_v53  ;;  %v6699_v8 = vpop.f32.mrf.mxu3  ;;  %v18367_v53 = vld [vmem:[#allocation25_spill] sm:$0xff]  ;;  %v6195_v12 = vrot.slane %v18196_v31, 3 }
 0x742   : > { %v14286_v41 = vadd.f32 %v6699_v8, %v5951_v40  ;;  %v3933_v52 = vrot.slane %v18367_v53, 1  ;;  %v18368_v40 = vld [vmem:[#allocation20_spill] sm:$0xff] }
 0x743   : > { %10138 = vmatmul.msk.bf16.gmra.mxu0 %vm1276_vm3, %v3932_v63  ;;  %10186 = vmatmul.msk.bf16.gmra.mxu1 %vm1276_vm3, %v14227_v17  ;;  %v3934_v24 = vrot.slane %v18368_v40, 2  ;;  %v18371_v17 = vld [vmem:[#allocation153_spill] sm:$0xff] }
 0x744   : > { %18366 = vst [vmem:[#allocation51_spill] sm:$0xff] %v14286_v41  ;;  %10258 = vmatmul.msk.bf16.gmra.mxu2 %vm1276_vm3, %v14283_v36 }
 0x745   : > { %v3935_v38 = vor.u32 %v3934_v24, %v3933_v52  ;;  %v18375_v52 = vld [vmem:[#allocation66_spill] sm:$0xff] }
 0x746   : > { %10326 = vmatmul.msk.bf16.gmra.mxu3 %vm1276_vm3, %v6193_v49 }
 0x747   : > { %v5711_v13 = vpop.f32.mrf.mxu2  ;;  %v3936_v9 = vsel %vm3681_vm5, %v3931_v23, %v3935_v38 }
 0x748   : > { %v5952_v62 = vadd.f32 %v5711_v13, %v5436_v2  ;;  %v4456_v4 = vpop.f32.mrf.mxu0  ;;  %v5197_v55 = vpop.f32.mrf.mxu1  ;;  %v10743_v2 = vld [vmem:[%s10997_s11 + $0x178] sm:$0xff] }
 0x749   : > { %v14298_v63 = vadd.f32 %v4456_v4, %v18369_v51  ;;  %v5437_v59 = vadd.f32 %v5197_v55, %v18371_v17  ;;  %v6702_v21 = vpop.f32.mrf.mxu3  ;;  %v4755_v8 = vrot.slane %v10743_v2, 2  ;;  %v6196_v4 = vor.u32 %v6195_v12, %v6194_v34  ;;  %v18373_v51 = vld [vmem:[#allocation95_spill] sm:$0xff]  ;;  %v18378_v34 = vld [vmem:[#allocation26_spill] sm:$0xff]  ;;  %v18379_v2 = vld [vmem:[#allocation96_spill] sm:$0xff] }
 0x74a   : > { %v14301_v50 = vadd.f32 %v6702_v21, %v5952_v62  ;;  %v3938_v12 = vrot.slane %v18378_v34, 2 }
 0x74b   : > { %18370 = vst [vmem:[#allocation215_spill] sm:$0xff] %v14298_v63  ;;  %v14311_v62 = vsel %vm4665_vm6, %v4753_v19, %v4755_v8  ;;  %v6197_v31 = vsel %vm6022_vm7, %v6192_v60, %v6196_v4  ;;  %v6198_v60 = vrot.slane %v18205_v44, 2 }
 0x74c   : > { %18372 = vst [vmem:[#allocation106_spill] sm:$0xff] %v14301_v50 }
 0x74f   : > { %v5713_v49 = vpop.f32.mrf.mxu2 }
 0x750   : > { %v5953_v13 = vadd.f32 %v5713_v49, %v5437_v59  ;;  %v4459_v41 = vpop.f32.mrf.mxu0  ;;  %v5200_v55 = vpop.f32.mrf.mxu1  ;;  %v18377_v59 = vld [vmem:[#allocation32_spill] sm:$0xff] }
 0x751   : > { %v14308_v63 = vadd.f32 %v4459_v41, %v18373_v51  ;;  %v5438_v24 = vadd.f32 %v5200_v55, %v18375_v52  ;;  %v6704_v57 = vpop.f32.mrf.mxu3  ;;  %v3937_v21 = vrot.slane %v18377_v59, 1 }
 0x752   : > { %v14314_v17 = vadd.f32 %v6704_v57, %v5953_v13  ;;  %v6199_v57 = vrot.slane %v18206_v61, 3 }
 0x753   : > { %18374 = vst [vmem:[#allocation205_spill] sm:$0xff] %v14308_v63  ;;  %10139 = vmatmul.msk.bf16.gmra.mxu0 %vm1276_vm3, %v3936_v9  ;;  %10187 = vmatmul.msk.bf16.gmra.mxu1 %vm1276_vm3, %v14255_v35  ;;  %v18381_v35 = vld [vmem:[#allocation78_spill] sm:$0xff]  ;;  %v3939_v52 = vor.u32 %v3938_v12, %v3937_v21  ;;  %v18385_v21 = vld [vmem:[#allocation83_spill] sm:$0xff] }
 0x754   : > { %18376 = vst [vmem:[#allocation202_spill] sm:$0xff] %v14314_v17  ;;  %10259 = vmatmul.msk.bf16.gmra.mxu2 %vm1276_vm3, %v14311_v62 }
 0x755   : > { %v3940_v63 = vsel %vm3681_vm5, %v3935_v38, %v3939_v52 }
 0x756   : > { %10327 = vmatmul.msk.bf16.gmra.mxu3 %vm1276_vm3, %v6197_v31 }
 0x757   : > { %v5716_v23 = vpop.f32.mrf.mxu2 }
 0x758   : > { %v5954_v19 = vadd.f32 %v5716_v23, %v5438_v24  ;;  %v4461_v41 = vpop.f32.mrf.mxu0  ;;  %v5202_v49 = vpop.f32.mrf.mxu1  ;;  %v10744_v24 = vld [vmem:[%s10997_s11 + $0x180] sm:$0xff] }
 0x759   : > { %v14326_v9 = vadd.f32 %v4461_v41, %v18379_v2  ;;  %v5439_v13 = vadd.f32 %v5202_v49, %v18381_v35  ;;  %v6707_v51 = vpop.f32.mrf.mxu3  ;;  %v4757_v31 = vrot.slane %v10744_v24, 2  ;;  %v6200_v41 = vor.u32 %v6199_v57, %v6198_v60  ;;  %v18383_v2 = vld [vmem:[#allocation99_spill] sm:$0xff]  ;;  %v18389_v57 = vld [vmem:[#allocation100_spill] sm:$0xff] }
 0x75a   : > { %v14329_v55 = vadd.f32 %v6707_v51, %v5954_v19 }
 0x75b   : > { %18380 = vst [vmem:[#allocation216_spill] sm:$0xff] %v14326_v9  ;;  %v14339_v19 = vsel %vm4665_vm6, %v4755_v8, %v4757_v31  ;;  %v6201_v61 = vsel %vm6022_vm7, %v6196_v4, %v6200_v41  ;;  %v6202_v4 = vrot.slane %v18215_v14, 2 }
 0x75c   : > { %18382 = vst [vmem:[#allocation54_spill] sm:$0xff] %v14329_v55 }
 0x75f   : > { %v5718_v23 = vpop.f32.mrf.mxu2 }
 0x760   : > { %v5955_v17 = vadd.f32 %v5718_v23, %v5439_v13  ;;  %v4464_v50 = vpop.f32.mrf.mxu0  ;;  %v5205_v49 = vpop.f32.mrf.mxu1  ;;  %v18387_v13 = vld [vmem:[#allocation37_spill] sm:$0xff] }
 0x761   : > { %v14336_v9 = vadd.f32 %v4464_v50, %v18383_v2  ;;  %v5440_v12 = vadd.f32 %v5205_v49, %v18385_v21  ;;  %v6709_v44 = vpop.f32.mrf.mxu3  ;;  %v3941_v51 = vrot.slane %v18387_v13, 1 }
 0x762   : > { %v14342_v35 = vadd.f32 %v6709_v44, %v5955_v17  ;;  %v18388_v17 = vld [vmem:[#allocation33_spill] sm:$0xff]  ;;  %v6203_v44 = vrot.slane %v18216_v15, 3 }
 0x763   : > { %18384 = vst [vmem:[#allocation219_spill] sm:$0xff] %v14336_v9  ;;  %10140 = vmatmul.msk.bf16.gmra.mxu0 %vm1276_vm3, %v3940_v63  ;;  %10188 = vmatmul.msk.bf16.gmra.mxu1 %vm1276_vm3, %v14283_v36  ;;  %v3942_v60 = vrot.slane %v18388_v17, 2  ;;  %v18391_v36 = vld [vmem:[#allocation72_spill] sm:$0xff] }
 0x764   : > { %18386 = vst [vmem:[#allocation57_spill] sm:$0xff] %v14342_v35  ;;  %10260 = vmatmul.msk.bf16.gmra.mxu2 %vm1276_vm3, %v14339_v19 }
 0x765   : > { %v3943_v21 = vor.u32 %v3942_v60, %v3941_v51  ;;  %v18394_v51 = vld [vmem:[#allocation82_spill] sm:$0xff] }
 0x766   : > { %10328 = vmatmul.msk.bf16.gmra.mxu3 %vm1276_vm3, %v6201_v61 }
 0x767   : > { %v5721_v50 = vpop.f32.mrf.mxu2 }
 0x768   : > { %v5956_v38 = vadd.f32 %v5721_v50, %v5440_v12  ;;  %v4466_v8 = vpop.f32.mrf.mxu0  ;;  %v5207_v24 = vpop.f32.mrf.mxu1  ;;  %v10745_v12 = vld [vmem:[%s10997_s11 + $0x188] sm:$0xff] }
 0x769   : > { %v14354_v63 = vadd.f32 %v4466_v8, %v18389_v57  ;;  %v5441_v23 = vadd.f32 %v5207_v24, %v18391_v36  ;;  %v6712_v2 = vpop.f32.mrf.mxu3  ;;  %v4759_v61 = vrot.slane %v10745_v12, 2  ;;  %v3944_v8 = vsel %vm3681_vm5, %v3939_v52, %v3943_v21  ;;  %v14379_v52 = vld [vmem:[%s10997_s11 + $0x220] sm:$0xff]   ;;  %v18398_v12 = vld [vmem:[#allocation87_spill] sm:$0xff] }
 0x76a   : > { %v14357_v49 = vadd.f32 %v6712_v2, %v5956_v38  ;;  %v6204_v57 = vor.u32 %v6203_v44, %v6202_v4  ;;  %v18396_v4 = vld [vmem:[#allocation104_spill] sm:$0xff] }
 0x76b   : > { %18390 = vst [vmem:[#allocation209_spill] sm:$0xff] %v14354_v63  ;;  %v18392_v63 = vld [vmem:[#allocation103_spill] sm:$0xff]  ;;  %v14367_v38 = vsel %vm4665_vm6, %v4757_v31, %v4759_v61  ;;  %v17624_v31 = vshrl.u32 %v14379_v52, 16 }
 0x76f   : > { %v5723_v50 = vpop.f32.mrf.mxu2 }
 0x770   : > { %v5957_v35 = vadd.f32 %v5723_v50, %v5441_v23  ;;  %v4469_v55 = vpop.f32.mrf.mxu0  ;;  %v5210_v24 = vpop.f32.mrf.mxu1 }
 0x771   : > { %v14364_v9 = vadd.f32 %v4469_v55, %v18392_v63  ;;  %v5442_v14 = vadd.f32 %v5210_v24, %v18394_v51  ;;  %v6714_v60 = vpop.f32.mrf.mxu3  ;;  %v6205_v55 = vsel %vm6022_vm7, %v6200_v41, %v6204_v57  ;;  %v17625_v63 = vshll.u32 %v14379_v52, 16 }
 0x772   : > { %v14370_v15 = vadd.f32 %v6714_v60, %v5957_v35  ;;  %v6206_v60 = vrot.slane %v18225_v26, 2 }
 0x773   : > { %18393 = vst [vmem:[#allocation206_spill] sm:$0xff] %v14364_v9  ;;  %10141 = vmatmul.msk.bf16.gmra.mxu0 %vm1276_vm3, %v3944_v8  ;;  %10189 = vmatmul.msk.bf16.gmra.mxu1 %vm1276_vm3, %v14311_v62  ;;  %v3948_v62 = vrot.slane %v17624_v31, 1  ;;  %v3951_v2 = vrot.slane %v17625_v63, 2 }
 0x774   : > { %18395 = vst [vmem:[#allocation220_spill] sm:$0xff] %v14370_v15  ;;  %10261 = vmatmul.msk.bf16.gmra.mxu2 %vm1276_vm3, %v14367_v38 }
 0x775   : > { %v3952_v51 = vor.u32 %v3951_v2, %v3948_v62  ;;  %v18401_v62 = vld [vmem:[#allocation88_spill] sm:$0xff] }
 0x776   : > { %10329 = vmatmul.msk.bf16.gmra.mxu3 %vm1276_vm3, %v6205_v55  ;;  %v10747_v55 = vld [vmem:[%s10997_s11 + $0x190] sm:$0xff] }
 0x777   : > { %v5726_v35 = vpop.f32.mrf.mxu2 }
 0x778   : > { %v5958_v36 = vadd.f32 %v5726_v35, %v5442_v14  ;;  %v4471_v23 = vpop.f32.mrf.mxu0  ;;  %v5212_v44 = vpop.f32.mrf.mxu1  ;;  %v6207_v14 = vrot.slane %v18226_v48, 3  ;;  %v4761_v35 = vrot.slane %v10747_v55, 2 }
 0x779   : > { %v14389_v41 = vadd.f32 %v4471_v23, %v18396_v4  ;;  %v5443_v50 = vadd.f32 %v5212_v44, %v18398_v12  ;;  %v6717_v8 = vpop.f32.mrf.mxu3  ;;  %v3953_v23 = vsel %vm3681_vm5, %v3943_v21, %v3952_v51 }
 0x77a   : > { %v14392_v24 = vadd.f32 %v6717_v8, %v5958_v36  ;;  %v6208_v4 = vor.u32 %v6207_v14, %v6206_v60  ;;  %v14402_v36 = vsel %vm4665_vm6, %v4759_v61, %v4761_v35  ;;  %v18403_v8 = vld [vmem:[#allocation62_spill] sm:$0xff] }
 0x77b   : > { %18397 = vst [vmem:[#allocation110_spill] sm:$0xff] %v14389_v41  ;;  %v18399_v41 = vld [vmem:[#allocation107_spill] sm:$0xff]  ;;  %v18405_v14 = vld [vmem:[#allocation86_spill] sm:$0xff] }
 0x77c   : > { %v6209_v21 = vsel %vm6022_vm7, %v6204_v57, %v6208_v4 }
 0x77f   : > { %v5728_v31 = vpop.f32.mrf.mxu2 }
 0x780   : > { %v5959_v9 = vadd.f32 %v5728_v31, %v5443_v50  ;;  %v4474_v63 = vpop.f32.mrf.mxu0  ;;  %v5215_v44 = vpop.f32.mrf.mxu1  ;;  %v14414_v31 = vld [vmem:[%s10997_s11 + $0x228] sm:$0xff] }
 0x781   : > { %v14399_v15 = vadd.f32 %v4474_v63, %v18399_v41  ;;  %v5444_v26 = vadd.f32 %v5215_v44, %v18401_v62  ;;  %v6719_v2 = vpop.f32.mrf.mxu3  ;;  %v17626_v61 = vshrl.u32 %v14414_v31, 16  ;;  %v17627_v63 = vshll.u32 %v14414_v31, 16 }
 0x782   : > { %v14405_v48 = vadd.f32 %v6719_v2, %v5959_v9  ;;  %v6210_v2 = vrot.slane %v18234_v11, 2 }
 0x783   : > { %18400 = vst [vmem:[#allocation222_spill] sm:$0xff] %v14399_v15  ;;  %10142 = vmatmul.msk.bf16.gmra.mxu0 %vm1276_vm3, %v3953_v23  ;;  %10190 = vmatmul.msk.bf16.gmra.mxu1 %vm1276_vm3, %v14339_v19  ;;  %v3957_v19 = vrot.slane %v17626_v61, 1  ;;  %v3960_v50 = vrot.slane %v17627_v63, 2 }
 0x784   : > { %18402 = vst [vmem:[#allocation61_spill] sm:$0xff] %v14405_v48  ;;  %10262 = vmatmul.msk.bf16.gmra.mxu2 %vm1276_vm3, %v14402_v36 }
 0x785   : > { %v3961_v62 = vor.u32 %v3960_v50, %v3957_v19  ;;  %v18409_v19 = vld [vmem:[#allocation38_spill] sm:$0xff] }
 0x786   : > { %10330 = vmatmul.msk.bf16.gmra.mxu3 %vm1276_vm3, %v6209_v21  ;;  %v10749_v21 = vld [vmem:[%s10997_s11 + $0x198] sm:$0xff] }
 0x787   : > { %v5731_v9 = vpop.f32.mrf.mxu2  ;;  %v3962_v63 = vsel %vm3681_vm5, %v3952_v51, %v3961_v62  ;;  %v18410_v51 = vld [vmem:[#allocation27_spill] sm:$0xff] }
 0x788   : > { %v5960_v41 = vadd.f32 %v5731_v9, %v5444_v26  ;;  %v4476_v12 = vpop.f32.mrf.mxu0  ;;  %v5217_v60 = vpop.f32.mrf.mxu1  ;;  %v6211_v26 = vrot.slane %v18235_v6, 3  ;;  %v4763_v9 = vrot.slane %v10749_v21, 2  ;;  %v18413_v21 = vld [vmem:[#allocation40_spill] sm:$0xff] }
 0x789   : > { %v14424_v57 = vadd.f32 %v4476_v12, %v18403_v8  ;;  %v5445_v55 = vadd.f32 %v5217_v60, %v18405_v14  ;;  %v6722_v23 = vpop.f32.mrf.mxu3  ;;  %v18407_v8 = vld [vmem:[#allocation108_spill] sm:$0xff] }
 0x78a   : > { %v14427_v44 = vadd.f32 %v6722_v23, %v5960_v41  ;;  %v6212_v12 = vor.u32 %v6211_v26, %v6210_v2  ;;  %v14437_v41 = vsel %vm4665_vm6, %v4761_v35, %v4763_v9  ;;  %v3967_v35 = vshll.u32 %v18410_v51, 16  ;;  %v18411_v2 = vld [vmem:[#allocation67_spill] sm:$0xff] }
 0x78b   : > { %18404 = vst [vmem:[#allocation213_spill] sm:$0xff] %v14424_v57 }
 0x78c   : > { %18406 = vst [vmem:[#allocation210_spill] sm:$0xff] %v14427_v44  ;;  %v6213_v6 = vsel %vm6022_vm7, %v6208_v4, %v6212_v12 }
 0x78f   : > { %v5733_v61 = vpop.f32.mrf.mxu2 }
 0x790   : > { %v5961_v15 = vadd.f32 %v5733_v61, %v5445_v55  ;;  %v4479_v48 = vpop.f32.mrf.mxu0  ;;  %v5220_v60 = vpop.f32.mrf.mxu1 }
 0x791   : > { %v14434_v57 = vadd.f32 %v4479_v48, %v18407_v8  ;;  %v5446_v50 = vadd.f32 %v5220_v60, %v18409_v19  ;;  %v6724_v11 = vpop.f32.mrf.mxu3  ;;  %v3964_v48 = vshrl.u32 %v18410_v51, 16 }
 0x792   : > { %v14440_v14 = vadd.f32 %v6724_v11, %v5961_v15  ;;  %v6214_v11 = vrot.slane %v18241_v37, 2 }
 0x793   : > { %18408 = vst [vmem:[#allocation223_spill] sm:$0xff] %v14434_v57  ;;  %10143 = vmatmul.msk.bf16.gmra.mxu0 %vm1276_vm3, %v3962_v63  ;;  %10191 = vmatmul.msk.bf16.gmra.mxu1 %vm1276_vm3, %v14367_v38  ;;  %v3966_v23 = vrot.slane %v3964_v48, 1  ;;  %v3969_v63 = vrot.slane %v3967_v35, 2  ;;  %v6215_v57 = vrot.slane %v18242_v39, 3 }
 0x794   : > { %10263 = vmatmul.msk.bf16.gmra.mxu2 %vm1276_vm3, %v14437_v41 }
 0x795   : > { %v3970_v19 = vor.u32 %v3969_v63, %v3966_v23  ;;  %v18416_v63 = vld [vmem:[#allocation101_spill] sm:$0xff] }
 0x796   : > { %10331 = vmatmul.msk.bf16.gmra.mxu3 %vm1276_vm3, %v6213_v6  ;;  %v10750_v6 = vld [vmem:[%s10997_s11 + $0x1a0] sm:$0xff] }
 0x797   : > { %v5736_v61 = vpop.f32.mrf.mxu2  ;;  %v4765_v44 = vrot.slane %v10750_v6, 2  ;;  %v3971_v35 = vsel %vm3681_vm5, %v3961_v62, %v3970_v19 }
 0x798   : > { %v5962_v15 = vadd.f32 %v5736_v61, %v5446_v50  ;;  %v4481_v55 = vpop.f32.mrf.mxu0  ;;  %v5222_v38 = vpop.f32.mrf.mxu1 }
 0x799   : > { %v14452_v26 = vadd.f32 %v4481_v55, %v18411_v2  ;;  %v5447_v8 = vadd.f32 %v5222_v38, %v18413_v21  ;;  %v6727_v60 = vpop.f32.mrf.mxu3  ;;  %v6216_v55 = vor.u32 %v6215_v57, %v6214_v11  ;;  %v18414_v2 = vld [vmem:[#allocation111_spill] sm:$0xff] }
 0x79a   : > { %v14455_v4 = vadd.f32 %v6727_v60, %v5962_v15  ;;  %v14465_v15 = vsel %vm4665_vm6, %v4763_v9, %v4765_v44  ;;  %v18418_v60 = vld [vmem:[#allocation179_spill] sm:$0xff] }
 0x79b   : > { %18412 = vst [vmem:[#allocation64_spill] sm:$0xff] %v14452_v26  ;;  %v6217_v57 = vsel %vm6022_vm7, %v6212_v12, %v6216_v55  ;;  %v6218_v12 = vrot.slane %v18248_v30, 2 }
 0x79f   : > { %v5738_v50 = vpop.f32.mrf.mxu2 }
 0x7a0   : > { %v5963_v61 = vadd.f32 %v5738_v50, %v5447_v8  ;;  %v4484_v48 = vpop.f32.mrf.mxu0  ;;  %v5225_v38 = vpop.f32.mrf.mxu1 }
 0x7a1   : > { %v14462_v26 = vadd.f32 %v4484_v48, %v18414_v2  ;;  %v5448_v23 = vadd.f32 %v5225_v38, %v13884_v7  ;;  %v6729_v37 = vpop.f32.mrf.mxu3  ;;  %v10753_v2 = vld [vmem:[%s10997_s11 + $0x1a8] sm:$0xff] }
 0x7a2   : > { %v14468_v39 = vadd.f32 %v6729_v37, %v5963_v61  ;;  %v10752_v61 = vld [vmem:[%s10997_s11 + $0x28] sm:$0xff]  ;;  %v4767_v38 = vrot.slane %v10753_v2, 2 }
 0x7a3   : > { %18415 = vst [vmem:[#allocation224_spill] sm:$0xff] %v14462_v26  ;;  %10144 = vmatmul.msk.bf16.gmra.mxu0 %vm1276_vm3, %v3971_v35  ;;  %10192 = vmatmul.msk.bf16.gmra.mxu1 %vm1276_vm3, %v14402_v36  ;;  %v10751_v36 = vld [vmem:[%s10997_s11 + $0x20] sm:$0xff]  ;;  %v7015_v48 = vrot.slane %v10752_v61, 3  ;;  %v6219_v35 = vrot.slane %v18249_v33, 3 }
 0x7a4   : > { %10264 = vmatmul.msk.bf16.gmra.mxu2 %vm1276_vm3, %v14465_v15  ;;  %v7014_v50 = vrot.slane %v10751_v36, 3 }
 0x7a6   : > { %10332 = vmatmul.msk.bf16.gmra.mxu3 %vm1276_vm3, %v6217_v57 }
 0x7a7   : > { %v5741_v62 = vpop.f32.mrf.mxu2 }
 0x7a8   : > { %v5964_v7 = vadd.f32 %v5741_v62, %v5448_v23  ;;  %v4486_v9 = vpop.f32.mrf.mxu0  ;;  %v5227_v8 = vpop.f32.mrf.mxu1  ;;  %v7016_v62 = vsel %vm7013_vm8, %v7014_v50, %v7015_v48  ;;  %v18421_v50 = vld [vmem:[#allocation34_spill] sm:$0xff] }
 0x7a9   : > { %v14478_v21 = vadd.f32 %v4486_v9, %v18416_v63  ;;  %v5449_v19 = vadd.f32 %v5227_v8, %v18418_v60  ;;  %v6732_v11 = vpop.f32.mrf.mxu3  ;;  %v6220_v9 = vor.u32 %v6219_v35, %v6218_v12  ;;  %v18419_v63 = vld [vmem:[#allocation112_spill] sm:$0xff]  ;;  %v14493_v60 = vsel %vm4665_vm6, %v4765_v44, %v4767_v38 }
 0x7aa   : > { %v14481_v6 = vadd.f32 %v6732_v11, %v5964_v7 }
 0x7ab   : > { %18417 = vst [vmem:[#allocation114_spill] sm:$0xff] %v14478_v21 }
 0x7af   : > { %v5743_v23 = vpop.f32.mrf.mxu2 }
 0x7b0   : > { %v5965_v37 = vadd.f32 %v5743_v23, %v5449_v19  ;;  %v4489_v57 = vpop.f32.mrf.mxu0  ;;  %v5230_v8 = vpop.f32.mrf.mxu1  ;;  %v6221_v19 = vsel %vm6022_vm7, %v6216_v55, %v6220_v9 }
 0x7b1   : > { %v14490_v7 = vadd.f32 %v4489_v57, %v18419_v63  ;;  %v5450_v30 = vadd.f32 %v5230_v8, %v13912_v58  ;;  %v6734_v33 = vpop.f32.mrf.mxu3  ;;  %v6222_v57 = vrot.slane %v18258_v43, 2  ;;  %v10755_v63 = vld [vmem:[%s10997_s11 + $0x1b0] sm:$0xff] }
 0x7b2   : > { %v14496_v11 = vadd.f32 %v6734_v33, %v5965_v37  ;;  %v4769_v8 = vrot.slane %v10755_v63, 2 }
 0x7b3   : > { %18420 = vst [vmem:[#allocation217_spill] sm:$0xff] %v14490_v7  ;;  %10353 = vmatmul.msk.bf16.vlgmr.msra.gmra.mxu0 %vm1276_vm3, %v7016_v62  ;;  %10193 = vmatmul.msk.bf16.gmra.mxu1 %vm1276_vm3, %v14437_v41  ;;  %v10754_v41 = vld [vmem:[%s10997_s11 + $0x30] sm:$0xff]  ;;  %v18423_v62 = vld [vmem:[#allocation8_spill] sm:$0xff] }
 0x7b4   : > { %10265 = vmatmul.msk.bf16.gmra.mxu2 %vm1276_vm3, %v14493_v60  ;;  %v7017_v37 = vrot.slane %v10754_v41, 3  ;;  %v6223_v55 = vrot.slane %v18423_v62, 3  ;;  %v18427_v62 = vld [vmem:[#allocation105_spill] sm:$0xff] }
 0x7b6   : > { %10333 = vmatmul.msk.bf16.gmra.mxu3 %vm1276_vm3, %v6221_v19 }
 0x7b7   : > { %v5746_v44 = vpop.f32.mrf.mxu2 }
 0x7b8   : > { %v5966_v36 = vadd.f32 %v5746_v44, %v5450_v30  ;;  %v4491_v58 = vpop.f32.mrf.mxu0  ;;  %v5232_v12 = vpop.f32.mrf.mxu1  ;;  %v7018_v44 = vsel %vm7013_vm8, %v7015_v48, %v7017_v37 }
 0x7b9   : > { %v14506_v61 = vadd.f32 %v4491_v58, %v18421_v50  ;;  %v5451_v35 = vadd.f32 %v5232_v12, %v13930_v42  ;;  %v6737_v2 = vpop.f32.mrf.mxu3  ;;  %v6224_v58 = vor.u32 %v6223_v55, %v6222_v57  ;;  %v18424_v50 = vld [vmem:[#allocation115_spill] sm:$0xff]  ;;  %v18426_v12 = vld [vmem:[#allocation97_spill] sm:$0xff] }
 0x7ba   : > { %v14509_v23 = vadd.f32 %v6737_v2, %v5966_v36  ;;  %v14520_v36 = vsel %vm4665_vm6, %v4767_v38, %v4769_v8 }
 0x7bb   : > { %18422 = vst [vmem:[#allocation214_spill] sm:$0xff] %v14506_v61  ;;  %v6225_v48 = vsel %vm6022_vm7, %v6220_v9, %v6224_v58 }
 0x7bf   : > { %v5748_v33 = vpop.f32.mrf.mxu2 }
 0x7c0   : > { %v5967_v30 = vadd.f32 %v5748_v33, %v5451_v35  ;;  %v4494_v19 = vpop.f32.mrf.mxu0  ;;  %v5235_v42 = vpop.f32.mrf.mxu1  ;;  %v18429_v33 = vld [vmem:[#allocation183_spill] sm:$0xff] }
 0x7c1   : > { %v14517_v61 = vadd.f32 %v4494_v19, %v18424_v50  ;;  %v5452_v2 = vadd.f32 %v5235_v42, %v18426_v12  ;;  %v6739_v43 = vpop.f32.mrf.mxu3  ;;  %v18430_v42 = vld [vmem:[#allocation21_spill] sm:$0xff] }
 0x7c2   : > { %v14523_v41 = vadd.f32 %v6739_v43, %v5967_v30  ;;  %v6226_v12 = vrot.slane %v18430_v42, 2  ;;  %v18431_v43 = vld [vmem:[#allocation16_spill] sm:$0xff] }
 0x7c3   : > { %18425 = vst [vmem:[#allocation225_spill] sm:$0xff] %v14517_v61  ;;  %10354 = vmatmul.msk.bf16.gmra.mxu0 %vm1276_vm3, %v7018_v44  ;;  %10194 = vmatmul.msk.bf16.gmra.mxu1 %vm1276_vm3, %v14465_v15  ;;  %v10756_v15 = vld [vmem:[%s10997_s11 + $0x38] sm:$0xff]  ;;  %v6227_v9 = vrot.slane %v18431_v43, 3 }
 0x7c4   : > { %10266 = vmatmul.msk.bf16.gmra.mxu2 %vm1276_vm3, %v14520_v36  ;;  %v7019_v50 = vrot.slane %v10756_v15, 3  ;;  %v10757_v61 = vld [vmem:[%s10997_s11 + $0x1b8] sm:$0xff] }
 0x7c5   : > { %v18438_v43 = vld [vmem:[#allocation184_spill] sm:$0xff] }
 0x7c6   : > { %10334 = vmatmul.msk.bf16.gmra.mxu3 %vm1276_vm3, %v6225_v48  ;;  %v4771_v48 = vrot.slane %v10757_v61, 2 }
 0x7c7   : > { %v5751_v38 = vpop.f32.mrf.mxu2 }
 0x7c8   : > { %v5968_v35 = vadd.f32 %v5751_v38, %v5452_v2  ;;  %v4496_v57 = vpop.f32.mrf.mxu0  ;;  %v5237_v63 = vpop.f32.mrf.mxu1 }
 0x7c9   : > { %v14533_v55 = vadd.f32 %v4496_v57, %v18427_v62  ;;  %v5453_v30 = vadd.f32 %v5237_v63, %v18429_v33  ;;  %v6742_v19 = vpop.f32.mrf.mxu3  ;;  %v7020_v57 = vsel %vm7013_vm8, %v7017_v37, %v7019_v50  ;;  %v6228_v62 = vor.u32 %v6227_v9, %v6226_v12  ;;  %v18434_v33 = vld [vmem:[#allocation173_spill] sm:$0xff] }
 0x7ca   : > { %v14536_v44 = vadd.f32 %v6742_v19, %v5968_v35  ;;  %v14547_v35 = vsel %vm4665_vm6, %v4769_v8, %v4771_v48 }
 0x7cb   : > { %18428 = vst [vmem:[#allocation226_spill] sm:$0xff] %v14533_v55  ;;  %v18432_v55 = vld [vmem:[#allocation116_spill] sm:$0xff] }
 0x7cf   : > { %v5753_v7 = vpop.f32.mrf.mxu2 }
 0x7d0   : > { %v5969_v2 = vadd.f32 %v5753_v7, %v5453_v30  ;;  %v4499_v38 = vpop.f32.mrf.mxu0  ;;  %v5240_v63 = vpop.f32.mrf.mxu1  ;;  %v6229_v7 = vsel %vm6022_vm7, %v6224_v58, %v6228_v62 }
 0x7d1   : > { %v14544_v21 = vadd.f32 %v4499_v38, %v18432_v55  ;;  %v5454_v19 = vadd.f32 %v5240_v63, %v18434_v33  ;;  %v6744_v15 = vpop.f32.mrf.mxu3  ;;  %v18436_v55 = vld [vmem:[#allocation119_spill] sm:$0xff]  ;;  %v18440_v63 = vld [vmem:[#allocation28_spill] sm:$0xff] }
 0x7d2   : > { %v14550_v42 = vadd.f32 %v6744_v15, %v5969_v2  ;;  %v6230_v33 = vrot.slane %v18440_v63, 2  ;;  %v18441_v15 = vld [vmem:[#allocation22_spill] sm:$0xff] }
 0x7d3   : > { %18433 = vst [vmem:[#allocation221_spill] sm:$0xff] %v14544_v21  ;;  %10355 = vmatmul.msk.bf16.gmra.mxu0 %vm1276_vm3, %v7020_v57  ;;  %10195 = vmatmul.msk.bf16.gmra.mxu1 %vm1276_vm3, %v14493_v60  ;;  %v10758_v60 = vld [vmem:[%s10997_s11 + $0x40] sm:$0xff]  ;;  %v6231_v58 = vrot.slane %v18441_v15, 3 }
 0x7d4   : > { %18435 = vst [vmem:[#allocation218_spill] sm:$0xff] %v14550_v42  ;;  %10267 = vmatmul.msk.bf16.gmra.mxu2 %vm1276_vm3, %v14547_v35  ;;  %v7021_v57 = vrot.slane %v10758_v60, 3  ;;  %v10759_v21 = vld [vmem:[%s10997_s11 + $0x1c0] sm:$0xff] }
 0x7d5   : > { %v18448_v15 = vld [vmem:[#allocation177_spill] sm:$0xff] }
 0x7d6   : > { %10335 = vmatmul.msk.bf16.gmra.mxu3 %vm1276_vm3, %v6229_v7  ;;  %v4773_v7 = vrot.slane %v10759_v21, 2 }
 0x7d7   : > { %v5756_v61 = vpop.f32.mrf.mxu2 }
 0x7d8   : > { %v5970_v37 = vadd.f32 %v5756_v61, %v5454_v19  ;;  %v4501_v8 = vpop.f32.mrf.mxu0  ;;  %v5242_v12 = vpop.f32.mrf.mxu1 }
 0x7d9   : > { %v14560_v30 = vadd.f32 %v4501_v8, %v18436_v55  ;;  %v5455_v9 = vadd.f32 %v5242_v12, %v18438_v43  ;;  %v6747_v2 = vpop.f32.mrf.mxu3  ;;  %v7022_v8 = vsel %vm7013_vm8, %v7019_v50, %v7021_v57  ;;  %v6232_v55 = vor.u32 %v6231_v58, %v6230_v33  ;;  %v18444_v43 = vld [vmem:[#allocation187_spill] sm:$0xff] }
 0x7da   : > { %v14563_v38 = vadd.f32 %v6747_v2, %v5970_v37  ;;  %v14574_v37 = vsel %vm4665_vm6, %v4771_v48, %v4773_v7 }
 0x7db   : > { %18437 = vst [vmem:[#allocation227_spill] sm:$0xff] %v14560_v30  ;;  %v18442_v30 = vld [vmem:[#allocation109_spill] sm:$0xff] }
 0x7dc   : > { %18439 = vst [vmem:[#allocation228_spill] sm:$0xff] %v14563_v38 }
 0x7df   : > { %v5758_v26 = vpop.f32.mrf.mxu2 }
 0x7e0   : > { %v5971_v19 = vadd.f32 %v5758_v26, %v5455_v9  ;;  %v4504_v61 = vpop.f32.mrf.mxu0  ;;  %v5245_v12 = vpop.f32.mrf.mxu1  ;;  %v6233_v26 = vsel %vm6022_vm7, %v6228_v62, %v6232_v55 }
 0x7e1   : > { %v14571_v42 = vadd.f32 %v4504_v61, %v18442_v30  ;;  %v5456_v2 = vadd.f32 %v5245_v12, %v18444_v43  ;;  %v6749_v60 = vpop.f32.mrf.mxu3  ;;  %v18446_v30 = vld [vmem:[#allocation120_spill] sm:$0xff]  ;;  %v18449_v12 = vld [vmem:[#allocation35_spill] sm:$0xff] }
 0x7e2   : > { %v14577_v63 = vadd.f32 %v6749_v60, %v5971_v19  ;;  %v6234_v43 = vrot.slane %v18449_v12, 2  ;;  %v18450_v60 = vld [vmem:[#allocation29_spill] sm:$0xff] }
 0x7e3   : > { %18443 = vst [vmem:[#allocation7_spill] sm:$0xff] %v14571_v42  ;;  %10356 = vmatmul.msk.bf16.gmra.mxu0 %vm1276_vm3, %v7022_v8  ;;  %10196 = vmatmul.msk.bf16.gmra.mxu1 %vm1276_vm3, %v14520_v36  ;;  %v10760_v36 = vld [vmem:[%s10997_s11 + $0x48] sm:$0xff]  ;;  %v6235_v62 = vrot.slane %v18450_v60, 3  ;;  %v18456_v60 = vld [vmem:[#allocation191_spill] sm:$0xff] }
 0x7e4   : > { %18445 = vst [vmem:[#allocation6_spill] sm:$0xff] %v14577_v63  ;;  %10268 = vmatmul.msk.bf16.gmra.mxu2 %vm1276_vm3, %v14574_v37  ;;  %v7023_v8 = vrot.slane %v10760_v36, 3  ;;  %v10761_v42 = vld [vmem:[%s10997_s11 + $0x1c8] sm:$0xff] }
 0x7e6   : > { %10336 = vmatmul.msk.bf16.gmra.mxu3 %vm1276_vm3, %v6233_v26  ;;  %v4775_v26 = vrot.slane %v10761_v42, 2 }
 0x7e7   : > { %v5761_v21 = vpop.f32.mrf.mxu2 }
 0x7e8   : > { %v5972_v50 = vadd.f32 %v5761_v21, %v5456_v2  ;;  %v4506_v48 = vpop.f32.mrf.mxu0  ;;  %v5247_v33 = vpop.f32.mrf.mxu1 }
 0x7e9   : > { %v14587_v9 = vadd.f32 %v4506_v48, %v18446_v30  ;;  %v5457_v58 = vadd.f32 %v5247_v33, %v18448_v15  ;;  %v6752_v19 = vpop.f32.mrf.mxu3  ;;  %v7024_v48 = vsel %vm7013_vm8, %v7021_v57, %v7023_v8  ;;  %v6236_v30 = vor.u32 %v6235_v62, %v6234_v43  ;;  %v18453_v15 = vld [vmem:[#allocation188_spill] sm:$0xff] }
 0x7ea   : > { %v14590_v61 = vadd.f32 %v6752_v19, %v5972_v50  ;;  %v14601_v50 = vsel %vm4665_vm6, %v4773_v7, %v4775_v26 }
 0x7eb   : > { %18447 = vst [vmem:[#allocation229_spill] sm:$0xff] %v14587_v9  ;;  %v18451_v9 = vld [vmem:[#allocation123_spill] sm:$0xff]  ;;  %v6237_v42 = vsel %vm6022_vm7, %v6232_v55, %v6236_v30  ;;  %v6239_v55 = vrot.slane %v18308_v56, 3 }
 0x7ef   : > { %v5763_v63 = vpop.f32.mrf.mxu2 }
 0x7f0   : > { %v5973_v2 = vadd.f32 %v5763_v63, %v5457_v58  ;;  %v4509_v21 = vpop.f32.mrf.mxu0  ;;  %v5250_v33 = vpop.f32.mrf.mxu1 }
 0x7f1   : > { %v14598_v38 = vadd.f32 %v4509_v21, %v18451_v9  ;;  %v5458_v19 = vadd.f32 %v5250_v33, %v18453_v15  ;;  %v6754_v36 = vpop.f32.mrf.mxu3  ;;  %v18454_v9 = vld [vmem:[#allocation113_spill] sm:$0xff]  ;;  %v6238_v33 = vrot.slane %v18307_v47, 2  ;;  %v10763_v15 = vld [vmem:[%s10997_s11 + $0x1d0] sm:$0xff] }
 0x7f2   : > { %v14604_v12 = vadd.f32 %v6754_v36, %v5973_v2  ;;  %v4777_v36 = vrot.slane %v10763_v15, 2  ;;  %v18463_v15 = vld [vmem:[#allocation195_spill] sm:$0xff] }
 0x7f3   : > { %18452 = vst [vmem:[#allocation150_spill] sm:$0xff] %v14598_v38  ;;  %10357 = vmatmul.msk.bf16.gmra.mxu0 %vm1276_vm3, %v7024_v48  ;;  %10197 = vmatmul.msk.bf16.gmra.mxu1 %vm1276_vm3, %v14547_v35  ;;  %v10762_v35 = vld [vmem:[%s10997_s11 + $0x50] sm:$0xff] }
 0x7f4   : > { %10269 = vmatmul.msk.bf16.gmra.mxu2 %vm1276_vm3, %v14601_v50  ;;  %v7025_v48 = vrot.slane %v10762_v35, 3  ;;  %v18461_v35 = vld [vmem:[#allocation127_spill] sm:$0xff] }
 0x7f6   : > { %10337 = vmatmul.msk.bf16.gmra.mxu3 %vm1276_vm3, %v6237_v42 }
 0x7f7   : > { %v5766_v57 = vpop.f32.mrf.mxu2 }
 0x7f8   : > { %v5974_v7 = vadd.f32 %v5766_v57, %v5458_v19  ;;  %v4511_v63 = vpop.f32.mrf.mxu0  ;;  %v5252_v43 = vpop.f32.mrf.mxu1 }
 0x7f9   : > { %v14614_v58 = vadd.f32 %v4511_v63, %v18454_v9  ;;  %v5459_v62 = vadd.f32 %v5252_v43, %v18456_v60  ;;  %v6757_v2 = vpop.f32.mrf.mxu3  ;;  %v7026_v63 = vsel %vm7013_vm8, %v7023_v8, %v7025_v48  ;;  %v6240_v9 = vor.u32 %v6239_v55, %v6238_v33  ;;  %v18459_v60 = vld [vmem:[#allocation178_spill] sm:$0xff] }
 0x7fa   : > { %v14617_v21 = vadd.f32 %v6757_v2, %v5974_v7  ;;  %v14628_v7 = vsel %vm4665_vm6, %v4775_v26, %v4777_v36 }
 0x7fb   : > { %18455 = vst [vmem:[#allocation230_spill] sm:$0xff] %v14614_v58  ;;  %v18457_v58 = vld [vmem:[#allocation124_spill] sm:$0xff]  ;;  %v6241_v8 = vsel %vm6022_vm7, %v6236_v30, %v6240_v9  ;;  %v6243_v30 = vrot.slane %v18318_v32, 3 }
 0x7ff   : > { %v5768_v42 = vpop.f32.mrf.mxu2 }
 0x800   : > { %v5975_v19 = vadd.f32 %v5768_v42, %v5459_v62  ;;  %v4514_v57 = vpop.f32.mrf.mxu0  ;;  %v5255_v43 = vpop.f32.mrf.mxu1 }
 0x801   : > { %v14625_v38 = vadd.f32 %v4514_v57, %v18457_v58  ;;  %v5460_v2 = vadd.f32 %v5255_v43, %v18459_v60  ;;  %v6759_v47 = vpop.f32.mrf.mxu3  ;;  %v6242_v43 = vrot.slane %v18317_v54, 2  ;;  %v10765_v60 = vld [vmem:[%s10997_s11 + $0x1d8] sm:$0xff] }
 0x802   : > { %v14631_v56 = vadd.f32 %v6759_v47, %v5975_v19  ;;  %v4779_v47 = vrot.slane %v10765_v60, 2  ;;  %v18470_v60 = vld [vmem:[#allocation199_spill] sm:$0xff] }
 0x803   : > { %18458 = vst [vmem:[#allocation132_spill] sm:$0xff] %v14625_v38  ;;  %10358 = vmatmul.msk.bf16.gmra.mxu0 %vm1276_vm3, %v7026_v63  ;;  %10198 = vmatmul.msk.bf16.gmra.mxu1 %vm1276_vm3, %v14574_v37  ;;  %v10764_v37 = vld [vmem:[%s10997_s11 + $0x58] sm:$0xff]  ;;  %v18465_v38 = vld [vmem:[#allocation117_spill] sm:$0xff] }
 0x804   : > { %18460 = vst [vmem:[#allocation15_spill] sm:$0xff] %v14631_v56  ;;  %10270 = vmatmul.msk.bf16.gmra.mxu2 %vm1276_vm3, %v14628_v7  ;;  %v7027_v63 = vrot.slane %v10764_v37, 3  ;;  %v18468_v37 = vld [vmem:[#allocation128_spill] sm:$0xff] }
 0x806   : > { %10338 = vmatmul.msk.bf16.gmra.mxu3 %vm1276_vm3, %v6241_v8 }
 0x807   : > { %v5771_v26 = vpop.f32.mrf.mxu2 }
 0x808   : > { %v5976_v58 = vadd.f32 %v5771_v26, %v5460_v2  ;;  %v4516_v62 = vpop.f32.mrf.mxu0  ;;  %v5257_v55 = vpop.f32.mrf.mxu1 }
 0x809   : > { %v14641_v33 = vadd.f32 %v4516_v62, %v18461_v35  ;;  %v5461_v42 = vadd.f32 %v5257_v55, %v18463_v15  ;;  %v6762_v19 = vpop.f32.mrf.mxu3  ;;  %v7028_v62 = vsel %vm7013_vm8, %v7025_v48, %v7027_v63  ;;  %v6244_v35 = vor.u32 %v6243_v30, %v6242_v43  ;;  %v18467_v15 = vld [vmem:[#allocation182_spill] sm:$0xff] }
 0x80a   : > { %v14644_v57 = vadd.f32 %v6762_v19, %v5976_v58  ;;  %v14655_v58 = vsel %vm4665_vm6, %v4777_v36, %v4779_v47 }
 0x80b   : > { %18462 = vst [vmem:[#allocation231_spill] sm:$0xff] %v14641_v33 }
 0x80c   : > { %18464 = vst [vmem:[#allocation135_spill] sm:$0xff] %v14644_v57  ;;  %v18482_v57 = vld [vmem:[#allocation118_spill] sm:$0xff] }
 0x80f   : > { %v5773_v8 = vpop.f32.mrf.mxu2 }
 0x810   : > { %v5977_v2 = vadd.f32 %v5773_v8, %v5461_v42  ;;  %v4519_v26 = vpop.f32.mrf.mxu0  ;;  %v5260_v55 = vpop.f32.mrf.mxu1 }
 0x811   : > { %v14652_v33 = vadd.f32 %v4519_v26, %v18465_v38  ;;  %v5462_v19 = vadd.f32 %v5260_v55, %v18467_v15  ;;  %v6764_v54 = vpop.f32.mrf.mxu3  ;;  %v6245_v38 = vsel %vm6022_vm7, %v6240_v9, %v6244_v35  ;;  %v6246_v55 = vrot.slane %v18327_v25, 2  ;;  %v10767_v15 = vld [vmem:[%s10997_s11 + $0x1e0] sm:$0xff] }
 0x812   : > { %v14658_v32 = vadd.f32 %v6764_v54, %v5977_v2  ;;  %v6247_v9 = vrot.slane %v18328_v10, 3  ;;  %v4781_v54 = vrot.slane %v10767_v15, 2  ;;  %v18476_v15 = vld [vmem:[#allocation200_spill] sm:$0xff] }
 0x813   : > { %18466 = vst [vmem:[#allocation157_spill] sm:$0xff] %v14652_v33  ;;  %10359 = vmatmul.msk.bf16.gmra.mxu0 %vm1276_vm3, %v7028_v62  ;;  %10199 = vmatmul.msk.bf16.gmra.mxu1 %vm1276_vm3, %v14601_v50  ;;  %v10766_v50 = vld [vmem:[%s10997_s11 + $0x60] sm:$0xff] }
 0x814   : > { %10271 = vmatmul.msk.bf16.gmra.mxu2 %vm1276_vm3, %v14655_v58  ;;  %v7029_v62 = vrot.slane %v10766_v50, 3  ;;  %v18471_v33 = vld [vmem:[#allocation69_spill] sm:$0xff]  ;;  %v18474_v50 = vld [vmem:[#allocation131_spill] sm:$0xff] }
 0x816   : > { %10339 = vmatmul.msk.bf16.gmra.mxu3 %vm1276_vm3, %v6245_v38 }
 0x817   : > { %v5776_v48 = vpop.f32.mrf.mxu2 }
 0x818   : > { %v5978_v36 = vadd.f32 %v5776_v48, %v5462_v19  ;;  %v4521_v42 = vpop.f32.mrf.mxu0  ;;  %v5262_v30 = vpop.f32.mrf.mxu1 }
 0x819   : > { %v14668_v43 = vadd.f32 %v4521_v42, %v18468_v37  ;;  %v5463_v8 = vadd.f32 %v5262_v30, %v18470_v60  ;;  %v6767_v2 = vpop.f32.mrf.mxu3  ;;  %v7030_v42 = vsel %vm7013_vm8, %v7027_v63, %v7029_v62  ;;  %v6248_v37 = vor.u32 %v6247_v9, %v6246_v55  ;;  %v18473_v60 = vld [vmem:[#allocation189_spill] sm:$0xff] }
 0x81a   : > { %v14671_v26 = vadd.f32 %v6767_v2, %v5978_v36  ;;  %v14682_v36 = vsel %vm4665_vm6, %v4779_v47, %v4781_v54 }
 0x81b   : > { %18469 = vst [vmem:[#allocation154_spill] sm:$0xff] %v14668_v43 }
 0x81f   : > { %v5778_v38 = vpop.f32.mrf.mxu2 }
 0x820   : > { %v5979_v19 = vadd.f32 %v5778_v38, %v5463_v8  ;;  %v4524_v48 = vpop.f32.mrf.mxu0  ;;  %v5265_v30 = vpop.f32.mrf.mxu1 }
 0x821   : > { %v14679_v43 = vadd.f32 %v4524_v48, %v18471_v33  ;;  %v5464_v2 = vadd.f32 %v5265_v30, %v18473_v60  ;;  %v6769_v25 = vpop.f32.mrf.mxu3  ;;  %v6249_v33 = vsel %vm6022_vm7, %v6244_v35, %v6248_v37  ;;  %v6250_v30 = vrot.slane %v18337_v1, 2  ;;  %v10769_v60 = vld [vmem:[%s10997_s11 + $0x1e8] sm:$0xff] }
 0x822   : > { %v14685_v10 = vadd.f32 %v6769_v25, %v5979_v19  ;;  %v6251_v35 = vrot.slane %v18338_v45, 3  ;;  %v4783_v25 = vrot.slane %v10769_v60, 2 }
 0x823   : > { %18472 = vst [vmem:[#allocation232_spill] sm:$0xff] %v14679_v43  ;;  %10360 = vmatmul.msk.bf16.gmra.mxu0 %vm1276_vm3, %v7030_v42  ;;  %10200 = vmatmul.msk.bf16.gmra.mxu1 %vm1276_vm3, %v14628_v7  ;;  %v10768_v7 = vld [vmem:[%s10997_s11 + $0x68] sm:$0xff] }
 0x824   : > { %10272 = vmatmul.msk.bf16.gmra.mxu2 %vm1276_vm3, %v14682_v36  ;;  %v7031_v42 = vrot.slane %v10768_v7, 3  ;;  %v18479_v7 = vld [vmem:[#allocation121_spill] sm:$0xff] }
 0x826   : > { %10340 = vmatmul.msk.bf16.gmra.mxu3 %vm1276_vm3, %v6249_v33 }
 0x827   : > { %v5781_v63 = vpop.f32.mrf.mxu2 }
 0x828   : > { %v5980_v47 = vadd.f32 %v5781_v63, %v5464_v2  ;;  %v4526_v8 = vpop.f32.mrf.mxu0  ;;  %v5267_v9 = vpop.f32.mrf.mxu1 }
 0x829   : > { %v14695_v55 = vadd.f32 %v4526_v8, %v18474_v50  ;;  %v5465_v38 = vadd.f32 %v5267_v9, %v18476_v15  ;;  %v6772_v19 = vpop.f32.mrf.mxu3  ;;  %v7032_v8 = vsel %vm7013_vm8, %v7029_v62, %v7031_v42  ;;  %v6252_v50 = vor.u32 %v6251_v35, %v6250_v30  ;;  %v18478_v15 = vld [vmem:[#allocation203_spill] sm:$0xff]  ;;  %v18480_v35 = vld [vmem:[#allocation190_spill] sm:$0xff] }
 0x82a   : > { %v14698_v48 = vadd.f32 %v6772_v19, %v5980_v47  ;;  %v14709_v47 = vsel %vm4665_vm6, %v4781_v54, %v4783_v25 }
 0x82b   : > { %18475 = vst [vmem:[#allocation125_spill] sm:$0xff] %v14695_v55  ;;  %v18477_v55 = vld [vmem:[#allocation41_spill] sm:$0xff]  ;;  %v6253_v62 = vsel %vm6022_vm7, %v6248_v37, %v6252_v50  ;;  %v6255_v37 = vrot.slane %v18346_v27, 3 }
 0x82f   : > { %v5783_v33 = vpop.f32.mrf.mxu2 }
 0x830   : > { %v5981_v2 = vadd.f32 %v5783_v33, %v5465_v38  ;;  %v7367_v63 = vpop.f32.mrf.mxu0  ;;  %v5270_v43 = vpop.f32.mrf.mxu1 }
 0x831   : > { %v14706_v9 = vadd.f32 %v7367_v63, %v18477_v55  ;;  %v5466_v19 = vadd.f32 %v5270_v43, %v18478_v15  ;;  %v6774_v1 = vpop.f32.mrf.mxu3  ;;  %v10771_v15 = vld [vmem:[%s10997_s11 + $0x1f0] sm:$0xff] }
 0x832   : > { %v14712_v45 = vadd.f32 %v6774_v1, %v5981_v2  ;;  %v4785_v1 = vrot.slane %v10771_v15, 2  ;;  %v18486_v15 = vld [vmem:[#allocation45_spill] sm:$0xff] }
 0x833   : > { %10361 = vmatmul.msk.bf16.gmra.mxu0 %vm1276_vm3, %v7032_v8  ;;  %10201 = vmatmul.msk.bf16.gmra.mxu1 %vm1276_vm3, %v14655_v58  ;;  %v10770_v58 = vld [vmem:[%s10997_s11 + $0x70] sm:$0xff]  ;;  %v6254_v8 = vrot.slane %v18345_v3, 2 }
 0x834   : > { %10273 = vmatmul.msk.bf16.gmra.mxu2 %vm1276_vm3, %v14709_v47  ;;  %v7033_v63 = vrot.slane %v10770_v58, 3 }
 0x836   : > { %10341 = vmatmul.msk.bf16.gmra.mxu3 %vm1276_vm3, %v6253_v62  ;;  %v7034_v56 = vsel %vm7013_vm8, %v7031_v42, %v7033_v63 }
 0x837   : > { %v5786_v54 = vpop.f32.mrf.mxu2 }
 0x838   : > { %v5982_v55 = vadd.f32 %v5786_v54, %v5466_v19  ;;  %v7369_v43 = vpop.f32.mrf.mxu0  ;;  %v5272_v38 = vpop.f32.mrf.mxu1 }
 0x839   : > { %v14722_v30 = vadd.f32 %v7369_v43, %v18479_v7  ;;  %v5467_v60 = vadd.f32 %v5272_v38, %v18480_v35  ;;  %v6777_v33 = vpop.f32.mrf.mxu3  ;;  %v6256_v43 = vor.u32 %v6255_v37, %v6254_v8  ;;  %v18483_v35 = vld [vmem:[#allocation42_spill] sm:$0xff]  ;;  %v18485_v8 = vld [vmem:[#allocation44_spill] sm:$0xff] }
 0x83a   : > { %v14725_v2 = vadd.f32 %v6777_v33, %v5982_v55  ;;  %v14736_v55 = vsel %vm4665_vm6, %v4783_v25, %v4785_v1 }
 0x83c   : > { %18481 = vst [vmem:[#allocation233_spill] sm:$0xff] %v14725_v2  ;;  %v18487_v2 = vld [vmem:[#allocation47_spill] sm:$0xff] }
 0x83f   : > { %v5788_v62 = vpop.f32.mrf.mxu2 }
 0x840   : > { %v5983_v19 = vadd.f32 %v5788_v62, %v5467_v60  ;;  %v7372_v54 = vpop.f32.mrf.mxu0  ;;  %v5275_v7 = vpop.f32.mrf.mxu1 }
 0x841   : > { %v14733_v38 = vadd.f32 %v7372_v54, %v18482_v57  ;;  %v5468_v33 = vadd.f32 %v5275_v7, %v18483_v35  ;;  %v6779_v3 = vpop.f32.mrf.mxu3  ;;  %v6257_v57 = vsel %vm6022_vm7, %v6252_v50, %v6256_v43  ;;  %v6258_v7 = vrot.slane %v18351_v20, 2  ;;  %v10773_v35 = vld [vmem:[%s10997_s11 + $0x1f8] sm:$0xff] }
 0x842   : > { %v14739_v27 = vadd.f32 %v6779_v3, %v5983_v19  ;;  %v6259_v50 = vrot.slane %v18352_v29, 3  ;;  %v4787_v3 = vrot.slane %v10773_v35, 2 }
 0x843   : > { %10362 = vmatmul.msk.bf16.gmra.mxu0 %vm1276_vm3, %v7034_v56  ;;  %10202 = vmatmul.msk.bf16.gmra.mxu1 %vm1276_vm3, %v14682_v36  ;;  %v10772_v36 = vld [vmem:[%s10997_s11 + $0x78] sm:$0xff] }
 0x844   : > { %18484 = vst [vmem:[#allocation136_spill] sm:$0xff] %v14739_v27  ;;  %10274 = vmatmul.msk.bf16.gmra.mxu2 %vm1276_vm3, %v14736_v55  ;;  %v7035_v54 = vrot.slane %v10772_v36, 3 }
 0x846   : > { %10342 = vmatmul.msk.bf16.gmra.mxu3 %vm1276_vm3, %v6257_v57  ;;  %v7036_v27 = vsel %vm7013_vm8, %v7033_v63, %v7035_v54 }
 0x847   : > { %v5791_v42 = vpop.f32.mrf.mxu2 }
 0x848   : > { %v5984_v25 = vadd.f32 %v5791_v42, %v5468_v33  ;;  %v7374_v60 = vpop.f32.mrf.mxu0  ;;  %v5277_v58 = vpop.f32.mrf.mxu1 }
 0x849   : > { %v14749_v37 = vadd.f32 %v7374_v60, %v18485_v8  ;;  %v5469_v56 = vadd.f32 %v5277_v58, %v18486_v15  ;;  %v6782_v62 = vpop.f32.mrf.mxu3  ;;  %v6260_v60 = vor.u32 %v6259_v50, %v6258_v7 }
 0x84a   : > { %v14752_v19 = vadd.f32 %v6782_v62, %v5984_v25  ;;  %v14763_v25 = vsel %vm4665_vm6, %v4785_v1, %v4787_v3  ;;  %v18488_v62 = vld [vmem:[#allocation122_spill] sm:$0xff] }
 0x84f   : > { %v5793_v57 = vpop.f32.mrf.mxu2 }
 0x850   : > { %v5985_v33 = vadd.f32 %v5793_v57, %v5469_v56  ;;  %v7377_v42 = vpop.f32.mrf.mxu0  ;;  %v5280_v8 = vpop.f32.mrf.mxu1  ;;  %v6262_v57 = vrot.slane %v18359_v46, 2 }
 0x851   : > { %v14760_v58 = vadd.f32 %v7377_v42, %v18487_v2  ;;  %v5470_v15 = vadd.f32 %v5280_v8, %v14196_v28  ;;  %v6784_v20 = vpop.f32.mrf.mxu3  ;;  %v6261_v2 = vsel %vm6022_vm7, %v6256_v43, %v6260_v60  ;;  %v6263_v43 = vrot.slane %v18360_v16, 3 }
 0x852   : > { %v14766_v29 = vadd.f32 %v6784_v20, %v5985_v33  ;;  %v10775_v33 = vld [vmem:[%s10997_s11 + $0x200] sm:$0xff] }
 0x853   : > { %10363 = vmatmul.msk.bf16.gmra.mxu0 %vm1276_vm3, %v7036_v27  ;;  %10203 = vmatmul.msk.bf16.gmra.mxu1 %vm1276_vm3, %v14709_v47  ;;  %v10774_v47 = vld [vmem:[%s10997_s11 + $0x80] sm:$0xff]  ;;  %v4789_v42 = vrot.slane %v10775_v33, 2 }
 0x854   : > { %10275 = vmatmul.msk.bf16.gmra.mxu2 %vm1276_vm3, %v14763_v25  ;;  %v7037_v35 = vrot.slane %v10774_v47, 3  ;;  %v18490_v47 = vld [vmem:[#allocation53_spill] sm:$0xff] }
 0x856   : > { %10343 = vmatmul.msk.bf16.gmra.mxu3 %vm1276_vm3, %v6261_v2  ;;  %v7038_v2 = vsel %vm7013_vm8, %v7035_v54, %v7037_v35 }
 0x857   : > { %v5796_v63 = vpop.f32.mrf.mxu2 }
 0x858   : > { %v5986_v1 = vadd.f32 %v5796_v63, %v5470_v15  ;;  %v7379_v28 = vpop.f32.mrf.mxu0  ;;  %v5282_v56 = vpop.f32.mrf.mxu1  ;;  %v6264_v63 = vor.u32 %v6263_v43, %v6262_v57 }
 0x859   : > { %v14776_v36 = vadd.f32 %v7379_v28, %v18488_v62  ;;  %v5471_v27 = vadd.f32 %v5282_v56, %v14214_v18  ;;  %v6787_v7 = vpop.f32.mrf.mxu3  ;;  %v18489_v62 = vld [vmem:[#allocation50_spill] sm:$0xff] }
 0x85a   : > { %v14779_v50 = vadd.f32 %v6787_v7, %v5986_v1  ;;  %v14790_v1 = vsel %vm4665_vm6, %v4787_v3, %v4789_v42  ;;  %v6265_v54 = vsel %vm6022_vm7, %v6260_v60, %v6264_v63  ;;  %v6267_v60 = vrot.slane %v18368_v40, 3 }
 0x85f   : > { %v5798_v8 = vpop.f32.mrf.mxu2 }
 0x860   : > { %v5987_v15 = vadd.f32 %v5798_v8, %v5471_v27  ;;  %v7382_v20 = vpop.f32.mrf.mxu0  ;;  %v5285_v28 = vpop.f32.mrf.mxu1 }
 0x861   : > { %v14787_v18 = vadd.f32 %v7382_v20, %v18489_v62  ;;  %v5472_v56 = vadd.f32 %v5285_v28, %v14224_v22  ;;  %v6789_v46 = vpop.f32.mrf.mxu3  ;;  %v6266_v20 = vrot.slane %v18367_v53, 2 }
 0x862   : > { %v14793_v16 = vadd.f32 %v6789_v46, %v5987_v15 }
 0x863   : > { %10364 = vmatmul.msk.bf16.gmra.mxu0 %vm1276_vm3, %v7038_v2  ;;  %10204 = vmatmul.msk.bf16.gmra.mxu1 %vm1276_vm3, %v14736_v55  ;;  %v10776_v55 = vld [vmem:[%s10997_s11 + $0x88] sm:$0xff] }
 0x864   : > { %10276 = vmatmul.msk.bf16.gmra.mxu2 %vm1276_vm3, %v14790_v1  ;;  %v7039_v15 = vrot.slane %v10776_v55, 3  ;;  %v10777_v2 = vld [vmem:[%s10997_s11 + $0x208] sm:$0xff] }
 0x865   : > { %v4791_v28 = vrot.slane %v10777_v2, 2 }
 0x866   : > { %10344 = vmatmul.msk.bf16.gmra.mxu3 %vm1276_vm3, %v6265_v54  ;;  %v7040_v54 = vsel %vm7013_vm8, %v7037_v35, %v7039_v15 }
 0x867   : > { %v5801_v3 = vpop.f32.mrf.mxu2 }
 0x868   : > { %v5988_v27 = vadd.f32 %v5801_v3, %v5472_v56  ;;  %v7384_v22 = vpop.f32.mrf.mxu0  ;;  %v5287_v7 = vpop.f32.mrf.mxu1  ;;  %v6268_v3 = vor.u32 %v6267_v60, %v6266_v20  ;;  %v18494_v60 = vld [vmem:[#allocation198_spill] sm:$0xff] }
 0x869   : > { %v14803_v57 = vadd.f32 %v7384_v22, %v18490_v47  ;;  %v5473_v43 = vadd.f32 %v5287_v7, %v14242_v0  ;;  %v6792_v33 = vpop.f32.mrf.mxu3  ;;  %v18491_v47 = vld [vmem:[#allocation126_spill] sm:$0xff]  ;;  %v18492_v7 = vld [vmem:[#allocation48_spill] sm:$0xff] }
 0x86a   : > { %v14806_v8 = vadd.f32 %v6792_v33, %v5988_v27  ;;  %v4792_v27 = vsel %vm4665_vm6, %v4789_v42, %v4791_v28  ;;  %v6269_v40 = vsel %vm6022_vm7, %v6264_v63, %v6268_v3 }
 0x86f   : > { %v5803_v62 = vpop.f32.mrf.mxu2 }
 0x870   : > { %v5989_v56 = vadd.f32 %v5803_v62, %v5473_v43  ;;  %v7387_v46 = vpop.f32.mrf.mxu0  ;;  %v5290_v22 = vpop.f32.mrf.mxu1 }
 0x871   : > { %v14814_v0 = vadd.f32 %v7387_v46, %v18491_v47  ;;  %v5474_v33 = vadd.f32 %v5290_v22, %v18492_v7  ;;  %v6794_v53 = vpop.f32.mrf.mxu3  ;;  %v10778_v46 = vld [vmem:[%s10997_s11 + $0x90] sm:$0xff]  ;;  %v6271_v22 = vrot.slane %v18378_v34, 3 }
 0x872   : > { %v14818_v55 = vadd.f32 %v6794_v53, %v5989_v56  ;;  %v10779_v47 = vld [vmem:[%s10997_s11 + $0x210] sm:$0xff] }
 0x873   : > { %10365 = vmatmul.msk.bf16.gmra.mxu0 %vm1276_vm3, %v7040_v54  ;;  %10205 = vmatmul.msk.bf16.gmra.mxu1 %vm1276_vm3, %v14763_v25  ;;  %v7041_v54 = vrot.slane %v10778_v46, 3  ;;  %v6270_v25 = vrot.slane %v18377_v59, 2  ;;  %v4793_v63 = vrot.slane %v10779_v47, 2 }
 0x874   : > { %18493 = vst [vmem:[#allocation161_spill] sm:$0xff] %v14818_v55  ;;  %10277 = vmatmul.msk.bf16.gmra.mxu2 %vm1276_vm3, %v4792_v27 }
 0x876   : > { %10345 = vmatmul.msk.bf16.gmra.mxu3 %vm1276_vm3, %v6269_v40 }
 0x877   : > { %v5806_v35 = vpop.f32.mrf.mxu2 }
 0x878   : > { %v5990_v42 = vadd.f32 %v5806_v35, %v5474_v33  ;;  %v14826_v43 = vpop.f32.mrf.mxu0  ;;  %v5292_v20 = vpop.f32.mrf.mxu1  ;;  %v7042_v33 = vsel %vm7013_vm8, %v7039_v15, %v7041_v54  ;;  %v6272_v35 = vor.u32 %v6271_v22, %v6270_v25  ;;  %v10780_v22 = vld [vmem:[%s10997_s11 + $0x98] sm:$0xff] }
 0x879   : > { %v5475_v2 = vadd.f32 %v5292_v20, %v18494_v60  ;;  %v6797_v62 = vpop.f32.mrf.mxu3  ;;  %v4794_v20 = vsel %vm4665_vm6, %v4791_v28, %v4793_v63  ;;  %v7043_v47 = vrot.slane %v10780_v22, 3 }
 0x87a   : > { %v14829_v56 = vadd.f32 %v6797_v62, %v5990_v42  ;;  %v6273_v59 = vsel %vm6022_vm7, %v6268_v3, %v6272_v35 }
 0x87c   : > { %18495 = vst [vmem:[#allocation158_spill] sm:$0xff] %v14829_v56 }
 0x87f   : > { %v5808_v7 = vpop.f32.mrf.mxu2 }
 0x880   : > { %v5991_v53 = vadd.f32 %v5808_v7, %v5475_v2  ;;  %v14835_v40 = vpop.f32.mrf.mxu0  ;;  %v5295_v55 = vpop.f32.mrf.mxu1  ;;  %v6275_v7 = vrot.slane %v18388_v17, 3 }
 0x881   : > { %v5476_v42 = vadd.f32 %v5295_v55, %v14280_v5  ;;  %v6799_v60 = vpop.f32.mrf.mxu3  ;;  %v18497_v55 = vld [vmem:[#allocation215_spill] sm:$0xff] }
 0x882   : > { %v14840_v62 = vadd.f32 %v6799_v60, %v5991_v53  ;;  %v10781_v53 = vld [vmem:[%s10997_s11 + $0x218] sm:$0xff] }
 0x883   : > { %10366 = vmatmul.msk.bf16.gmra.mxu0 %vm1276_vm3, %v7042_v33  ;;  %10206 = vmatmul.msk.bf16.gmra.mxu1 %vm1276_vm3, %v14790_v1  ;;  %v6274_v1 = vrot.slane %v18387_v13, 2  ;;  %v4795_v3 = vrot.slane %v10781_v53, 2 }
 0x884   : > { %18496 = vst [vmem:[#allocation234_spill] sm:$0xff] %v14840_v62  ;;  %10278 = vmatmul.msk.bf16.gmra.mxu2 %vm1276_vm3, %v4794_v20 }
 0x886   : > { %10346 = vmatmul.msk.bf16.gmra.mxu3 %vm1276_vm3, %v6273_v59 }
 0x887   : > { %v5811_v34 = vpop.f32.mrf.mxu2 }
 0x888   : > { %v5992_v15 = vadd.f32 %v5811_v34, %v5476_v42  ;;  %v14848_v28 = vpop.f32.mrf.mxu0  ;;  %v5297_v5 = vpop.f32.mrf.mxu1  ;;  %v7044_v42 = vsel %vm7013_vm8, %v7041_v54, %v7043_v47  ;;  %v6276_v34 = vor.u32 %v6275_v7, %v6274_v1 }
 0x889   : > { %v5477_v2 = vadd.f32 %v5297_v5, %v18497_v55  ;;  %v6802_v46 = vpop.f32.mrf.mxu3  ;;  %v14859_v5 = vsel %vm4665_vm6, %v4793_v63, %v4795_v3 }
 0x88a   : > { %v14851_v25 = vadd.f32 %v6802_v46, %v5992_v15  ;;  %v18499_v15 = vld [vmem:[#allocation205_spill] sm:$0xff]  ;;  %v6277_v13 = vsel %vm6022_vm7, %v6272_v35, %v6276_v34 }
 0x88b   : > { %v10783_v35 = vld [vmem:[%s10997_s11 + $0x220] sm:$0xff]  }
 0x88c   : > { %18498 = vst [vmem:[#allocation139_spill] sm:$0xff] %v14851_v25  ;;  %v4797_v25 = vrot.slane %v10783_v35, 2 }
 0x88f   : > { %v5813_v33 = vpop.f32.mrf.mxu2 }
 0x890   : > { %v5993_v60 = vadd.f32 %v5813_v33, %v5477_v2  ;;  %v7397_v59 = vpop.f32.mrf.mxu0  ;;  %v5300_v62 = vpop.f32.mrf.mxu1  ;;  %v10782_v33 = vld [vmem:[%s10997_s11 + $0xa0] sm:$0xff] }
 0x891   : > { %v5478_v55 = vadd.f32 %v5300_v62, %v18499_v15  ;;  %v6804_v46 = vpop.f32.mrf.mxu3  ;;  %v18501_v62 = vld [vmem:[#allocation216_spill] sm:$0xff]  ;;  %v18504_v15 = vshll.u32 %v14379_v52, 16 }
 0x892   : > { %v14862_v22 = vadd.f32 %v6804_v46, %v5993_v60  ;;  %v7045_v60 = vrot.slane %v10782_v33, 3 }
 0x893   : > { %10367 = vmatmul.msk.bf16.gmra.mxu0 %vm1276_vm3, %v7044_v42  ;;  %10207 = vmatmul.msk.bf16.gmra.mxu1 %vm1276_vm3, %v4792_v27  ;;  %v18503_v27 = vshrl.u32 %v14379_v52, 16  ;;  %v6279_v46 = vrot.slane %v18504_v15, 3  ;;  %v18508_v15 = vld [vmem:[#allocation209_spill] sm:$0xff] }
 0x894   : > { %18500 = vst [vmem:[#allocation235_spill] sm:$0xff] %v14862_v22  ;;  %10279 = vmatmul.msk.bf16.gmra.mxu2 %vm1276_vm3, %v14859_v5 }
 0x895   : > { %v6278_v42 = vrot.slane %v18503_v27, 2 }
 0x896   : > { %10347 = vmatmul.msk.bf16.gmra.mxu3 %vm1276_vm3, %v6277_v13 }
 0x897   : > { %v5816_v17 = vpop.f32.mrf.mxu2  ;;  %v6280_v56 = vor.u32 %v6279_v46, %v6278_v42  ;;  %v18507_v42 = vld [vmem:[#allocation70_spill] sm:$0xff] }
 0x898   : > { %v5994_v54 = vadd.f32 %v5816_v17, %v5478_v55  ;;  %v7399_v63 = vpop.f32.mrf.mxu0  ;;  %v5302_v2 = vpop.f32.mrf.mxu1  ;;  %v7046_v17 = vsel %vm7013_vm8, %v7043_v47, %v7045_v60 }
 0x899   : > { %v5479_v1 = vadd.f32 %v5302_v2, %v18501_v62  ;;  %v6807_v7 = vpop.f32.mrf.mxu3  ;;  %v18505_v62 = vld [vmem:[#allocation219_spill] sm:$0xff]  ;;  %v6281_v52 = vsel %vm6022_vm7, %v6276_v34, %v6280_v56  ;;  %v18511_v34 = vshrl.u32 %v14414_v31, 16 }
 0x89a   : > { %v14871_v53 = vadd.f32 %v6807_v7, %v5994_v54  ;;  %v14881_v54 = vsel %vm4665_vm6, %v4795_v3, %v4797_v25 }
 0x89c   : > { %18502 = vst [vmem:[#allocation129_spill] sm:$0xff] %v14871_v53 }
 0x89f   : > { %v5818_v13 = vpop.f32.mrf.mxu2 }
 0x8a0   : > { %v5995_v22 = vadd.f32 %v5818_v13, %v5479_v1  ;;  %v7402_v55 = vpop.f32.mrf.mxu0  ;;  %v5305_v2 = vpop.f32.mrf.mxu1  ;;  %v18509_v13 = vld [vmem:[#allocation134_spill] sm:$0xff] }
 0x8a1   : > { %v5480_v7 = vadd.f32 %v5305_v2, %v18505_v62  ;;  %v6809_v33 = vpop.f32.mrf.mxu3  ;;  %v10784_v2 = vld [vmem:[%s10997_s11 + $0xa8] sm:$0xff] }
 0x8a2   : > { %v14884_v53 = vadd.f32 %v6809_v33, %v5995_v22  ;;  %v7047_v62 = vrot.slane %v10784_v2, 3  ;;  %v6282_v33 = vrot.slane %v18511_v34, 2  ;;  %v18515_v2 = vld [vmem:[#allocation130_spill] sm:$0xff] }
 0x8a3   : > { %10368 = vmatmul.msk.bf16.gmra.mxu0 %vm1276_vm3, %v7046_v17  ;;  %10208 = vmatmul.msk.bf16.gmra.mxu1 %vm1276_vm3, %v4794_v20  ;;  %v7721_v17 = vadd.f32 %v7402_v55, %v18509_v13  ;;  %v7718_v34 = vadd.f32 %v14848_v28, %v18515_v2  ;;  %v18521_v2 = vld [vmem:[#allocation145_spill] sm:$0xff] }
 0x8a4   : > { %18506 = vst [vmem:[#allocation165_spill] sm:$0xff] %v14884_v53  ;;  %10280 = vmatmul.msk.bf16.gmra.mxu2 %vm1276_vm3, %v14881_v54 }
 0x8a6   : > { %10348 = vmatmul.msk.bf16.gmra.mxu3 %vm1276_vm3, %v6281_v52  ;;  %v18512_v52 = vshll.u32 %v14414_v31, 16  ;;  %v18516_v31 = vld [vmem:[#allocation141_spill] sm:$0xff] }
 0x8a7   : > { %v5821_v47 = vpop.f32.mrf.mxu2 }
 0x8a8   : > { %v5996_v3 = vadd.f32 %v5821_v47, %v5480_v7  ;;  %v7404_v1 = vpop.f32.mrf.mxu0  ;;  %v5307_v27 = vpop.f32.mrf.mxu1  ;;  %v6283_v7 = vrot.slane %v18512_v52, 3  ;;  %v18513_v47 = vld [vmem:[#allocation68_spill] sm:$0xff] }
 0x8a9   : > { %v7722_v22 = vadd.f32 %v7404_v1, %v18507_v42  ;;  %v5481_v46 = vadd.f32 %v5307_v27, %v18508_v15  ;;  %v6812_v35 = vpop.f32.mrf.mxu3  ;;  %v7720_v53 = vadd.f32 %v7399_v63, %v18513_v47  ;;  %v10785_v1 = vld [vmem:[%s10997_s11 + $0x228] sm:$0xff]  ;;  %v18514_v27 = vld [vmem:[#allocation63_spill] sm:$0xff] }
 0x8aa   : > { %v14895_v20 = vadd.f32 %v6812_v35, %v5996_v3  ;;  %v14904_v42 = vrot.slane %v10785_v1, 2  ;;  %v7719_v15 = vadd.f32 %v7397_v59, %v18514_v27  ;;  %v7048_v35 = vsel %vm7013_vm8, %v7045_v60, %v7047_v62  ;;  %v18517_v59 = vld [vmem:[#allocation60_spill] sm:$0xff] }
 0x8ab   : > { %8228 = vmatpush.msrb.mxu1 %v7722_v22  ;;  %v6284_v13 = vor.u32 %v6283_v7, %v6282_v33  ;;  %v18519_v60 = vld [vmem:[#allocation56_spill] sm:$0xff]  ;;  %v10786_v33 = vld [vmem:[%s10997_s11 + $0x230] sm:$0xff]  }
 0x8ac   : > { %18510 = vst [vmem:[#allocation162_spill] sm:$0xff] %v14895_v20  ;;  %v4800_v63 = vsel %vm4665_vm6, %v4797_v25, %v14904_v42  ;;  %v7716_v25 = vadd.f32 %v14826_v43, %v18519_v60  ;;  %v6287_v7 = vshrl.u32 %v10786_v33, 16  ;;  %v6290_v47 = vshll.u32 %v10786_v33, 16  ;;  %v18520_v1 = vld [vmem:[#allocation152_spill] sm:$0xff]  ;;  %v18626_v20 = vld [vmem:[#allocation194_spill] sm:$0xff] }
 0x8ad   : > { %8229 = vmatpush.msrb.mxu1 %v7721_v17  ;;  %v6285_v28 = vsel %vm6022_vm7, %v6280_v56, %v6284_v13 }
 0x8ae   : > { %v6292_v43 = vrot.slane %v6290_v47, 3 }
 0x8af   : > { %v5823_v55 = vpop.f32.mrf.mxu2  ;;  %8230 = vmatpush.msrb.mxu1 %v7720_v53  ;;  %v7717_v53 = vadd.f32 %v14835_v40, %v18517_v59 }
 0x8b0   : > { %v5997_v3 = vadd.f32 %v5823_v55, %v5481_v46  ;;  %v7407_v22 = vpop.f32.mrf.mxu0  ;;  %v5517_v55 = vrot.slane %v10786_v33, 2 }
 0x8b1   : > { %v14911_v52 = vadd.f32 %v7407_v22, %v18516_v31  ;;  %8231 = vmatpush.msrb.mxu1 %v7719_v15  ;;  %v6814_v17 = vpop.f32.mrf.mxu3  ;;  %v6289_v15 = vrot.slane %v6287_v7, 2  ;;  %v18522_v31 = vld [vmem:[#allocation142_spill] sm:$0xff] }
 0x8b2   : > { %v14917_v46 = vadd.f32 %v6814_v17, %v5997_v3 }
 0x8b3   : > { %10369 = vmatmul.msk.bf16.gmra.mxu0 %vm1276_vm3, %v7048_v35  ;;  %8232 = vmatpush.msrb.mxu1 %v7718_v34  ;;  %v6293_v35 = vor.u32 %v6292_v43, %v6289_v15  ;;  %v18525_v15 = vld [vmem:[#allocation159_spill] sm:$0xff] }
 0x8b4   : > { %18518 = vst [vmem:[#allocation236_spill] sm:$0xff] %v14917_v46  ;;  %10209 = vmatmul.msk.bf16.gmra.mxu1 %vm1276_vm3, %v14859_v5  ;;  %10281 = vmatmul.msk.bf16.gmra.mxu2 %vm1276_vm3, %v4800_v63  ;;  %v10787_v5 = vld [vmem:[%s10997_s11 + $0xb0] sm:$0xff] }
 0x8b5   : > { %8233 = vmatpush.msrb.mxu1 %v7717_v53  ;;  %v7049_v56 = vrot.slane %v10787_v5, 3 }
 0x8b6   : > { %10349 = vmatmul.msk.bf16.gmra.mxu3 %vm1276_vm3, %v6285_v28  ;;  %v368_v28 = vld [vmem:[%s10997_s11 + $0x240] sm:$0xf] }
 0x8b7   : > { %8234 = vmatpush.msrb.mxu1 %v7716_v25  ;;  %v7050_v22 = vsel %vm7013_vm8, %v7047_v62, %v7049_v56 }
 0x8b8   : > { %v7409_v40 = vpop.f32.mrf.mxu0 }
 0x8b9   : > { %v14929_v27 = vadd.f32 %v7409_v40, %v18520_v1  ;;  %8235 = vmatpush.msrb.mxu1 %v14814_v0  ;;  %v18523_v40 = vld [vmem:[#allocation156_spill] sm:$0xff] }
 0x8bb   : > { %8236 = vmatpush.msrb.mxu1 %v14803_v57  ;;  %v5518_v57 = vsel %vm4665_vm6, %v14904_v42, %v5517_v55 }
 0x8bd   : > { %8237 = vmatpush.msrb.mxu1 %v14787_v18  ;;  %v10527_v18 = vld [vmem:[%s10997_s11 + $0x238] sm:$0xff] }
 0x8be   : > { %v6296_v0 = vshrl.u32 %v10527_v18, 16  ;;  %v6299_v62 = vshll.u32 %v10527_v18, 16 }
 0x8bf   : > { %8238 = vmatpush.msrb.mxu1 %v14776_v36  ;;  %v6294_v36 = vsel %vm6022_vm7, %v6284_v13, %v6293_v35  ;;  %v5519_v13 = vrot.slane %v10527_v18, 2 }
 0x8c0   : > { %v7412_v3 = vpop.f32.mrf.mxu0  ;;  %v6298_v59 = vrot.slane %v6296_v0, 2  ;;  %v6301_v53 = vrot.slane %v6299_v62, 3 }
 0x8c1   : > { %v14938_v34 = vadd.f32 %v7412_v3, %v18521_v2  ;;  %8239 = vmatpush.msrb.mxu1 %v14760_v58  ;;  %v5520_v7 = vsel %vm4665_vm6, %v5517_v55, %v5519_v13  ;;  %v10789_v55 = vld [vmem:[%s10997_s11 + $0xc0] sm:$0xff]  ;;  %v4801_v2 = vrot.slane %v18410_v51, 2 }
 0x8c2   : > { %v6302_v25 = vor.u32 %v6301_v53, %v6298_v59  ;;  %v7053_v3 = vrot.slane %v10789_v55, 3  ;;  %v10790_v53 = vld [vmem:[%s10997_s11 + $0xc8] sm:$0xff]  ;;  %v10792_v55 = vld [vmem:[%s10997_s11 + $0xd8] sm:$0xff] }
 0x8c3   : > { %10370 = vmatmul.msk.bf16.gmra.mxu0 %vm1276_vm3, %v7050_v22  ;;  %8240 = vmatpush.msrb.mxu1 %v14749_v37  ;;  %v4802_v62 = vsel %vm4665_vm6, %v14904_v42, %v4801_v2 }
 0x8c4   : > { %10210 = vmatmul.msk.bf16.gmra.mxu1 %vm1276_vm3, %v14881_v54  ;;  %10282 = vmatmul.msk.bf16.gmra.mxu2 %vm1276_vm3, %v5518_v57  ;;  %v10788_v54 = vld [vmem:[%s10997_s11 + $0xb8] sm:$0xff] }
 0x8c5   : > { %8241 = vmatpush.msrb.mxu1 %v14733_v38  ;;  %v7051_v17 = vrot.slane %v10788_v54, 3 }
 0x8c6   : > { %10350 = vmatmul.msk.bf16.gmra.mxu3 %vm1276_vm3, %v6294_v36 }
 0x8c7   : > { %8242 = vmatpush.msrb.mxu1 %v14722_v30  ;;  %v7052_v38 = vsel %vm7013_vm8, %v7049_v56, %v7051_v17  ;;  %v5513_v30 = vunpack.c.l.b16 %v368_v28  ;;  %v7054_v36 = vsel %vm7013_vm8, %v7051_v17, %v7053_v3  ;;  %v18527_v17 = vld [vmem:[#allocation160_spill] sm:$0xff]  ;;  %v7055_v28 = vrot.slane %v10790_v53, 3  ;;  %v18535_v53 = vld [vmem:[#allocation85_spill] sm:$0xff] }
 0x8c8   : > { %v7414_v58 = vpop.f32.mrf.mxu0 }
 0x8c9   : > { %v14954_v37 = vadd.f32 %v7414_v58, %v18522_v31  ;;  %8243 = vmatpush.msrb.mxu1 %v14706_v9  ;;  %v6303_v9 = vsel %vm6022_vm7, %v6293_v35, %v6302_v25  ;;  %v14968_v47 = vpack.c.b16 %v5513_v30, %v5513_v30  ;;  %v18526_v58 = vld [vmem:[#allocation149_spill] sm:$0xff] }
 0x8cb   : > { %18524 = vst [vmem:[#allocation140_spill] sm:$0xff] %v14968_v47  ;;  %v6305_v5 = vshrl.u32 %v14968_v47, 16  ;;  %v6308_v56 = vshll.u32 %v14968_v47, 16  ;;  %v5521_v35 = vrot.slane %v14968_v47, 2  ;;  %v18574_v47 = vld [vmem:[#allocation59_spill] sm:$0xff] }
 0x8cd   : > { %v6307_v22 = vrot.slane %v6305_v5, 2  ;;  %v5522_v31 = vsel %vm4665_vm6, %v5519_v13, %v5521_v35  ;;  %v7056_v13 = vsel %vm7013_vm8, %v7053_v3, %v7055_v28  ;;  %v7059_v3 = vrot.slane %v10792_v55, 3 }
 0x8d0   : > { %v7417_v60 = vpop.f32.mrf.mxu0 }
 0x8d1   : > { %v14961_v33 = vadd.f32 %v7417_v60, %v18523_v40  ;;  %v14994_v60 = vpop.f32.mrf.mxu1 }
 0x8d3   : > { %10371 = vmatmul.msk.bf16.gmra.mxu0 %vm1276_vm3, %v7052_v38  ;;  %v18528_v38 = vld [vmem:[#allocation163_spill] sm:$0xff] }
 0x8d4   : > { %10211 = vmatmul.msk.bf16.gmra.mxu1 %vm1276_vm3, %v4800_v63  ;;  %10283 = vmatmul.msk.bf16.gmra.mxu2 %vm1276_vm3, %v5520_v7  ;;  %v6310_v63 = vrot.slane %v6308_v56, 3 }
 0x8d6   : > { %10351 = vmatmul.msk.bf16.gmra.mxu3 %vm1276_vm3, %v6303_v9  ;;  %v6311_v18 = vor.u32 %v6310_v63, %v6307_v22 }
 0x8d8   : > { %v7419_v1 = vpop.f32.mrf.mxu0  ;;  %v6312_v51 = vsel %vm6022_vm7, %v6302_v25, %v6311_v18  ;;  %v10791_v25 = vld [vmem:[%s10997_s11 + $0xd0] sm:$0xff] }
 0x8d9   : > { %v14974_v43 = vadd.f32 %v7419_v1, %v18525_v15  ;;  %v14998_v7 = vpop.f32.mrf.mxu1  ;;  %v7057_v9 = vrot.slane %v10791_v25, 3  ;;  %v18537_v25 = vld [vmem:[#allocation168_spill] sm:$0xff] }
 0x8da   : > { %18529 = vst [vmem:[#allocation5_spill] sm:$0xff] %v14998_v7 }
 0x8db   : > { %v7058_v5 = vsel %vm7013_vm8, %v7055_v28, %v7057_v9  ;;  %v7060_v2 = vsel %vm7013_vm8, %v7057_v9, %v7059_v3 }
 0x8e0   : > { %v7422_v57 = vpop.f32.mrf.mxu0 }
 0x8e1   : > { %v14981_v0 = vadd.f32 %v7422_v57, %v18526_v58  ;;  %v15003_v56 = vpop.f32.mrf.mxu1 }
 0x8e2   : > { %18530 = vst [vmem:[#allocation237_spill] sm:$0xff] %v15003_v56 }
 0x8e3   : > { %10372 = vmatmul.msk.bf16.gmra.mxu0 %vm1276_vm3, %v7054_v36  ;;  %v10793_v36 = vld [vmem:[%s10997_s11 + $0xe0] sm:$0xff] }
 0x8e4   : > { %10212 = vmatmul.msk.bf16.gmra.mxu1 %vm1276_vm3, %v4802_v62  ;;  %10284 = vmatmul.msk.bf16.gmra.mxu2 %vm1276_vm3, %v5522_v31  ;;  %v7061_v18 = vrot.slane %v10793_v36, 3  ;;  %v18539_v36 = vld [vmem:[#allocation81_spill] sm:$0xff] }
 0x8e6   : > { %10352 = vmatmul.msk.bf16.gmra.mxu3 %vm1276_vm3, %v6312_v51  ;;  %v7062_v62 = vsel %vm7013_vm8, %v7059_v3, %v7061_v18 }
 0x8e8   : > { %v7424_v54 = vpop.f32.mrf.mxu0 }
 0x8e9   : > { %v7730_v59 = vadd.f32 %v7424_v54, %v18527_v17  ;;  %v15006_v22 = vpop.f32.mrf.mxu1  ;;  %v18534_v54 = vld [vmem:[#allocation171_spill] sm:$0xff] }
 0x8ea   : > { %18531 = vst [vmem:[#allocation143_spill] sm:$0xff] %v15006_v22 }
 0x8f0   : > { %v7427_v42 = vpop.f32.mrf.mxu0 }
 0x8f1   : > { %v7731_v30 = vadd.f32 %v7427_v42, %v18528_v38  ;;  %v15010_v57 = vpop.f32.mrf.mxu1  ;;  %v10794_v42 = vld [vmem:[%s10997_s11 + $0xe8] sm:$0xff] }
 0x8f2   : > { %18532 = vst [vmem:[#allocation169_spill] sm:$0xff] %v15010_v57 }
 0x8f3   : > { %10373 = vmatmul.msk.bf16.gmra.mxu0 %vm1276_vm3, %v7056_v13  ;;  %v7063_v13 = vrot.slane %v10794_v42, 3  ;;  %v18544_v42 = vld [vmem:[#allocation89_spill] sm:$0xff] }
 0x8f8   : > { %v7429_v40 = vpop.f32.mrf.mxu0 }
 0x8f9   : > { %v15014_v31 = vpop.f32.mrf.mxu1 }
 0x8fa   : > { %18533 = vst [vmem:[#allocation166_spill] sm:$0xff] %v15014_v31 }
 0x900   : > { %v7432_v1 = vpop.f32.mrf.mxu0 }
 0x901   : > { %v15020_v38 = vpop.f32.mrf.mxu1 }
 0x902   : > { %18536 = vst [vmem:[#allocation238_spill] sm:$0xff] %v15020_v38 }
 0x903   : > { %10374 = vmatmul.msk.bf16.gmra.mxu0 %vm1276_vm3, %v7058_v5  ;;  %v18538_v5 = vld [vmem:[#allocation167_spill] sm:$0xff] }
 0x908   : > { %v7434_v15 = vpop.f32.mrf.mxu0 }
 0x910   : > { %v7437_v63 = vpop.f32.mrf.mxu0 }
 0x911   : > { %v7735_v55 = vadd.f32 %v7437_v63, %v18538_v5  ;;  %v15032_v63 = vpop.f32.mrf.mxu1 }
 0x912   : > { %18543 = vst [vmem:[#allocation133_spill] sm:$0xff] %v15032_v63 }
 0x913   : > { %10375 = vmatmul.msk.bf16.gmra.mxu0 %vm1276_vm3, %v7060_v2  ;;  %v7064_v2 = vsel %vm7013_vm8, %v7061_v18, %v7063_v13 }
 0x918   : > { %v7439_v35 = vpop.f32.mrf.mxu0 }
 0x919   : > { %v7736_v9 = vadd.f32 %v7439_v35, %v18537_v25  ;;  %v18542_v35 = vld [vmem:[#allocation79_spill] sm:$0xff]  ;;  %v15043_v5 = vpop.f32.mrf.mxu1 }
 0x91a   : > { %18546 = vst [vmem:[#allocation9_spill] sm:$0xff] %v15043_v5 }
 0x920   : > { %v7442_v58 = vpop.f32.mrf.mxu0 }
 0x921   : > { %v7737_v28 = vadd.f32 %v7442_v58, %v18535_v53  ;;  %v18541_v58 = vld [vmem:[#allocation164_spill] sm:$0xff]  ;;  %v7732_v53 = vadd.f32 %v7429_v40, %v18542_v35  ;;  %v10797_v35 = vld [vmem:[%s10997_s11 + $0x100] sm:$0xff] }
 0x923   : > { %10376 = vmatmul.msk.bf16.gmra.mxu0 %vm1276_vm3, %v7062_v62  ;;  %v7734_v62 = vadd.f32 %v7434_v15, %v18539_v36  ;;  %v10795_v15 = vld [vmem:[%s10997_s11 + $0xf0] sm:$0xff] }
 0x924   : > { %v7065_v25 = vrot.slane %v10795_v15, 3 }
 0x926   : > { %v7066_v40 = vsel %vm7013_vm8, %v7063_v13, %v7065_v25  ;;  %v15059_v13 = vpop.f32.mrf.mxu1 }
 0x927   : > { %18550 = vst [vmem:[#allocation144_spill] sm:$0xff] %v15059_v13 }
 0x928   : > { %v7444_v51 = vpop.f32.mrf.mxu0 }
 0x929   : > { %v7738_v17 = vadd.f32 %v7444_v51, %v18534_v54  ;;  %v18540_v51 = vld [vmem:[#allocation172_spill] sm:$0xff] }
 0x92b   : > { %8341 = vmatpush.msrb.mxu2 %v7738_v17  ;;  %v7733_v17 = vadd.f32 %v7432_v1, %v18541_v58 }
 0x92d   : > { %8342 = vmatpush.msrb.mxu2 %v7737_v28 }
 0x92f   : > { %8343 = vmatpush.msrb.mxu2 %v7736_v9  ;;  %v15041_v9 = vpop.f32.mrf.mxu2 }
 0x930   : > { %v7447_v3 = vpop.f32.mrf.mxu0  ;;  %18545 = vst [vmem:[#allocation10_spill] sm:$0xff] %v15041_v9 }
 0x931   : > { %v15027_v54 = vadd.f32 %v7447_v3, %v18540_v51  ;;  %8344 = vmatpush.msrb.mxu2 %v7735_v55  ;;  %v18547_v55 = vld [vmem:[#allocation175_spill] sm:$0xff]  ;;  %v15069_v51 = vpop.f32.mrf.mxu1 }
 0x932   : > { %18553 = vst [vmem:[#allocation147_spill] sm:$0xff] %v15069_v51 }
 0x933   : > { %10377 = vmatmul.msk.bf16.gmra.mxu0 %vm1276_vm3, %v7064_v2  ;;  %8345 = vmatpush.msrb.mxu2 %v7734_v62  ;;  %v18551_v62 = vld [vmem:[#allocation93_spill] sm:$0xff] }
 0x935   : > { %8346 = vmatpush.msrb.mxu2 %v7733_v17 }
 0x937   : > { %8347 = vmatpush.msrb.mxu2 %v7732_v53  ;;  %v7069_v53 = vrot.slane %v10797_v35, 3 }
 0x938   : > { %v7449_v28 = vpop.f32.mrf.mxu0 }
 0x939   : > { %v15035_v18 = vadd.f32 %v7449_v28, %v18544_v42  ;;  %8348 = vmatpush.msrb.mxu2 %v7731_v30  ;;  %v15057_v30 = vpop.f32.mrf.mxu2  ;;  %v15077_v42 = vpop.f32.mrf.mxu1 }
 0x93a   : > { %18549 = vst [vmem:[#allocation239_spill] sm:$0xff] %v15057_v30 }
 0x93b   : > { %8349 = vmatpush.msrb.mxu2 %v7730_v59  ;;  %18556 = vst [vmem:[#allocation11_spill] sm:$0xff] %v15077_v42 }
 0x93d   : > { %8350 = vmatpush.msrb.mxu2 %v14981_v0  ;;  %v18548_v0 = vld [vmem:[#allocation176_spill] sm:$0xff] }
 0x93f   : > { %8351 = vmatpush.msrb.mxu2 %v14974_v43 }
 0x940   : > { %v7452_v1 = vpop.f32.mrf.mxu0 }
 0x941   : > { %v15046_v3 = vadd.f32 %v7452_v1, %v18547_v55  ;;  %8352 = vmatpush.msrb.mxu2 %v14961_v33  ;;  %v10796_v33 = vld [vmem:[%s10997_s11 + $0xf8] sm:$0xff]  ;;  %v18557_v1 = vld [vmem:[#allocation43_spill] sm:$0xff]  ;;  %v7843_v55 = vld [vmem:[%s17391_s4] sm:$0xff] }
 0x942   : > { %v7067_v2 = vrot.slane %v10796_v33, 3  ;;  %8244 = vmatmul.f32.vlgmr.msrb.gmra.mxu1 %v7843_v55  ;;  %v15089_v33 = vpop.f32.mrf.mxu1 }
 0x943   : > { %10378 = vmatmul.msk.bf16.gmra.mxu0 %vm1276_vm3, %v7066_v40  ;;  %8353 = vmatpush.msrb.mxu2 %v14954_v37  ;;  %18559 = vst [vmem:[#allocation137_spill] sm:$0xff] %v15089_v33  ;;  %v10800_v33 = vld [vmem:[%s10997_s11 + $0x118] sm:$0xff] }
 0x944   : > { %v7068_v37 = vsel %vm7013_vm8, %v7065_v25, %v7067_v2  ;;  %v7070_v25 = vsel %vm7013_vm8, %v7067_v2, %v7069_v53  ;;  %v7852_v2 = vld [vmem:[%s17391_s4 + $0x48] sm:$0xff] }
 0x945   : > { %8354 = vmatpush.msrb.mxu2 %v14938_v34 }
 0x947   : > { %8355 = vmatpush.msrb.mxu2 %v14929_v27  ;;  %v15067_v27 = vpop.f32.mrf.mxu2 }
 0x948   : > { %v7454_v43 = vpop.f32.mrf.mxu0  ;;  %18552 = vst [vmem:[#allocation240_spill] sm:$0xff] %v15067_v27  ;;  %v8059_v27 = vld [vmem:[%s17391_s4 + $0x6c0] sm:$0xff] }
 0x949   : > { %v15054_v59 = vadd.f32 %v7454_v43, %v18548_v0  ;;  %8356 = vmatpush.msrb.mxu2 %v14911_v52  ;;  %v18554_v52 = vld [vmem:[#allocation90_spill] sm:$0xff] }
 0x94a   : > { %8247 = vmatmul.f32.gmra.mxu1 %v7852_v2  ;;  %v10799_v2 = vld [vmem:[%s10997_s11 + $0x110] sm:$0xff] }
 0x94f   : > { %v15075_v28 = vpop.f32.mrf.mxu2 }
 0x950   : > { %v7457_v36 = vpop.f32.mrf.mxu0  ;;  %18555 = vst [vmem:[#allocation17_spill] sm:$0xff] %v15075_v28 }
 0x951   : > { %v15064_v34 = vadd.f32 %v7457_v36, %v18551_v62  ;;  %v18560_v36 = vld [vmem:[#allocation180_spill] sm:$0xff]  ;;  %v10798_v62 = vld [vmem:[%s10997_s11 + $0x108] sm:$0xff] }
 0x953   : > { %10379 = vmatmul.msk.bf16.gmra.mxu0 %vm1276_vm3, %v7068_v37 }
 0x957   : > { %v15087_v0 = vpop.f32.mrf.mxu2 }
 0x958   : > { %v7459_v58 = vpop.f32.mrf.mxu0  ;;  %18558 = vst [vmem:[#allocation241_spill] sm:$0xff] %v15087_v0  ;;  %v18581_v0 = vld [vmem:[#allocation181_spill] sm:$0xff] }
 0x959   : > { %v15072_v17 = vadd.f32 %v7459_v58, %v18554_v52  ;;  %v7071_v58 = vrot.slane %v10798_v62, 3  ;;  %v7073_v62 = vrot.slane %v10799_v2, 3  ;;  %v7888_v2 = vld [vmem:[%s17391_s4 + $0x168] sm:$0xff] }
 0x95b   : > { %v7072_v35 = vsel %vm7013_vm8, %v7069_v53, %v7071_v58  ;;  %v7870_v53 = vld [vmem:[%s17391_s4 + $0xd8] sm:$0xff]  ;;  %v7074_v13 = vsel %vm7013_vm8, %v7071_v58, %v7073_v62  ;;  %v7075_v58 = vrot.slane %v10800_v33, 3 }
 0x95f   : > { %v15105_v55 = vpop.f32.mrf.mxu2 }
 0x960   : > { %v7462_v15 = vpop.f32.mrf.mxu0  ;;  %18562 = vst [vmem:[#allocation242_spill] sm:$0xff] %v15105_v55 }
 0x961   : > { %v15081_v40 = vadd.f32 %v7462_v15, %v18557_v1  ;;  %v18561_v15 = vld [vmem:[#allocation46_spill] sm:$0xff]  ;;  %v7861_v1 = vld [vmem:[%s17391_s4 + $0x90] sm:$0xff] }
 0x962   : > { %8250 = vmatmul.f32.gmra.mxu1 %v7861_v1 }
 0x963   : > { %10380 = vmatmul.msk.bf16.gmra.mxu0 %vm1276_vm3, %v7070_v25 }
 0x968   : > { %v7464_v43 = vpop.f32.mrf.mxu0 }
 0x969   : > { %v15092_v37 = vadd.f32 %v7464_v43, %v18560_v36  ;;  %v15107_v43 = vpop.f32.mrf.mxu1 }
 0x96a   : > { %18563 = vst [vmem:[#allocation148_spill] sm:$0xff] %v15107_v43  ;;  %8253 = vmatmul.f32.gmra.mxu1 %v7870_v53 }
 0x970   : > { %v7467_v52 = vpop.f32.mrf.mxu0 }
 0x971   : > { %v15100_v25 = vadd.f32 %v7467_v52, %v18561_v15  ;;  %v15116_v52 = vpop.f32.mrf.mxu2  ;;  %v15118_v15 = vpop.f32.mrf.mxu1 }
 0x972   : > { %18564 = vst [vmem:[#allocation23_spill] sm:$0xff] %v15116_v52 }
 0x973   : > { %10381 = vmatmul.msk.bf16.gmra.mxu0 %vm1276_vm3, %v7072_v35  ;;  %18565 = vst [vmem:[#allocation18_spill] sm:$0xff] %v15118_v15  ;;  %v7879_v35 = vld [vmem:[%s17391_s4 + $0x120] sm:$0xff]  ;;  %v7076_v15 = vsel %vm7013_vm8, %v7073_v62, %v7075_v58 }
 0x974   : > { %8256 = vmatmul.f32.gmra.mxu1 %v7879_v35 }
 0x978   : > { %v15110_v36 = vpop.f32.mrf.mxu0 }
 0x979   : > { %v15125_v51 = vpop.f32.mrf.mxu2  ;;  %v15127_v42 = vpop.f32.mrf.mxu1 }
 0x97a   : > { %18566 = vst [vmem:[#allocation75_spill] sm:$0xff] %v15125_v51 }
 0x97b   : > { %18567 = vst [vmem:[#allocation151_spill] sm:$0xff] %v15127_v42 }
 0x97c   : > { %8259 = vmatmul.f32.gmra.mxu1 %v7888_v2  ;;  %v7906_v2 = vld [vmem:[%s17391_s4 + $0x1f8] sm:$0xff] }
 0x980   : > { %v7472_v1 = vpop.f32.mrf.mxu0 }
 0x981   : > { %v15134_v5 = vpop.f32.mrf.mxu2  ;;  %v15136_v35 = vpop.f32.mrf.mxu1 }
 0x982   : > { %18568 = vst [vmem:[#allocation65_spill] sm:$0xff] %v15134_v5  ;;  %v10801_v5 = vld [vmem:[%s10997_s11 + $0x120] sm:$0xff] }
 0x983   : > { %10382 = vmatmul.msk.bf16.gmra.mxu0 %vm1276_vm3, %v7074_v13  ;;  %18569 = vst [vmem:[#allocation138_spill] sm:$0xff] %v15136_v35  ;;  %v7897_v13 = vld [vmem:[%s17391_s4 + $0x1b0] sm:$0xff]  ;;  %v7077_v35 = vrot.slane %v10801_v5, 3  ;;  %v7924_v5 = vld [vmem:[%s17391_s4 + $0x288] sm:$0xff] }
 0x984   : > { %8262 = vmatmul.f32.gmra.mxu1 %v7897_v13 }
 0x985   : > { %v7078_v63 = vsel %vm7013_vm8, %v7075_v58, %v7077_v35  ;;  %v18575_v58 = vld [vmem:[#allocation174_spill] sm:$0xff] }
 0x988   : > { %v7474_v53 = vpop.f32.mrf.mxu0 }
 0x989   : > { %v15145_v33 = vpop.f32.mrf.mxu2  ;;  %v15147_v62 = vpop.f32.mrf.mxu1 }
 0x98a   : > { %18570 = vst [vmem:[#allocation30_spill] sm:$0xff] %v15145_v33 }
 0x98b   : > { %18571 = vst [vmem:[#allocation24_spill] sm:$0xff] %v15147_v62 }
 0x98c   : > { %8265 = vmatmul.f32.gmra.mxu1 %v7906_v2 }
 0x990   : > { %v7477_v43 = vpop.f32.mrf.mxu0 }
 0x991   : > { %v15155_v13 = vpop.f32.mrf.mxu2  ;;  %v15157_v2 = vpop.f32.mrf.mxu1 }
 0x992   : > { %18572 = vst [vmem:[#allocation58_spill] sm:$0xff] %v15155_v13  ;;  %v18576_v13 = vld [vmem:[#allocation55_spill] sm:$0xff] }
 0x993   : > { %10383 = vmatmul.msk.bf16.gmra.mxu0 %vm1276_vm3, %v7076_v15  ;;  %v7915_v15 = vld [vmem:[%s17391_s4 + $0x240] sm:$0xff]  ;;  %18573 = vst [vmem:[#allocation155_spill] sm:$0xff] %v15157_v2 }
 0x994   : > { %8268 = vmatmul.f32.gmra.mxu1 %v7915_v15  ;;  %v7844_v15 = vld [vmem:[%s17391_s4 + $0x8] sm:$0xff] }
 0x995   : > { %8357 = vmatmul.f32.vlgmr.msrb.gmra.mxu2 %v7844_v15 }
 0x998   : > { %v7479_v42 = vpop.f32.mrf.mxu0 }
 0x999   : > { %v7752_v2 = vadd.f32 %v7479_v42, %v18576_v13  ;;  %v15169_v55 = vpop.f32.mrf.mxu2  ;;  %v7933_v42 = vld [vmem:[%s17391_s4 + $0x2d0] sm:$0xff] }
 0x99a   : > { %18577 = vst [vmem:[#allocation76_spill] sm:$0xff] %v15169_v55  ;;  %v10807_v55 = vld [vmem:[%s10997_s11 + $0x150] sm:$0xff] }
 0x99c   : > { %8271 = vmatmul.f32.gmra.mxu1 %v7924_v5 }
 0x9a0   : > { %v7482_v51 = vpop.f32.mrf.mxu0 }
 0x9a1   : > { %v7753_v52 = vadd.f32 %v7482_v51, %v18575_v58 }
 0x9a3   : > { %10384 = vmatmul.msk.bf16.gmra.mxu0 %vm1276_vm3, %v7078_v63  ;;  %v10802_v63 = vld [vmem:[%s10997_s11 + $0x128] sm:$0xff] }
 0x9a4   : > { %v7079_v38 = vrot.slane %v10802_v63, 3  ;;  %8274 = vmatmul.f32.gmra.mxu1 %v7933_v42  ;;  %v7942_v63 = vld [vmem:[%s17391_s4 + $0x318] sm:$0xff] }
 0x9a6   : > { %v7080_v51 = vsel %vm7013_vm8, %v7077_v35, %v7079_v38  ;;  %v15189_v35 = vpop.f32.mrf.mxu2 }
 0x9a7   : > { %18584 = vst [vmem:[#allocation31_spill] sm:$0xff] %v15189_v35  ;;  %v7089_v35 = vrot.slane %v10807_v55, 3  ;;  %v7943_v55 = vld [vmem:[%s17391_s4 + $0x320] sm:$0xff] }
 0x9a8   : > { %v7484_v33 = vpop.f32.mrf.mxu0 }
 0x9a9   : > { %v7754_v62 = vadd.f32 %v7484_v33, %v18574_v47  ;;  %v15171_v47 = vpop.f32.mrf.mxu1  ;;  %v18579_v33 = vld [vmem:[#allocation52_spill] sm:$0xff] }
 0x9aa   : > { %18578 = vst [vmem:[#allocation36_spill] sm:$0xff] %v15171_v47  ;;  %v7751_v31 = vadd.f32 %v7477_v43, %v18579_v33  ;;  %v7853_v43 = vld [vmem:[%s17391_s4 + $0x50] sm:$0xff] }
 0x9ab   : > { %8454 = vmatpush.msrb.mxu3 %v7754_v62  ;;  %v18580_v62 = vld [vmem:[#allocation170_spill] sm:$0xff]  ;;  %8360 = vmatmul.f32.gmra.mxu2 %v7853_v43  ;;  %v10803_v33 = vld [vmem:[%s10997_s11 + $0x130] sm:$0xff] }
 0x9ac   : > { %v7750_v58 = vadd.f32 %v7474_v53, %v18580_v62  ;;  %v18583_v53 = vld [vmem:[#allocation94_spill] sm:$0xff]  ;;  %8277 = vmatmul.f32.gmra.mxu1 %v7942_v63  ;;  %v18595_v63 = vld [vmem:[#allocation39_spill] sm:$0xff] }
 0x9ad   : > { %8455 = vmatpush.msrb.mxu3 %v7753_v52  ;;  %v18582_v52 = vld [vmem:[#allocation49_spill] sm:$0xff]  ;;  %v7960_v43 = vld [vmem:[%s17391_s4 + $0x3a8] sm:$0xff] }
 0x9ae   : > { %v7749_v13 = vadd.f32 %v7472_v1, %v18582_v52  ;;  %v18586_v1 = vld [vmem:[#allocation192_spill] sm:$0xff]  ;;  %v15217_v52 = vpop.f32.mrf.mxu2 }
 0x9af   : > { %8456 = vmatpush.msrb.mxu3 %v7752_v2  ;;  %18589 = vst [vmem:[#allocation13_spill] sm:$0xff] %v15217_v52 }
 0x9b0   : > { %v7487_v5 = vpop.f32.mrf.mxu0 }
 0x9b1   : > { %v15177_v57 = vadd.f32 %v7487_v5, %v18581_v0  ;;  %8457 = vmatpush.msrb.mxu3 %v7751_v31  ;;  %v7748_v0 = vadd.f32 %v15110_v36, %v18583_v53  ;;  %v15191_v2 = vpop.f32.mrf.mxu1  ;;  %v7862_v36 = vld [vmem:[%s17391_s4 + $0x98] sm:$0xff]  ;;  %v7081_v5 = vrot.slane %v10803_v33, 3  ;;  %v7880_v53 = vld [vmem:[%s17391_s4 + $0x128] sm:$0xff]  ;;  %v7969_v33 = vld [vmem:[%s17391_s4 + $0x3f0] sm:$0xff] }
 0x9b2   : > { %18585 = vst [vmem:[#allocation71_spill] sm:$0xff] %v15191_v2  ;;  %v18604_v2 = vld [vmem:[#allocation193_spill] sm:$0xff] }
 0x9b3   : > { %10385 = vmatmul.msk.bf16.gmra.mxu0 %vm1276_vm3, %v7080_v51  ;;  %8458 = vmatpush.msrb.mxu3 %v7750_v58  ;;  %v15207_v51 = vpop.f32.mrf.mxu3  ;;  %v7082_v62 = vsel %vm7013_vm8, %v7079_v38, %v7081_v5  ;;  %v18588_v58 = vld [vmem:[#allocation185_spill] sm:$0xff] }
 0x9b4   : > { %8363 = vmatmul.f32.gmra.mxu2 %v7862_v36  ;;  %18587 = vst [vmem:[#allocation80_spill] sm:$0xff] %v15207_v51  ;;  %v7871_v38 = vld [vmem:[%s17391_s4 + $0xe0] sm:$0xff] }
 0x9b5   : > { %8459 = vmatpush.msrb.mxu3 %v7749_v13 }
 0x9b7   : > { %8460 = vmatpush.msrb.mxu3 %v7748_v0 }
 0x9b8   : > { %v7489_v31 = vpop.f32.mrf.mxu0 }
 0x9b9   : > { %v15194_v15 = vadd.f32 %v7489_v31, %v18586_v1  ;;  %8461 = vmatpush.msrb.mxu3 %v15100_v25 }
 0x9bb   : > { %8462 = vmatpush.msrb.mxu3 %v15092_v37  ;;  %v7951_v37 = vld [vmem:[%s17391_s4 + $0x360] sm:$0xff] }
 0x9bc   : > { %8280 = vmatmul.f32.gmra.mxu1 %v7951_v37  ;;  %8366 = vmatmul.f32.gmra.mxu2 %v7871_v38  ;;  %v18599_v38 = vld [vmem:[#allocation186_spill] sm:$0xff] }
 0x9bd   : > { %8463 = vmatpush.msrb.mxu3 %v15081_v40  ;;  %v15219_v40 = vpop.f32.mrf.mxu1 }
 0x9be   : > { %18590 = vst [vmem:[#allocation12_spill] sm:$0xff] %v15219_v40 }
 0x9bf   : > { %8464 = vmatpush.msrb.mxu3 %v15072_v17  ;;  %v18591_v17 = vld [vmem:[#allocation196_spill] sm:$0xff] }
 0x9c0   : > { %v7492_v25 = vpop.f32.mrf.mxu0 }
 0x9c1   : > { %v15211_v42 = vadd.f32 %v7492_v25, %v18588_v58  ;;  %8465 = vmatpush.msrb.mxu3 %v15064_v34  ;;  %v7889_v25 = vld [vmem:[%s17391_s4 + $0x170] sm:$0xff] }
 0x9c3   : > { %10386 = vmatmul.msk.bf16.gmra.mxu0 %vm1276_vm3, %v7082_v62  ;;  %8466 = vmatpush.msrb.mxu3 %v15054_v59  ;;  %v15235_v59 = vpop.f32.mrf.mxu3 }
 0x9c4   : > { %18592 = vst [vmem:[#allocation73_spill] sm:$0xff] %v15235_v59  ;;  %8283 = vmatmul.f32.gmra.mxu1 %v7960_v43  ;;  %8369 = vmatmul.f32.gmra.mxu2 %v7880_v53  ;;  %v7898_v43 = vld [vmem:[%s17391_s4 + $0x1b8] sm:$0xff]  ;;  %v10805_v53 = vld [vmem:[%s10997_s11 + $0x140] sm:$0xff] }
 0x9c5   : > { %8467 = vmatpush.msrb.mxu3 %v15046_v3  ;;  %v10804_v3 = vld [vmem:[%s10997_s11 + $0x138] sm:$0xff]  ;;  %v15243_v31 = vpop.f32.mrf.mxu1 }
 0x9c6   : > { %v7083_v0 = vrot.slane %v10804_v3, 3  ;;  %18594 = vst [vmem:[#allocation146_spill] sm:$0xff] %v15243_v31  ;;  %v7085_v3 = vrot.slane %v10805_v53, 3 }
 0x9c7   : > { %8468 = vmatpush.msrb.mxu3 %v15035_v18  ;;  %v15241_v18 = vpop.f32.mrf.mxu2 }
 0x9c8   : > { %v7494_v34 = vpop.f32.mrf.mxu0  ;;  %18593 = vst [vmem:[#allocation84_spill] sm:$0xff] %v15241_v18 }
 0x9c9   : > { %v15229_v13 = vadd.f32 %v7494_v34, %v18591_v17  ;;  %8469 = vmatpush.msrb.mxu3 %v15027_v54  ;;  %v7084_v54 = vsel %vm7013_vm8, %v7081_v5, %v7083_v0  ;;  %v7978_v17 = vld [vmem:[%s17391_s4 + $0x438] sm:$0xff] }
 0x9cb   : > { %v15256_v62 = vpop.f32.mrf.mxu3 }
 0x9cc   : > { %8286 = vmatmul.f32.gmra.mxu1 %v7969_v33  ;;  %18596 = vst [vmem:[#allocation19_spill] sm:$0xff] %v15256_v62  ;;  %8372 = vmatmul.f32.gmra.mxu2 %v7889_v25  ;;  %v7086_v33 = vsel %vm7013_vm8, %v7083_v0, %v7085_v3 }
 0x9cd   : > { %v15260_v5 = vpop.f32.mrf.mxu1 }
 0x9ce   : > { %18598 = vst [vmem:[#allocation77_spill] sm:$0xff] %v15260_v5 }
 0x9cf   : > { %v15258_v58 = vpop.f32.mrf.mxu2 }
 0x9d0   : > { %v7497_v1 = vpop.f32.mrf.mxu0  ;;  %18597 = vst [vmem:[#allocation14_spill] sm:$0xff] %v15258_v58 }
 0x9d1   : > { %v15247_v36 = vadd.f32 %v7497_v1, %v18595_v63 }
 0x9d3   : > { %10387 = vmatmul.msk.bf16.gmra.mxu0 %vm1276_vm3, %v7084_v54  ;;  %v15272_v1 = vpop.f32.mrf.mxu3 }
 0x9d4   : > { %8289 = vmatmul.f32.gmra.mxu1 %v7978_v17  ;;  %8375 = vmatmul.f32.gmra.mxu2 %v7898_v43  ;;  %18600 = vst [vmem:[#allocation74_spill] sm:$0xff] %v15272_v1  ;;  %v7987_v17 = vld [vmem:[%s17391_s4 + $0x480] sm:$0xff] }
 0x9d5   : > { %v15274_v54 = vpop.f32.mrf.mxu1  ;;  %v7907_v43 = vld [vmem:[%s17391_s4 + $0x200] sm:$0xff] }
 0x9d7   : > { %v15277_v25 = vpop.f32.mrf.mxu2 }
 0x9d8   : > { %v7499_v37 = vpop.f32.mrf.mxu0  ;;  %18601 = vst [vmem:[#allocation91_spill] sm:$0xff] %v15277_v25 }
 0x9d9   : > { %v15263_v34 = vadd.f32 %v7499_v37, %v18599_v38  ;;  %v18602_v37 = vld [vmem:[#allocation98_spill] sm:$0xff] }
 0x9db   : > { %v15291_v0 = vpop.f32.mrf.mxu3 }
 0x9dc   : > { %8292 = vmatmul.f32.gmra.mxu1 %v7987_v17  ;;  %8378 = vmatmul.f32.gmra.mxu2 %v7907_v43  ;;  %18603 = vst [vmem:[#allocation25_spill] sm:$0xff] %v15291_v0  ;;  %v10806_v43 = vld [vmem:[%s10997_s11 + $0x148] sm:$0xff] }
 0x9dd   : > { %v15289_v53 = vpop.f32.mrf.mxu1  ;;  %v7087_v40 = vrot.slane %v10806_v43, 3 }
 0x9df   : > { %v15299_v17 = vpop.f32.mrf.mxu2  ;;  %v7090_v18 = vsel %vm7013_vm8, %v7087_v40, %v7089_v35 }
 0x9e0   : > { %v7502_v63 = vpop.f32.mrf.mxu0  ;;  %18605 = vst [vmem:[#allocation20_spill] sm:$0xff] %v15299_v17 }
 0x9e1   : > { %v15280_v38 = vadd.f32 %v7502_v63, %v18602_v37  ;;  %v7996_v37 = vld [vmem:[%s17391_s4 + $0x4c8] sm:$0xff] }
 0x9e3   : > { %10388 = vmatmul.msk.bf16.gmra.mxu0 %vm1276_vm3, %v7086_v33  ;;  %v7916_v33 = vld [vmem:[%s17391_s4 + $0x248] sm:$0xff]  ;;  %v15314_v17 = vpop.f32.mrf.mxu3 }
 0x9e4   : > { %8295 = vmatmul.f32.gmra.mxu1 %v7996_v37  ;;  %8381 = vmatmul.f32.gmra.mxu2 %v7916_v33  ;;  %v8005_v37 = vld [vmem:[%s17391_s4 + $0x510] sm:$0xff]  ;;  %18607 = vst [vmem:[#allocation92_spill] sm:$0xff] %v15314_v17 }
 0x9e5   : > { %v15305_v31 = vpop.f32.mrf.mxu1  ;;  %v7925_v33 = vld [vmem:[%s17391_s4 + $0x290] sm:$0xff] }
 0x9e7   : > { %v15320_v43 = vpop.f32.mrf.mxu2 }
 0x9e8   : > { %v7504_v47 = vpop.f32.mrf.mxu0  ;;  %18608 = vst [vmem:[#allocation153_spill] sm:$0xff] %v15320_v43 }
 0x9e9   : > { %v15294_v63 = vadd.f32 %v7504_v47, %v18604_v2  ;;  %v7088_v47 = vsel %vm7013_vm8, %v7085_v3, %v7087_v40  ;;  %v18606_v2 = vld [vmem:[#allocation204_spill] sm:$0xff]  ;;  %v8032_v40 = vld [vmem:[%s17391_s4 + $0x5e8] sm:$0xff] }
 0x9ec   : > { %8298 = vmatmul.f32.gmra.mxu1 %v8005_v37  ;;  %8384 = vmatmul.f32.gmra.mxu2 %v7925_v33  ;;  %v15332_v37 = vpop.f32.mrf.mxu3 }
 0x9ed   : > { %v15322_v3 = vpop.f32.mrf.mxu1  ;;  %18609 = vst [vmem:[#allocation95_spill] sm:$0xff] %v15332_v37 }
 0x9ef   : > { %v15335_v33 = vpop.f32.mrf.mxu2 }
 0x9f0   : > { %v7507_v5 = vpop.f32.mrf.mxu0  ;;  %18610 = vst [vmem:[#allocation66_spill] sm:$0xff] %v15335_v33 }
 0x9f1   : > { %v15309_v25 = vadd.f32 %v7507_v5, %v18606_v2  ;;  %v8014_v2 = vld [vmem:[%s17391_s4 + $0x558] sm:$0xff] }
 0x9f3   : > { %10389 = vmatmul.msk.bf16.gmra.mxu0 %vm1276_vm3, %v7088_v47  ;;  %v7934_v47 = vld [vmem:[%s17391_s4 + $0x2d8] sm:$0xff] }
 0x9f4   : > { %8301 = vmatmul.f32.gmra.mxu1 %v8014_v2  ;;  %8387 = vmatmul.f32.gmra.mxu2 %v7934_v47  ;;  %v8023_v2 = vld [vmem:[%s17391_s4 + $0x5a0] sm:$0xff]  ;;  %v15349_v47 = vpop.f32.mrf.mxu3 }
 0x9f5   : > { %v15337_v43 = vpop.f32.mrf.mxu1  ;;  %18611 = vst [vmem:[#allocation32_spill] sm:$0xff] %v15349_v47 }
 0x9f7   : > { %v15353_v37 = vpop.f32.mrf.mxu2 }
 0x9f8   : > { %v15324_v5 = vpop.f32.mrf.mxu0  ;;  %18612 = vst [vmem:[#allocation26_spill] sm:$0xff] %v15353_v37  ;;  %v8041_v37 = vld [vmem:[%s17391_s4 + $0x630] sm:$0xff] }
 0x9fc   : > { %8304 = vmatmul.f32.gmra.mxu1 %v8023_v2  ;;  %8390 = vmatmul.f32.gmra.mxu2 %v7943_v55  ;;  %v10808_v2 = vld [vmem:[%s10997_s11 + $0x158] sm:$0xff]  ;;  %v15362_v55 = vpop.f32.mrf.mxu3 }
 0x9fd   : > { %v15351_v33 = vpop.f32.mrf.mxu1  ;;  %v7091_v17 = vrot.slane %v10808_v2, 3  ;;  %18613 = vst [vmem:[#allocation96_spill] sm:$0xff] %v15362_v55 }
 0x9ff   : > { %v7092_v0 = vsel %vm7013_vm8, %v7089_v35, %v7091_v17  ;;  %v8050_v35 = vld [vmem:[%s17391_s4 + $0x678] sm:$0xff] }
 0xa00   : > { %v15339_v52 = vpop.f32.mrf.mxu0 }
 0xa03   : > { %10390 = vmatmul.msk.bf16.gmra.mxu0 %vm1276_vm3, %v7090_v18  ;;  %v7952_v18 = vld [vmem:[%s17391_s4 + $0x368] sm:$0xff] }
 0xa04   : > { %8307 = vmatmul.f32.gmra.mxu1 %v8032_v40  ;;  %8393 = vmatmul.f32.gmra.mxu2 %v7952_v18  ;;  %v15370_v40 = vpop.f32.mrf.mxu2  ;;  %v7961_v18 = vld [vmem:[%s17391_s4 + $0x3b0] sm:$0xff]  ;;  %v15379_v55 = vpop.f32.mrf.mxu3 }
 0xa05   : > { %v15365_v1 = vpop.f32.mrf.mxu1  ;;  %18614 = vst [vmem:[#allocation78_spill] sm:$0xff] %v15370_v40 }
 0xa06   : > { %18615 = vst [vmem:[#allocation99_spill] sm:$0xff] %v15379_v55 }
 0xa08   : > { %v7514_v58 = vpop.f32.mrf.mxu0 }
 0xa09   : > { %v7766_v9 = vadd.f32 %v7514_v58, %v18626_v20  ;;  %v7997_v20 = vld [vmem:[%s17391_s4 + $0x4d0] sm:$0xff] }
 0xa0c   : > { %8310 = vmatmul.f32.gmra.mxu1 %v8041_v37  ;;  %8396 = vmatmul.f32.gmra.mxu2 %v7961_v18  ;;  %v7970_v37 = vld [vmem:[%s17391_s4 + $0x3f8] sm:$0xff]  ;;  %v15387_v22 = vpop.f32.mrf.mxu2  ;;  %v15397_v55 = vpop.f32.mrf.mxu3 }
 0xa0d   : > { %v15384_v40 = vpop.f32.mrf.mxu1  ;;  %18616 = vst [vmem:[#allocation83_spill] sm:$0xff] %v15387_v22  ;;  %v18620_v22 = vld [vmem:[#allocation201_spill] sm:$0xff] }
 0xa0e   : > { %18617 = vst [vmem:[#allocation37_spill] sm:$0xff] %v15397_v55  ;;  %v7845_v55 = vld [vmem:[%s17391_s4 + $0x10] sm:$0xff] }
 0xa0f   : > { %8470 = vmatmul.f32.vlgmr.msrb.gmra.mxu3 %v7845_v55 }
 0xa10   : > { %v7517_v47 = vpop.f32.mrf.mxu0 }
 0xa13   : > { %10391 = vmatmul.msk.bf16.gmra.mxu0 %vm1276_vm3, %v7092_v0  ;;  %v10809_v0 = vld [vmem:[%s10997_s11 + $0x160] sm:$0xff] }
 0xa14   : > { %8313 = vmatmul.f32.gmra.mxu1 %v8050_v35  ;;  %v7093_v28 = vrot.slane %v10809_v0, 3  ;;  %8399 = vmatmul.f32.gmra.mxu2 %v7970_v37  ;;  %v7979_v35 = vld [vmem:[%s17391_s4 + $0x440] sm:$0xff]  ;;  %v15401_v0 = vpop.f32.mrf.mxu2  ;;  %v15416_v30 = vpop.f32.mrf.mxu3 }
 0xa15   : > { %v15399_v37 = vpop.f32.mrf.mxu1  ;;  %18619 = vst [vmem:[#allocation100_spill] sm:$0xff] %v15401_v0 }
 0xa16   : > { %v7094_v62 = vsel %vm7013_vm8, %v7091_v17, %v7093_v28  ;;  %18618 = vst [vmem:[#allocation33_spill] sm:$0xff] %v15399_v37  ;;  %v10810_v37 = vld [vmem:[%s10997_s11 + $0x168] sm:$0xff] }
 0xa17   : > { %v7095_v0 = vrot.slane %v10810_v37, 3  ;;  %18623 = vst [vmem:[#allocation72_spill] sm:$0xff] %v15416_v30  ;;  %v18627_v37 = vld [vmem:[#allocation212_spill] sm:$0xff] }
 0xa18   : > { %v7519_v2 = vpop.f32.mrf.mxu0  ;;  %v7882_v30 = vld [vmem:[%s17391_s4 + $0x138] sm:$0xff] }
 0xa19   : > { %v7096_v51 = vsel %vm7013_vm8, %v7093_v28, %v7095_v0  ;;  %v7854_v28 = vld [vmem:[%s17391_s4 + $0x58] sm:$0xff] }
 0xa1a   : > { %8473 = vmatmul.f32.gmra.mxu3 %v7854_v28 }
 0xa1c   : > { %8316 = vmatmul.f32.gmra.mxu1 %v8059_v27  ;;  %8402 = vmatmul.f32.gmra.mxu2 %v7979_v35  ;;  %v8068_v27 = vld [vmem:[%s17391_s4 + $0x708] sm:$0xff] }
 0xa1d   : > { %v7988_v35 = vld [vmem:[%s17391_s4 + $0x488] sm:$0xff] }
 0xa20   : > { %v7522_v18 = vpop.f32.mrf.mxu0 }
 0xa23   : > { %10392 = vmatmul.msk.bf16.gmra.mxu0 %vm1276_vm3, %v7094_v62  ;;  %v18621_v62 = vld [vmem:[#allocation211_spill] sm:$0xff] }
 0xa24   : > { %8319 = vmatmul.f32.gmra.mxu1 %v8068_v27  ;;  %v7769_v59 = vadd.f32 %v7522_v18, %v18621_v62  ;;  %8405 = vmatmul.f32.gmra.mxu2 %v7988_v35  ;;  %v18624_v27 = vld [vmem:[#allocation208_spill] sm:$0xff]  ;;  %v15421_v62 = vpop.f32.mrf.mxu1  ;;  %v18631_v35 = vld [vmem:[#allocation51_spill] sm:$0xff] }
 0xa25   : > { %v7767_v18 = vadd.f32 %v7517_v47, %v18624_v27  ;;  %18625 = vst [vmem:[#allocation103_spill] sm:$0xff] %v15421_v62  ;;  %v18628_v47 = vld [vmem:[#allocation197_spill] sm:$0xff]  ;;  %v8086_v27 = vld [vmem:[%s17391_s4 + $0x798] sm:$0xff] }
 0xa28   : > { %v7524_v17 = vpop.f32.mrf.mxu0 }
 0xa29   : > { %v7770_v56 = vadd.f32 %v7524_v17, %v18620_v22  ;;  %v18622_v22 = vld [vmem:[#allocation102_spill] sm:$0xff] }
 0xa2a   : > { %v7768_v17 = vadd.f32 %v7519_v2, %v18622_v22  ;;  %v7765_v2 = vadd.f32 %v15339_v52, %v18628_v47 }
 0xa2b   : > { %8567 = vmatpush.msra.mxu1 %v7770_v56  ;;  %v15419_v56 = vpop.f32.mrf.mxu2 }
 0xa2c   : > { %8408 = vmatmul.f32.gmra.mxu2 %v7997_v20  ;;  %v8095_v20 = vld [vmem:[%s17391_s4 + $0x7e0] sm:$0xff] }
 0xa2d   : > { %8568 = vmatpush.msra.mxu1 %v7769_v59  ;;  %v8077_v59 = vld [vmem:[%s17391_s4 + $0x750] sm:$0xff] }
 0xa2e   : > { %8322 = vmatmul.f32.gmra.mxu1 %v8077_v59 }
 0xa2f   : > { %8569 = vmatpush.msra.mxu1 %v7768_v17  ;;  %v15450_v17 = vpop.f32.mrf.mxu1 }
 0xa30   : > { %v7527_v7 = vpop.f32.mrf.mxu0  ;;  %18632 = vst [vmem:[#allocation104_spill] sm:$0xff] %v15450_v17  ;;  %v10814_v17 = vld [vmem:[%s10997_s11 + $0x188] sm:$0xff] }
 0xa31   : > { %v15426_v55 = vadd.f32 %v7527_v7, %v18627_v37  ;;  %8570 = vmatpush.msra.mxu1 %v7767_v18  ;;  %v18629_v7 = vld [vmem:[#allocation207_spill] sm:$0xff]  ;;  %v8006_v18 = vld [vmem:[%s17391_s4 + $0x518] sm:$0xff] }
 0xa32   : > { %v7764_v58 = vadd.f32 %v15324_v5, %v18629_v7  ;;  %v7863_v5 = vld [vmem:[%s17391_s4 + $0xa0] sm:$0xff]  ;;  %v10811_v37 = vld [vmem:[%s10997_s11 + $0x170] sm:$0xff] }
 0xa33   : > { %10393 = vmatmul.msk.bf16.gmra.mxu0 %vm1276_vm3, %v7096_v51  ;;  %8571 = vmatpush.msra.mxu1 %v7766_v9  ;;  %v15442_v52 = vpop.f32.mrf.mxu2  ;;  %v15444_v51 = vpop.f32.mrf.mxu3  ;;  %v7097_v59 = vrot.slane %v10811_v37, 3 }
 0xa34   : > { %18630 = vst [vmem:[#allocation82_spill] sm:$0xff] %v15444_v51  ;;  %8476 = vmatmul.f32.gmra.mxu3 %v7863_v5  ;;  %8411 = vmatmul.f32.gmra.mxu2 %v8006_v18  ;;  %v10812_v5 = vld [vmem:[%s10997_s11 + $0x178] sm:$0xff] }
 0xa35   : > { %8572 = vmatpush.msra.mxu1 %v7765_v2  ;;  %v18633_v2 = vld [vmem:[#allocation106_spill] sm:$0xff]  ;;  %v7099_v18 = vrot.slane %v10812_v5, 3 }
 0xa36   : > { %8325 = vmatmul.f32.gmra.mxu1 %v8086_v27  ;;  %v7881_v27 = vld [vmem:[%s17391_s4 + $0x130] sm:$0xff] }
 0xa37   : > { %8573 = vmatpush.msra.mxu1 %v7764_v58  ;;  %v18636_v58 = vld [vmem:[#allocation202_spill] sm:$0xff] }
 0xa38   : > { %v7529_v9 = vpop.f32.mrf.mxu0 }
 0xa39   : > { %v15447_v22 = vadd.f32 %v7529_v9, %v18631_v35  ;;  %8574 = vmatpush.msra.mxu1 %v15309_v25  ;;  %v8104_v35 = vld [vmem:[%s17391_s4 + $0x828] sm:$0xff] }
 0xa3b   : > { %8575 = vmatpush.msra.mxu1 %v15294_v63  ;;  %v15465_v25 = vpop.f32.mrf.mxu2  ;;  %v7098_v63 = vsel %vm7013_vm8, %v7095_v0, %v7097_v59  ;;  %v15475_v7 = vpop.f32.mrf.mxu3 }
 0xa3c   : > { %18634 = vst [vmem:[#allocation87_spill] sm:$0xff] %v15475_v7 }
 0xa3d   : > { %8576 = vmatpush.msra.mxu1 %v15280_v38  ;;  %v15485_v38 = vpop.f32.mrf.mxu1 }
 0xa3e   : > { %8328 = vmatmul.f32.gmra.mxu1 %v8095_v20  ;;  %18635 = vst [vmem:[#allocation107_spill] sm:$0xff] %v15485_v38  ;;  %v7846_v38 = vld [vmem:[%s17391_s4 + $0x18] sm:$0xff] }
 0xa3f   : > { %8577 = vmatpush.msra.mxu1 %v15263_v34  ;;  %v7872_v34 = vld [vmem:[%s17391_s4 + $0xe8] sm:$0xff] }
 0xa40   : > { %v7532_v47 = vpop.f32.mrf.mxu0  ;;  %8479 = vmatmul.f32.gmra.mxu3 %v7872_v34  ;;  %v8113_v34 = vld [vmem:[%s17391_s4 + $0x870] sm:$0xff] }
 0xa41   : > { %v15469_v28 = vadd.f32 %v7532_v47, %v18633_v2  ;;  %8578 = vmatpush.msra.mxu1 %v15247_v36  ;;  %v8015_v36 = vld [vmem:[%s17391_s4 + $0x560] sm:$0xff]  ;;  %v18639_v2 = vld [vmem:[#allocation54_spill] sm:$0xff] }
 0xa42   : > { %8414 = vmatmul.f32.gmra.mxu2 %v8015_v36  ;;  %v7890_v36 = vld [vmem:[%s17391_s4 + $0x178] sm:$0xff] }
 0xa43   : > { %10394 = vmatmul.msk.bf16.gmra.mxu0 %vm1276_vm3, %v7098_v63  ;;  %8579 = vmatpush.msra.mxu1 %v15229_v13  ;;  %v15489_v0 = vpop.f32.mrf.mxu2  ;;  %v7100_v63 = vsel %vm7013_vm8, %v7097_v59, %v7099_v18 }
 0xa45   : > { %8580 = vmatpush.msra.mxu1 %v15211_v42  ;;  %v15504_v42 = vpop.f32.mrf.mxu3 }
 0xa46   : > { %8331 = vmatmul.f32.gmra.mxu1 %v8104_v35  ;;  %18637 = vst [vmem:[#allocation88_spill] sm:$0xff] %v15504_v42 }
 0xa47   : > { %8581 = vmatpush.msra.mxu1 %v15194_v15  ;;  %v8024_v15 = vld [vmem:[%s17391_s4 + $0x5a8] sm:$0xff] }
 0xa48   : > { %v7534_v13 = vpop.f32.mrf.mxu0  ;;  %8482 = vmatmul.f32.gmra.mxu3 %v7881_v27 }
 0xa49   : > { %v15492_v9 = vadd.f32 %v7534_v13, %v18636_v58  ;;  %8582 = vmatpush.msra.mxu1 %v15177_v57  ;;  %v15507_v57 = vpop.f32.mrf.mxu1  ;;  %v8033_v13 = vld [vmem:[%s17391_s4 + $0x5f0] sm:$0xff] }
 0xa4a   : > { %8417 = vmatmul.f32.gmra.mxu2 %v8024_v15  ;;  %18638 = vst [vmem:[#allocation62_spill] sm:$0xff] %v15507_v57  ;;  %v18642_v15 = vld [vmem:[#allocation57_spill] sm:$0xff] }
 0xa4b   : > { %v15509_v37 = vpop.f32.mrf.mxu2 }
 0xa4d   : > { %v15525_v59 = vpop.f32.mrf.mxu3 }
 0xa4e   : > { %8334 = vmatmul.f32.gmra.mxu1 %v8113_v34  ;;  %18640 = vst [vmem:[#allocation86_spill] sm:$0xff] %v15525_v59  ;;  %v10813_v34 = vld [vmem:[%s10997_s11 + $0x180] sm:$0xff]  ;;  %v7918_v59 = vld [vmem:[%s17391_s4 + $0x258] sm:$0xff] }
 0xa50   : > { %v7537_v47 = vpop.f32.mrf.mxu0  ;;  %8485 = vmatmul.f32.gmra.mxu3 %v7890_v36  ;;  %v7101_v36 = vrot.slane %v10813_v34, 3  ;;  %v18645_v34 = vld [vmem:[#allocation220_spill] sm:$0xff] }
 0xa51   : > { %v15513_v20 = vadd.f32 %v7537_v47, %v18639_v2  ;;  %v15529_v35 = vpop.f32.mrf.mxu1  ;;  %v8122_v47 = vld [vmem:[%s17391_s4 + $0x8b8] sm:$0xff] }
 0xa52   : > { %8420 = vmatmul.f32.gmra.mxu2 %v8033_v13  ;;  %18641 = vst [vmem:[#allocation108_spill] sm:$0xff] %v15529_v35  ;;  %v8042_v2 = vld [vmem:[%s17391_s4 + $0x638] sm:$0xff]  ;;  %v7102_v35 = vsel %vm7013_vm8, %v7099_v18, %v7101_v36  ;;  %v8051_v18 = vld [vmem:[%s17391_s4 + $0x680] sm:$0xff] }
 0xa53   : > { %10395 = vmatmul.msk.bf16.gmra.mxu0 %vm1276_vm3, %v7100_v63  ;;  %v15527_v58 = vpop.f32.mrf.mxu2  ;;  %v7899_v63 = vld [vmem:[%s17391_s4 + $0x1c0] sm:$0xff] }
 0xa56   : > { %8337 = vmatmul.f32.gmra.mxu1 %v8122_v47 }
 0xa58   : > { %v7539_v27 = vpop.f32.mrf.mxu0  ;;  %8488 = vmatmul.f32.gmra.mxu3 %v7899_v63  ;;  %v7908_v63 = vld [vmem:[%s17391_s4 + $0x208] sm:$0xff] }
 0xa59   : > { %v15532_v5 = vadd.f32 %v7539_v27, %v18642_v15  ;;  %v15546_v27 = vpop.f32.mrf.mxu3  ;;  %v15552_v57 = vpop.f32.mrf.mxu1 }
 0xa5a   : > { %8423 = vmatmul.f32.gmra.mxu2 %v8042_v2  ;;  %18643 = vst [vmem:[#allocation38_spill] sm:$0xff] %v15546_v27  ;;  %v7864_v27 = vld [vmem:[%s17391_s4 + $0xa8] sm:$0xff] }
 0xa5b   : > { %v15544_v13 = vpop.f32.mrf.mxu2  ;;  %18644 = vst [vmem:[#allocation27_spill] sm:$0xff] %v15552_v57  ;;  %v7917_v57 = vld [vmem:[%s17391_s4 + $0x250] sm:$0xff] }
 0xa5e   : > { %8583 = vmatmul.f32.vlgmr.msra.gmra.mxu1 %v7846_v38  ;;  %v7855_v38 = vld [vmem:[%s17391_s4 + $0x60] sm:$0xff] }
 0xa60   : > { %v7542_v15 = vpop.f32.mrf.mxu0  ;;  %8491 = vmatmul.f32.gmra.mxu3 %v7908_v63  ;;  %v8060_v63 = vld [vmem:[%s17391_s4 + $0x6c8] sm:$0xff] }
 0xa61   : > { %v15550_v47 = vadd.f32 %v7542_v15, %v14357_v49 }
 0xa62   : > { %8426 = vmatmul.f32.gmra.mxu2 %v8051_v18  ;;  %v15580_v18 = vpop.f32.mrf.mxu1 }
 0xa63   : > { %10396 = vmatmul.msk.bf16.gmra.mxu0 %vm1276_vm3, %v7102_v35  ;;  %v15564_v49 = vpop.f32.mrf.mxu2  ;;  %v15572_v35 = vpop.f32.mrf.mxu3  ;;  %18647 = vst [vmem:[#allocation40_spill] sm:$0xff] %v15580_v18 }
 0xa64   : > { %18646 = vst [vmem:[#allocation67_spill] sm:$0xff] %v15572_v35 }
 0xa66   : > { %8586 = vmatmul.f32.gmra.mxu1 %v7855_v38 }
 0xa68   : > { %v7544_v2 = vpop.f32.mrf.mxu0  ;;  %8494 = vmatmul.f32.gmra.mxu3 %v7917_v57  ;;  %v8069_v57 = vld [vmem:[%s17391_s4 + $0x710] sm:$0xff] }
 0xa69   : > { %v15567_v15 = vadd.f32 %v7544_v2, %v18645_v34  ;;  %v7103_v2 = vrot.slane %v10814_v17, 3  ;;  %v7926_v17 = vld [vmem:[%s17391_s4 + $0x298] sm:$0xff] }
 0xa6a   : > { %8429 = vmatmul.f32.gmra.mxu2 %v8060_v63 }
 0xa6b   : > { %v15583_v34 = vpop.f32.mrf.mxu2  ;;  %v7104_v35 = vsel %vm7013_vm8, %v7101_v36, %v7103_v2  ;;  %v15599_v36 = vpop.f32.mrf.mxu3 }
 0xa6c   : > { %18648 = vst [vmem:[#allocation111_spill] sm:$0xff] %v15583_v34 }
 0xa6d   : > { %18649 = vst [vmem:[#allocation101_spill] sm:$0xff] %v15599_v36 }
 0xa6e   : > { %8589 = vmatmul.f32.gmra.mxu1 %v7864_v27  ;;  %v7873_v27 = vld [vmem:[%s17391_s4 + $0xf0] sm:$0xff] }
 0xa70   : > { %v7547_v62 = vpop.f32.mrf.mxu0  ;;  %8497 = vmatmul.f32.gmra.mxu3 %v7926_v17  ;;  %v8078_v17 = vld [vmem:[%s17391_s4 + $0x758] sm:$0xff] }
 0xa71   : > { %v15587_v38 = vadd.f32 %v7547_v62, %v14392_v24  ;;  %v15601_v24 = vpop.f32.mrf.mxu1 }
 0xa72   : > { %8432 = vmatmul.f32.gmra.mxu2 %v8069_v57  ;;  %18650 = vst [vmem:[#allocation179_spill] sm:$0xff] %v15601_v24  ;;  %v10815_v57 = vld [vmem:[%s10997_s11 + $0x190] sm:$0xff] }
 0xa73   : > { %10397 = vmatmul.msk.bf16.gmra.mxu0 %vm1276_vm3, %v7104_v35  ;;  %v15603_v62 = vpop.f32.mrf.mxu2  ;;  %v7935_v35 = vld [vmem:[%s17391_s4 + $0x2e0] sm:$0xff]  ;;  %v7105_v18 = vrot.slane %v10815_v57, 3  ;;  %v15617_v24 = vpop.f32.mrf.mxu3 }
 0xa74   : > { %18651 = vst [vmem:[#allocation112_spill] sm:$0xff] %v15603_v62 }
 0xa75   : > { %18652 = vst [vmem:[#allocation34_spill] sm:$0xff] %v15617_v24 }
 0xa76   : > { %8592 = vmatmul.f32.gmra.mxu1 %v7873_v27  ;;  %v7106_v27 = vsel %vm7013_vm8, %v7103_v2, %v7105_v18 }
 0xa78   : > { %v15605_v63 = vpop.f32.mrf.mxu0  ;;  %8500 = vmatmul.f32.gmra.mxu3 %v7935_v35  ;;  %v7944_v35 = vld [vmem:[%s17391_s4 + $0x328] sm:$0xff] }
 0xa79   : > { %v15621_v34 = vpop.f32.mrf.mxu1 }
 0xa7a   : > { %8435 = vmatmul.f32.gmra.mxu2 %v8078_v17  ;;  %18654 = vst [vmem:[#allocation115_spill] sm:$0xff] %v15621_v34  ;;  %v8087_v17 = vld [vmem:[%s17391_s4 + $0x7a0] sm:$0xff] }
 0xa7b   : > { %v15619_v62 = vpop.f32.mrf.mxu2  ;;  %v15638_v2 = vpop.f32.mrf.mxu3 }
 0xa7c   : > { %18653 = vst [vmem:[#allocation8_spill] sm:$0xff] %v15619_v62 }
 0xa7d   : > { %18656 = vst [vmem:[#allocation105_spill] sm:$0xff] %v15638_v2 }
 0xa7e   : > { %8595 = vmatmul.f32.gmra.mxu1 %v7882_v30  ;;  %v7891_v30 = vld [vmem:[%s17391_s4 + $0x180] sm:$0xff] }
 0xa80   : > { %v15623_v36 = vpop.f32.mrf.mxu0  ;;  %8503 = vmatmul.f32.gmra.mxu3 %v7944_v35  ;;  %v8096_v35 = vld [vmem:[%s17391_s4 + $0x7e8] sm:$0xff] }
 0xa81   : > { %v15642_v62 = vpop.f32.mrf.mxu1 }
 0xa82   : > { %8438 = vmatmul.f32.gmra.mxu2 %v8087_v17  ;;  %18657 = vst [vmem:[#allocation183_spill] sm:$0xff] %v15642_v62  ;;  %v10816_v17 = vld [vmem:[%s10997_s11 + $0x198] sm:$0xff] }
 0xa83   : > { %10398 = vmatmul.msk.bf16.gmra.mxu0 %vm1276_vm3, %v7106_v27  ;;  %v15636_v57 = vpop.f32.mrf.mxu2  ;;  %v7953_v27 = vld [vmem:[%s17391_s4 + $0x370] sm:$0xff]  ;;  %v15660_v51 = vpop.f32.mrf.mxu3 }
 0xa84   : > { %18655 = vst [vmem:[#allocation97_spill] sm:$0xff] %v15636_v57  ;;  %v7107_v57 = vrot.slane %v10816_v17, 3 }
 0xa85   : > { %18659 = vst [vmem:[#allocation16_spill] sm:$0xff] %v15660_v51  ;;  %v8114_v51 = vld [vmem:[%s17391_s4 + $0x878] sm:$0xff] }
 0xa86   : > { %8598 = vmatmul.f32.gmra.mxu1 %v7891_v30  ;;  %v7108_v2 = vsel %vm7013_vm8, %v7105_v18, %v7107_v57  ;;  %v7900_v30 = vld [vmem:[%s17391_s4 + $0x1c8] sm:$0xff] }
 0xa88   : > { %v15640_v34 = vpop.f32.mrf.mxu0  ;;  %8506 = vmatmul.f32.gmra.mxu3 %v7953_v27  ;;  %v7962_v27 = vld [vmem:[%s17391_s4 + $0x3b8] sm:$0xff] }
 0xa89   : > { %v15669_v17 = vpop.f32.mrf.mxu1 }
 0xa8a   : > { %8441 = vmatmul.f32.gmra.mxu2 %v8096_v35  ;;  %v8105_v35 = vld [vmem:[%s17391_s4 + $0x830] sm:$0xff]  ;;  %18660 = vst [vmem:[#allocation116_spill] sm:$0xff] %v15669_v17 }
 0xa8b   : > { %v15654_v24 = vpop.f32.mrf.mxu2  ;;  %v15682_v7 = vpop.f32.mrf.mxu3 }
 0xa8c   : > { %18658 = vst [vmem:[#allocation21_spill] sm:$0xff] %v15654_v24 }
 0xa8d   : > { %18662 = vst [vmem:[#allocation119_spill] sm:$0xff] %v15682_v7 }
 0xa8e   : > { %8601 = vmatmul.f32.gmra.mxu1 %v7900_v30  ;;  %v7909_v30 = vld [vmem:[%s17391_s4 + $0x210] sm:$0xff] }
 0xa90   : > { %v7557_v62 = vpop.f32.mrf.mxu0  ;;  %8509 = vmatmul.f32.gmra.mxu3 %v7962_v27  ;;  %v10817_v27 = vld [vmem:[%s10997_s11 + $0x1a0] sm:$0xff] }
 0xa91   : > { %v15685_v17 = vpop.f32.mrf.mxu1 }
 0xa92   : > { %8444 = vmatmul.f32.gmra.mxu2 %v8105_v35  ;;  %v7109_v35 = vrot.slane %v10817_v27, 3  ;;  %18663 = vst [vmem:[#allocation184_spill] sm:$0xff] %v15685_v17 }
 0xa93   : > { %10399 = vmatmul.msk.bf16.gmra.mxu0 %vm1276_vm3, %v7108_v2  ;;  %v15671_v18 = vpop.f32.mrf.mxu2  ;;  %v7971_v2 = vld [vmem:[%s17391_s4 + $0x400] sm:$0xff]  ;;  %v15700_v27 = vpop.f32.mrf.mxu3 }
 0xa94   : > { %18661 = vst [vmem:[#allocation173_spill] sm:$0xff] %v15671_v18 }
 0xa95   : > { %18665 = vst [vmem:[#allocation22_spill] sm:$0xff] %v15700_v27 }
 0xa96   : > { %8604 = vmatmul.f32.gmra.mxu1 %v7909_v30  ;;  %v7110_v30 = vsel %vm7013_vm8, %v7107_v57, %v7109_v35 }
 0xa98   : > { %v7559_v24 = vpop.f32.mrf.mxu0  ;;  %8512 = vmatmul.f32.gmra.mxu3 %v7971_v2  ;;  %v7980_v2 = vld [vmem:[%s17391_s4 + $0x448] sm:$0xff] }
 0xa99   : > { %v15704_v17 = vpop.f32.mrf.mxu1 }
 0xa9a   : > { %8447 = vmatmul.f32.gmra.mxu2 %v8114_v51  ;;  %v8123_v51 = vld [vmem:[%s17391_s4 + $0x8c0] sm:$0xff]  ;;  %18667 = vst [vmem:[#allocation187_spill] sm:$0xff] %v15704_v17  ;;  %v7784_v17 = vadd.f32 %v7559_v24, %v14468_v39  ;;  %v18670_v39 = vld [vmem:[#allocation210_spill] sm:$0xff] }
 0xa9b   : > { %v15687_v18 = vpop.f32.mrf.mxu2 }
 0xa9c   : > { %18664 = vst [vmem:[#allocation28_spill] sm:$0xff] %v15687_v18 }
 0xa9e   : > { %8607 = vmatmul.f32.gmra.mxu1 %v7918_v59 }
 0xaa0   : > { %v7562_v42 = vpop.f32.mrf.mxu0  ;;  %8515 = vmatmul.f32.gmra.mxu3 %v7980_v2  ;;  %v7989_v2 = vld [vmem:[%s17391_s4 + $0x490] sm:$0xff] }
 0xaa1   : > { %v7785_v7 = vadd.f32 %v7562_v42, %v14481_v6  ;;  %v7782_v42 = vadd.f32 %v15640_v34, %v14440_v14  ;;  %v7998_v14 = vld [vmem:[%s17391_s4 + $0x4d8] sm:$0xff] }
 0xaa2   : > { %8450 = vmatmul.f32.gmra.mxu2 %v8123_v51  ;;  %v10818_v51 = vld [vmem:[%s10997_s11 + $0x1a8] sm:$0xff] }
 0xaa3   : > { %10400 = vmatmul.msk.bf16.gmra.mxu0 %vm1276_vm3, %v7110_v30  ;;  %v15702_v57 = vpop.f32.mrf.mxu2  ;;  %v7927_v30 = vld [vmem:[%s17391_s4 + $0x2a0] sm:$0xff]  ;;  %v7111_v27 = vrot.slane %v10818_v51, 3 }
 0xaa4   : > { %18666 = vst [vmem:[#allocation109_spill] sm:$0xff] %v15702_v57 }
 0xaa5   : > { %v7112_v6 = vsel %vm7013_vm8, %v7109_v35, %v7111_v27  ;;  %v7945_v35 = vld [vmem:[%s17391_s4 + $0x330] sm:$0xff] }
 0xaa6   : > { %8610 = vmatmul.f32.gmra.mxu1 %v7927_v30 }
 0xaa8   : > { %v7564_v59 = vpop.f32.mrf.mxu0  ;;  %8518 = vmatmul.f32.gmra.mxu3 %v7989_v2  ;;  %v15727_v2 = vpop.f32.mrf.mxu1 }
 0xaa9   : > { %v7786_v18 = vadd.f32 %v7564_v59, %v14496_v11  ;;  %v7783_v11 = vadd.f32 %v7557_v62, %v14455_v4  ;;  %v15717_v59 = vpop.f32.mrf.mxu3  ;;  %18669 = vst [vmem:[#allocation177_spill] sm:$0xff] %v15727_v2  ;;  %v7936_v4 = vld [vmem:[%s17391_s4 + $0x2e8] sm:$0xff] }
 0xaab   : > { %8680 = vmatpush.msra.mxu2 %v7786_v18  ;;  %v15719_v57 = vpop.f32.mrf.mxu2 }
 0xaac   : > { %18668 = vst [vmem:[#allocation120_spill] sm:$0xff] %v15719_v57 }
 0xaad   : > { %8681 = vmatpush.msra.mxu2 %v7785_v7  ;;  %v7781_v7 = vadd.f32 %v15623_v36, %v18670_v39 }
 0xaae   : > { %8613 = vmatmul.f32.gmra.mxu1 %v7936_v4  ;;  %v7954_v4 = vld [vmem:[%s17391_s4 + $0x378] sm:$0xff] }
 0xaaf   : > { %8682 = vmatpush.msra.mxu2 %v7784_v17 }
 0xab0   : > { %v7567_v30 = vpop.f32.mrf.mxu0  ;;  %8521 = vmatmul.f32.gmra.mxu3 %v7998_v14  ;;  %v15755_v51 = vpop.f32.mrf.mxu1  ;;  %v10820_v14 = vld [vmem:[%s10997_s11 + $0x1b8] sm:$0xff] }
 0xab1   : > { %v15725_v18 = vadd.f32 %v7567_v30, %v14509_v23  ;;  %8683 = vmatpush.msra.mxu2 %v7783_v11  ;;  %v18671_v23 = vld [vmem:[#allocation61_spill] sm:$0xff]  ;;  %v15740_v24 = vpop.f32.mrf.mxu3  ;;  %18673 = vst [vmem:[#allocation29_spill] sm:$0xff] %v15755_v51  ;;  %v10819_v11 = vld [vmem:[%s10997_s11 + $0x1b0] sm:$0xff] }
 0xab2   : > { %v7780_v34 = vadd.f32 %v15605_v63, %v18671_v23  ;;  %v8007_v63 = vld [vmem:[%s17391_s4 + $0x520] sm:$0xff]  ;;  %v7113_v30 = vrot.slane %v10819_v11, 3  ;;  %v7115_v23 = vrot.slane %v10820_v14, 3  ;;  %v18679_v11 = vld [vmem:[#allocation228_spill] sm:$0xff]  ;;  %v7981_v14 = vld [vmem:[%s17391_s4 + $0x450] sm:$0xff] }
 0xab3   : > { %10401 = vmatmul.msk.bf16.gmra.mxu0 %vm1276_vm3, %v7112_v6  ;;  %8684 = vmatpush.msra.mxu2 %v7782_v42  ;;  %v15742_v62 = vpop.f32.mrf.mxu2 }
 0xab4   : > { %18672 = vst [vmem:[#allocation35_spill] sm:$0xff] %v15742_v62  ;;  %v7114_v6 = vsel %vm7013_vm8, %v7111_v27, %v7113_v30 }
 0xab5   : > { %8685 = vmatpush.msra.mxu2 %v7781_v7 }
 0xab6   : > { %8616 = vmatmul.f32.gmra.mxu1 %v7945_v35 }
 0xab7   : > { %8686 = vmatpush.msra.mxu2 %v7780_v34 }
 0xab8   : > { %v7569_v17 = vpop.f32.mrf.mxu0  ;;  %8524 = vmatmul.f32.gmra.mxu3 %v8007_v63  ;;  %v7116_v63 = vsel %vm7013_vm8, %v7113_v30, %v7115_v23 }
 0xab9   : > { %v15745_v36 = vadd.f32 %v7569_v17, %v14523_v41  ;;  %8687 = vmatpush.msra.mxu2 %v15587_v38  ;;  %v15760_v41 = vpop.f32.mrf.mxu3 }
 0xabb   : > { %8688 = vmatpush.msra.mxu2 %v15567_v15  ;;  %v15767_v42 = vpop.f32.mrf.mxu2 }
 0xabc   : > { %18674 = vst [vmem:[#allocation123_spill] sm:$0xff] %v15767_v42 }
 0xabd   : > { %8689 = vmatpush.msra.mxu2 %v15550_v47  ;;  %v7847_v47 = vld [vmem:[%s17391_s4 + $0x20] sm:$0xff] }
 0xabe   : > { %8619 = vmatmul.f32.gmra.mxu1 %v7954_v4  ;;  %v8034_v4 = vld [vmem:[%s17391_s4 + $0x5f8] sm:$0xff] }
 0xabf   : > { %8690 = vmatpush.msra.mxu2 %v15532_v5  ;;  %v8016_v5 = vld [vmem:[%s17391_s4 + $0x568] sm:$0xff] }
 0xac0   : > { %v7572_v38 = vpop.f32.mrf.mxu0  ;;  %8527 = vmatmul.f32.gmra.mxu3 %v8016_v5 }
 0xac1   : > { %v15764_v15 = vadd.f32 %v7572_v38, %v14536_v44  ;;  %8691 = vmatpush.msra.mxu2 %v15513_v20  ;;  %v15778_v44 = vpop.f32.mrf.mxu1 }
 0xac2   : > { %18675 = vst [vmem:[#allocation188_spill] sm:$0xff] %v15778_v44 }
 0xac3   : > { %10402 = vmatmul.msk.bf16.gmra.mxu0 %vm1276_vm3, %v7114_v6  ;;  %8692 = vmatpush.msra.mxu2 %v15492_v9  ;;  %v15781_v20 = vpop.f32.mrf.mxu3  ;;  %v18676_v9 = vld [vmem:[#allocation218_spill] sm:$0xff] }
 0xac4   : > { %v7972_v6 = vld [vmem:[%s17391_s4 + $0x408] sm:$0xff] }
 0xac5   : > { %8693 = vmatpush.msra.mxu2 %v15469_v28  ;;  %v7963_v28 = vld [vmem:[%s17391_s4 + $0x3c0] sm:$0xff]  ;;  %v15796_v7 = vpop.f32.mrf.mxu2 }
 0xac6   : > { %8622 = vmatmul.f32.gmra.mxu1 %v7963_v28  ;;  %18677 = vst [vmem:[#allocation113_spill] sm:$0xff] %v15796_v7 }
 0xac7   : > { %8694 = vmatpush.msra.mxu2 %v15447_v22  ;;  %v8025_v22 = vld [vmem:[%s17391_s4 + $0x5b0] sm:$0xff] }
 0xac8   : > { %v7574_v27 = vpop.f32.mrf.mxu0  ;;  %8530 = vmatmul.f32.gmra.mxu3 %v8025_v22 }
 0xac9   : > { %v15787_v39 = vadd.f32 %v7574_v27, %v18676_v9  ;;  %8695 = vmatpush.msra.mxu2 %v15426_v55  ;;  %v7856_v55 = vld [vmem:[%s17391_s4 + $0x68] sm:$0xff]  ;;  %v15804_v17 = vpop.f32.mrf.mxu1 }
 0xaca   : > { %8696 = vmatmul.f32.vlgmr.msra.gmra.mxu2 %v7847_v47  ;;  %18678 = vst [vmem:[#allocation191_spill] sm:$0xff] %v15804_v17  ;;  %v7865_v47 = vld [vmem:[%s17391_s4 + $0xb0] sm:$0xff]  ;;  %v18681_v9 = vld [vmem:[#allocation6_spill] sm:$0xff] }
 0xacb   : > { %v15799_v34 = vpop.f32.mrf.mxu3 }
 0xacd   : > { %v15817_v5 = vpop.f32.mrf.mxu2 }
 0xace   : > { %8625 = vmatmul.f32.gmra.mxu1 %v7972_v6  ;;  %18680 = vst [vmem:[#allocation124_spill] sm:$0xff] %v15817_v5  ;;  %v7874_v6 = vld [vmem:[%s17391_s4 + $0xf8] sm:$0xff] }
 0xad0   : > { %v7577_v35 = vpop.f32.mrf.mxu0  ;;  %8533 = vmatmul.f32.gmra.mxu3 %v8034_v4 }
 0xad1   : > { %v15808_v38 = vadd.f32 %v7577_v35, %v18679_v11  ;;  %v15827_v22 = vpop.f32.mrf.mxu1  ;;  %v10821_v35 = vld [vmem:[%s10997_s11 + $0x1c0] sm:$0xff] }
 0xad2   : > { %8699 = vmatmul.f32.gmra.mxu2 %v7856_v55  ;;  %18682 = vst [vmem:[#allocation178_spill] sm:$0xff] %v15827_v22  ;;  %v8043_v55 = vld [vmem:[%s17391_s4 + $0x640] sm:$0xff] }
 0xad3   : > { %10403 = vmatmul.msk.bf16.gmra.mxu0 %vm1276_vm3, %v7116_v63  ;;  %v15819_v30 = vpop.f32.mrf.mxu3  ;;  %v7117_v63 = vrot.slane %v10821_v35, 3 }
 0xad5   : > { %v15841_v4 = vpop.f32.mrf.mxu2 }
 0xad6   : > { %8628 = vmatmul.f32.gmra.mxu1 %v7981_v14  ;;  %18683 = vst [vmem:[#allocation127_spill] sm:$0xff] %v15841_v4  ;;  %v7990_v14 = vld [vmem:[%s17391_s4 + $0x498] sm:$0xff] }
 0xad8   : > { %v7579_v27 = vpop.f32.mrf.mxu0  ;;  %8536 = vmatmul.f32.gmra.mxu3 %v8043_v55  ;;  %v8052_v55 = vld [vmem:[%s17391_s4 + $0x688] sm:$0xff] }
 0xad9   : > { %v15825_v28 = vadd.f32 %v7579_v27, %v18681_v9  ;;  %v7118_v9 = vsel %vm7013_vm8, %v7115_v23, %v7117_v63  ;;  %v15854_v35 = vpop.f32.mrf.mxu1 }
 0xada   : > { %8702 = vmatmul.f32.gmra.mxu2 %v7865_v47  ;;  %18684 = vst [vmem:[#allocation195_spill] sm:$0xff] %v15854_v35 }
 0xadb   : > { %v15836_v11 = vpop.f32.mrf.mxu3 }
 0xade   : > { %8631 = vmatmul.f32.gmra.mxu1 %v7990_v14  ;;  %v8061_v14 = vld [vmem:[%s17391_s4 + $0x6d0] sm:$0xff] }
 0xae0   : > { %v7582_v27 = vpop.f32.mrf.mxu0  ;;  %8539 = vmatmul.f32.gmra.mxu3 %v8052_v55  ;;  %v10822_v55 = vld [vmem:[%s10997_s11 + $0x1c8] sm:$0xff] }
 0xae1   : > { %v15845_v47 = vadd.f32 %v7582_v27, %v14590_v61  ;;  %v7883_v61 = vld [vmem:[%s17391_s4 + $0x140] sm:$0xff]  ;;  %v7119_v35 = vrot.slane %v10822_v55, 3  ;;  %v15873_v17 = vpop.f32.mrf.mxu1 }
 0xae2   : > { %8705 = vmatmul.f32.gmra.mxu2 %v7874_v6  ;;  %v15864_v6 = vpop.f32.mrf.mxu2  ;;  %18686 = vst [vmem:[#allocation182_spill] sm:$0xff] %v15873_v17 }
 0xae3   : > { %10404 = vmatmul.msk.bf16.gmra.mxu0 %vm1276_vm3, %v7118_v9  ;;  %v15856_v23 = vpop.f32.mrf.mxu3  ;;  %18685 = vst [vmem:[#allocation117_spill] sm:$0xff] %v15864_v6  ;;  %v7999_v9 = vld [vmem:[%s17391_s4 + $0x4e0] sm:$0xff]  ;;  %v7120_v51 = vsel %vm7013_vm8, %v7117_v63, %v7119_v35 }
 0xae6   : > { %8634 = vmatmul.f32.gmra.mxu1 %v7999_v9  ;;  %v8008_v9 = vld [vmem:[%s17391_s4 + $0x528] sm:$0xff] }
 0xae8   : > { %v7584_v27 = vpop.f32.mrf.mxu0  ;;  %8542 = vmatmul.f32.gmra.mxu3 %v8061_v14  ;;  %v8070_v14 = vld [vmem:[%s17391_s4 + $0x718] sm:$0xff] }
 0xae9   : > { %v15862_v22 = vadd.f32 %v7584_v27, %v14604_v12  ;;  %v7892_v12 = vld [vmem:[%s17391_s4 + $0x188] sm:$0xff] }
 0xaea   : > { %8708 = vmatmul.f32.gmra.mxu2 %v7883_v61  ;;  %v15891_v55 = vpop.f32.mrf.mxu2 }
 0xaeb   : > { %v15875_v44 = vpop.f32.mrf.mxu3  ;;  %18688 = vst [vmem:[#allocation199_spill] sm:$0xff] %v15891_v55 }
 0xaec   : > { %18687 = vst [vmem:[#allocation128_spill] sm:$0xff] %v15875_v44 }
 0xaee   : > { %8637 = vmatmul.f32.gmra.mxu1 %v8008_v9  ;;  %v10823_v9 = vld [vmem:[%s10997_s11 + $0x1d0] sm:$0xff] }
 0xaf0   : > { %v7587_v27 = vpop.f32.mrf.mxu0  ;;  %8545 = vmatmul.f32.gmra.mxu3 %v8070_v14  ;;  %v7121_v14 = vrot.slane %v10823_v9, 3  ;;  %v8026_v9 = vld [vmem:[%s17391_s4 + $0x5b8] sm:$0xff] }
 0xaf1   : > { %v15882_v61 = vadd.f32 %v7587_v27, %v14617_v21  ;;  %v7901_v21 = vld [vmem:[%s17391_s4 + $0x1d0] sm:$0xff]  ;;  %v15898_v27 = vpop.f32.mrf.mxu1 }
 0xaf2   : > { %8711 = vmatmul.f32.gmra.mxu2 %v7892_v12  ;;  %18690 = vst [vmem:[#allocation189_spill] sm:$0xff] %v15898_v27  ;;  %v8079_v12 = vld [vmem:[%s17391_s4 + $0x760] sm:$0xff]  ;;  %v15909_v55 = vpop.f32.mrf.mxu2  ;;  %v7910_v27 = vld [vmem:[%s17391_s4 + $0x218] sm:$0xff] }
 0xaf3   : > { %10405 = vmatmul.msk.bf16.gmra.mxu0 %vm1276_vm3, %v7120_v51  ;;  %v15893_v63 = vpop.f32.mrf.mxu3  ;;  %v8017_v51 = vld [vmem:[%s17391_s4 + $0x570] sm:$0xff]  ;;  %18691 = vst [vmem:[#allocation131_spill] sm:$0xff] %v15909_v55 }
 0xaf4   : > { %18689 = vst [vmem:[#allocation69_spill] sm:$0xff] %v15893_v63 }
 0xaf6   : > { %8640 = vmatmul.f32.gmra.mxu1 %v8017_v51 }
 0xaf8   : > { %v15900_v17 = vpop.f32.mrf.mxu0  ;;  %8548 = vmatmul.f32.gmra.mxu3 %v8079_v12  ;;  %v8088_v12 = vld [vmem:[%s17391_s4 + $0x7a8] sm:$0xff] }
 0xaf9   : > { %v15919_v51 = vpop.f32.mrf.mxu1 }
 0xafa   : > { %8714 = vmatmul.f32.gmra.mxu2 %v7901_v21  ;;  %v7122_v21 = vsel %vm7013_vm8, %v7119_v35, %v7121_v14  ;;  %18693 = vst [vmem:[#allocation41_spill] sm:$0xff] %v15919_v51  ;;  %v7919_v35 = vld [vmem:[%s17391_s4 + $0x260] sm:$0xff]  ;;  %v15933_v51 = vpop.f32.mrf.mxu2 }
 0xafb   : > { %v15911_v6 = vpop.f32.mrf.mxu3  ;;  %18695 = vst [vmem:[#allocation121_spill] sm:$0xff] %v15933_v51  ;;  %v7928_v51 = vld [vmem:[%s17391_s4 + $0x2a8] sm:$0xff] }
 0xafc   : > { %18692 = vst [vmem:[#allocation200_spill] sm:$0xff] %v15911_v6 }
 0xafe   : > { %8643 = vmatmul.f32.gmra.mxu1 %v8026_v9 }
 0xb00   : > { %v15916_v2 = vpop.f32.mrf.mxu0  ;;  %8551 = vmatmul.f32.gmra.mxu3 %v8088_v12  ;;  %v10824_v12 = vld [vmem:[%s10997_s11 + $0x1d8] sm:$0xff] }
 0xb01   : > { %v15943_v9 = vpop.f32.mrf.mxu1  ;;  %v7123_v5 = vrot.slane %v10824_v12, 3 }
 0xb02   : > { %8717 = vmatmul.f32.gmra.mxu2 %v7910_v27  ;;  %v8035_v27 = vld [vmem:[%s17391_s4 + $0x600] sm:$0xff]  ;;  %18696 = vst [vmem:[#allocation190_spill] sm:$0xff] %v15943_v9 }
 0xb03   : > { %10406 = vmatmul.msk.bf16.gmra.mxu0 %vm1276_vm3, %v7122_v21  ;;  %v15928_v55 = vpop.f32.mrf.mxu3  ;;  %v8097_v21 = vld [vmem:[%s17391_s4 + $0x7f0] sm:$0xff]  ;;  %v7124_v62 = vsel %vm7013_vm8, %v7121_v14, %v7123_v5 }
 0xb04   : > { %18694 = vst [vmem:[#allocation203_spill] sm:$0xff] %v15928_v55  ;;  %v7937_v14 = vld [vmem:[%s17391_s4 + $0x2f0] sm:$0xff] }
 0xb06   : > { %8646 = vmatmul.f32.gmra.mxu1 %v8035_v27  ;;  %v8044_v27 = vld [vmem:[%s17391_s4 + $0x648] sm:$0xff] }
 0xb08   : > { %v15935_v4 = vpop.f32.mrf.mxu0  ;;  %8554 = vmatmul.f32.gmra.mxu3 %v8097_v21  ;;  %v8106_v21 = vld [vmem:[%s17391_s4 + $0x838] sm:$0xff] }
 0xb09   : > { %v15961_v12 = vpop.f32.mrf.mxu1 }
 0xb0a   : > { %8720 = vmatmul.f32.gmra.mxu2 %v7919_v35  ;;  %v15952_v35 = vpop.f32.mrf.mxu2 }
 0xb0b   : > { %v15946_v7 = vpop.f32.mrf.mxu3  ;;  %18698 = vst [vmem:[#allocation42_spill] sm:$0xff] %v15952_v35 }
 0xb0c   : > { %18697 = vst [vmem:[#allocation118_spill] sm:$0xff] %v15946_v7  ;;  %v7946_v7 = vld [vmem:[%s17391_s4 + $0x338] sm:$0xff] }
 0xb0e   : > { %8649 = vmatmul.f32.gmra.mxu1 %v8044_v27 }
 0xb10   : > { %v7597_v42 = vpop.f32.mrf.mxu0  ;;  %8557 = vmatmul.f32.gmra.mxu3 %v8106_v21  ;;  %v10825_v21 = vld [vmem:[%s10997_s11 + $0x1e0] sm:$0xff] }
 0xb11   : > { %v7125_v57 = vrot.slane %v10825_v21, 3  ;;  %v15982_v55 = vpop.f32.mrf.mxu1  ;;  %v7799_v44 = vadd.f32 %v7597_v42, %v14671_v26  ;;  %v8080_v26 = vld [vmem:[%s17391_s4 + $0x768] sm:$0xff]  ;;  %v18707_v42 = vld [vmem:[#allocation135_spill] sm:$0xff] }
 0xb12   : > { %8723 = vmatmul.f32.gmra.mxu2 %v7928_v51  ;;  %v8053_v51 = vld [vmem:[%s17391_s4 + $0x690] sm:$0xff]  ;;  %v15974_v27 = vpop.f32.mrf.mxu2 }
 0xb13   : > { %10407 = vmatmul.msk.bf16.gmra.mxu0 %vm1276_vm3, %v7124_v62  ;;  %v15963_v9 = vpop.f32.mrf.mxu3  ;;  %v8115_v62 = vld [vmem:[%s17391_s4 + $0x880] sm:$0xff]  ;;  %18700 = vst [vmem:[#allocation45_spill] sm:$0xff] %v15974_v27 }
 0xb14   : > { %18699 = vst [vmem:[#allocation44_spill] sm:$0xff] %v15963_v9 }
 0xb16   : > { %8652 = vmatmul.f32.gmra.mxu1 %v8053_v51  ;;  %v8062_v51 = vld [vmem:[%s17391_s4 + $0x6d8] sm:$0xff] }
 0xb18   : > { %v7599_v35 = vpop.f32.mrf.mxu0  ;;  %8560 = vmatmul.f32.gmra.mxu3 %v8115_v62  ;;  %v8124_v62 = vld [vmem:[%s17391_s4 + $0x8c8] sm:$0xff] }
 0xb19   : > { %v16000_v63 = vpop.f32.mrf.mxu1 }
 0xb1a   : > { %8726 = vmatmul.f32.gmra.mxu2 %v7937_v14  ;;  %v7126_v14 = vsel %vm7013_vm8, %v7123_v5, %v7125_v57  ;;  %v15992_v21 = vpop.f32.mrf.mxu2  ;;  %v7955_v5 = vld [vmem:[%s17391_s4 + $0x380] sm:$0xff] }
 0xb1b   : > { %v15977_v9 = vpop.f32.mrf.mxu3  ;;  %18702 = vst [vmem:[#allocation122_spill] sm:$0xff] %v15992_v21 }
 0xb1c   : > { %18701 = vst [vmem:[#allocation47_spill] sm:$0xff] %v15977_v9 }
 0xb1e   : > { %8655 = vmatmul.f32.gmra.mxu1 %v8062_v51 }
 0xb20   : > { %v7602_v6 = vpop.f32.mrf.mxu0  ;;  %8563 = vmatmul.f32.gmra.mxu3 %v8124_v62  ;;  %v10826_v62 = vld [vmem:[%s10997_s11 + $0x1e8] sm:$0xff] }
 0xb21   : > { %v7801_v51 = vadd.f32 %v7602_v6, %v14698_v48  ;;  %v7127_v21 = vrot.slane %v10826_v62, 3  ;;  %v7798_v6 = vadd.f32 %v15935_v4, %v14658_v32  ;;  %v18708_v32 = vld [vmem:[#allocation15_spill] sm:$0xff] }
 0xb22   : > { %8729 = vmatmul.f32.gmra.mxu2 %v7946_v7  ;;  %v16014_v46 = vpop.f32.mrf.mxu2  ;;  %v7796_v4 = vadd.f32 %v15900_v17, %v18708_v32  ;;  %v8089_v17 = vld [vmem:[%s17391_s4 + $0x7b0] sm:$0xff] }
 0xb23   : > { %10408 = vmatmul.msk.bf16.gmra.mxu0 %vm1276_vm3, %v7126_v14  ;;  %v15994_v27 = vpop.f32.mrf.mxu3  ;;  %v8071_v14 = vld [vmem:[%s17391_s4 + $0x720] sm:$0xff]  ;;  %18705 = vst [vmem:[#allocation126_spill] sm:$0xff] %v16014_v46  ;;  %v7128_v48 = vsel %vm7013_vm8, %v7125_v57, %v7127_v21  ;;  %v16028_v57 = vpop.f32.mrf.mxu1 }
 0xb24   : > { %18703 = vst [vmem:[#allocation50_spill] sm:$0xff] %v15994_v27  ;;  %v7800_v27 = vadd.f32 %v7599_v35, %v14685_v10  ;;  %v7797_v35 = vadd.f32 %v15916_v2, %v18707_v42 }
 0xb26   : > { %8658 = vmatmul.f32.gmra.mxu1 %v8071_v14 }
 0xb28   : > { %v7604_v9 = vpop.f32.mrf.mxu0 }
 0xb29   : > { %v7802_v7 = vadd.f32 %v7604_v9, %v14712_v45  ;;  %v7964_v9 = vld [vmem:[%s17391_s4 + $0x3c8] sm:$0xff] }
 0xb2a   : > { %8732 = vmatmul.f32.gmra.mxu2 %v7955_v5  ;;  %v16041_v62 = vpop.f32.mrf.mxu2 }
 0xb2b   : > { %8793 = vmatpush.msra.mxu3 %v7802_v7  ;;  %v16009_v45 = vpop.f32.mrf.mxu3  ;;  %v18706_v7 = vld [vmem:[#allocation233_spill] sm:$0xff]  ;;  %18711 = vst [vmem:[#allocation198_spill] sm:$0xff] %v16041_v62 }
 0xb2c   : > { %18704 = vst [vmem:[#allocation53_spill] sm:$0xff] %v16009_v45  ;;  %v18805_v45 = vld [vmem:[#allocation76_spill] sm:$0xff] }
 0xb2d   : > { %8794 = vmatpush.msra.mxu3 %v7801_v51  ;;  %v18710_v51 = vld [vmem:[#allocation136_spill] sm:$0xff] }
 0xb2e   : > { %8661 = vmatmul.f32.gmra.mxu1 %v8080_v26 }
 0xb2f   : > { %8795 = vmatpush.msra.mxu3 %v7800_v27  ;;  %v7973_v27 = vld [vmem:[%s17391_s4 + $0x410] sm:$0xff] }
 0xb30   : > { %v7607_v5 = vpop.f32.mrf.mxu0 }
 0xb31   : > { %v16020_v10 = vadd.f32 %v7607_v5, %v18706_v7  ;;  %8796 = vmatpush.msra.mxu3 %v7799_v44 }
 0xb32   : > { %8735 = vmatmul.f32.gmra.mxu2 %v7964_v9  ;;  %v10827_v9 = vld [vmem:[%s10997_s11 + $0x1f0] sm:$0xff] }
 0xb33   : > { %10409 = vmatmul.msk.bf16.gmra.mxu0 %vm1276_vm3, %v7128_v48  ;;  %8797 = vmatpush.msra.mxu3 %v7798_v6  ;;  %v16032_v44 = vpop.f32.mrf.mxu3  ;;  %v7129_v5 = vrot.slane %v10827_v9, 3  ;;  %v16049_v48 = vpop.f32.mrf.mxu1 }
 0xb34   : > { %18709 = vst [vmem:[#allocation48_spill] sm:$0xff] %v16032_v44  ;;  %v18804_v44 = vld [vmem:[#allocation147_spill] sm:$0xff] }
 0xb35   : > { %8798 = vmatpush.msra.mxu3 %v7797_v35  ;;  %v7130_v7 = vsel %vm7013_vm8, %v7127_v21, %v7129_v5  ;;  %v7991_v21 = vld [vmem:[%s17391_s4 + $0x4a0] sm:$0xff] }
 0xb36   : > { %8664 = vmatmul.f32.gmra.mxu1 %v8089_v17 }
 0xb37   : > { %8799 = vmatpush.msra.mxu3 %v7796_v4  ;;  %v8362_v4 = vadd.f32 %v15442_v52, %v15289_v53 }
 0xb38   : > { %v7609_v14 = vpop.f32.mrf.mxu0 }
 0xb39   : > { %v16038_v2 = vadd.f32 %v7609_v14, %v18710_v51  ;;  %8800 = vmatpush.msra.mxu3 %v15882_v61  ;;  %v7982_v61 = vld [vmem:[%s17391_s4 + $0x458] sm:$0xff]  ;;  %v8000_v14 = vld [vmem:[%s17391_s4 + $0x4e8] sm:$0xff]  ;;  %v8475_v9 = vadd.f32 %v15740_v24, %v8362_v4 }
 0xb3a   : > { %8738 = vmatmul.f32.gmra.mxu2 %v7973_v27 }
 0xb3b   : > { %8801 = vmatpush.msra.mxu3 %v15862_v22  ;;  %v16060_v22 = vpop.f32.mrf.mxu3  ;;  %v16079_v42 = vpop.f32.mrf.mxu1  ;;  %v8588_v24 = vadd.f32 %v15982_v55, %v8475_v9 }
 0xb3c   : > { %18712 = vst [vmem:[#allocation215_spill] sm:$0xff] %v16060_v22  ;;  %v18796_v22 = vld [vmem:[#allocation86_spill] sm:$0xff] }
 0xb3d   : > { %8802 = vmatpush.msra.mxu3 %v15845_v47  ;;  %v8098_v47 = vld [vmem:[%s17391_s4 + $0x7f8] sm:$0xff] }
 0xb3e   : > { %8667 = vmatmul.f32.gmra.mxu1 %v8098_v47  ;;  %v8009_v47 = vld [vmem:[%s17391_s4 + $0x530] sm:$0xff] }
 0xb3f   : > { %8803 = vmatpush.msra.mxu3 %v15825_v28  ;;  %v16067_v28 = vpop.f32.mrf.mxu2 }
 0xb40   : > { %v7612_v6 = vpop.f32.mrf.mxu0  ;;  %18713 = vst [vmem:[#allocation205_spill] sm:$0xff] %v16067_v28 }
 0xb41   : > { %v16057_v26 = vadd.f32 %v7612_v6, %v14752_v19  ;;  %8804 = vmatpush.msra.mxu3 %v15808_v38  ;;  %v8359_v19 = vadd.f32 %v15419_v56, %v15274_v54  ;;  %v7848_v38 = vld [vmem:[%s17391_s4 + $0x28] sm:$0xff]  ;;  %v8107_v54 = vld [vmem:[%s17391_s4 + $0x840] sm:$0xff] }
 0xb42   : > { %8741 = vmatmul.f32.gmra.mxu2 %v7982_v61 }
 0xb43   : > { %10410 = vmatmul.msk.bf16.gmra.mxu0 %vm1276_vm3, %v7130_v7  ;;  %8805 = vmatpush.msra.mxu3 %v15787_v39  ;;  %v8472_v35 = vadd.f32 %v15717_v59, %v8359_v19  ;;  %v16089_v56 = vpop.f32.mrf.mxu3  ;;  %v16108_v52 = vpop.f32.mrf.mxu1  ;;  %v7866_v7 = vld [vmem:[%s17391_s4 + $0xb8] sm:$0xff] }
 0xb44   : > { %18714 = vst [vmem:[#allocation216_spill] sm:$0xff] %v16089_v56 }
 0xb45   : > { %8806 = vmatpush.msra.mxu3 %v15764_v15  ;;  %v8585_v59 = vadd.f32 %v15961_v12, %v8472_v35  ;;  %v8116_v12 = vld [vmem:[%s17391_s4 + $0x888] sm:$0xff]  ;;  %v8368_v35 = vadd.f32 %v15489_v0, %v15322_v3 }
 0xb46   : > { %8670 = vmatmul.f32.gmra.mxu1 %v8107_v54 }
 0xb47   : > { %8807 = vmatpush.msra.mxu3 %v15745_v36  ;;  %v10828_v36 = vld [vmem:[%s10997_s11 + $0x1f8] sm:$0xff]  ;;  %v8481_v3 = vadd.f32 %v15781_v20, %v8368_v35  ;;  %v7884_v20 = vld [vmem:[%s17391_s4 + $0x148] sm:$0xff] }
 0xb48   : > { %v7614_v39 = vpop.f32.mrf.mxu0  ;;  %v7131_v15 = vrot.slane %v10828_v36, 3  ;;  %v18719_v35 = vld [vmem:[#allocation158_spill] sm:$0xff] }
 0xb49   : > { %v16083_v32 = vadd.f32 %v7614_v39, %v14766_v29  ;;  %8808 = vmatpush.msra.mxu3 %v15725_v18  ;;  %v7857_v18 = vld [vmem:[%s17391_s4 + $0x70] sm:$0xff] }
 0xb4a   : > { %8809 = vmatmul.f32.vlgmr.msra.gmra.mxu3 %v7848_v38  ;;  %8744 = vmatmul.f32.gmra.mxu2 %v7991_v21  ;;  %v7132_v17 = vsel %vm7013_vm8, %v7129_v5, %v7131_v15  ;;  %v8365_v5 = vadd.f32 %v15465_v25, %v15305_v31  ;;  %v8125_v25 = vld [vmem:[%s17391_s4 + $0x8d0] sm:$0xff]  ;;  %v10829_v21 = vld [vmem:[%s10997_s11 + $0x200] sm:$0xff] }
 0xb4b   : > { %v16117_v61 = vpop.f32.mrf.mxu3  ;;  %v16134_v55 = vpop.f32.mrf.mxu1  ;;  %v7133_v39 = vrot.slane %v10829_v21, 3 }
 0xb4c   : > { %18715 = vst [vmem:[#allocation219_spill] sm:$0xff] %v16117_v61  ;;  %v8478_v38 = vadd.f32 %v15760_v41, %v8365_v5 }
 0xb4d   : > { %v8697_v29 = vpop.f32.mrf.mxu2 }
 0xb4e   : > { %v16095_v27 = vadd.f32 %v8697_v29, %v8585_v59  ;;  %8673 = vmatmul.f32.gmra.mxu1 %v8116_v12  ;;  %v8591_v54 = vadd.f32 %v16000_v63, %v8478_v38  ;;  %v8018_v59 = vld [vmem:[%s17391_s4 + $0x578] sm:$0xff]  ;;  %v8371_v63 = vadd.f32 %v15509_v37, %v15337_v43  ;;  %v18717_v12 = vld [vmem:[#allocation161_spill] sm:$0xff]  ;;  %v10830_v37 = vld [vmem:[%s10997_s11 + $0x208] sm:$0xff] }
 0xb50   : > { %v7617_v51 = vpop.f32.mrf.mxu0  ;;  %v8484_v9 = vadd.f32 %v15799_v34, %v8371_v63  ;;  %v7893_v34 = vld [vmem:[%s17391_s4 + $0x190] sm:$0xff] }
 0xb51   : > { %v16106_v53 = vadd.f32 %v7617_v51, %v14779_v50 }
 0xb52   : > { %8812 = vmatmul.f32.gmra.mxu3 %v7857_v18  ;;  %8747 = vmatmul.f32.gmra.mxu2 %v8000_v14  ;;  %v7134_v18 = vsel %vm7013_vm8, %v7131_v15, %v7133_v39  ;;  %v8594_v14 = vadd.f32 %v16028_v57, %v8481_v3  ;;  %v7135_v57 = vrot.slane %v10830_v37, 3  ;;  %v8063_v37 = vld [vmem:[%s17391_s4 + $0x6e0] sm:$0xff] }
 0xb53   : > { %10411 = vmatmul.msk.bf16.gmra.mxu0 %vm1276_vm3, %v7132_v17  ;;  %v16145_v4 = vpop.f32.mrf.mxu3 }
 0xb54   : > { %18716 = vst [vmem:[#allocation70_spill] sm:$0xff] %v16145_v4 }
 0xb55   : > { %v8700_v50 = vpop.f32.mrf.mxu2 }
 0xb56   : > { %v16119_v6 = vadd.f32 %v8700_v50, %v8588_v24  ;;  %8676 = vmatmul.f32.gmra.mxu1 %v8125_v25  ;;  %v8374_v24 = vadd.f32 %v15527_v58, %v15351_v33  ;;  %v8597_v50 = vadd.f32 %v16049_v48, %v8484_v9  ;;  %v7136_v25 = vsel %vm7013_vm8, %v7133_v39, %v7135_v57  ;;  %v8045_v39 = vld [vmem:[%s17391_s4 + $0x650] sm:$0xff]  ;;  %v7920_v9 = vld [vmem:[%s17391_s4 + $0x268] sm:$0xff] }
 0xb57   : > { %v8377_v48 = vadd.f32 %v15544_v13, %v15365_v1  ;;  %v10831_v1 = vld [vmem:[%s10997_s11 + $0x210] sm:$0xff] }
 0xb58   : > { %v7619_v19 = vpop.f32.mrf.mxu0  ;;  %v8487_v21 = vadd.f32 %v15819_v30, %v8374_v24  ;;  %v7902_v30 = vld [vmem:[%s17391_s4 + $0x1d8] sm:$0xff]  ;;  %v7137_v13 = vrot.slane %v10831_v1, 3 }
 0xb59   : > { %v16129_v31 = vadd.f32 %v7619_v19, %v14793_v16  ;;  %v7875_v16 = vld [vmem:[%s17391_s4 + $0x100] sm:$0xff]  ;;  %v8036_v19 = vld [vmem:[%s17391_s4 + $0x608] sm:$0xff] }
 0xb5a   : > { %8815 = vmatmul.f32.gmra.mxu3 %v7866_v7  ;;  %8750 = vmatmul.f32.gmra.mxu2 %v8009_v47 }
 0xb5b   : > { %v16171_v43 = vpop.f32.mrf.mxu3 }
 0xb5c   : > { %18718 = vst [vmem:[#allocation209_spill] sm:$0xff] %v16171_v43  ;;  %v18788_v43 = vld [vmem:[#allocation227_spill] sm:$0xff] }
 0xb5d   : > { %v8703_v41 = vpop.f32.mrf.mxu2 }
 0xb5e   : > { %v16140_v36 = vadd.f32 %v8703_v41, %v8591_v54  ;;  %v8600_v54 = vadd.f32 %v16079_v42, %v8487_v21  ;;  %v8380_v42 = vadd.f32 %v15564_v49, %v15384_v40  ;;  %v7138_v40 = vsel %vm7013_vm8, %v7135_v57, %v7137_v13  ;;  %v10832_v57 = vld [vmem:[%s10997_s11 + $0x218] sm:$0xff]  ;;  %v8081_v21 = vld [vmem:[%s17391_s4 + $0x770] sm:$0xff] }
 0xb5f   : > { %v7139_v24 = vrot.slane %v10832_v57, 3  ;;  %v18729_v57 = vld [vmem:[#allocation162_spill] sm:$0xff] }
 0xb60   : > { %v7622_v29 = vpop.f32.mrf.mxu0  ;;  %v8493_v49 = vadd.f32 %v15856_v23, %v8380_v42 }
 0xb61   : > { %v16153_v0 = vadd.f32 %v7622_v29, %v14806_v8  ;;  %v8027_v8 = vld [vmem:[%s17391_s4 + $0x5c0] sm:$0xff]  ;;  %v8490_v29 = vadd.f32 %v15836_v11, %v8377_v48  ;;  %v8054_v11 = vld [vmem:[%s17391_s4 + $0x698] sm:$0xff] }
 0xb62   : > { %8818 = vmatmul.f32.gmra.mxu3 %v7875_v16  ;;  %8753 = vmatmul.f32.gmra.mxu2 %v8018_v59 }
 0xb63   : > { %10412 = vmatmul.msk.bf16.gmra.mxu0 %vm1276_vm3, %v7134_v18  ;;  %v16191_v58 = vpop.f32.mrf.mxu3  ;;  %v8603_v18 = vadd.f32 %v16108_v52, %v8490_v29  ;;  %v8606_v52 = vadd.f32 %v16134_v55, %v8493_v49  ;;  %v7929_v55 = vld [vmem:[%s17391_s4 + $0x2b0] sm:$0xff]  ;;  %v8090_v29 = vld [vmem:[%s17391_s4 + $0x7b8] sm:$0xff] }
 0xb64   : > { %18720 = vst [vmem:[#allocation134_spill] sm:$0xff] %v16191_v58 }
 0xb65   : > { %v8706_v51 = vpop.f32.mrf.mxu2 }
 0xb66   : > { %v16159_v17 = vadd.f32 %v8706_v51, %v8594_v14  ;;  %v7911_v51 = vld [vmem:[%s17391_s4 + $0x220] sm:$0xff] }
 0xb68   : > { %v7624_v15 = vpop.f32.mrf.mxu0 }
 0xb69   : > { %v16169_v5 = vadd.f32 %v7624_v15, %v18717_v12 }
 0xb6a   : > { %8821 = vmatmul.f32.gmra.mxu3 %v7884_v20  ;;  %8756 = vmatmul.f32.gmra.mxu2 %v8027_v8 }
 0xb6b   : > { %v16211_v3 = vpop.f32.mrf.mxu3 }
 0xb6c   : > { %18721 = vst [vmem:[#allocation68_spill] sm:$0xff] %v16211_v3  ;;  %v18787_v3 = vld [vmem:[#allocation14_spill] sm:$0xff] }
 0xb6d   : > { %v8709_v7 = vpop.f32.mrf.mxu2 }
 0xb6e   : > { %v16177_v47 = vadd.f32 %v8709_v7, %v8597_v50  ;;  %v16238_v50 = vpop.f32.mrf.mxu1  ;;  %v8072_v7 = vld [vmem:[%s17391_s4 + $0x728] sm:$0xff] }
 0xb70   : > { %v7627_v38 = vpop.f32.mrf.mxu0 }
 0xb71   : > { %v16188_v33 = vadd.f32 %v7627_v38, %v18719_v35 }
 0xb72   : > { %8824 = vmatmul.f32.gmra.mxu3 %v7893_v34  ;;  %8759 = vmatmul.f32.gmra.mxu2 %v8036_v19  ;;  %v7140_v19 = vsel %vm7013_vm8, %v7137_v13, %v7139_v24 }
 0xb73   : > { %10413 = vmatmul.msk.bf16.gmra.mxu0 %vm1276_vm3, %v7136_v25  ;;  %v16232_v12 = vpop.f32.mrf.mxu3  ;;  %v7938_v25 = vld [vmem:[%s17391_s4 + $0x2f8] sm:$0xff] }
 0xb74   : > { %18722 = vst [vmem:[#allocation63_spill] sm:$0xff] %v16232_v12 }
 0xb75   : > { %v8712_v41 = vpop.f32.mrf.mxu2 }
 0xb76   : > { %v16196_v16 = vadd.f32 %v8712_v41, %v8600_v54  ;;  %v16256_v48 = vpop.f32.mrf.mxu1  ;;  %v10833_v41 = vld [vmem:[%s10997_s11 + $0x220] sm:$0xff]  }
 0xb78   : > { %v16204_v59 = vpop.f32.mrf.mxu0 }
 0xb7a   : > { %8827 = vmatmul.f32.gmra.mxu3 %v7902_v30  ;;  %8762 = vmatmul.f32.gmra.mxu2 %v8045_v39  ;;  %v7141_v30 = vrot.slane %v10833_v41, 3  ;;  %v7947_v39 = vld [vmem:[%s17391_s4 + $0x340] sm:$0xff]  ;;  %v18731_v41 = vld [vmem:[#allocation80_spill] sm:$0xff] }
 0xb7b   : > { %v16247_v38 = vpop.f32.mrf.mxu3 }
 0xb7c   : > { %18723 = vst [vmem:[#allocation130_spill] sm:$0xff] %v16247_v38  ;;  %v7142_v13 = vsel %vm7013_vm8, %v7139_v24, %v7141_v30 }
 0xb7d   : > { %v8715_v63 = vpop.f32.mrf.mxu2 }
 0xb7e   : > { %v16213_v14 = vadd.f32 %v8715_v63, %v8603_v18  ;;  %v16268_v42 = vpop.f32.mrf.mxu1  ;;  %v7956_v63 = vld [vmem:[%s17391_s4 + $0x388] sm:$0xff] }
 0xb80   : > { %v16221_v20 = vpop.f32.mrf.mxu0 }
 0xb82   : > { %8830 = vmatmul.f32.gmra.mxu3 %v7911_v51  ;;  %8765 = vmatmul.f32.gmra.mxu2 %v8054_v11  ;;  %v8099_v51 = vld [vmem:[%s17391_s4 + $0x800] sm:$0xff] }
 0xb83   : > { %10414 = vmatmul.msk.bf16.gmra.mxu0 %vm1276_vm3, %v7138_v40  ;;  %v16258_v54 = vpop.f32.mrf.mxu3  ;;  %v18726_v40 = vld [vmem:[#allocation206_spill] sm:$0xff] }
 0xb84   : > { %18724 = vst [vmem:[#allocation141_spill] sm:$0xff] %v16258_v54  ;;  %v5482_v49 = vadd.f32 %v14994_v60, %v18726_v40  ;;  %v18735_v40 = vld [vmem:[#allocation5_spill] sm:$0xff]  ;;  %v18784_v54 = vld [vmem:[#allocation151_spill] sm:$0xff] }
 0xb85   : > { %v8718_v8 = vpop.f32.mrf.mxu2 }
 0xb86   : > { %v16227_v15 = vadd.f32 %v8718_v8, %v8606_v52  ;;  %v18727_v52 = vld [vmem:[#allocation236_spill] sm:$0xff] }
 0xb88   : > { %v7634_v23 = vpop.f32.mrf.mxu0 }
 0xb8a   : > { %8833 = vmatmul.f32.gmra.mxu3 %v7920_v9  ;;  %8768 = vmatmul.f32.gmra.mxu2 %v8063_v37  ;;  %v18728_v9 = vld [vmem:[#allocation10_spill] sm:$0xff] }
 0xb8b   : > { %v16271_v18 = vpop.f32.mrf.mxu3  ;;  %v5998_v37 = vadd.f32 %v18728_v9, %v5482_v49  ;;  %v18737_v9 = vld [vmem:[#allocation239_spill] sm:$0xff] }
 0xb8c   : > { %18725 = vst [vmem:[#allocation60_spill] sm:$0xff] %v16271_v18  ;;  %v18783_v18 = vld [vmem:[#allocation229_spill] sm:$0xff] }
 0xb8d   : > { %v5497_v38 = vadd.f32 %v18784_v54, %v18783_v18  ;;  %v18794_v54 = vld [vmem:[#allocation137_spill] sm:$0xff] }
 0xb8f   : > { %v6013_v58 = vadd.f32 %v18787_v3, %v5497_v38  ;;  %v8100_v3 = vld [vmem:[%s17391_s4 + $0x808] sm:$0xff]  ;;  %v18798_v38 = vld [vmem:[#allocation11_spill] sm:$0xff] }
 0xb90   : > { %v7637_v34 = vpop.f32.mrf.mxu0 }
 0xb92   : > { %8836 = vmatmul.f32.gmra.mxu3 %v7929_v55  ;;  %8771 = vmatmul.f32.gmra.mxu2 %v8072_v7  ;;  %v10834_v55 = vld [vmem:[%s10997_s11 + $0x228] sm:$0xff] }
 0xb93   : > { %10415 = vmatmul.msk.bf16.gmra.mxu0 %vm1276_vm3, %v7140_v19  ;;  %v7143_v7 = vrot.slane %v10834_v55, 3  ;;  %v16285_v19 = vpop.f32.mrf.mxu1  ;;  %v18739_v55 = vld [vmem:[#allocation234_spill] sm:$0xff] }
 0xb98   : > { %v7639_v35 = vpop.f32.mrf.mxu0 }
 0xb9a   : > { %8839 = vmatmul.f32.gmra.mxu3 %v7938_v25  ;;  %8774 = vmatmul.f32.gmra.mxu2 %v8081_v21  ;;  %v18730_v25 = vld [vmem:[#allocation165_spill] sm:$0xff] }
 0xb9b   : > { %v7816_v21 = vadd.f32 %v7639_v35, %v18730_v25  ;;  %v18734_v35 = vld [vmem:[#allocation110_spill] sm:$0xff]  ;;  %v16310_v25 = vpop.f32.mrf.mxu1 }
 0xb9c   : > { %v5483_v49 = vadd.f32 %v18735_v40, %v18734_v35  ;;  %v10835_v35 = vld [vmem:[%s10997_s11 + $0x230] sm:$0xff]  }
 0xb9d   : > { %v7145_v40 = vrot.slane %v10835_v35, 3 }
 0xba0   : > { %v7642_v1 = vpop.f32.mrf.mxu0 }
 0xba1   : > { %v7817_v24 = vadd.f32 %v7642_v1, %v18729_v57  ;;  %v8108_v1 = vld [vmem:[%s17391_s4 + $0x848] sm:$0xff]  ;;  %v18738_v57 = vld [vmem:[#allocation139_spill] sm:$0xff] }
 0xba2   : > { %8842 = vmatmul.f32.gmra.mxu3 %v7947_v39  ;;  %8777 = vmatmul.f32.gmra.mxu2 %v8090_v29  ;;  %v6989_v39 = vadd.f32 %v18731_v41, %v5998_v37  ;;  %v18732_v29 = vld [vmem:[#allocation129_spill] sm:$0xff]  ;;  %v5999_v37 = vadd.f32 %v18737_v9, %v5483_v49  ;;  %v7974_v41 = vld [vmem:[%s17391_s4 + $0x418] sm:$0xff]  ;;  %v18745_v49 = vld [vmem:[#allocation19_spill] sm:$0xff] }
 0xba3   : > { %10416 = vmatmul.msk.bf16.gmra.mxu0 %vm1276_vm3, %v7142_v13  ;;  %v7815_v60 = vadd.f32 %v7637_v34, %v18732_v29  ;;  %v7965_v13 = vld [vmem:[%s17391_s4 + $0x3d0] sm:$0xff]  ;;  %v18741_v29 = vld [vmem:[#allocation222_spill] sm:$0xff] }
 0xba8   : > { %v7644_v11 = vpop.f32.mrf.mxu0 }
 0xba9   : > { %v7818_v8 = vadd.f32 %v7644_v11, %v18727_v52  ;;  %v7144_v11 = vsel %vm7013_vm8, %v7141_v30, %v7143_v7  ;;  %v18736_v52 = vld [vmem:[#allocation235_spill] sm:$0xff]  ;;  %v7812_v30 = vadd.f32 %v16204_v59, %v18739_v55 }
 0xbaa   : > { %8845 = vmatmul.f32.gmra.mxu3 %v7956_v63  ;;  %8780 = vmatmul.f32.gmra.mxu2 %v8099_v51  ;;  %v16293_v63 = vpop.f32.mrf.mxu3 }
 0xbab   : > { %8906 = vmatpush.msrb.mxu1 %v7818_v8  ;;  %18733 = vst [vmem:[#allocation56_spill] sm:$0xff] %v16293_v63  ;;  %v7814_v8 = vadd.f32 %v7634_v23, %v18736_v52  ;;  %v18740_v23 = vld [vmem:[#allocation73_spill] sm:$0xff] }
 0xbad   : > { %8907 = vmatpush.msrb.mxu1 %v7817_v24  ;;  %v7813_v24 = vadd.f32 %v16221_v20, %v18738_v57  ;;  %v8117_v20 = vld [vmem:[%s17391_s4 + $0x890] sm:$0xff]  ;;  %v18746_v57 = vld [vmem:[#allocation213_spill] sm:$0xff] }
 0xbaf   : > { %8908 = vmatpush.msrb.mxu1 %v7816_v21  ;;  %v6990_v21 = vadd.f32 %v18740_v23, %v5999_v37  ;;  %v7146_v37 = vsel %vm7013_vm8, %v7143_v7, %v7145_v40  ;;  %v18750_v7 = vld [vmem:[#allocation74_spill] sm:$0xff] }
 0xbb0   : > { %v7647_v51 = vpop.f32.mrf.mxu0 }
 0xbb1   : > { %v16302_v34 = vadd.f32 %v7647_v51, %v6989_v39  ;;  %8909 = vmatpush.msrb.mxu1 %v7815_v60  ;;  %v18742_v60 = vld [vmem:[#allocation237_spill] sm:$0xff]  ;;  %v18744_v51 = vld [vmem:[#allocation240_spill] sm:$0xff] }
 0xbb2   : > { %8848 = vmatmul.f32.gmra.mxu3 %v7965_v13  ;;  %8783 = vmatmul.f32.gmra.mxu2 %v8108_v1  ;;  %v5484_v13 = vadd.f32 %v18742_v60, %v18741_v29  ;;  %v16324_v1 = vpop.f32.mrf.mxu3  ;;  %v18752_v29 = vld [vmem:[#allocation169_spill] sm:$0xff] }
 0xbb3   : > { %10417 = vmatmul.msk.bf16.gmra.mxu0 %vm1276_vm3, %v7144_v11  ;;  %8910 = vmatpush.msrb.mxu1 %v7814_v8  ;;  %18743 = vst [vmem:[#allocation152_spill] sm:$0xff] %v16324_v1  ;;  %v8126_v8 = vld [vmem:[%s17391_s4 + $0x8d8] sm:$0xff] }
 0xbb4   : > { %v6000_v11 = vadd.f32 %v18744_v51, %v5484_v13  ;;  %v10836_v51 = vld [vmem:[%s10997_s11 + $0x238] sm:$0xff] }
 0xbb5   : > { %8911 = vmatpush.msrb.mxu1 %v7813_v24  ;;  %v18747_v24 = vld [vmem:[#allocation143_spill] sm:$0xff] }
 0xbb6   : > { %v6991_v52 = vadd.f32 %v18745_v49, %v6000_v11  ;;  %v7147_v11 = vrot.slane %v10836_v51, 3 }
 0xbb7   : > { %8912 = vmatpush.msrb.mxu1 %v7812_v30 }
 0xbb8   : > { %v7649_v39 = vpop.f32.mrf.mxu0 }
 0xbb9   : > { %v16321_v59 = vadd.f32 %v7649_v39, %v6990_v21  ;;  %8913 = vmatpush.msrb.mxu1 %v16188_v33  ;;  %v7983_v33 = vld [vmem:[%s17391_s4 + $0x460] sm:$0xff]  ;;  %v18751_v39 = vld [vmem:[#allocation223_spill] sm:$0xff] }
 0xbba   : > { %8851 = vmatmul.f32.gmra.mxu3 %v7974_v41  ;;  %8786 = vmatmul.f32.gmra.mxu2 %v8117_v20  ;;  %v16349_v23 = vpop.f32.mrf.mxu3  ;;  %v7849_v41 = vld [vmem:[%s17391_s4 + $0x30] sm:$0xff] }
 0xbbb   : > { %8914 = vmatpush.msrb.mxu1 %v16169_v5  ;;  %v16339_v5 = vpop.f32.mrf.mxu1  ;;  %18749 = vst [vmem:[#allocation145_spill] sm:$0xff] %v16349_v23 }
 0xbbd   : > { %8915 = vmatpush.msrb.mxu1 %v16153_v0  ;;  %v5485_v0 = vadd.f32 %v18747_v24, %v18746_v57  ;;  %v18756_v57 = vld [vmem:[#allocation64_spill] sm:$0xff]  ;;  %v18757_v24 = vld [vmem:[#allocation166_spill] sm:$0xff] }
 0xbbf   : > { %8916 = vmatpush.msrb.mxu1 %v16129_v31  ;;  %v18748_v31 = vld [vmem:[#allocation17_spill] sm:$0xff] }
 0xbc0   : > { %v7652_v9 = vpop.f32.mrf.mxu0  ;;  %v6001_v30 = vadd.f32 %v18748_v31, %v5485_v0  ;;  %v5487_v0 = vadd.f32 %v18757_v24, %v18756_v57  ;;  %v8019_v24 = vld [vmem:[%s17391_s4 + $0x580] sm:$0xff] }
 0xbc1   : > { %v16343_v55 = vadd.f32 %v7652_v9, %v6991_v52  ;;  %8917 = vmatpush.msrb.mxu1 %v16106_v53  ;;  %v7992_v53 = vld [vmem:[%s17391_s4 + $0x4a8] sm:$0xff]  ;;  %v18755_v52 = vld [vmem:[#allocation25_spill] sm:$0xff] }
 0xbc2   : > { %8854 = vmatmul.f32.gmra.mxu3 %v7983_v33  ;;  %8789 = vmatmul.f32.gmra.mxu2 %v8126_v8  ;;  %v6992_v21 = vadd.f32 %v18750_v7, %v6001_v30  ;;  %v8001_v8 = vld [vmem:[%s17391_s4 + $0x4f0] sm:$0xff] }
 0xbc3   : > { %10418 = vmatmul.msk.bf16.gmra.mxu0 %vm1276_vm3, %v7146_v37  ;;  %8918 = vmatpush.msrb.mxu1 %v16083_v32  ;;  %v5486_v32 = vadd.f32 %v18752_v29, %v18751_v39  ;;  %v7148_v37 = vsel %vm7013_vm8, %v7145_v40, %v7147_v11  ;;  %v8010_v40 = vld [vmem:[%s17391_s4 + $0x538] sm:$0xff]  ;;  %v7867_v39 = vld [vmem:[%s17391_s4 + $0xc0] sm:$0xff] }
 0xbc5   : > { %8919 = vmatpush.msrb.mxu1 %v16057_v26  ;;  %v16365_v26 = vpop.f32.mrf.mxu1 }
 0xbc6   : > { %18753 = vst [vmem:[#allocation142_spill] sm:$0xff] %v16365_v26  ;;  %v18807_v26 = vld [vmem:[#allocation91_spill] sm:$0xff] }
 0xbc7   : > { %8920 = vmatpush.msrb.mxu1 %v16038_v2  ;;  %v18754_v2 = vld [vmem:[#allocation241_spill] sm:$0xff] }
 0xbc8   : > { %v7654_v20 = vpop.f32.mrf.mxu0  ;;  %v6002_v13 = vadd.f32 %v18754_v2, %v5486_v32  ;;  %v18761_v32 = vld [vmem:[#allocation224_spill] sm:$0xff]  ;;  %v18762_v2 = vld [vmem:[#allocation238_spill] sm:$0xff] }
 0xbc9   : > { %v16362_v60 = vadd.f32 %v7654_v20, %v6992_v21  ;;  %8921 = vmatpush.msrb.mxu1 %v16020_v10  ;;  %v7858_v10 = vld [vmem:[%s17391_s4 + $0x78] sm:$0xff] }
 0xbca   : > { %8857 = vmatmul.f32.gmra.mxu3 %v7992_v53  ;;  %8922 = vmatmul.f32.vlgmr.msrb.gmra.mxu1 %v7849_v41  ;;  %v6993_v33 = vadd.f32 %v18755_v52, %v6002_v13  ;;  %v18760_v41 = vld [vmem:[#allocation92_spill] sm:$0xff]  ;;  %v5488_v13 = vadd.f32 %v18762_v2, %v18761_v32 }
 0xbcb   : > { %v18764_v52 = vld [vmem:[#allocation140_spill] sm:$0xff] }
 0xbcd   : > { %v8810_v35 = vpop.f32.mrf.mxu3  ;;  %v16386_v7 = vpop.f32.mrf.mxu1 }
 0xbce   : > { %v16370_v49 = vadd.f32 %v8810_v35, %v16095_v27  ;;  %v18758_v27 = vld [vmem:[#allocation242_spill] sm:$0xff]  ;;  %18759 = vst [vmem:[#allocation156_spill] sm:$0xff] %v16386_v7  ;;  %v18806_v7 = vld [vmem:[#allocation87_spill] sm:$0xff] }
 0xbcf   : > { %v6003_v30 = vadd.f32 %v18758_v27, %v5487_v0  ;;  %v16413_v0 = vpop.f32.mrf.mxu2  ;;  %v7876_v27 = vld [vmem:[%s17391_s4 + $0x108] sm:$0xff] }
 0xbd0   : > { %v7657_v9 = vpop.f32.mrf.mxu0 }
 0xbd1   : > { %v16382_v31 = vadd.f32 %v7657_v9, %v6993_v33  ;;  %v6994_v20 = vadd.f32 %v18760_v41, %v6003_v30  ;;  %v7149_v33 = vrot.slane %v18764_v52, 3  ;;  %v18767_v41 = vld [vmem:[#allocation114_spill] sm:$0xff] }
 0xbd2   : > { %8860 = vmatmul.f32.gmra.mxu3 %v8001_v8  ;;  %8925 = vmatmul.f32.gmra.mxu1 %v7858_v10 }
 0xbd3   : > { %10419 = vmatmul.msk.bf16.gmra.mxu0 %vm1276_vm3, %v7148_v37  ;;  %v18766_v37 = vld [vmem:[#allocation95_spill] sm:$0xff] }
 0xbd5   : > { %v8813_v21 = vpop.f32.mrf.mxu3  ;;  %v16407_v9 = vpop.f32.mrf.mxu1 }
 0xbd6   : > { %v16389_v53 = vadd.f32 %v8813_v21, %v16119_v6  ;;  %v18763_v6 = vld [vmem:[#allocation23_spill] sm:$0xff]  ;;  %18765 = vst [vmem:[#allocation159_spill] sm:$0xff] %v16407_v9  ;;  %v7150_v21 = vsel %vm7013_vm8, %v7147_v11, %v7149_v33  ;;  %v8028_v11 = vld [vmem:[%s17391_s4 + $0x5c8] sm:$0xff] }
 0xbd7   : > { %v6004_v35 = vadd.f32 %v18763_v6, %v5488_v13  ;;  %v18770_v13 = vld [vmem:[#allocation32_spill] sm:$0xff] }
 0xbd8   : > { %v7659_v29 = vpop.f32.mrf.mxu0 }
 0xbd9   : > { %v16400_v51 = vadd.f32 %v7659_v29, %v6994_v20  ;;  %v6995_v57 = vadd.f32 %v18766_v37, %v6004_v35  ;;  %v7885_v35 = vld [vmem:[%s17391_s4 + $0x150] sm:$0xff]  ;;  %v18773_v37 = vld [vmem:[#allocation9_spill] sm:$0xff] }
 0xbda   : > { %8863 = vmatmul.f32.gmra.mxu3 %v8010_v40  ;;  %8928 = vmatmul.f32.gmra.mxu1 %v7867_v39  ;;  %v18769_v39 = vld [vmem:[#allocation75_spill] sm:$0xff] }
 0xbdd   : > { %v8816_v8 = vpop.f32.mrf.mxu3  ;;  %v16435_v33 = vpop.f32.mrf.mxu1 }
 0xbde   : > { %v16405_v10 = vadd.f32 %v8816_v8, %v16140_v36  ;;  %v18768_v36 = vld [vmem:[#allocation133_spill] sm:$0xff]  ;;  %18771 = vst [vmem:[#allocation149_spill] sm:$0xff] %v16435_v33  ;;  %v18800_v33 = vld [vmem:[#allocation88_spill] sm:$0xff] }
 0xbdf   : > { %v5489_v20 = vadd.f32 %v18768_v36, %v18767_v41  ;;  %v18772_v8 = vld [vmem:[#allocation217_spill] sm:$0xff]  ;;  %v18775_v36 = vld [vmem:[#allocation96_spill] sm:$0xff] }
 0xbe0   : > { %v7662_v30 = vpop.f32.mrf.mxu0 }
 0xbe1   : > { %v16421_v40 = vadd.f32 %v7662_v30, %v6995_v57  ;;  %v6005_v29 = vadd.f32 %v18769_v39, %v5489_v20  ;;  %v5490_v57 = vadd.f32 %v18773_v37, %v18772_v8  ;;  %v8037_v39 = vld [vmem:[%s17391_s4 + $0x610] sm:$0xff]  ;;  %v7903_v8 = vld [vmem:[%s17391_s4 + $0x1e0] sm:$0xff] }
 0xbe2   : > { %8866 = vmatmul.f32.gmra.mxu3 %v8019_v24  ;;  %8931 = vmatmul.f32.gmra.mxu1 %v7876_v27  ;;  %v18774_v27 = vld [vmem:[#allocation65_spill] sm:$0xff] }
 0xbe3   : > { %10420 = vmatmul.msk.bf16.gmra.mxu0 %vm1276_vm3, %v7150_v21  ;;  %v6996_v6 = vadd.f32 %v18770_v13, %v6005_v29  ;;  %v6006_v30 = vadd.f32 %v18774_v27, %v5490_v57  ;;  %v7894_v29 = vld [vmem:[%s17391_s4 + $0x198] sm:$0xff] }
 0xbe5   : > { %v8819_v32 = vpop.f32.mrf.mxu3  ;;  %v6997_v20 = vadd.f32 %v18775_v36, %v6006_v30  ;;  %v7912_v36 = vld [vmem:[%s17391_s4 + $0x228] sm:$0xff] }
 0xbe6   : > { %v16426_v2 = vadd.f32 %v8819_v32, %v16159_v17  ;;  %v16441_v17 = vpop.f32.mrf.mxu2 }
 0xbe8   : > { %v7664_v52 = vpop.f32.mrf.mxu0 }
 0xbe9   : > { %v16439_v24 = vadd.f32 %v7664_v52, %v6996_v6  ;;  %v16456_v6 = vpop.f32.mrf.mxu1  ;;  %v8046_v52 = vld [vmem:[%s17391_s4 + $0x658] sm:$0xff] }
 0xbea   : > { %8869 = vmatmul.f32.gmra.mxu3 %v8028_v11  ;;  %8934 = vmatmul.f32.gmra.mxu1 %v7885_v35  ;;  %18776 = vst [vmem:[#allocation160_spill] sm:$0xff] %v16456_v6  ;;  %v18793_v6 = vld [vmem:[#allocation221_spill] sm:$0xff] }
 0xbeb   : > { %v5494_v18 = vadd.f32 %v18794_v54, %v18793_v6  ;;  %v18801_v54 = vld [vmem:[#allocation150_spill] sm:$0xff] }
 0xbed   : > { %v8822_v21 = vpop.f32.mrf.mxu3 }
 0xbee   : > { %v16445_v41 = vadd.f32 %v8822_v21, %v16177_v47  ;;  %v16458_v11 = vpop.f32.mrf.mxu2  ;;  %v8055_v21 = vld [vmem:[%s17391_s4 + $0x6a0] sm:$0xff] }
 0xbf0   : > { %v7667_v32 = vpop.f32.mrf.mxu0 }
 0xbf1   : > { %v16454_v13 = vadd.f32 %v7667_v32, %v6997_v20  ;;  %v16471_v57 = vpop.f32.mrf.mxu1 }
 0xbf2   : > { %8872 = vmatmul.f32.gmra.mxu3 %v8037_v39  ;;  %8937 = vmatmul.f32.gmra.mxu1 %v7894_v29  ;;  %18777 = vst [vmem:[#allocation163_spill] sm:$0xff] %v16471_v57 }
 0xbf5   : > { %v8825_v47 = vpop.f32.mrf.mxu3 }
 0xbf6   : > { %v16461_v35 = vadd.f32 %v8825_v47, %v16196_v16  ;;  %v16473_v30 = vpop.f32.mrf.mxu2 }
 0xbf8   : > { %v16469_v37 = vpop.f32.mrf.mxu0 }
 0xbf9   : > { %v16494_v47 = vpop.f32.mrf.mxu1 }
 0xbfa   : > { %8875 = vmatmul.f32.gmra.mxu3 %v8046_v52  ;;  %8940 = vmatmul.f32.gmra.mxu1 %v7903_v8  ;;  %18778 = vst [vmem:[#allocation171_spill] sm:$0xff] %v16494_v47  ;;  %v7921_v52 = vld [vmem:[%s17391_s4 + $0x270] sm:$0xff]  ;;  %v18790_v47 = vld [vmem:[#allocation84_spill] sm:$0xff] }
 0xbfd   : > { %v8828_v27 = vpop.f32.mrf.mxu3 }
 0xbfe   : > { %v16476_v16 = vadd.f32 %v8828_v27, %v16213_v14  ;;  %v8064_v14 = vld [vmem:[%s17391_s4 + $0x6e8] sm:$0xff]  ;;  %v16492_v32 = vpop.f32.mrf.mxu2 }
 0xc00   : > { %v16484_v20 = vpop.f32.mrf.mxu0 }
 0xc01   : > { %v16511_v23 = vpop.f32.mrf.mxu1 }
 0xc02   : > { %8878 = vmatmul.f32.gmra.mxu3 %v8055_v21  ;;  %8943 = vmatmul.f32.gmra.mxu1 %v7912_v36  ;;  %v7930_v21 = vld [vmem:[%s17391_s4 + $0x2b8] sm:$0xff]  ;;  %18780 = vst [vmem:[#allocation168_spill] sm:$0xff] %v16511_v23 }
 0xc03   : > { %v18789_v23 = vld [vmem:[#allocation148_spill] sm:$0xff] }
 0xc04   : > { %v5495_v4 = vadd.f32 %v18789_v23, %v18788_v43  ;;  %v7957_v43 = vld [vmem:[%s17391_s4 + $0x390] sm:$0xff] }
 0xc05   : > { %v8831_v39 = vpop.f32.mrf.mxu3 }
 0xc06   : > { %v16487_v29 = vadd.f32 %v8831_v39, %v16227_v15  ;;  %v8073_v15 = vld [vmem:[%s17391_s4 + $0x730] sm:$0xff]  ;;  %v16509_v39 = vpop.f32.mrf.mxu2 }
 0xc07   : > { %18779 = vst [vmem:[#allocation85_spill] sm:$0xff] %v16509_v39 }
 0xc08   : > { %v16499_v8 = vpop.f32.mrf.mxu0 }
 0xc09   : > { %v16523_v63 = vpop.f32.mrf.mxu1 }
 0xc0a   : > { %8881 = vmatmul.f32.gmra.mxu3 %v8064_v14  ;;  %8946 = vmatmul.f32.gmra.mxu1 %v7921_v52  ;;  %v8082_v14 = vld [vmem:[%s17391_s4 + $0x778] sm:$0xff]  ;;  %v7939_v52 = vld [vmem:[%s17391_s4 + $0x300] sm:$0xff]  ;;  %18782 = vst [vmem:[#allocation81_spill] sm:$0xff] %v16523_v63 }
 0xc0d   : > { %v16501_v27 = vpop.f32.mrf.mxu3 }
 0xc0e   : > { %v16521_v62 = vpop.f32.mrf.mxu2 }
 0xc0f   : > { %18781 = vst [vmem:[#allocation167_spill] sm:$0xff] %v16521_v62 }
 0xc10   : > { %v7677_v36 = vpop.f32.mrf.mxu0 }
 0xc11   : > { %v16543_v56 = vpop.f32.mrf.mxu1 }
 0xc12   : > { %8884 = vmatmul.f32.gmra.mxu3 %v8073_v15  ;;  %8949 = vmatmul.f32.gmra.mxu1 %v7930_v21  ;;  %v8091_v15 = vld [vmem:[%s17391_s4 + $0x7c0] sm:$0xff]  ;;  %v7948_v21 = vld [vmem:[%s17391_s4 + $0x348] sm:$0xff]  ;;  %18792 = vst [vmem:[#allocation164_spill] sm:$0xff] %v16543_v56 }
 0xc15   : > { %v16519_v1 = vpop.f32.mrf.mxu3 }
 0xc16   : > { %v16541_v57 = vpop.f32.mrf.mxu2 }
 0xc17   : > { %18791 = vst [vmem:[#allocation172_spill] sm:$0xff] %v16541_v57 }
 0xc18   : > { %v7679_v28 = vpop.f32.mrf.mxu0 }
 0xc1a   : > { %8887 = vmatmul.f32.gmra.mxu3 %v8082_v14  ;;  %8952 = vmatmul.f32.gmra.mxu1 %v7939_v52  ;;  %v18785_v14 = vld [vmem:[#allocation7_spill] sm:$0xff]  ;;  %v18786_v52 = vld [vmem:[#allocation18_spill] sm:$0xff] }
 0xc1b   : > { %v5496_v12 = vadd.f32 %v18786_v52, %v18785_v14  ;;  %v7004_v14 = vadd.f32 %v18796_v22, %v6013_v58  ;;  %v18799_v52 = vld [vmem:[#allocation31_spill] sm:$0xff]  ;;  %v18803_v58 = vld [vmem:[#allocation225_spill] sm:$0xff] }
 0xc1c   : > { %v6010_v56 = vadd.f32 %v18799_v52, %v5494_v18  ;;  %v5492_v9 = vadd.f32 %v18804_v44, %v18803_v58  ;;  %v18808_v18 = vld [vmem:[#allocation214_spill] sm:$0xff]  ;;  %v18809_v52 = vld [vmem:[#allocation144_spill] sm:$0xff] }
 0xc1d   : > { %v16536_v63 = vpop.f32.mrf.mxu3  ;;  %v6012_v61 = vadd.f32 %v18790_v47, %v5496_v12  ;;  %v18797_v12 = vld [vmem:[#allocation226_spill] sm:$0xff] }
 0xc1e   : > { %v5493_v23 = vadd.f32 %v18798_v38, %v18797_v12 }
 0xc1f   : > { %v7003_v6 = vadd.f32 %v18800_v33, %v6012_v61  ;;  %v5491_v61 = vadd.f32 %v18809_v52, %v18808_v18  ;;  %v18810_v33 = vld [vmem:[#allocation58_spill] sm:$0xff] }
 0xc20   : > { %v7682_v46 = vpop.f32.mrf.mxu0  ;;  %v6009_v57 = vadd.f32 %v18805_v45, %v5493_v23  ;;  %v6008_v39 = vadd.f32 %v18810_v33, %v5492_v9  ;;  %v18813_v45 = vld [vmem:[#allocation72_spill] sm:$0xff]  ;;  %v16580_v9 = vpop.f32.mrf.mxu1 }
 0xc21   : > { %v7833_v38 = vadd.f32 %v7682_v46, %v7003_v6  ;;  %v8109_v46 = vld [vmem:[%s17391_s4 + $0x850] sm:$0xff]  ;;  %v16578_v6 = vpop.f32.mrf.mxu2  ;;  %18815 = vst [vmem:[#allocation79_spill] sm:$0xff] %v16580_v9 }
 0xc22   : > { %8890 = vmatmul.f32.gmra.mxu3 %v8091_v15  ;;  %8955 = vmatmul.f32.gmra.mxu1 %v7948_v21  ;;  %v18795_v15 = vld [vmem:[#allocation13_spill] sm:$0xff]  ;;  %v7000_v23 = vadd.f32 %v18813_v45, %v6009_v57 }
 0xc23   : > { %v6011_v21 = vadd.f32 %v18795_v15, %v5495_v4  ;;  %v18802_v4 = vld [vmem:[#allocation138_spill] sm:$0xff] }
 0xc24   : > { %v5498_v15 = vadd.f32 %v18802_v4, %v18801_v54  ;;  %v18811_v54 = vld [vmem:[#allocation82_spill] sm:$0xff]  ;;  %v7830_v57 = vadd.f32 %v16499_v8, %v7000_v23  ;;  %v8118_v8 = vld [vmem:[%s17391_s4 + $0x898] sm:$0xff] }
 0xc25   : > { %v7002_v62 = vadd.f32 %v18806_v7, %v6011_v21  ;;  %v16570_v44 = vpop.f32.mrf.mxu3  ;;  %v18814_v7 = vld [vmem:[#allocation38_spill] sm:$0xff] }
 0xc26   : > { %v6014_v12 = vadd.f32 %v18807_v26, %v5498_v15 }
 0xc28   : > { %v7684_v47 = vpop.f32.mrf.mxu0  ;;  %v7005_v21 = vadd.f32 %v18814_v7, %v6014_v12  ;;  %v16605_v52 = vpop.f32.mrf.mxu1  ;;  %v8011_v7 = vld [vmem:[%s17391_s4 + $0x540] sm:$0xff] }
 0xc29   : > { %v7834_v22 = vadd.f32 %v7684_v47, %v7004_v14  ;;  %v7001_v14 = vadd.f32 %v18811_v54, %v6010_v56  ;;  %v7832_v47 = vadd.f32 %v7679_v28, %v7002_v62  ;;  %v7966_v62 = vld [vmem:[%s17391_s4 + $0x3d8] sm:$0xff]  ;;  %v18816_v56 = vld [vmem:[#allocation37_spill] sm:$0xff]  ;;  %18818 = vst [vmem:[#allocation89_spill] sm:$0xff] %v16605_v52 }
 0xc2a   : > { %8893 = vmatmul.f32.gmra.mxu3 %v8100_v3  ;;  %8958 = vmatmul.f32.gmra.mxu1 %v7957_v43  ;;  %v18812_v3 = vld [vmem:[#allocation30_spill] sm:$0xff]  ;;  %v6999_v4 = vadd.f32 %v18816_v56, %v6008_v39  ;;  %v7975_v39 = vld [vmem:[%s17391_s4 + $0x420] sm:$0xff]  ;;  %v18844_v52 = vld [vmem:[#allocation16_spill] sm:$0xff] }
 0xc2b   : > { %9019 = vmatpush.msrb.mxu2 %v7834_v22  ;;  %v6007_v43 = vadd.f32 %v18812_v3, %v5491_v61  ;;  %v7831_v26 = vadd.f32 %v7677_v36, %v7001_v14  ;;  %v18817_v36 = vld [vmem:[#allocation99_spill] sm:$0xff]  ;;  %v18823_v56 = vld [vmem:[#allocation125_spill] sm:$0xff] }
 0xc2c   : > { %v7829_v58 = vadd.f32 %v16484_v20, %v6999_v4  ;;  %v16603_v20 = vpop.f32.mrf.mxu2  ;;  %v18824_v4 = vld [vmem:[#allocation77_spill] sm:$0xff] }
 0xc2d   : > { %9020 = vmatpush.msrb.mxu2 %v7833_v38  ;;  %v6998_v22 = vadd.f32 %v18817_v36, %v6007_v43  ;;  %v16592_v38 = vpop.f32.mrf.mxu3  ;;  %v7868_v43 = vld [vmem:[%s17391_s4 + $0xc8] sm:$0xff] }
 0xc2f   : > { %9021 = vmatpush.msrb.mxu2 %v7832_v47  ;;  %v7828_v12 = vadd.f32 %v16469_v37, %v6998_v22  ;;  %v8127_v37 = vld [vmem:[%s17391_s4 + $0x8e0] sm:$0xff]  ;;  %v8002_v47 = vld [vmem:[%s17391_s4 + $0x4f8] sm:$0xff] }
 0xc30   : > { %v7687_v28 = vpop.f32.mrf.mxu0 }
 0xc31   : > { %v16587_v15 = vadd.f32 %v7687_v28, %v7005_v21  ;;  %9022 = vmatpush.msrb.mxu2 %v7831_v26 }
 0xc32   : > { %8896 = vmatmul.f32.gmra.mxu3 %v8109_v46  ;;  %8961 = vmatmul.f32.gmra.mxu1 %v7966_v62  ;;  %v7877_v46 = vld [vmem:[%s17391_s4 + $0x110] sm:$0xff]  ;;  %v8020_v62 = vld [vmem:[%s17391_s4 + $0x588] sm:$0xff] }
 0xc33   : > { %9023 = vmatpush.msrb.mxu2 %v7830_v57  ;;  %v5505_v57 = vadd.f32 %v18824_v4, %v18823_v56  ;;  %v18835_v56 = vld [vmem:[#allocation78_spill] sm:$0xff] }
 0xc35   : > { %9024 = vmatpush.msrb.mxu2 %v7829_v58  ;;  %v16619_v33 = vpop.f32.mrf.mxu3  ;;  %v18827_v58 = vld [vmem:[#allocation232_spill] sm:$0xff] }
 0xc37   : > { %9025 = vmatpush.msrb.mxu2 %v7828_v12  ;;  %v18828_v12 = vld [vmem:[#allocation146_spill] sm:$0xff] }
 0xc38   : > { %v16600_v18 = vpop.f32.mrf.mxu0 }
 0xc39   : > { %9026 = vmatpush.msrb.mxu2 %v16454_v13  ;;  %v7984_v13 = vld [vmem:[%s17391_s4 + $0x468] sm:$0xff] }
 0xc3a   : > { %8899 = vmatmul.f32.gmra.mxu3 %v8118_v8  ;;  %8964 = vmatmul.f32.gmra.mxu1 %v7975_v39  ;;  %v5504_v8 = vadd.f32 %v18828_v12, %v18827_v58  ;;  %v18829_v39 = vld [vmem:[#allocation100_spill] sm:$0xff]  ;;  %v18837_v58 = vld [vmem:[#allocation231_spill] sm:$0xff] }
 0xc3b   : > { %9027 = vmatpush.msrb.mxu2 %v16439_v24  ;;  %v7850_v24 = vld [vmem:[%s17391_s4 + $0x38] sm:$0xff] }
 0xc3c   : > { %v18838_v12 = vld [vmem:[#allocation36_spill] sm:$0xff] }
 0xc3d   : > { %9028 = vmatpush.msrb.mxu2 %v16421_v40  ;;  %v16622_v40 = vpop.f32.mrf.mxu2 }
 0xc3f   : > { %9029 = vmatpush.msrb.mxu2 %v16400_v51  ;;  %v16624_v51 = vpop.f32.mrf.mxu1 }
 0xc40   : > { %v16616_v61 = vpop.f32.mrf.mxu0  ;;  %18819 = vst [vmem:[#allocation175_spill] sm:$0xff] %v16624_v51 }
 0xc41   : > { %9030 = vmatpush.msrb.mxu2 %v16382_v31  ;;  %v7993_v31 = vld [vmem:[%s17391_s4 + $0x4b0] sm:$0xff] }
 0xc42   : > { %8902 = vmatmul.f32.gmra.mxu3 %v8127_v37  ;;  %8967 = vmatmul.f32.gmra.mxu1 %v7984_v13  ;;  %v6021_v37 = vadd.f32 %v18829_v39, %v5505_v57  ;;  %v18830_v13 = vld [vmem:[#allocation154_spill] sm:$0xff]  ;;  %v5501_v39 = vadd.f32 %v18838_v12, %v18837_v58 }
 0xc43   : > { %9031 = vmatpush.msrb.mxu2 %v16362_v60  ;;  %v16637_v60 = vpop.f32.mrf.mxu3 }
 0xc45   : > { %9032 = vmatpush.msrb.mxu2 %v16343_v55  ;;  %v16639_v14 = vpop.f32.mrf.mxu2 }
 0xc47   : > { %9033 = vmatpush.msrb.mxu2 %v16321_v59  ;;  %v16641_v55 = vpop.f32.mrf.mxu1  ;;  %v7859_v59 = vld [vmem:[%s17391_s4 + $0x80] sm:$0xff] }
 0xc48   : > { %v16634_v54 = vpop.f32.mrf.mxu0  ;;  %18820 = vst [vmem:[#allocation176_spill] sm:$0xff] %v16641_v55  ;;  %v18836_v55 = vld [vmem:[#allocation22_spill] sm:$0xff] }
 0xc49   : > { %9034 = vmatpush.msrb.mxu2 %v16302_v34  ;;  %v7012_v51 = vadd.f32 %v18836_v55, %v6021_v37  ;;  %v18841_v55 = vld [vmem:[#allocation132_spill] sm:$0xff]  ;;  %v18842_v37 = vld [vmem:[#allocation155_spill] sm:$0xff] }
 0xc4a   : > { %9035 = vmatmul.f32.vlgmr.msrb.gmra.mxu2 %v7850_v24  ;;  %8970 = vmatmul.f32.gmra.mxu1 %v7993_v31  ;;  %v18831_v24 = vld [vmem:[#allocation12_spill] sm:$0xff] }
 0xc4b   : > { %v16649_v34 = vpop.f32.mrf.mxu3  ;;  %v5503_v31 = vadd.f32 %v18831_v24, %v18830_v13  ;;  %v18840_v24 = vld [vmem:[#allocation119_spill] sm:$0xff] }
 0xc4d   : > { %v16654_v45 = vpop.f32.mrf.mxu2  ;;  %v6019_v4 = vadd.f32 %v18835_v56, %v5503_v31  ;;  %v18843_v56 = vld [vmem:[#allocation66_spill] sm:$0xff] }
 0xc4e   : > { %18821 = vst [vmem:[#allocation93_spill] sm:$0xff] %v16654_v45 }
 0xc4f   : > { %v16656_v23 = vpop.f32.mrf.mxu1  ;;  %v7010_v9 = vadd.f32 %v18844_v52, %v6019_v4  ;;  %v8038_v4 = vld [vmem:[%s17391_s4 + $0x618] sm:$0xff] }
 0xc50   : > { %v7697_v3 = vpop.f32.mrf.mxu0  ;;  %18822 = vst [vmem:[#allocation90_spill] sm:$0xff] %v16656_v23 }
 0xc52   : > { %9038 = vmatmul.f32.gmra.mxu2 %v7859_v59  ;;  %8973 = vmatmul.f32.gmra.mxu1 %v8002_v47  ;;  %v18832_v59 = vld [vmem:[#allocation83_spill] sm:$0xff] }
 0xc53   : > { %v16661_v26 = vpop.f32.mrf.mxu3  ;;  %v6020_v47 = vadd.f32 %v18832_v59, %v5504_v8  ;;  %v18839_v8 = vld [vmem:[#allocation26_spill] sm:$0xff] }
 0xc55   : > { %v16671_v36 = vpop.f32.mrf.mxu2  ;;  %v7011_v59 = vadd.f32 %v18840_v24, %v6020_v47  ;;  %v18848_v47 = vld [vmem:[#allocation24_spill] sm:$0xff] }
 0xc56   : > { %18825 = vst [vmem:[#allocation43_spill] sm:$0xff] %v16671_v36  ;;  %v18851_v24 = vld [vmem:[#allocation20_spill] sm:$0xff] }
 0xc57   : > { %v16673_v22 = vpop.f32.mrf.mxu1 }
 0xc58   : > { %v7699_v21 = vpop.f32.mrf.mxu0  ;;  %18826 = vst [vmem:[#allocation180_spill] sm:$0xff] %v16673_v22  ;;  %v6017_v22 = vadd.f32 %v18843_v56, %v5501_v39  ;;  %v18852_v39 = vld [vmem:[#allocation34_spill] sm:$0xff] }
 0xc5a   : > { %9041 = vmatmul.f32.gmra.mxu2 %v7868_v43  ;;  %8976 = vmatmul.f32.gmra.mxu1 %v8011_v7  ;;  %v18833_v43 = vld [vmem:[#allocation157_spill] sm:$0xff]  ;;  %v18834_v7 = vld [vmem:[#allocation71_spill] sm:$0xff] }
 0xc5b   : > { %v5502_v23 = vadd.f32 %v18834_v7, %v18833_v43  ;;  %v16695_v31 = vpop.f32.mrf.mxu3  ;;  %v5500_v7 = vadd.f32 %v18842_v37, %v18841_v55  ;;  %v7008_v37 = vadd.f32 %v18852_v39, %v6017_v22 }
 0xc5d   : > { %v6018_v13 = vadd.f32 %v18839_v8, %v5502_v23  ;;  %v16701_v45 = vpop.f32.mrf.mxu2  ;;  %v18847_v23 = vld [vmem:[#allocation230_spill] sm:$0xff]  ;;  %v7840_v8 = vadd.f32 %v7699_v21, %v7010_v9  ;;  %v18854_v9 = vld [vmem:[#allocation67_spill] sm:$0xff] }
 0xc5e   : > { %18845 = vst [vmem:[#allocation46_spill] sm:$0xff] %v16701_v45 }
 0xc5f   : > { %v16703_v58 = vpop.f32.mrf.mxu1 }
 0xc60   : > { %v7702_v28 = vpop.f32.mrf.mxu0  ;;  %18846 = vst [vmem:[#allocation59_spill] sm:$0xff] %v16703_v58  ;;  %v7994_v58 = vld [vmem:[%s17391_s4 + $0x4b8] sm:$0xff] }
 0xc61   : > { %v7841_v36 = vadd.f32 %v7702_v28, %v7011_v59  ;;  %v7895_v28 = vld [vmem:[%s17391_s4 + $0x1a0] sm:$0xff] }
 0xc62   : > { %9044 = vmatmul.f32.gmra.mxu2 %v7877_v46  ;;  %8979 = vmatmul.f32.gmra.mxu1 %v8020_v62  ;;  %v7886_v46 = vld [vmem:[%s17391_s4 + $0x158] sm:$0xff]  ;;  %v8029_v62 = vld [vmem:[%s17391_s4 + $0x5d0] sm:$0xff]  ;;  %v18853_v59 = vld [vmem:[#allocation101_spill] sm:$0xff] }
 0xc67   : > { %v16726_v56 = vpop.f32.mrf.mxu1 }
 0xc68   : > { %v7704_v57 = vpop.f32.mrf.mxu0  ;;  %18856 = vst [vmem:[#allocation55_spill] sm:$0xff] %v16726_v56  ;;  %v8128_v56 = vld [vmem:[%s17391_s4 + $0x8e8] sm:$0xff] }
 0xc69   : > { %v7842_v43 = vadd.f32 %v7704_v57, %v7012_v51  ;;  %v5499_v51 = vadd.f32 %v18848_v47, %v18847_v23  ;;  %v18849_v57 = vld [vmem:[#allocation153_spill] sm:$0xff] }
 0xc6a   : > { %9047 = vmatmul.f32.gmra.mxu2 %v7886_v46  ;;  %8982 = vmatmul.f32.gmra.mxu1 %v8029_v62  ;;  %v6016_v12 = vadd.f32 %v18849_v57, %v5500_v7  ;;  %v18850_v46 = vld [vmem:[#allocation105_spill] sm:$0xff]  ;;  %v16724_v7 = vpop.f32.mrf.mxu2  ;;  %v7913_v57 = vld [vmem:[%s17391_s4 + $0x230] sm:$0xff] }
 0xc6b   : > { %9140 = vmatpush.msrb.mxu3 %v7842_v43  ;;  %v7009_v62 = vadd.f32 %v18850_v46, %v6018_v13  ;;  %v6015_v55 = vadd.f32 %v18851_v24, %v5499_v51  ;;  %v7838_v13 = vadd.f32 %v16634_v54, %v7008_v37  ;;  %18855 = vst [vmem:[#allocation174_spill] sm:$0xff] %v16724_v7  ;;  %v7851_v54 = vld [vmem:[%s17391_s4 + $0x40] sm:$0xff]  ;;  %v7860_v51 = vld [vmem:[%s17391_s4 + $0x88] sm:$0xff]  ;;  %v7869_v46 = vld [vmem:[%s17391_s4 + $0xd0] sm:$0xff] }
 0xc6c   : > { %v7007_v43 = vadd.f32 %v18853_v59, %v6016_v12  ;;  %v8047_v23 = vld [vmem:[%s17391_s4 + $0x660] sm:$0xff]  ;;  %v7878_v37 = vld [vmem:[%s17391_s4 + $0x118] sm:$0xff] }
 0xc6d   : > { %9141 = vmatpush.msrb.mxu3 %v7841_v36  ;;  %v7839_v52 = vadd.f32 %v7697_v3, %v7009_v62  ;;  %v7006_v21 = vadd.f32 %v18854_v9, %v6015_v55  ;;  %v16721_v36 = vpop.f32.mrf.mxu3  ;;  %v8065_v55 = vld [vmem:[%s17391_s4 + $0x6f0] sm:$0xff]  ;;  %v7940_v9 = vld [vmem:[%s17391_s4 + $0x308] sm:$0xff]  ;;  %v8066_v7 = vld [vmem:[%s17391_s4 + $0x6f8] sm:$0xff] }
 0xc6e   : > { %v7837_v3 = vadd.f32 %v16616_v61, %v7007_v43  ;;  %v7904_v61 = vld [vmem:[%s17391_s4 + $0x1e8] sm:$0xff] }
 0xc6f   : > { %9142 = vmatpush.msrb.mxu3 %v7840_v8  ;;  %v7836_v22 = vadd.f32 %v16600_v18, %v7006_v21  ;;  %v16741_v47 = vpop.f32.mrf.mxu1  ;;  %v7922_v8 = vld [vmem:[%s17391_s4 + $0x278] sm:$0xff]  ;;  %v8083_v21 = vld [vmem:[%s17391_s4 + $0x780] sm:$0xff] }
 0xc71   : > { %9143 = vmatpush.msrb.mxu3 %v7839_v52  ;;  %v7931_v52 = vld [vmem:[%s17391_s4 + $0x2c0] sm:$0xff] }
 0xc72   : > { %9050 = vmatmul.f32.gmra.mxu2 %v7895_v28  ;;  %8985 = vmatmul.f32.gmra.mxu1 %v8038_v4  ;;  %v16749_v12 = vpop.f32.mrf.mxu2  ;;  %v8074_v28 = vld [vmem:[%s17391_s4 + $0x738] sm:$0xff] }
 0xc73   : > { %9144 = vmatpush.msrb.mxu3 %v7838_v13  ;;  %18857 = vst [vmem:[#allocation52_spill] sm:$0xff] %v16749_v12  ;;  %v7887_v13 = vld [vmem:[%s17391_s4 + $0x160] sm:$0xff]  ;;  %v8004_v12 = vld [vmem:[%s17391_s4 + $0x508] sm:$0xff] }
 0xc75   : > { %9145 = vmatpush.msrb.mxu3 %v7837_v3  ;;  %v16739_v18 = vpop.f32.mrf.mxu3 }
 0xc77   : > { %9146 = vmatpush.msrb.mxu3 %v7836_v22  ;;  %v16763_v24 = vpop.f32.mrf.mxu1 }
 0xc79   : > { %9147 = vmatpush.msrb.mxu3 %v16587_v15  ;;  %v8056_v15 = vld [vmem:[%s17391_s4 + $0x6a8] sm:$0xff] }
 0xc7a   : > { %10421 = vmatmul.msk.f32.vlgmr.msrb.gmra.mxu3 %vm8131_vm9, %v7851_v54  ;;  %9053 = vmatmul.f32.gmra.mxu2 %v7904_v61  ;;  %v16768_v39 = vpop.f32.mrf.mxu2  ;;  %v7896_v61 = vld [vmem:[%s17391_s4 + $0x1a8] sm:$0xff] }
 0xc7b   : > { %8988 = vmatmul.f32.gmra.mxu1 %v8047_v23  ;;  %18858 = vst [vmem:[#allocation170_spill] sm:$0xff] %v16768_v39  ;;  %v7949_v23 = vld [vmem:[%s17391_s4 + $0x350] sm:$0xff] }
 0xc7d   : > { %v16758_v62 = vpop.f32.mrf.mxu3 }
 0xc7f   : > { %v16782_v59 = vpop.f32.mrf.mxu1 }
 0xc82   : > { %10422 = vmatmul.msk.f32.gmra.mxu3 %vm8131_vm9, %v7860_v51  ;;  %9056 = vmatmul.f32.gmra.mxu2 %v7913_v57  ;;  %v16785_v43 = vpop.f32.mrf.mxu2  ;;  %v8092_v51 = vld [vmem:[%s17391_s4 + $0x7c8] sm:$0xff] }
 0xc83   : > { %8991 = vmatmul.f32.gmra.mxu1 %v8056_v15  ;;  %18859 = vst [vmem:[#allocation181_spill] sm:$0xff] %v16785_v43 }
 0xc85   : > { %v16780_v4 = vpop.f32.mrf.mxu3 }
 0xc87   : > { %v16799_v22 = vpop.f32.mrf.mxu1 }
 0xc8a   : > { %10423 = vmatmul.msk.f32.gmra.mxu3 %vm8131_vm9, %v7869_v46  ;;  %9059 = vmatmul.f32.gmra.mxu2 %v7922_v8  ;;  %v16801_v54 = vpop.f32.mrf.mxu2  ;;  %v7905_v46 = vld [vmem:[%s17391_s4 + $0x1f0] sm:$0xff]  ;;  %v7958_v8 = vld [vmem:[%s17391_s4 + $0x398] sm:$0xff] }
 0xc8b   : > { %8994 = vmatmul.f32.gmra.mxu1 %v8065_v55  ;;  %18861 = vst [vmem:[#allocation94_spill] sm:$0xff] %v16801_v54 }
 0xc8d   : > { %v16797_v3 = vpop.f32.mrf.mxu3 }
 0xc8e   : > { %18860 = vst [vmem:[#allocation49_spill] sm:$0xff] %v16797_v3 }
 0xc8f   : > { %v16815_v15 = vpop.f32.mrf.mxu1 }
 0xc92   : > { %10424 = vmatmul.msk.f32.gmra.mxu3 %vm8131_vm9, %v7878_v37  ;;  %9062 = vmatmul.f32.gmra.mxu2 %v7931_v52  ;;  %v16823_v55 = vpop.f32.mrf.mxu2  ;;  %v8101_v37 = vld [vmem:[%s17391_s4 + $0x810] sm:$0xff]  ;;  %v7914_v52 = vld [vmem:[%s17391_s4 + $0x238] sm:$0xff] }
 0xc93   : > { %8997 = vmatmul.f32.gmra.mxu1 %v8074_v28  ;;  %18863 = vst [vmem:[#allocation185_spill] sm:$0xff] %v16823_v55  ;;  %v8012_v55 = vld [vmem:[%s17391_s4 + $0x548] sm:$0xff] }
 0xc95   : > { %v16813_v57 = vpop.f32.mrf.mxu3 }
 0xc96   : > { %18862 = vst [vmem:[#allocation192_spill] sm:$0xff] %v16813_v57 }
 0xc9a   : > { %10425 = vmatmul.msk.f32.gmra.mxu3 %vm8131_vm9, %v7887_v13  ;;  %9065 = vmatmul.f32.gmra.mxu2 %v7940_v9  ;;  %v7967_v13 = vld [vmem:[%s17391_s4 + $0x3e0] sm:$0xff]  ;;  %v16837_v9 = vpop.f32.mrf.mxu1 }
 0xc9b   : > { %9000 = vmatmul.f32.gmra.mxu1 %v8083_v21  ;;  %v8110_v21 = vld [vmem:[%s17391_s4 + $0x858] sm:$0xff] }
 0xc9d   : > { %v16832_v28 = vpop.f32.mrf.mxu3 }
 0xc9e   : > { %18864 = vst [vmem:[#allocation196_spill] sm:$0xff] %v16832_v28  ;;  %v16949_v28 = vld [vmem:[%s17389_s2] ss:$0 sm:$0xff] }
 0xca2   : > { %10426 = vmatmul.msk.f32.gmra.mxu3 %vm8131_vm9, %v7896_v61  ;;  %9068 = vmatmul.f32.gmra.mxu2 %v7949_v23  ;;  %v16842_v61 = vpop.f32.mrf.mxu2  ;;  %v7923_v23 = vld [vmem:[%s17391_s4 + $0x280] sm:$0xff] }
 0xca3   : > { %9003 = vmatmul.f32.gmra.mxu1 %v8092_v51  ;;  %18865 = vst [vmem:[#allocation39_spill] sm:$0xff] %v16842_v61  ;;  %v7976_v51 = vld [vmem:[%s17391_s4 + $0x428] sm:$0xff] }
 0xcaa   : > { %10427 = vmatmul.msk.f32.gmra.mxu3 %vm8131_vm9, %v7905_v46  ;;  %9071 = vmatmul.f32.gmra.mxu2 %v7958_v8  ;;  %v8119_v46 = vld [vmem:[%s17391_s4 + $0x8a0] sm:$0xff]  ;;  %v16854_v8 = vpop.f32.mrf.mxu3 }
 0xcab   : > { %9006 = vmatmul.f32.gmra.mxu1 %v8101_v37  ;;  %18866 = vst [vmem:[#allocation186_spill] sm:$0xff] %v16854_v8  ;;  %v16856_v37 = vpop.f32.mrf.mxu1 }
 0xcb2   : > { %10428 = vmatmul.msk.f32.gmra.mxu3 %vm8131_vm9, %v7914_v52  ;;  %9074 = vmatmul.f32.gmra.mxu2 %v7967_v13  ;;  %v16859_v52 = vpop.f32.mrf.mxu2  ;;  %v7932_v13 = vld [vmem:[%s17391_s4 + $0x2c8] sm:$0xff] }
 0xcb3   : > { %9009 = vmatmul.f32.gmra.mxu1 %v8110_v21  ;;  %18867 = vst [vmem:[#allocation98_spill] sm:$0xff] %v16859_v52  ;;  %v7985_v21 = vld [vmem:[%s17391_s4 + $0x470] sm:$0xff] }
 0xcb4   : > { %v7941_v52 = vld [vmem:[%s17391_s4 + $0x310] sm:$0xff] }
 0xcba   : > { %10429 = vmatmul.msk.f32.gmra.mxu3 %vm8131_vm9, %v7923_v23  ;;  %9077 = vmatmul.f32.gmra.mxu2 %v7976_v51  ;;  %v16871_v23 = vpop.f32.mrf.mxu3  ;;  %v16873_v51 = vpop.f32.mrf.mxu1 }
 0xcbb   : > { %9012 = vmatmul.f32.gmra.mxu1 %v8119_v46  ;;  %18868 = vst [vmem:[#allocation193_spill] sm:$0xff] %v16871_v23  ;;  %v16875_v46 = vpop.f32.mrf.mxu2 }
 0xcbc   : > { %18869 = vst [vmem:[#allocation204_spill] sm:$0xff] %v16875_v46  ;;  %v8003_v46 = vld [vmem:[%s17391_s4 + $0x500] sm:$0xff] }
 0xcc2   : > { %10430 = vmatmul.msk.f32.gmra.mxu3 %vm8131_vm9, %v7932_v13  ;;  %9080 = vmatmul.f32.gmra.mxu2 %v7985_v21  ;;  %v16884_v13 = vpop.f32.mrf.mxu3 }
 0xcc3   : > { %9015 = vmatmul.f32.gmra.mxu1 %v8128_v56  ;;  %18870 = vst [vmem:[#allocation201_spill] sm:$0xff] %v16884_v13  ;;  %v7950_v56 = vld [vmem:[%s17391_s4 + $0x358] sm:$0xff] }
 0xcca   : > { %10431 = vmatmul.msk.f32.gmra.mxu3 %vm8131_vm9, %v7941_v52  ;;  %9083 = vmatmul.f32.gmra.mxu2 %v7994_v58  ;;  %v7959_v52 = vld [vmem:[%s17391_s4 + $0x3a0] sm:$0xff]  ;;  %v16896_v58 = vpop.f32.mrf.mxu3 }
 0xccb   : > { %18871 = vst [vmem:[#allocation211_spill] sm:$0xff] %v16896_v58 }
 0xccd   : > { %v9036_v21 = vpop.f32.mrf.mxu2 }
 0xcd2   : > { %10432 = vmatmul.msk.f32.gmra.mxu3 %vm8131_vm9, %v7950_v56  ;;  %9086 = vmatmul.f32.gmra.mxu2 %v8003_v46  ;;  %v7968_v56 = vld [vmem:[%s17391_s4 + $0x3e8] sm:$0xff]  ;;  %v8021_v46 = vld [vmem:[%s17391_s4 + $0x590] sm:$0xff]  ;;  %v16908_v54 = vpop.f32.mrf.mxu3 }
 0xcd3   : > { %18872 = vst [vmem:[#allocation102_spill] sm:$0xff] %v16908_v54 }
 0xcd5   : > { %v9039_v61 = vpop.f32.mrf.mxu2 }
 0xcda   : > { %10433 = vmatmul.msk.f32.gmra.mxu3 %vm8131_vm9, %v7959_v52  ;;  %9089 = vmatmul.f32.gmra.mxu2 %v8012_v55  ;;  %v7977_v55 = vld [vmem:[%s17391_s4 + $0x430] sm:$0xff]  ;;  %v8030_v52 = vld [vmem:[%s17391_s4 + $0x5d8] sm:$0xff]  ;;  %v16920_v23 = vpop.f32.mrf.mxu3 }
 0xcdb   : > { %18873 = vst [vmem:[#allocation208_spill] sm:$0xff] %v16920_v23  ;;  %v8924_v23 = vadd.f32 %v16741_v47, %v16370_v49  ;;  %v8057_v49 = vld [vmem:[%s17391_s4 + $0x6b0] sm:$0xff] }
 0xcdd   : > { %v9042_v13 = vpop.f32.mrf.mxu2 }
 0xce2   : > { %10434 = vmatmul.msk.f32.gmra.mxu3 %vm8131_vm9, %v7968_v56  ;;  %9092 = vmatmul.f32.gmra.mxu2 %v8021_v46  ;;  %v7986_v56 = vld [vmem:[%s17391_s4 + $0x478] sm:$0xff]  ;;  %v8039_v46 = vld [vmem:[%s17391_s4 + $0x620] sm:$0xff]  ;;  %v16931_v54 = vpop.f32.mrf.mxu3 }
 0xce3   : > { %18874 = vst [vmem:[#allocation194_spill] sm:$0xff] %v16931_v54 }
 0xce5   : > { %v16911_v58 = vpop.f32.mrf.mxu2 }
 0xcea   : > { %10435 = vmatmul.msk.f32.gmra.mxu3 %vm8131_vm9, %v7977_v55  ;;  %9095 = vmatmul.f32.gmra.mxu2 %v8030_v52  ;;  %v7995_v55 = vld [vmem:[%s17391_s4 + $0x4c0] sm:$0xff]  ;;  %v8048_v52 = vld [vmem:[%s17391_s4 + $0x668] sm:$0xff] }
 0xced   : > { %v16922_v43 = vpop.f32.mrf.mxu2 }
 0xcf2   : > { %10436 = vmatmul.msk.f32.gmra.mxu3 %vm8131_vm9, %v7986_v56  ;;  %9098 = vmatmul.f32.gmra.mxu2 %v8039_v46  ;;  %v9037_v56 = vadd.f32 %v9036_v21, %v8924_v23  ;;  %v16961_v23 = vld [vmem:[%s17390_s3] ss:$0 sm:$0xff]  ;;  %v8927_v21 = vadd.f32 %v16763_v24, %v16389_v53 }
 0xcf5   : > { %v16933_v8 = vpop.f32.mrf.mxu2 }
 0xcfa   : > { %10437 = vmatmul.msk.f32.gmra.mxu3 %vm8131_vm9, %v7995_v55  ;;  %9101 = vmatmul.f32.gmra.mxu2 %v8048_v52  ;;  %v9040_v55 = vadd.f32 %v9039_v61, %v8927_v21 }
 0xcfd   : > { %v9149_v46 = vpop.f32.mrf.mxu3  ;;  %v16944_v39 = vpop.f32.mrf.mxu2 }
 0xcfe   : > { %v9150_v54 = vadd.f32 %v9149_v46, %v9037_v56 }
 0xd00   : > { %v9249_v47 = vmul.f32 %v16949_v28, %v9150_v54  ;;  %v8013_v54 = vld [vmem:[%s17391_s4 + $0x550] sm:$0xff] }
 0xd02   : > { %10438 = vmatmul.msk.f32.gmra.mxu3 %vm8131_vm9, %v8004_v12  ;;  %9104 = vmatmul.f32.gmra.mxu2 %v8057_v49  ;;  %v9285_v46 = vadd.f32 %v16961_v23, %v9249_v47  ;;  %v16977_v12 = vpop.f32.mrf.mxu1  ;;  %v8930_v49 = vadd.f32 %v16782_v59, %v16405_v10  ;;  %v8075_v10 = vld [vmem:[%s17391_s4 + $0x740] sm:$0xff] }
 0xd04   : > { %v9317_v24 = vmax.f32 %v9285_v46, 0.0  ;;  %v9043_v21 = vadd.f32 %v9042_v13, %v8930_v49  ;;  %v8022_v46 = vld [vmem:[%s17391_s4 + $0x598] sm:$0xff]  ;;  %v8933_v13 = vadd.f32 %v16799_v22, %v16426_v2  ;;  %v8084_v2 = vld [vmem:[%s17391_s4 + $0x788] sm:$0xff] }
 0xd05   : > { %v9152_v52 = vpop.f32.mrf.mxu3  ;;  %v16966_v56 = vpop.f32.mrf.mxu2 }
 0xd06   : > { %v9153_v57 = vadd.f32 %v9152_v52, %v9040_v55 }
 0xd08   : > { %v9250_v53 = vmul.f32 %v16949_v28, %v9153_v57  ;;  %v9349_v57 = vmin.f32 %v9317_v24, 6.0 }
 0xd0a   : > { %v9286_v61 = vadd.f32 %v16961_v23, %v9250_v53  ;;  %10439 = vmatmul.msk.f32.gmra.mxu3 %vm8131_vm9, %v8013_v54  ;;  %9107 = vmatmul.f32.gmra.mxu2 %v8066_v7  ;;  %v17000_v54 = vpop.f32.mrf.mxu1  ;;  %v9046_v53 = vadd.f32 %v16911_v58, %v8933_v13 }
 0xd0c   : > { %v9318_v47 = vmax.f32 %v9286_v61, 0.0 }
 0xd0d   : > { %v9155_v55 = vpop.f32.mrf.mxu3  ;;  %v16985_v52 = vpop.f32.mrf.mxu2 }
 0xd0e   : > { %v9350_v3 = vmin.f32 %v9318_v47, 6.0  ;;  %v9156_v45 = vadd.f32 %v9155_v55, %v9043_v21  ;;  %v8936_v21 = vadd.f32 %v16815_v15, %v16445_v41  ;;  %v8093_v41 = vld [vmem:[%s17391_s4 + $0x7d0] sm:$0xff] }
 0xd10   : > { %v10540_v59 = vpack.c.bf16 %v9350_v3, %v9349_v57  ;;  %v9251_v7 = vmul.f32 %v16949_v28, %v9156_v45  ;;  %v8031_v45 = vld [vmem:[%s17391_s4 + $0x5e0] sm:$0xff]  ;;  %v9049_v57 = vadd.f32 %v16922_v43, %v8936_v21  ;;  %v8102_v21 = vld [vmem:[%s17391_s4 + $0x818] sm:$0xff] }
 0xd12   : > { %10541 = vst [vmem:[%s16993_s9] sm:$0xff] %v10540_v59   ;;  %10440 = vmatmul.msk.f32.gmra.mxu3 %vm8131_vm9, %v8022_v46  ;;  %9110 = vmatmul.f32.gmra.mxu2 %v8075_v10  ;;  %v9287_v3 = vadd.f32 %v16961_v23, %v9251_v7  ;;  %v17018_v10 = vpop.f32.mrf.mxu1 }
 0xd14   : > { %v9319_v47 = vmax.f32 %v9287_v3, 0.0  ;;  %v8939_v3 = vadd.f32 %v16837_v9, %v16461_v35 }
 0xd15   : > { %v9158_v24 = vpop.f32.mrf.mxu3  ;;  %v17003_v61 = vpop.f32.mrf.mxu2 }
 0xd16   : > { %v9159_v49 = vadd.f32 %v9158_v24, %v9046_v53  ;;  %v9351_v59 = vmin.f32 %v9319_v47, 6.0  ;;  %v8040_v53 = vld [vmem:[%s17391_s4 + $0x628] sm:$0xff]  ;;  %v8049_v47 = vld [vmem:[%s17391_s4 + $0x670] sm:$0xff] }
 0xd18   : > { %v9252_v22 = vmul.f32 %v16949_v28, %v9159_v49  ;;  %v9052_v49 = vadd.f32 %v16933_v8, %v8939_v3 }
 0xd1a   : > { %v9288_v58 = vadd.f32 %v16961_v23, %v9252_v22  ;;  %10441 = vmatmul.msk.f32.gmra.mxu3 %vm8131_vm9, %v8031_v45  ;;  %9113 = vmatmul.f32.gmra.mxu2 %v8084_v2 }
 0xd1c   : > { %v9320_v55 = vmax.f32 %v9288_v58, 0.0  ;;  %v17038_v58 = vpop.f32.mrf.mxu1 }
 0xd1d   : > { %v9161_v46 = vpop.f32.mrf.mxu3  ;;  %v17023_v24 = vpop.f32.mrf.mxu2 }
 0xd1e   : > { %v9352_v7 = vmin.f32 %v9320_v55, 6.0  ;;  %v9162_v13 = vadd.f32 %v9161_v46, %v9049_v57  ;;  %v8942_v57 = vadd.f32 %v16856_v37, %v16476_v16  ;;  %v18875_v46 = vld [vmem:[#allocation33_spill] sm:$0xff]  ;;  %v18877_v37 = vld [vmem:[#allocation128_spill] sm:$0xff] }
 0xd1f   : > { %v8111_v16 = vld [vmem:[%s17391_s4 + $0x860] sm:$0xff] }
 0xd20   : > { %v10545_v15 = vpack.c.bf16 %v9352_v7, %v9351_v59  ;;  %v9253_v43 = vmul.f32 %v16949_v28, %v9162_v13  ;;  %v18876_v59 = vld [vmem:[#allocation111_spill] sm:$0xff] }
 0xd21   : > { %v8383_v7 = vadd.f32 %v18876_v59, %v18875_v46 }
 0xd22   : > { %10619 = vst [vmem:[%s16993_s9 + $0x8] sm:$0xff] %v10545_v15   ;;  %10442 = vmatmul.msk.f32.gmra.mxu3 %vm8131_vm9, %v8040_v53  ;;  %9116 = vmatmul.f32.gmra.mxu2 %v8093_v41  ;;  %v9289_v2 = vadd.f32 %v16961_v23, %v9253_v43  ;;  %v9055_v53 = vadd.f32 %v16944_v39, %v8942_v57 }
 0xd24   : > { %v9321_v55 = vmax.f32 %v9289_v2, 0.0 }
 0xd25   : > { %v9164_v45 = vpop.f32.mrf.mxu3  ;;  %v17044_v9 = vpop.f32.mrf.mxu2 }
 0xd26   : > { %v9165_v22 = vadd.f32 %v9164_v45, %v9052_v49  ;;  %v9353_v15 = vmin.f32 %v9321_v55, 6.0  ;;  %v8058_v49 = vld [vmem:[%s17391_s4 + $0x6b8] sm:$0xff]  ;;  %v8496_v45 = vadd.f32 %v18877_v37, %v8383_v7 }
 0xd27   : > { %v18879_v55 = vld [vmem:[#allocation112_spill] sm:$0xff] }
 0xd28   : > { %v9254_v35 = vmul.f32 %v16949_v28, %v9165_v22  ;;  %v17060_v22 = vpop.f32.mrf.mxu1  ;;  %v8609_v57 = vadd.f32 %v16238_v50, %v8496_v45  ;;  %v18882_v37 = vld [vmem:[#allocation8_spill] sm:$0xff] }
 0xd2a   : > { %v9290_v8 = vadd.f32 %v16961_v23, %v9254_v35  ;;  %10443 = vmatmul.msk.f32.gmra.mxu3 %vm8131_vm9, %v8049_v47  ;;  %9119 = vmatmul.f32.gmra.mxu2 %v8102_v21  ;;  %v8945_v47 = vadd.f32 %v16873_v51, %v16487_v29  ;;  %v18878_v35 = vld [vmem:[#allocation103_spill] sm:$0xff]  ;;  %v8722_v7 = vadd.f32 %v16413_v0, %v8609_v57  ;;  %v8067_v29 = vld [vmem:[%s17391_s4 + $0x700] sm:$0xff]  ;;  %v8120_v51 = vld [vmem:[%s17391_s4 + $0x8a8] sm:$0xff] }
 0xd2c   : > { %v9322_v13 = vmax.f32 %v9290_v8, 0.0  ;;  %v8386_v8 = vadd.f32 %v18879_v55, %v18878_v35  ;;  %v9058_v46 = vadd.f32 %v16966_v56, %v8945_v47  ;;  %v8835_v50 = vadd.f32 %v16501_v27, %v8722_v7 }
 0xd2d   : > { %v9167_v41 = vpop.f32.mrf.mxu3  ;;  %v17067_v21 = vpop.f32.mrf.mxu2 }
 0xd2e   : > { %v9354_v43 = vmin.f32 %v9322_v13, 6.0  ;;  %v9168_v3 = vadd.f32 %v9167_v41, %v9055_v53  ;;  %v18880_v41 = vld [vmem:[#allocation69_spill] sm:$0xff] }
 0xd30   : > { %v10550_v2 = vpack.c.bf16 %v9354_v43, %v9353_v15  ;;  %v9255_v39 = vmul.f32 %v16949_v28, %v9168_v3  ;;  %v8499_v15 = vadd.f32 %v18880_v41, %v8386_v8  ;;  %v8948_v3 = vadd.f32 %v16977_v12, %v8835_v50 }
 0xd32   : > { %10620 = vst [vmem:[%s16993_s9 + $0x10] sm:$0xff] %v10550_v2   ;;  %10444 = vmatmul.msk.f32.gmra.mxu3 %vm8131_vm9, %v8058_v49  ;;  %9122 = vmatmul.f32.gmra.mxu2 %v8111_v16  ;;  %v9291_v13 = vadd.f32 %v16961_v23, %v9255_v39  ;;  %v17087_v49 = vpop.f32.mrf.mxu1  ;;  %v18881_v16 = vld [vmem:[#allocation104_spill] sm:$0xff]  ;;  %v8612_v2 = vadd.f32 %v16256_v48, %v8499_v15 }
 0xd33   : > { %v8389_v45 = vadd.f32 %v18882_v37, %v18881_v16  ;;  %v9061_v27 = vadd.f32 %v16985_v52, %v8948_v3  ;;  %v18883_v48 = vld [vmem:[#allocation200_spill] sm:$0xff]  ;;  %v18886_v37 = vld [vmem:[#allocation203_spill] sm:$0xff] }
 0xd34   : > { %v9323_v43 = vmax.f32 %v9291_v13, 0.0  ;;  %v8725_v55 = vadd.f32 %v16441_v17, %v8612_v2 }
 0xd35   : > { %v9170_v59 = vpop.f32.mrf.mxu3  ;;  %v17093_v35 = vpop.f32.mrf.mxu2  ;;  %v8502_v7 = vadd.f32 %v18883_v48, %v8389_v45 }
 0xd36   : > { %v9171_v53 = vadd.f32 %v9170_v59, %v9058_v46  ;;  %v9355_v12 = vmin.f32 %v9323_v43, 6.0  ;;  %v8076_v46 = vld [vmem:[%s17391_s4 + $0x748] sm:$0xff]  ;;  %v8129_v59 = vld [vmem:[%s17391_s4 + $0x8f0] sm:$0xff]  ;;  %v8838_v52 = vadd.f32 %v16519_v1, %v8725_v55 }
 0xd37   : > { %v8615_v15 = vadd.f32 %v16268_v42, %v8502_v7 }
 0xd38   : > { %v9256_v56 = vmul.f32 %v16949_v28, %v9171_v53  ;;  %v8951_v17 = vadd.f32 %v17000_v54, %v8838_v52  ;;  %v8085_v54 = vld [vmem:[%s17391_s4 + $0x790] sm:$0xff] }
 0xd39   : > { %v8728_v1 = vadd.f32 %v16458_v11, %v8615_v15 }
 0xd3a   : > { %v9292_v0 = vadd.f32 %v16961_v23, %v9256_v56  ;;  %10445 = vmatmul.msk.f32.gmra.mxu3 %vm8131_vm9, %v8067_v29  ;;  %9125 = vmatmul.f32.gmra.mxu2 %v8120_v51  ;;  %v18884_v29 = vld [vmem:[#allocation107_spill] sm:$0xff]  ;;  %v18885_v51 = vld [vmem:[#allocation97_spill] sm:$0xff]  ;;  %v9064_v50 = vadd.f32 %v17003_v61, %v8951_v17  ;;  %v17112_v43 = vpop.f32.mrf.mxu1 }
 0xd3b   : > { %v8392_v41 = vadd.f32 %v18885_v51, %v18884_v29  ;;  %v8841_v42 = vadd.f32 %v16536_v63, %v8728_v1  ;;  %v18890_v51 = vld [vmem:[#allocation108_spill] sm:$0xff] }
 0xd3c   : > { %v9324_v39 = vmax.f32 %v9292_v0, 0.0 }
 0xd3d   : > { %v9173_v47 = vpop.f32.mrf.mxu3  ;;  %v17119_v16 = vpop.f32.mrf.mxu2  ;;  %v8505_v45 = vadd.f32 %v18886_v37, %v8392_v41  ;;  %v8954_v11 = vadd.f32 %v17018_v10, %v8841_v42  ;;  %v8094_v10 = vld [vmem:[%s17391_s4 + $0x7d8] sm:$0xff]  ;;  %v18891_v41 = vld [vmem:[#allocation173_spill] sm:$0xff] }
 0xd3e   : > { %v9356_v8 = vmin.f32 %v9324_v39, 6.0  ;;  %v9174_v57 = vadd.f32 %v9173_v47, %v9061_v27  ;;  %v18887_v27 = vld [vmem:[#allocation62_spill] sm:$0xff]  ;;  %v18888_v47 = vld [vmem:[#allocation21_spill] sm:$0xff]  ;;  %v8398_v15 = vadd.f32 %v18891_v41, %v18890_v51 }
 0xd3f   : > { %v8395_v55 = vadd.f32 %v18888_v47, %v18887_v27 }
 0xd40   : > { %v10555_v13 = vpack.c.bf16 %v9356_v8, %v9355_v12  ;;  %v9257_v53 = vmul.f32 %v16949_v28, %v9174_v57  ;;  %v8618_v12 = vadd.f32 %v16285_v19, %v8505_v45  ;;  %v9067_v57 = vadd.f32 %v17023_v24, %v8954_v11  ;;  %v18894_v11 = vld [vmem:[#allocation28_spill] sm:$0xff] }
 0xd42   : > { %10621 = vst [vmem:[%s16993_s9 + $0x18] sm:$0xff] %v10555_v13   ;;  %10446 = vmatmul.msk.f32.gmra.mxu3 %vm8131_vm9, %v8076_v46  ;;  %9128 = vmatmul.f32.gmra.mxu2 %v8129_v59  ;;  %v9293_v0 = vadd.f32 %v16961_v23, %v9257_v53  ;;  %v8731_v63 = vadd.f32 %v16473_v30, %v8618_v12  ;;  %v17135_v52 = vpop.f32.mrf.mxu1  ;;  %v18889_v13 = vld [vmem:[#allocation118_spill] sm:$0xff] }
 0xd43   : > { %v8508_v53 = vadd.f32 %v18889_v13, %v8395_v55 }
 0xd44   : > { %v9325_v2 = vmax.f32 %v9293_v0, 0.0  ;;  %v8844_v17 = vadd.f32 %v16570_v44, %v8731_v63 }
 0xd45   : > { %v9176_v56 = vpop.f32.mrf.mxu3  ;;  %v17139_v29 = vpop.f32.mrf.mxu2 }
 0xd46   : > { %v9177_v3 = vadd.f32 %v9176_v56, %v9064_v50  ;;  %v9357_v59 = vmin.f32 %v9325_v2, 6.0  ;;  %v8957_v30 = vadd.f32 %v17038_v58, %v8844_v17  ;;  %v8621_v50 = vadd.f32 %v16310_v25, %v8508_v53  ;;  %v18892_v58 = vld [vmem:[#allocation44_spill] sm:$0xff] }
 0xd47   : > { %v8511_v37 = vadd.f32 %v18892_v58, %v8398_v15  ;;  %v18897_v17 = vld [vmem:[#allocation40_spill] sm:$0xff] }
 0xd48   : > { %v9258_v61 = vmul.f32 %v16949_v28, %v9177_v3  ;;  %v9070_v56 = vadd.f32 %v17044_v9, %v8957_v30  ;;  %v8734_v44 = vadd.f32 %v16492_v32, %v8621_v50  ;;  %v18899_v30 = vld [vmem:[#allocation142_spill] sm:$0xff] }
 0xd49   : > { %v8624_v47 = vadd.f32 %v16339_v5, %v8511_v37 }
 0xd4a   : > { %v9294_v39 = vadd.f32 %v16961_v23, %v9258_v61  ;;  %10447 = vmatmul.msk.f32.gmra.mxu3 %vm8131_vm9, %v8085_v54  ;;  %v8103_v54 = vld [vmem:[%s17391_s4 + $0x820] sm:$0xff]  ;;  %v8847_v45 = vadd.f32 %v16592_v38, %v8734_v44  ;;  %v17157_v61 = vpop.f32.mrf.mxu1 }
 0xd4c   : > { %v9326_v8 = vmax.f32 %v9294_v39, 0.0  ;;  %v8960_v32 = vadd.f32 %v17060_v22, %v8847_v45  ;;  %v18893_v39 = vld [vmem:[#allocation27_spill] sm:$0xff]  ;;  %v8112_v22 = vld [vmem:[%s17391_s4 + $0x868] sm:$0xff] }
 0xd4d   : > { %v9179_v46 = vpop.f32.mrf.mxu3  ;;  %v17162_v2 = vpop.f32.mrf.mxu2  ;;  %v8401_v27 = vadd.f32 %v18894_v11, %v18893_v39 }
 0xd4e   : > { %v9358_v48 = vmin.f32 %v9326_v8, 6.0  ;;  %v9180_v7 = vadd.f32 %v9179_v46, %v9067_v57  ;;  %v9073_v55 = vadd.f32 %v17067_v21, %v8960_v32  ;;  %v18895_v8 = vld [vmem:[#allocation85_spill] sm:$0xff]  ;;  %v18904_v32 = vld [vmem:[#allocation156_spill] sm:$0xff] }
 0xd4f   : > { %v8737_v57 = vadd.f32 %v18895_v8, %v8624_v47 }
 0xd50   : > { %v10560_v19 = vpack.c.bf16 %v9358_v48, %v9357_v59  ;;  %v9259_v24 = vmul.f32 %v16949_v28, %v9180_v7  ;;  %v18896_v48 = vld [vmem:[#allocation47_spill] sm:$0xff] }
 0xd51   : > { %v8514_v7 = vadd.f32 %v18896_v48, %v8401_v27 }
 0xd52   : > { %10622 = vst [vmem:[%s16993_s9 + $0x20] sm:$0xff] %v10560_v19   ;;  %10448 = vmatmul.msk.f32.gmra.mxu3 %vm8131_vm9, %v8094_v10  ;;  %v9295_v0 = vadd.f32 %v16961_v23, %v9259_v24  ;;  %v8850_v10 = vadd.f32 %v16619_v33, %v8737_v57  ;;  %v17178_v53 = vpop.f32.mrf.mxu1  ;;  %v18898_v19 = vld [vmem:[#allocation109_spill] sm:$0xff]  ;;  %v18900_v33 = vld [vmem:[#allocation167_spill] sm:$0xff] }
 0xd53   : > { %v8404_v24 = vadd.f32 %v18898_v19, %v18897_v17  ;;  %v8627_v51 = vadd.f32 %v18899_v30, %v8514_v7 }
 0xd54   : > { %v9327_v25 = vmax.f32 %v9295_v0, 0.0  ;;  %v8963_v21 = vadd.f32 %v17087_v49, %v8850_v10  ;;  %v8121_v49 = vld [vmem:[%s17391_s4 + $0x8b0] sm:$0xff]  ;;  %v18901_v0 = vld [vmem:[#allocation50_spill] sm:$0xff] }
 0xd55   : > { %v9182_v1 = vpop.f32.mrf.mxu3  ;;  %v17184_v50 = vpop.f32.mrf.mxu2  ;;  %v18907_v10 = vld [vmem:[#allocation115_spill] sm:$0xff] }
 0xd56   : > { %v9183_v3 = vadd.f32 %v9182_v1, %v9070_v56  ;;  %v9359_v46 = vmin.f32 %v9327_v25, 6.0  ;;  %v9076_v41 = vadd.f32 %v17093_v35, %v8963_v21  ;;  %v8740_v56 = vadd.f32 %v18900_v33, %v8627_v51  ;;  %v18903_v25 = vld [vmem:[#allocation120_spill] sm:$0xff]  ;;  %v18909_v21 = vld [vmem:[#allocation159_spill] sm:$0xff] }
 0xd58   : > { %v9260_v42 = vmul.f32 %v16949_v28, %v9183_v3  ;;  %v8517_v3 = vadd.f32 %v18901_v0, %v8404_v24  ;;  %v18911_v0 = vld [vmem:[#allocation183_spill] sm:$0xff] }
 0xd5a   : > { %v9296_v9 = vadd.f32 %v16961_v23, %v9260_v42  ;;  %10449 = vmatmul.msk.f32.gmra.mxu3 %vm8131_vm9, %v8103_v54  ;;  %v8853_v54 = vadd.f32 %v16637_v60, %v8740_v56  ;;  %v18902_v42 = vld [vmem:[#allocation179_spill] sm:$0xff]  ;;  %v8630_v39 = vadd.f32 %v18904_v32, %v8517_v3  ;;  %v8977_v60 = vpop.f32.mrf.mxu1 }
 0xd5b   : > { %v18912_v3 = vld [vmem:[#allocation123_spill] sm:$0xff] }
 0xd5c   : > { %v9328_v38 = vmax.f32 %v9296_v9, 0.0  ;;  %v8966_v45 = vadd.f32 %v17112_v43, %v8853_v54  ;;  %v8407_v9 = vadd.f32 %v18903_v25, %v18902_v42  ;;  %v8130_v43 = vld [vmem:[%s17391_s4 + $0x8f8] sm:$0xff]  ;;  %v18913_v54 = vld [vmem:[#allocation149_spill] sm:$0xff]  ;;  %v18914_v32 = vld [vmem:[#allocation215_spill] sm:$0xff] }
 0xd5d   : > { %v9185_v12 = vpop.f32.mrf.mxu3 }
 0xd5e   : > { %v9360_v63 = vmin.f32 %v9328_v38, 6.0  ;;  %v9186_v59 = vadd.f32 %v9185_v12, %v9073_v55  ;;  %v9079_v27 = vadd.f32 %v17119_v16, %v8966_v45  ;;  %v18905_v38 = vld [vmem:[#allocation172_spill] sm:$0xff] }
 0xd5f   : > { %v8743_v55 = vadd.f32 %v18905_v38, %v8630_v39 }
 0xd60   : > { %v10565_v13 = vpack.c.bf16 %v9360_v63, %v9359_v46  ;;  %v9261_v5 = vmul.f32 %v16949_v28, %v9186_v59  ;;  %v9090_v46 = vpop.f32.mrf.mxu2  ;;  %v18906_v63 = vld [vmem:[#allocation53_spill] sm:$0xff] }
 0xd61   : > { %v8520_v59 = vadd.f32 %v18906_v63, %v8407_v9 }
 0xd62   : > { %10623 = vst [vmem:[%s16993_s9 + $0x28] sm:$0xff] %v10565_v13   ;;  %10450 = vmatmul.msk.f32.gmra.mxu3 %vm8131_vm9, %v8112_v22  ;;  %v9297_v1 = vadd.f32 %v16961_v23, %v9261_v5  ;;  %v8856_v22 = vadd.f32 %v16649_v34, %v8743_v55  ;;  %v18908_v13 = vld [vmem:[#allocation35_spill] sm:$0xff] }
 0xd63   : > { %v8410_v5 = vadd.f32 %v18908_v13, %v18907_v10  ;;  %v8633_v17 = vadd.f32 %v18909_v21, %v8520_v59 }
 0xd64   : > { %v9329_v37 = vmax.f32 %v9297_v1, 0.0  ;;  %v8969_v7 = vadd.f32 %v17135_v52, %v8856_v22 }
 0xd65   : > { %v9188_v15 = vpop.f32.mrf.mxu3  ;;  %v8746_v30 = vadd.f32 %v16578_v6, %v8633_v17  ;;  %v8413_v6 = vadd.f32 %v18912_v3, %v18911_v0  ;;  %v18919_v17 = vld [vmem:[#allocation184_spill] sm:$0xff] }
 0xd66   : > { %v9189_v44 = vadd.f32 %v9188_v15, %v9076_v41  ;;  %v9361_v12 = vmin.f32 %v9329_v37, 6.0  ;;  %v9082_v19 = vadd.f32 %v17139_v29, %v8969_v7  ;;  %v8980_v41 = vpop.f32.mrf.mxu1  ;;  %v18910_v15 = vld [vmem:[#allocation48_spill] sm:$0xff] }
 0xd67   : > { %v8523_v33 = vadd.f32 %v18910_v15, %v8410_v5  ;;  %v8859_v52 = vadd.f32 %v16661_v26, %v8746_v30  ;;  %v8526_v39 = vadd.f32 %v18914_v32, %v8413_v6  ;;  %v18923_v6 = vld [vmem:[#allocation187_spill] sm:$0xff] }
 0xd68   : > { %v9262_v58 = vmul.f32 %v16949_v28, %v9189_v44  ;;  %v9093_v1 = vpop.f32.mrf.mxu2 }
 0xd69   : > { %v8972_v29 = vadd.f32 %v17157_v61, %v8859_v52 }
 0xd6a   : > { %v9298_v35 = vadd.f32 %v16961_v23, %v9262_v58  ;;  %10451 = vmatmul.msk.f32.gmra.mxu3 %vm8131_vm9, %v8121_v49  ;;  %v8636_v58 = vadd.f32 %v18913_v54, %v8523_v33  ;;  %v18924_v54 = vld [vmem:[#allocation127_spill] sm:$0xff] }
 0xd6c   : > { %v9330_v11 = vmax.f32 %v9298_v35, 0.0  ;;  %v9085_v35 = vadd.f32 %v17162_v2, %v8972_v29  ;;  %v8749_v26 = vadd.f32 %v16603_v20, %v8636_v58  ;;  %v18916_v2 = vld [vmem:[#allocation113_spill] sm:$0xff]  ;;  %v8422_v58 = vadd.f32 %v18924_v54, %v18923_v6  ;;  %v18940_v54 = vld [vmem:[#allocation131_spill] sm:$0xff] }
 0xd6d   : > { %v9191_v47 = vpop.f32.mrf.mxu3 }
 0xd6e   : > { %v9362_v8 = vmin.f32 %v9330_v11, 6.0  ;;  %v9192_v57 = vadd.f32 %v9191_v47, %v9079_v27  ;;  %v8862_v11 = vadd.f32 %v16695_v31, %v8749_v26  ;;  %v8983_v61 = vpop.f32.mrf.mxu1  ;;  %v18926_v26 = vld [vmem:[#allocation93_spill] sm:$0xff] }
 0xd70   : > { %v10570_v48 = vpack.c.bf16 %v9362_v8, %v9361_v12  ;;  %v9263_v16 = vmul.f32 %v16949_v28, %v9192_v57  ;;  %v8975_v38 = vadd.f32 %v17178_v53, %v8862_v11  ;;  %v9096_v55 = vpop.f32.mrf.mxu2  ;;  %v18915_v12 = vld [vmem:[#allocation116_spill] sm:$0xff] }
 0xd71   : > { %v8416_v8 = vadd.f32 %v18916_v2, %v18915_v12  ;;  %v18917_v57 = vld [vmem:[#allocation160_spill] sm:$0xff]  ;;  %v18929_v12 = vld [vmem:[#allocation117_spill] sm:$0xff] }
 0xd72   : > { %10624 = vst [vmem:[%s16993_s9 + $0x30] sm:$0xff] %v10570_v48   ;;  %10452 = vmatmul.msk.f32.gmra.mxu3 %vm8131_vm9, %v8130_v43  ;;  %v9299_v34 = vadd.f32 %v16961_v23, %v9263_v16  ;;  %v8639_v20 = vadd.f32 %v18917_v57, %v8526_v39  ;;  %v9088_v43 = vadd.f32 %v17184_v50, %v8975_v38  ;;  %v18918_v48 = vld [vmem:[#allocation216_spill] sm:$0xff] }
 0xd73   : > { %v8529_v16 = vadd.f32 %v18918_v48, %v8416_v8  ;;  %v18920_v50 = vld [vmem:[#allocation124_spill] sm:$0xff] }
 0xd74   : > { %v9331_v44 = vmax.f32 %v9299_v34, 0.0  ;;  %v8752_v59 = vadd.f32 %v16622_v40, %v8639_v20  ;;  %v18930_v8 = vld [vmem:[#allocation168_spill] sm:$0xff] }
 0xd75   : > { %v9194_v24 = vpop.f32.mrf.mxu3 }
 0xd76   : > { %v9195_v51 = vadd.f32 %v9194_v24, %v9082_v19  ;;  %v9363_v42 = vmin.f32 %v9331_v44, 6.0  ;;  %v8865_v7 = vadd.f32 %v16721_v36, %v8752_v59  ;;  %v8986_v21 = vpop.f32.mrf.mxu1  ;;  %v8419_v19 = vadd.f32 %v18920_v50, %v18919_v17  ;;  %v18921_v24 = vld [vmem:[#allocation163_spill] sm:$0xff]  ;;  %v18933_v50 = vld [vmem:[#allocation29_spill] sm:$0xff] }
 0xd77   : > { %v8642_v40 = vadd.f32 %v18921_v24, %v8529_v16  ;;  %v18922_v44 = vld [vmem:[#allocation219_spill] sm:$0xff]  ;;  %v18935_v24 = vld [vmem:[#allocation81_spill] sm:$0xff] }
 0xd78   : > { %v9264_v56 = vmul.f32 %v16949_v28, %v9195_v51  ;;  %v8978_v5 = vadd.f32 %v8977_v60, %v8865_v7  ;;  %v9099_v15 = vpop.f32.mrf.mxu2  ;;  %v18931_v59 = vld [vmem:[#allocation43_spill] sm:$0xff]  ;;  %v18932_v7 = vld [vmem:[#allocation209_spill] sm:$0xff] }
 0xd79   : > { %v8755_v33 = vadd.f32 %v16639_v14, %v8642_v40 }
 0xd7a   : > { %v9300_v49 = vadd.f32 %v16961_v23, %v9264_v56  ;;  %v9091_v34 = vadd.f32 %v9090_v46, %v8978_v5  ;;  %v18925_v46 = vld [vmem:[#allocation171_spill] sm:$0xff] }
 0xd7b   : > { %v8868_v29 = vadd.f32 %v16739_v18, %v8755_v33  ;;  %v18927_v18 = vld [vmem:[#allocation70_spill] sm:$0xff] }
 0xd7c   : > { %v9332_v37 = vmax.f32 %v9300_v49, 0.0  ;;  %v8532_v49 = vadd.f32 %v18922_v44, %v8419_v19  ;;  %v8535_v39 = vadd.f32 %v18927_v18, %v8422_v58  ;;  %v18934_v19 = vld [vmem:[#allocation199_spill] sm:$0xff]  ;;  %v18938_v44 = vld [vmem:[#allocation49_spill] sm:$0xff] }
 0xd7d   : > { %v9197_v45 = vpop.f32.mrf.mxu3  ;;  %v8981_v3 = vadd.f32 %v8980_v41, %v8868_v29 }
 0xd7e   : > { %v9364_v25 = vmin.f32 %v9332_v37, 6.0  ;;  %v9198_v9 = vadd.f32 %v9197_v45, %v9085_v35  ;;  %v8645_v37 = vadd.f32 %v18925_v46, %v8532_v49  ;;  %v8989_v14 = vpop.f32.mrf.mxu1  ;;  %v8648_v57 = vadd.f32 %v18930_v8, %v8535_v39  ;;  %v18941_v46 = vld [vmem:[#allocation164_spill] sm:$0xff]  ;;  %v18946_v8 = vld [vmem:[#allocation121_spill] sm:$0xff] }
 0xd7f   : > { %v9094_v35 = vadd.f32 %v9093_v1, %v8981_v3  ;;  %v18928_v1 = vld [vmem:[#allocation177_spill] sm:$0xff] }
 0xd80   : > { %v10575_v27 = vpack.c.bf16 %v9364_v25, %v9363_v42  ;;  %v9265_v47 = vmul.f32 %v16949_v28, %v9198_v9  ;;  %v8758_v42 = vadd.f32 %v18926_v26, %v8645_v37  ;;  %v9102_v32 = vpop.f32.mrf.mxu2  ;;  %v8425_v2 = vadd.f32 %v18929_v12, %v18928_v1 }
 0xd82   : > { %10625 = vst [vmem:[%s16993_s9 + $0x38] sm:$0xff] %v10575_v27   ;;  %v9301_v31 = vadd.f32 %v16961_v23, %v9265_v47  ;;  %v8871_v11 = vadd.f32 %v16758_v62, %v8758_v42  ;;  %v18942_v42 = vld [vmem:[#allocation174_spill] sm:$0xff] }
 0xd84   : > { %v9333_v10 = vmax.f32 %v9301_v31, 0.0  ;;  %v8984_v38 = vadd.f32 %v8983_v61, %v8871_v11  ;;  %v8761_v31 = vadd.f32 %v18931_v59, %v8648_v57  ;;  %v18943_v11 = vld [vmem:[#allocation68_spill] sm:$0xff] }
 0xd85   : > { %v9200_v63 = vpop.f32.mrf.mxu3 }
 0xd86   : > { %v9201_v22 = vadd.f32 %v9200_v63, %v9088_v43  ;;  %v9365_v36 = vmin.f32 %v9333_v10, 6.0  ;;  %v9097_v43 = vadd.f32 %v9096_v55, %v8984_v38  ;;  %v8992_v16 = vpop.f32.mrf.mxu1  ;;  %v8874_v10 = vadd.f32 %v16780_v4, %v8761_v31  ;;  %v18948_v31 = vld [vmem:[#allocation52_spill] sm:$0xff] }
 0xd87   : > { %v8428_v55 = vadd.f32 %v18934_v19, %v18933_v50  ;;  %v18951_v19 = vld [vmem:[#allocation178_spill] sm:$0xff] }
 0xd88   : > { %v9266_v53 = vmul.f32 %v16949_v28, %v9201_v22  ;;  %v9105_v61 = vpop.f32.mrf.mxu2  ;;  %v8987_v17 = vadd.f32 %v8986_v21, %v8874_v10  ;;  %v18950_v10 = vld [vmem:[#allocation196_spill] sm:$0xff] }
 0xd8a   : > { %v9302_v13 = vadd.f32 %v16961_v23, %v9266_v53  ;;  %v8538_v53 = vadd.f32 %v18932_v7, %v8425_v2  ;;  %v18945_v2 = vld [vmem:[#allocation191_spill] sm:$0xff] }
 0xd8b   : > { %v8434_v57 = vadd.f32 %v18946_v8, %v18945_v2  ;;  %v18949_v7 = vld [vmem:[#allocation63_spill] sm:$0xff]  ;;  %v18963_v8 = vld [vmem:[#allocation182_spill] sm:$0xff] }
 0xd8c   : > { %v9334_v30 = vmax.f32 %v9302_v13, 0.0  ;;  %v8651_v40 = vadd.f32 %v18935_v24, %v8538_v53  ;;  %v18953_v24 = vld [vmem:[#allocation89_spill] sm:$0xff] }
 0xd8d   : > { %v9203_v51 = vpop.f32.mrf.mxu3  ;;  %v8547_v53 = vadd.f32 %v18949_v7, %v8434_v57  ;;  %v18964_v57 = vld [vmem:[#allocation122_spill] sm:$0xff] }
 0xd8e   : > { %v9366_v52 = vmin.f32 %v9334_v30, 6.0  ;;  %v9204_v56 = vadd.f32 %v9203_v51, %v9091_v34  ;;  %v9100_v30 = vadd.f32 %v9099_v15, %v8987_v17  ;;  %v18936_v51 = vld [vmem:[#allocation46_spill] sm:$0xff]  ;;  %v18939_v15 = vld [vmem:[#allocation188_spill] sm:$0xff] }
 0xd8f   : > { %v8764_v33 = vadd.f32 %v18936_v51, %v8651_v40  ;;  %v8431_v58 = vadd.f32 %v18940_v54, %v18939_v15  ;;  %v8660_v40 = vadd.f32 %v18953_v24, %v8547_v53  ;;  %v18969_v24 = vld [vmem:[#allocation189_spill] sm:$0xff] }
 0xd90   : > { %v10580_v60 = vpack.c.bf16 %v9366_v52, %v9365_v36  ;;  %v9267_v0 = vmul.f32 %v16949_v28, %v9204_v56  ;;  %v18937_v56 = vld [vmem:[#allocation134_spill] sm:$0xff]  ;;  %v9108_v6 = vpop.f32.mrf.mxu2 }
 0xd91   : > { %v8541_v4 = vadd.f32 %v18937_v56, %v8428_v55  ;;  %v8877_v49 = vadd.f32 %v18938_v44, %v8764_v33 }
 0xd92   : > { %10626 = vst [vmem:[%s16993_s9 + $0x40] sm:$0xff] %v10580_v60   ;;  %v9303_v25 = vadd.f32 %v16961_v23, %v9267_v0  ;;  %v8995_v60 = vpop.f32.mrf.mxu1 }
 0xd93   : > { %v8990_v3 = vadd.f32 %v8989_v14, %v8877_v49  ;;  %v8654_v37 = vadd.f32 %v18941_v46, %v8541_v4  ;;  %v18958_v46 = vld [vmem:[#allocation45_spill] sm:$0xff] }
 0xd94   : > { %v9335_v27 = vmax.f32 %v9303_v25, 0.0 }
 0xd95   : > { %v9206_v45 = vpop.f32.mrf.mxu3  ;;  %v8767_v25 = vadd.f32 %v18942_v42, %v8654_v37  ;;  %v18959_v37 = vld [vmem:[#allocation175_spill] sm:$0xff]  ;;  %v18960_v42 = vld [vmem:[#allocation181_spill] sm:$0xff] }
 0xd96   : > { %v9207_v9 = vadd.f32 %v9206_v45, %v9094_v35  ;;  %v9367_v22 = vmin.f32 %v9335_v27, 6.0  ;;  %v9103_v45 = vadd.f32 %v9102_v32, %v8990_v3  ;;  %v18944_v27 = vld [vmem:[#allocation192_spill] sm:$0xff]  ;;  %v18947_v32 = vld [vmem:[#allocation79_spill] sm:$0xff] }
 0xd98   : > { %v9268_v41 = vmul.f32 %v16949_v28, %v9207_v9  ;;  %v9111_v59 = vpop.f32.mrf.mxu2 }
 0xd9a   : > { %v9304_v47 = vadd.f32 %v16961_v23, %v9268_v41  ;;  %v8544_v41 = vadd.f32 %v18943_v11, %v8431_v58  ;;  %v8998_v12 = vpop.f32.mrf.mxu1  ;;  %v18957_v58 = vld [vmem:[#allocation195_spill] sm:$0xff]  ;;  %v18961_v11 = vld [vmem:[#allocation141_spill] sm:$0xff] }
 0xd9c   : > { %v9336_v20 = vmax.f32 %v9304_v47, 0.0  ;;  %v8880_v47 = vadd.f32 %v18944_v27, %v8767_v25  ;;  %v18962_v27 = vld [vmem:[#allocation193_spill] sm:$0xff] }
 0xd9d   : > { %v9209_v63 = vpop.f32.mrf.mxu3 }
 0xd9e   : > { %v9368_v48 = vmin.f32 %v9336_v20, 6.0  ;;  %v9210_v62 = vadd.f32 %v9209_v63, %v9097_v43  ;;  %v8993_v1 = vadd.f32 %v8992_v16, %v8880_v47  ;;  %v8657_v20 = vadd.f32 %v18947_v32, %v8544_v41 }
 0xd9f   : > { %v8443_v32 = vadd.f32 %v18964_v57, %v18963_v8  ;;  %v18981_v57 = vld [vmem:[#allocation190_spill] sm:$0xff] }
 0xda0   : > { %v10585_v13 = vpack.c.bf16 %v9368_v48, %v9367_v22  ;;  %v9269_v5 = vmul.f32 %v16949_v28, %v9210_v62  ;;  %v9106_v43 = vadd.f32 %v9105_v61, %v8993_v1  ;;  %v8770_v22 = vadd.f32 %v18948_v31, %v8657_v20  ;;  %v18952_v61 = vld [vmem:[#allocation42_spill] sm:$0xff]  ;;  %v9114_v49 = vpop.f32.mrf.mxu2  ;;  %v18965_v20 = vld [vmem:[#allocation176_spill] sm:$0xff] }
 0xda1   : > { %v8437_v55 = vadd.f32 %v18952_v61, %v18951_v19 }
 0xda2   : > { %10627 = vst [vmem:[%s16993_s9 + $0x48] sm:$0xff] %v10585_v13   ;;  %v9305_v36 = vadd.f32 %v16961_v23, %v9269_v5  ;;  %v8883_v13 = vadd.f32 %v18950_v10, %v8770_v22  ;;  %v9001_v33 = vpop.f32.mrf.mxu1  ;;  %v18966_v22 = vld [vmem:[#allocation94_spill] sm:$0xff]  ;;  %v18967_v10 = vld [vmem:[#allocation60_spill] sm:$0xff] }
 0xda4   : > { %v9337_v21 = vmax.f32 %v9305_v36, 0.0  ;;  %v8996_v50 = vadd.f32 %v8995_v60, %v8883_v13  ;;  %v18954_v36 = vld [vmem:[#allocation170_spill] sm:$0xff]  ;;  %v8556_v13 = vadd.f32 %v18967_v10, %v8443_v32  ;;  %v18982_v32 = vld [vmem:[#allocation205_spill] sm:$0xff] }
 0xda5   : > { %v9212_v34 = vpop.f32.mrf.mxu3 }
 0xda6   : > { %v9213_v52 = vadd.f32 %v9212_v34, %v9100_v30  ;;  %v9369_v9 = vmin.f32 %v9337_v21, 6.0  ;;  %v9109_v34 = vadd.f32 %v9108_v6, %v8996_v50  ;;  %v8440_v6 = vadd.f32 %v18958_v46, %v18957_v58  ;;  %v18975_v46 = vld [vmem:[#allocation41_spill] sm:$0xff] }
 0xda8   : > { %v9270_v29 = vmul.f32 %v16949_v28, %v9213_v52  ;;  %v8773_v52 = vadd.f32 %v18954_v36, %v8660_v40  ;;  %v8553_v41 = vadd.f32 %v18961_v11, %v8440_v6  ;;  %v18970_v40 = vld [vmem:[#allocation126_spill] sm:$0xff] }
 0xda9   : > { %v18976_v6 = vld [vmem:[#allocation198_spill] sm:$0xff] }
 0xdaa   : > { %v9306_v0 = vadd.f32 %v16961_v23, %v9270_v29  ;;  %v18955_v29 = vld [vmem:[#allocation130_spill] sm:$0xff] }
 0xdab   : > { %v8550_v21 = vadd.f32 %v18955_v29, %v8437_v55 }
 0xdac   : > { %v9338_v35 = vmax.f32 %v9306_v0, 0.0  ;;  %v18956_v0 = vld [vmem:[#allocation186_spill] sm:$0xff] }
 0xdad   : > { %v9215_v26 = vpop.f32.mrf.mxu3  ;;  %v8886_v3 = vadd.f32 %v18956_v0, %v8773_v52  ;;  %v18972_v52 = vld [vmem:[#allocation185_spill] sm:$0xff] }
 0xdae   : > { %v9370_v18 = vmin.f32 %v9338_v35, 6.0  ;;  %v9216_v39 = vadd.f32 %v9215_v26, %v9103_v45  ;;  %v8663_v35 = vadd.f32 %v18959_v37, %v8550_v21  ;;  %v18974_v21 = vld [vmem:[#allocation211_spill] sm:$0xff]  ;;  %v8449_v37 = vadd.f32 %v18976_v6, %v18975_v46 }
 0xdaf   : > { %v8999_v54 = vadd.f32 %v8998_v12, %v8886_v3 }
 0xdb0   : > { %v10590_v38 = vpack.c.bf16 %v9370_v18, %v9369_v9  ;;  %v9271_v14 = vmul.f32 %v16949_v28, %v9216_v39  ;;  %v8776_v25 = vadd.f32 %v18960_v42, %v8663_v35  ;;  %v9004_v39 = vpop.f32.mrf.mxu1  ;;  %v18977_v35 = vld [vmem:[#allocation180_spill] sm:$0xff] }
 0xdb1   : > { %v9112_v45 = vadd.f32 %v9111_v59, %v8999_v54 }
 0xdb2   : > { %10628 = vst [vmem:[%s16993_s9 + $0x50] sm:$0xff] %v10590_v38   ;;  %v9307_v48 = vadd.f32 %v16961_v23, %v9271_v14  ;;  %v8889_v47 = vadd.f32 %v18962_v27, %v8776_v25  ;;  %v9117_v14 = vpop.f32.mrf.mxu2 }
 0xdb4   : > { %v9339_v5 = vmax.f32 %v9307_v48, 0.0  ;;  %v9002_v2 = vadd.f32 %v9001_v33, %v8889_v47  ;;  %v18979_v47 = vld [vmem:[#allocation152_spill] sm:$0xff] }
 0xdb5   : > { %v9218_v63 = vpop.f32.mrf.mxu3 }
 0xdb6   : > { %v9219_v62 = vadd.f32 %v9218_v63, %v9106_v43  ;;  %v9371_v56 = vmin.f32 %v9339_v5, 6.0  ;;  %v8666_v43 = vadd.f32 %v18965_v20, %v8553_v41  ;;  %v9115_v59 = vadd.f32 %v9114_v49, %v9002_v2  ;;  %v18973_v49 = vld [vmem:[#allocation56_spill] sm:$0xff] }
 0xdb7   : > { %v8452_v20 = vadd.f32 %v18982_v32, %v18981_v57 }
 0xdb8   : > { %v9272_v16 = vmul.f32 %v16949_v28, %v9219_v62  ;;  %v8779_v48 = vadd.f32 %v18966_v22, %v8666_v43  ;;  %v9007_v50 = vpop.f32.mrf.mxu1  ;;  %v18983_v43 = vld [vmem:[#allocation59_spill] sm:$0xff] }
 0xdba   : > { %v9308_v17 = vadd.f32 %v16961_v23, %v9272_v16  ;;  %v18968_v16 = vld [vmem:[#allocation201_spill] sm:$0xff]  ;;  %v9120_v55 = vpop.f32.mrf.mxu2 }
 0xdbb   : > { %v8892_v5 = vadd.f32 %v18968_v16, %v8779_v48  ;;  %v18984_v48 = vld [vmem:[#allocation98_spill] sm:$0xff] }
 0xdbc   : > { %v9340_v30 = vmax.f32 %v9308_v17, 0.0 }
 0xdbd   : > { %v9221_v51 = vpop.f32.mrf.mxu3  ;;  %v9005_v61 = vadd.f32 %v9004_v39, %v8892_v5  ;;  %v18986_v5 = vld [vmem:[#allocation208_spill] sm:$0xff] }
 0xdbe   : > { %v9372_v4 = vmin.f32 %v9340_v30, 6.0  ;;  %v9222_v44 = vadd.f32 %v9221_v51, %v9109_v34  ;;  %v8446_v30 = vadd.f32 %v18970_v40, %v18969_v24  ;;  %v18971_v34 = vld [vmem:[#allocation90_spill] sm:$0xff]  ;;  %v18987_v24 = vld [vmem:[#allocation55_spill] sm:$0xff] }
 0xdbf   : > { %v8669_v51 = vadd.f32 %v18971_v34, %v8556_v13  ;;  %v9118_v33 = vadd.f32 %v9117_v14, %v9005_v61  ;;  %v18980_v14 = vld [vmem:[#allocation102_spill] sm:$0xff]  ;;  %v18985_v13 = vld [vmem:[#allocation145_spill] sm:$0xff] }
 0xdc0   : > { %v10595_v60 = vpack.c.bf16 %v9372_v4, %v9371_v56  ;;  %v9273_v15 = vmul.f32 %v16949_v28, %v9222_v44  ;;  %v8559_v29 = vadd.f32 %v18973_v49, %v8446_v30  ;;  %v9010_v58 = vpop.f32.mrf.mxu1  ;;  %v8565_v16 = vadd.f32 %v18985_v13, %v8452_v20  ;;  %v18989_v49 = vld [vmem:[#allocation194_spill] sm:$0xff] }
 0xdc1   : > { %v8782_v56 = vadd.f32 %v18972_v52, %v8669_v51 }
 0xdc2   : > { %10629 = vst [vmem:[%s16993_s9 + $0x58] sm:$0xff] %v10595_v60   ;;  %v9309_v9 = vadd.f32 %v16961_v23, %v9273_v15  ;;  %v8678_v40 = vadd.f32 %v18987_v24, %v8565_v16 }
 0xdc3   : > { %v8895_v0 = vadd.f32 %v18974_v21, %v8782_v56 }
 0xdc4   : > { %v9341_v1 = vmax.f32 %v9309_v9, 0.0  ;;  %v9123_v9 = vpop.f32.mrf.mxu2 }
 0xdc5   : > { %v9224_v26 = vpop.f32.mrf.mxu3  ;;  %v9008_v54 = vadd.f32 %v9007_v50, %v8895_v0 }
 0xdc6   : > { %v9225_v18 = vadd.f32 %v9224_v26, %v9112_v45  ;;  %v9373_v62 = vmin.f32 %v9341_v1, 6.0  ;;  %v8672_v45 = vadd.f32 %v18977_v35, %v8559_v29 }
 0xdc7   : > { %v9121_v42 = vadd.f32 %v9120_v55, %v9008_v54 }
 0xdc8   : > { %v9274_v38 = vmul.f32 %v16949_v28, %v9225_v18  ;;  %v18978_v18 = vld [vmem:[#allocation39_spill] sm:$0xff]  ;;  %v9013_v22 = vpop.f32.mrf.mxu1 }
 0xdc9   : > { %v8785_v39 = vadd.f32 %v18978_v18, %v8672_v45 }
 0xdca   : > { %v9310_v12 = vadd.f32 %v16961_v23, %v9274_v38  ;;  %v8562_v38 = vadd.f32 %v18979_v47, %v8449_v37 }
 0xdcb   : > { %v8898_v1 = vadd.f32 %v18980_v14, %v8785_v39 }
 0xdcc   : > { %v9342_v63 = vmax.f32 %v9310_v12, 0.0  ;;  %v9126_v10 = vpop.f32.mrf.mxu2 }
 0xdcd   : > { %v9227_v31 = vpop.f32.mrf.mxu3  ;;  %v9011_v8 = vadd.f32 %v9010_v58, %v8898_v1 }
 0xdce   : > { %v9374_v7 = vmin.f32 %v9342_v63, 6.0  ;;  %v9228_v53 = vadd.f32 %v9227_v31, %v9115_v59  ;;  %v8675_v63 = vadd.f32 %v18983_v43, %v8562_v38 }
 0xdcf   : > { %v9124_v59 = vadd.f32 %v9123_v9, %v9011_v8 }
 0xdd0   : > { %v10600_v17 = vpack.c.bf16 %v9374_v7, %v9373_v62  ;;  %v9275_v19 = vmul.f32 %v16949_v28, %v9228_v53  ;;  %v8788_v62 = vadd.f32 %v18984_v48, %v8675_v63 }
 0xdd2   : > { %10630 = vst [vmem:[%s16993_s9 + $0x60] sm:$0xff] %v10600_v17   ;;  %v9311_v4 = vadd.f32 %v16961_v23, %v9275_v19  ;;  %v8901_v17 = vadd.f32 %v18986_v5, %v8788_v62 }
 0xdd4   : > { %v9343_v60 = vmax.f32 %v9311_v4, 0.0  ;;  %v9014_v55 = vadd.f32 %v9013_v22, %v8901_v17  ;;  %v9129_v0 = vpop.f32.mrf.mxu2 }
 0xdd5   : > { %v9230_v36 = vpop.f32.mrf.mxu3 }
 0xdd6   : > { %v9231_v44 = vadd.f32 %v9230_v36, %v9118_v33  ;;  %v9375_v11 = vmin.f32 %v9343_v60, 6.0  ;;  %v9127_v34 = vadd.f32 %v9126_v10, %v9014_v55  ;;  %v18988_v33 = vld [vmem:[#allocation204_spill] sm:$0xff] }
 0xdd7   : > { %v8791_v36 = vadd.f32 %v18988_v33, %v8678_v40 }
 0xdd8   : > { %v9276_v3 = vmul.f32 %v16949_v28, %v9231_v44  ;;  %v9016_v44 = vpop.f32.mrf.mxu1 }
 0xdd9   : > { %v8904_v29 = vadd.f32 %v18989_v49, %v8791_v36 }
 0xdda   : > { %v9312_v15 = vadd.f32 %v16961_v23, %v9276_v3 }
 0xddb   : > { %v9017_v60 = vadd.f32 %v9016_v44, %v8904_v29 }
 0xddc   : > { %v9344_v26 = vmax.f32 %v9312_v15, 0.0 }
 0xddd   : > { %v9233_v25 = vpop.f32.mrf.mxu3  ;;  %v9130_v15 = vadd.f32 %v9129_v0, %v9017_v60 }
 0xdde   : > { %v9376_v41 = vmin.f32 %v9344_v26, 6.0  ;;  %v9234_v27 = vadd.f32 %v9233_v25, %v9121_v42 }
 0xde0   : > { %v10605_v12 = vpack.c.bf16 %v9376_v41, %v9375_v11  ;;  %v9277_v2 = vmul.f32 %v16949_v28, %v9234_v27 }
 0xde2   : > { %10631 = vst [vmem:[%s16993_s9 + $0x68] sm:$0xff] %v10605_v12   ;;  %v9313_v7 = vadd.f32 %v16961_v23, %v9277_v2 }
 0xde4   : > { %v9345_v19 = vmax.f32 %v9313_v7, 0.0 }
 0xde5   : > { %v9236_v31 = vpop.f32.mrf.mxu3 }
 0xde6   : > { %v9237_v53 = vadd.f32 %v9236_v31, %v9124_v59  ;;  %v9377_v52 = vmin.f32 %v9345_v19, 6.0 }
 0xde8   : > { %v9278_v50 = vmul.f32 %v16949_v28, %v9237_v53 }
 0xdea   : > { %v9314_v61 = vadd.f32 %v16961_v23, %v9278_v50 }
 0xdec   : > { %v9346_v30 = vmax.f32 %v9314_v61, 0.0 }
 0xded   : > { %v9239_v51 = vpop.f32.mrf.mxu3 }
 0xdee   : > { %v9378_v56 = vmin.f32 %v9346_v30, 6.0  ;;  %v9240_v4 = vadd.f32 %v9239_v51, %v9127_v34 }
 0xdf0   : > { %v10610_v21 = vpack.c.bf16 %v9378_v56, %v9377_v52  ;;  %v9279_v3 = vmul.f32 %v16949_v28, %v9240_v4 }
 0xdf2   : > { %10632 = vst [vmem:[%s16993_s9 + $0x70] sm:$0xff] %v10610_v21   ;;  %v9315_v58 = vadd.f32 %v16961_v23, %v9279_v3 }
 0xdf4   : > { %v9347_v37 = vmax.f32 %v9315_v58, 0.0 }
 0xdf5   : > { %v9242_v54 = vpop.f32.mrf.mxu3 }
 0xdf6   : > { %v9243_v46 = vadd.f32 %v9242_v54, %v9130_v15  ;;  %v9379_v26 = vmin.f32 %v9347_v37, 6.0 }
 0xdf8   : > { %v9280_v6 = vmul.f32 %v16949_v28, %v9243_v46 }
 0xdfa   : > { %v9316_v35 = vadd.f32 %v16961_v23, %v9280_v6 }
 0xdfc   : > { %v9348_v45 = vmax.f32 %v9316_v35, 0.0 }
 0xdfe   : > { %v9380_v42 = vmin.f32 %v9348_v45, 6.0 }
 0xe00   : > { %v10615_v25 = vpack.c.bf16 %v9380_v42, %v9379_v26 }
 0xe02   : > { %10633 = vst [vmem:[%s16993_s9 + $0x78] sm:$0xff] %v10615_v25  }
 0xe03   : > { %10864 = shalt.err (!%p10861_p3)
}
 0xe04   : > { %s10902_s25 = smov 64   ;;  %s10903_s9 = smov 4  }
 0xe05   : > { %10638 = dma.vmem_to_hbm [thread:$0]  (%p10972_p5), %s9459_s7, 2048, %s9461_s8, %s9446_s22, %s10902_s25, %s10902_s25, %s10903_s9  }
 0xe06 PF: > { %p10644_p4 = scmp.ge.s32.totalorder %s10899_s21, 2  ;;  %s9475_s17 = sand.u32 1, %s10887_s18  }
 0xe07   : > { %s9476_s23 = scalar_lea.sflag [#allocation3], %s9475_s17 }
 0xe08   : > { %p10641_p7 = pnand %p10644_p4, %p10976_p6 }
 0xe0a   : > { %p10642_p8 = pneg %p10641_p7 }
 0xe0c   : > { %10882 = dma.done.wait (%p10642_p8), %s9476_s23, 2048  }
 0xe0d   : > { %10884 = vsyncadd (%p10642_p8), %s9476_s23, 4294965248  ;;  %p15_p9 = scmp.ge.s32.totalorder %s10959_s24, 4   ;;  %s18990_s18 = smov %s10891_s19 }
 0xe0e   : > { %s18991_s19 = smov %s10895_s20  ;;  %s18992_s20 = smov %s10970_s27 }
 0xe0f   : > { %s18993_s21 = smov %s10959_s24  ;;  %17 = sbr.rel (!%p15_p9) target bundleno = 3 (0x3), region = 75 }
 0xe14   :  { %9482 = vsyncpa [#allocation3], 1 }
 0xe15   :  { %9484 = vsyncpa [#allocation3 + $0x1], 1 }

</bundles_post_ra>
